<compile_context>
chip_gen: v7x
topology: tpu7x:2x2x1
jax: 0.10.0
libtpu: 0.0.40
codegen_flags: <defaults>
</compile_context>

<pallas_src>
import functools
import math

import jax
import jax.numpy as jnp
from jax.experimental import pallas as pl
from jax.experimental.pallas import tpu as pltpu

A1 = 1.340264
A2 = -0.081106
A3 = 0.000893
A4 = 0.003796
SF = 66.50336

HID = 1024          # MLP hidden width (nn.Linear(512, 1024) etc.)
ENC = 256           # GaussianEncoding encoded_size
IN_DIM = 2
RFF_OUT = 2 * ENC   # 512 (cos || sin)
OUT_DIM = 512
MAX_BATCH_TILE = 256  # MXU M-tile (matches the 256-wide MXU on v6e/v7x; fine on v5e too)


def equal_earth_projection(coordinates):
    """(B, 2) lat/lon degrees -> (B, 2) projected coords, matching the torch reference."""
    latitude = coordinates[:, 0]
    longitude = coordinates[:, 1]
    latitude_rad = jnp.deg2rad(latitude)
    longitude_rad = jnp.deg2rad(longitude)
    sin_theta = jnp.sqrt(3.0) / 2.0 * jnp.sin(latitude_rad)
    theta = jnp.arcsin(sin_theta)
    denominator = 3.0 * (9.0 * A4 * theta ** 8 + 7.0 * A3 * theta ** 6
                         + 3.0 * A2 * theta ** 2 + A1)
    x = 2.0 * jnp.sqrt(3.0) * longitude_rad * jnp.cos(theta) / denominator
    y = A4 * theta ** 9 + A3 * theta ** 7 + A2 * theta ** 3 + A1 * theta
    return jnp.stack((x, y), axis=1) * SF / 180.0


def _num_core_splits():
    """Use 2 grid splits only on 2-TensorCore chips (v7x); 1 on v5e/v6e (single TC)."""
    try:
        kind = jax.devices()[0].device_kind.lower()
    except Exception:
        return 1
    return 2 if ("v7" in kind or "7x" in kind) else 1


def _capsule_kernel(loc_ref, brff_ref,
                    w1_ref, s1_ref, b1_ref,
                    w2_ref, s2_ref, b2_ref,
                    w3_ref, s3_ref, b3_ref,
                    wh_ref, sh_ref, bh_ref,
                    out_ref, *, num_capsules, per_split, batch_tile, guard_tail):
    split = pl.program_id(0)       # "parallel" axis (v7x: one TC per value; size 1 elsewhere)
    j = pl.program_id(1)           # "arbitrary" reduction over this split's capsules
    cap = split * per_split + j    # logical capsule index

    @pl.when(j == 0)
    def _():
        out_ref[...] = jnp.zeros_like(out_ref)

    def compute():
        brff = brff_ref[...]                             # (2, 256) f32
        s1 = s1_ref[...]; b1 = b1_ref[...]               # (1, HID) f32
        s2 = s2_ref[...]; b2 = b2_ref[...]
        s3 = s3_ref[...]; b3 = b3_ref[...]
        sh = sh_ref[...]; bh = bh_ref[...]               # (1, OUT_DIM) f32

        # Dequant = pure int8 -> bf16 cast (values <= 127 exact in bf16); the per-output-
        # channel scale is applied to the matmul result below.  Done once per capsule,
        # reused across all batch tiles; overlaps with the next capsule's weight DMA.
        w1b = w1_ref[...].astype(jnp.bfloat16)           # (512, HID)
        w1c = w1b[0:ENC, :]                              # cos-half
        w1s = w1b[ENC:RFF_OUT, :]                        # sin-half
        w2 = w2_ref[...].astype(jnp.bfloat16)
        w3 = w3_ref[...].astype(jnp.bfloat16)
        wh = wh_ref[...].astype(jnp.bfloat16)

        n_tiles = out_ref.shape[0] // batch_tile         # static; 1 for small batches
        for bt in range(n_tiles):
            sl = slice(bt * batch_tile, (bt + 1) * batch_tile)
            loc = loc_ref[sl, :]                          # (TB, 2) f32

            # Random Fourier Features on the VPU (no degenerate K=2 MXU matmul):
            # gamma(v) = [cos(2*pi*v@B), sin(2*pi*v@B)]
            proj = loc[:, 0:1] * brff[0:1, :] + loc[:, 1:2] * brff[1:2, :]   # (TB, 256)
            vp = (2.0 * jnp.pi) * proj
            cos_x = jnp.cos(vp).astype(jnp.bfloat16)
            sin_x = jnp.sin(vp).astype(jnp.bfloat16)

            # First layer as cos-half / sin-half accumulating matmuls (no concatenate).
            h = (jnp.dot(cos_x, w1c, preferred_element_type=jnp.float32)
                 + jnp.dot(sin_x, w1s, preferred_element_type=jnp.float32)) * s1 + b1
            h = jnp.maximum(h, 0.0)
            h = jnp.dot(h.astype(jnp.bfloat16), w2,
                        preferred_element_type=jnp.float32) * s2 + b2
            h = jnp.maximum(h, 0.0)
            h = jnp.dot(h.astype(jnp.bfloat16), w3,
                        preferred_element_type=jnp.float32) * s3 + b3
            h = jnp.maximum(h, 0.0)
            y = jnp.dot(h.astype(jnp.bfloat16), wh,
                        preferred_element_type=jnp.float32) * sh + bh        # (TB, 512)
            out_ref[sl, :] += y

    if guard_tail:
        # Only needed when C is not divisible by the core split: the clamped tail capsule's
        # DMA repeats the previous block (elided) and its accumulation is gated off here.
        pl.when(cap < num_capsules)(compute)
    else:
        compute()


def location_encoder_pallas(location, params, *, core_splits=None):
    """location: (B, 2) float32 lat/lon degrees -> (B, 512) float32."""
    eep = equal_earth_projection(location).astype(jnp.float32)   # plain-JAX glue
    B = eep.shape[0]
    if B <= MAX_BATCH_TILE:
        batch_tile = max(8, ((B + 7) // 8) * 8)                  # f32 sublane multiple
    else:
        batch_tile = MAX_BATCH_TILE
    Bp = ((B + batch_tile - 1) // batch_tile) * batch_tile
    if Bp != B:
        eep = jnp.pad(eep, ((0, Bp - B), (0, 0)))

    C = params["brff"].shape[0]
    splits = _num_core_splits() if core_splits is None else core_splits
    splits = max(1, min(splits, C))
    per_split = pl.cdiv(C, splits)
    guard_tail = (splits * per_split != C)

    kernel = functools.partial(_capsule_kernel, num_capsules=C, per_split=per_split,
                               batch_tile=batch_tile, guard_tail=guard_tail)

    def per_cap(shape):
        # Leading capsule dim squeezed out of the kernel ref; index clamped so an odd-tail
        # iteration repeats the previous block index (its DMA is elided, compute is gated).
        return pl.BlockSpec(
            (None,) + shape,
            lambda s, j: (jnp.minimum(s * per_split + j, C - 1),) + (0,) * len(shape))

    def replicated(shape):
        return pl.BlockSpec(shape, lambda s, j: (0,) * len(shape))

    per_cap_weight_elems = RFF_OUT * HID + 2 * HID * HID + HID * OUT_DIM
    cost = pl.CostEstimate(
        flops=2 * Bp * C * per_cap_weight_elems,
        transcendentals=Bp * C * 2 * ENC,
        bytes_accessed=(C * per_cap_weight_elems                     # int8 weights
                        + C * 2 * (3 * HID + OUT_DIM) * 4            # scales + biases (f32)
                        + C * IN_DIM * ENC * 4                       # RFF matrices (f32)
                        + Bp * IN_DIM * 4 + splits * Bp * OUT_DIM * 4))

    partials = pl.pallas_call(
        kernel,
        out_shape=jax.ShapeDtypeStruct((splits, Bp, OUT_DIM), jnp.float32),
        grid=(splits, per_split),
        in_specs=[
            replicated((Bp, IN_DIM)),                       # projected location (f32)
            per_cap((IN_DIM, ENC)),                         # RFF B matrix (f32, tiny)
            per_cap((RFF_OUT, HID)),                        # w1 (int8)
            per_cap((1, HID)), per_cap((1, HID)),           # s1, b1 (f32)
            per_cap((HID, HID)),                            # w2 (int8)
            per_cap((1, HID)), per_cap((1, HID)),           # s2, b2
            per_cap((HID, HID)),                            # w3 (int8)
            per_cap((1, HID)), per_cap((1, HID)),           # s3, b3
            per_cap((HID, OUT_DIM)),                        # head w (int8)
            per_cap((1, OUT_DIM)), per_cap((1, OUT_DIM)),   # sh, bh
        ],
        out_specs=pl.BlockSpec((None, Bp, OUT_DIM), lambda s, j: (s, 0, 0)),
        compiler_params=pltpu.CompilerParams(
            dimension_semantics=("parallel", "arbitrary"),  # capsule axis accumulates
            vmem_limit_bytes=32 * 1024 * 1024,              # ~14 MiB actual footprint
        ),
        cost_estimate=cost,
    )(eep, params["brff"],
      params["w1"], params["s1"], params["b1"],
      params["w2"], params["s2"], params["b2"],
      params["w3"], params["s3"], params["b3"],
      params["wh"], params["sh"], params["bh"])

    out = partials[0] if splits == 1 else partials.sum(axis=0)
    return out[:B]


def location_encoder_reference(location, params):
    """Pure-JAX reference mirroring the kernel numerics (int8 weights, bf16 MXU, f32 accum)."""
    eep = equal_earth_projection(location).astype(jnp.float32)
    C = params["brff"].shape[0]
    out = jnp.zeros((location.shape[0], OUT_DIM), jnp.float32)
    for c in range(C):
        brff = params["brff"][c]
        proj = eep[:, 0:1] * brff[0:1, :] + eep[:, 1:2] * brff[1:2, :]
        vp = (2.0 * jnp.pi) * proj
        cos_x = jnp.cos(vp).astype(jnp.bfloat16)
        sin_x = jnp.sin(vp).astype(jnp.bfloat16)
        w1 = params["w1"][c].astype(jnp.bfloat16)
        h = ((jnp.dot(cos_x, w1[:ENC], preferred_element_type=jnp.float32)
              + jnp.dot(sin_x, w1[ENC:], preferred_element_type=jnp.float32))
             * params["s1"][c] + params["b1"][c])
        h = jax.nn.relu(h)
        h = jax.nn.relu(
            jnp.dot(h.astype(jnp.bfloat16), params["w2"][c].astype(jnp.bfloat16),
                    preferred_element_type=jnp.float32) * params["s2"][c] + params["b2"][c])
        h = jax.nn.relu(
            jnp.dot(h.astype(jnp.bfloat16), params["w3"][c].astype(jnp.bfloat16),
                    preferred_element_type=jnp.float32) * params["s3"][c] + params["b3"][c])
        out = out + (
            jnp.dot(h.astype(jnp.bfloat16), params["wh"][c].astype(jnp.bfloat16),
                    preferred_element_type=jnp.float32) * params["sh"][c] + params["bh"][c])
    return out


def _quantize_per_out_channel(w):
    """(C, in, out) f32 -> int8 values + (C, 1, out) f32 per-output-channel scales."""
    amax = jnp.max(jnp.abs(w), axis=1, keepdims=True)
    scale = jnp.where(amax > 0.0, amax / 127.0, 1.0).astype(jnp.float32)
    q = jnp.clip(jnp.round(w / scale), -127.0, 127.0).astype(jnp.int8)
    return q, scale


def init_params(key, sigma_list):
    """Deterministic synthetic weights (the torch module torch.load()s a checkpoint).

    Big matmul weights are weight-only int8-quantized with per-output-channel scales
    (streamed at 1/4 the f32 / half the bf16 HBM cost); the tiny RFF projection matrices,
    scales and biases stay f32.
    """
    C = len(sigma_list)
    keys = jax.random.split(key, 10)

    def dense(k, cin, cout):
        w = jax.random.normal(k, (C, cin, cout), jnp.float32) * (1.0 / math.sqrt(cin))
        return _quantize_per_out_channel(w)

    def bias(k, cout):
        return jax.random.normal(k, (C, 1, cout), jnp.float32) * 0.01

    sigmas = jnp.asarray(sigma_list, jnp.float32).reshape(C, 1, 1)
    brff = jax.random.normal(keys[0], (C, IN_DIM, ENC), jnp.float32) * sigmas  # N(0, sigma^2)

    w1, s1 = dense(keys[1], RFF_OUT, HID)
    w2, s2 = dense(keys[3], HID, HID)
    w3, s3 = dense(keys[5], HID, HID)
    wh, sh = dense(keys[7], HID, OUT_DIM)
    return {
        "brff": brff,
        "w1": w1, "s1": s1, "b1": bias(keys[2], HID),
        "w2": w2, "s2": s2, "b2": bias(keys[4], HID),
        "w3": w3, "s3": s3, "b3": bias(keys[6], HID),
        "wh": wh, "sh": sh, "bh": bias(keys[8], OUT_DIM),
    }


if __name__ == "__main__":
    key = jax.random.PRNGKey(0)
    k_params, k_lat, k_lon = jax.random.split(key, 3)

    sigma_list = [2 ** 0, 2 ** 4, 2 ** 8]
    params = init_params(k_params, sigma_list)

    B = 8  # small batch of (lat, lon) pairs; larger B amortizes the one-time weight stream
    lat = jax.random.uniform(k_lat, (B,), jnp.float32, -90.0, 90.0)
    lon = jax.random.uniform(k_lon, (B,), jnp.float32, -180.0, 180.0)
    location = jnp.stack([lat, lon], axis=1)   # (B, 2)

    out = jax.block_until_ready(location_encoder_pallas(location, params))
    ref = jax.block_until_ready(location_encoder_reference(location, params))

    assert out.shape == (B, OUT_DIM) and out.dtype == jnp.float32
    # bf16-operand MXU matmuls (mirrored in the reference) -> loosened tolerance vs f32 path.
    assert jnp.allclose(out, ref, rtol=2e-2, atol=2e-2), "Pallas output mismatch vs reference"
    print("KERNEL_OK")
</pallas_src>

<mosaic_0001>
module attributes {stable_mosaic.version = 11 : i64} {
  func.func @_capsule_kernel(%arg0: i32, %arg1: i32, %arg2: memref<8x2xf32, #tpu.memory_space<vmem>>, %arg3: memref<1x2x256xf32, #tpu.memory_space<vmem>>, %arg4: memref<1x512x1024xi8, #tpu.memory_space<vmem>>, %arg5: memref<1x1x1024xf32, #tpu.memory_space<vmem>>, %arg6: memref<1x1x1024xf32, #tpu.memory_space<vmem>>, %arg7: memref<1x1024x1024xi8, #tpu.memory_space<vmem>>, %arg8: memref<1x1x1024xf32, #tpu.memory_space<vmem>>, %arg9: memref<1x1x1024xf32, #tpu.memory_space<vmem>>, %arg10: memref<1x1024x1024xi8, #tpu.memory_space<vmem>>, %arg11: memref<1x1x1024xf32, #tpu.memory_space<vmem>>, %arg12: memref<1x1x1024xf32, #tpu.memory_space<vmem>>, %arg13: memref<1x1024x512xi8, #tpu.memory_space<vmem>>, %arg14: memref<1x1x512xf32, #tpu.memory_space<vmem>>, %arg15: memref<1x1x512xf32, #tpu.memory_space<vmem>>, %arg16: memref<1x8x512xf32, #tpu.memory_space<vmem>>) attributes {dimension_semantics = [#tpu.dimension_semantics<parallel>, #tpu.dimension_semantics<arbitrary>], iteration_bounds = array<i64: 1, 3>, scalar_prefetch = 0 : i64, scratch_operands = 0 : i64, tpu.core_type = #tpu.core_type<tc>, window_params = [{pipeline_mode = #tpu.pipeline_mode<synchronous>, transform_indices = @transform_0, window_bounds = array<i64: 8, 2>}, {transform_indices = @transform_1, window_bounds = array<i64: 1, 2, 256>}, {transform_indices = @transform_2, window_bounds = array<i64: 1, 512, 1024>}, {transform_indices = @transform_3, window_bounds = array<i64: 1, 1, 1024>}, {transform_indices = @transform_4, window_bounds = array<i64: 1, 1, 1024>}, {transform_indices = @transform_5, window_bounds = array<i64: 1, 1024, 1024>}, {transform_indices = @transform_6, window_bounds = array<i64: 1, 1, 1024>}, {transform_indices = @transform_7, window_bounds = array<i64: 1, 1, 1024>}, {transform_indices = @transform_8, window_bounds = array<i64: 1, 1024, 1024>}, {transform_indices = @transform_9, window_bounds = array<i64: 1, 1, 1024>}, {transform_indices = @transform_10, window_bounds = array<i64: 1, 1, 1024>}, {transform_indices = @transform_11, window_bounds = array<i64: 1, 1024, 512>}, {transform_indices = @transform_12, window_bounds = array<i64: 1, 1, 512>}, {transform_indices = @transform_13, window_bounds = array<i64: 1, 1, 512>}, {transform_indices = @transform_14, window_bounds = array<i64: 1, 8, 512>}]} {
    %c0_i32 = arith.constant 0 : i32
    %0 = arith.cmpi eq, %arg1, %c0_i32 : i32
    %1 = arith.extui %0 : i1 to i32
    %c0_i32_0 = arith.constant 0 : i32
    %2 = arith.cmpi ne, %1, %c0_i32_0 : i32
    scf.if %2 {
      %cst_55 = arith.constant 0.000000e+00 : f32
      %90 = vector.broadcast %cst_55 : f32 to vector<8x512xf32>
      %c0_56 = arith.constant 0 : index
      %c0_57 = arith.constant 0 : index
      %c0_58 = arith.constant 0 : index
      %91 = vector.load %arg16[%c0_56, %c0_57, %c0_58] : memref<1x8x512xf32, #tpu.memory_space<vmem>>, vector<1x8x512xf32>
      %92 = vector.shape_cast %91 : vector<1x8x512xf32> to vector<8x512xf32>
      %93 = vector.shape_cast %90 : vector<8x512xf32> to vector<1x8x512xf32>
      tpu.vector_store %arg16[%c0_56, %c0_57, %c0_58], %93 {strides = array<i32>} : memref<1x8x512xf32, #tpu.memory_space<vmem>>, vector<1x8x512xf32>,
    } else {
    }
    %c0 = arith.constant 0 : index
    %c0_1 = arith.constant 0 : index
    %c0_2 = arith.constant 0 : index
    %3 = vector.load %arg3[%c0, %c0_1, %c0_2] : memref<1x2x256xf32, #tpu.memory_space<vmem>>, vector<1x2x256xf32>
    %4 = vector.shape_cast %3 : vector<1x2x256xf32> to vector<2x256xf32>
    %c0_3 = arith.constant 0 : index
    %c0_4 = arith.constant 0 : index
    %c0_5 = arith.constant 0 : index
    %5 = vector.load %arg5[%c0_3, %c0_4, %c0_5] : memref<1x1x1024xf32, #tpu.memory_space<vmem>>, vector<1x1x1024xf32>
    %6 = vector.shape_cast %5 : vector<1x1x1024xf32> to vector<1x1024xf32>
    %c0_6 = arith.constant 0 : index
    %c0_7 = arith.constant 0 : index
    %c0_8 = arith.constant 0 : index
    %7 = vector.load %arg6[%c0_6, %c0_7, %c0_8] : memref<1x1x1024xf32, #tpu.memory_space<vmem>>, vector<1x1x1024xf32>
    %8 = vector.shape_cast %7 : vector<1x1x1024xf32> to vector<1x1024xf32>
    %c0_9 = arith.constant 0 : index
    %c0_10 = arith.constant 0 : index
    %c0_11 = arith.constant 0 : index
    %9 = vector.load %arg8[%c0_9, %c0_10, %c0_11] : memref<1x1x1024xf32, #tpu.memory_space<vmem>>, vector<1x1x1024xf32>
    %10 = vector.shape_cast %9 : vector<1x1x1024xf32> to vector<1x1024xf32>
    %c0_12 = arith.constant 0 : index
    %c0_13 = arith.constant 0 : index
    %c0_14 = arith.constant 0 : index
    %11 = vector.load %arg9[%c0_12, %c0_13, %c0_14] : memref<1x1x1024xf32, #tpu.memory_space<vmem>>, vector<1x1x1024xf32>
    %12 = vector.shape_cast %11 : vector<1x1x1024xf32> to vector<1x1024xf32>
    %c0_15 = arith.constant 0 : index
    %c0_16 = arith.constant 0 : index
    %c0_17 = arith.constant 0 : index
    %13 = vector.load %arg11[%c0_15, %c0_16, %c0_17] : memref<1x1x1024xf32, #tpu.memory_space<vmem>>, vector<1x1x1024xf32>
    %14 = vector.shape_cast %13 : vector<1x1x1024xf32> to vector<1x1024xf32>
    %c0_18 = arith.constant 0 : index
    %c0_19 = arith.constant 0 : index
    %c0_20 = arith.constant 0 : index
    %15 = vector.load %arg12[%c0_18, %c0_19, %c0_20] : memref<1x1x1024xf32, #tpu.memory_space<vmem>>, vector<1x1x1024xf32>
    %16 = vector.shape_cast %15 : vector<1x1x1024xf32> to vector<1x1024xf32>
    %c0_21 = arith.constant 0 : index
    %c0_22 = arith.constant 0 : index
    %c0_23 = arith.constant 0 : index
    %17 = vector.load %arg14[%c0_21, %c0_22, %c0_23] : memref<1x1x512xf32, #tpu.memory_space<vmem>>, vector<1x1x512xf32>
    %18 = vector.shape_cast %17 : vector<1x1x512xf32> to vector<1x512xf32>
    %c0_24 = arith.constant 0 : index
    %c0_25 = arith.constant 0 : index
    %c0_26 = arith.constant 0 : index
    %19 = vector.load %arg15[%c0_24, %c0_25, %c0_26] : memref<1x1x512xf32, #tpu.memory_space<vmem>>, vector<1x1x512xf32>
    %20 = vector.shape_cast %19 : vector<1x1x512xf32> to vector<1x512xf32>
    %c0_27 = arith.constant 0 : index
    %c0_28 = arith.constant 0 : index
    %c0_29 = arith.constant 0 : index
    %21 = vector.load %arg4[%c0_27, %c0_28, %c0_29] : memref<1x512x1024xi8, #tpu.memory_space<vmem>>, vector<1x512x1024xi8>
    %22 = vector.shape_cast %21 : vector<1x512x1024xi8> to vector<512x1024xi8>
    %23 = arith.sitofp %22 : vector<512x1024xi8> to vector<512x1024xbf16>
    %24 = vector.extract_strided_slice %23 {offsets = [0, 0], sizes = [256, 1024], strides = [1, 1]} : vector<512x1024xbf16> to vector<256x1024xbf16>
    %25 = vector.extract_strided_slice %23 {offsets = [256, 0], sizes = [256, 1024], strides = [1, 1]} : vector<512x1024xbf16> to vector<256x1024xbf16>
    %c0_30 = arith.constant 0 : index
    %c0_31 = arith.constant 0 : index
    %c0_32 = arith.constant 0 : index
    %26 = vector.load %arg7[%c0_30, %c0_31, %c0_32] : memref<1x1024x1024xi8, #tpu.memory_space<vmem>>, vector<1x1024x1024xi8>
    %27 = vector.shape_cast %26 : vector<1x1024x1024xi8> to vector<1024x1024xi8>
    %28 = arith.sitofp %27 : vector<1024x1024xi8> to vector<1024x1024xbf16>
    %c0_33 = arith.constant 0 : index
    %c0_34 = arith.constant 0 : index
    %c0_35 = arith.constant 0 : index
    %29 = vector.load %arg10[%c0_33, %c0_34, %c0_35] : memref<1x1024x1024xi8, #tpu.memory_space<vmem>>, vector<1x1024x1024xi8>
    %30 = vector.shape_cast %29 : vector<1x1024x1024xi8> to vector<1024x1024xi8>
    %31 = arith.sitofp %30 : vector<1024x1024xi8> to vector<1024x1024xbf16>
    %c0_36 = arith.constant 0 : index
    %c0_37 = arith.constant 0 : index
    %c0_38 = arith.constant 0 : index
    %32 = vector.load %arg13[%c0_36, %c0_37, %c0_38] : memref<1x1024x512xi8, #tpu.memory_space<vmem>>, vector<1x1024x512xi8>
    %33 = vector.shape_cast %32 : vector<1x1024x512xi8> to vector<1024x512xi8>
    %34 = arith.sitofp %33 : vector<1024x512xi8> to vector<1024x512xbf16>
    %c0_39 = arith.constant 0 : index
    %c0_40 = arith.constant 0 : index
    %35 = vector.load %arg2[%c0_39, %c0_40] : memref<8x2xf32, #tpu.memory_space<vmem>>, vector<8x2xf32>
    %36 = vector.extract_strided_slice %35 {offsets = [0, 0], sizes = [8, 1], strides = [1, 1]} : vector<8x2xf32> to vector<8x1xf32>
    %37 = vector.extract_strided_slice %4 {offsets = [0, 0], sizes = [1, 256], strides = [1, 1]} : vector<2x256xf32> to vector<1x256xf32>
    %38 = vector.broadcast %36 : vector<8x1xf32> to vector<8x256xf32>
    %39 = vector.broadcast %37 : vector<1x256xf32> to vector<8x256xf32>
    %40 = arith.mulf %38, %39 : vector<8x256xf32>
    %41 = vector.extract_strided_slice %35 {offsets = [0, 1], sizes = [8, 1], strides = [1, 1]} : vector<8x2xf32> to vector<8x1xf32>
    %42 = vector.extract_strided_slice %4 {offsets = [1, 0], sizes = [1, 256], strides = [1, 1]} : vector<2x256xf32> to vector<1x256xf32>
    %43 = vector.broadcast %41 : vector<8x1xf32> to vector<8x256xf32>
    %44 = vector.broadcast %42 : vector<1x256xf32> to vector<8x256xf32>
    %45 = arith.mulf %43, %44 : vector<8x256xf32>
    %46 = arith.addf %40, %45 : vector<8x256xf32>
    %cst = arith.constant 6.28318548 : f32
    %47 = vector.broadcast %cst : f32 to vector<8x256xf32>
    %48 = arith.mulf %47, %46 : vector<8x256xf32>
    %49 = math.cos %48 : vector<8x256xf32>
    %50 = arith.truncf %49 : vector<8x256xf32> to vector<8x256xbf16>
    %51 = math.sin %48 : vector<8x256xf32>
    %52 = arith.truncf %51 : vector<8x256xf32> to vector<8x256xbf16>
    %cst_41 = arith.constant dense<0.000000e+00> : vector<8x1024xf32>
    %53 = tpu.matmul %50, %24, %cst_41 {dimension_numbers = #tpu.dot_dimension_numbers<[1], [0], [0], [1], [0, 0, 1, 1], [], []>} : vector<8x256xbf16>, vector<256x1024xbf16>, vector<8x1024xf32> -> vector<8x1024xf32>
    %cst_42 = arith.constant dense<0.000000e+00> : vector<8x1024xf32>
    %54 = tpu.matmul %52, %25, %cst_42 {dimension_numbers = #tpu.dot_dimension_numbers<[1], [0], [0], [1], [0, 0, 1, 1], [], []>} : vector<8x256xbf16>, vector<256x1024xbf16>, vector<8x1024xf32> -> vector<8x1024xf32>
    %55 = arith.addf %53, %54 : vector<8x1024xf32>
    %56 = vector.broadcast %6 : vector<1x1024xf32> to vector<8x1024xf32>
    %57 = arith.mulf %55, %56 : vector<8x1024xf32>
    %58 = vector.broadcast %8 : vector<1x1024xf32> to vector<8x1024xf32>
    %59 = arith.addf %57, %58 : vector<8x1024xf32>
    %cst_43 = arith.constant 0.000000e+00 : f32
    %60 = vector.broadcast %cst_43 : f32 to vector<8x1024xf32>
    %61 = arith.maximumf %59, %60 : vector<8x1024xf32>
    %62 = arith.truncf %61 : vector<8x1024xf32> to vector<8x1024xbf16>
    %cst_44 = arith.constant dense<0.000000e+00> : vector<8x1024xf32>
    %63 = tpu.matmul %62, %28, %cst_44 {dimension_numbers = #tpu.dot_dimension_numbers<[1], [0], [0], [1], [0, 0, 1, 1], [], []>} : vector<8x1024xbf16>, vector<1024x1024xbf16>, vector<8x1024xf32> -> vector<8x1024xf32>
    %64 = vector.broadcast %10 : vector<1x1024xf32> to vector<8x1024xf32>
    %65 = arith.mulf %63, %64 : vector<8x1024xf32>
    %66 = vector.broadcast %12 : vector<1x1024xf32> to vector<8x1024xf32>
    %67 = arith.addf %65, %66 : vector<8x1024xf32>
    %cst_45 = arith.constant 0.000000e+00 : f32
    %68 = vector.broadcast %cst_45 : f32 to vector<8x1024xf32>
    %69 = arith.maximumf %67, %68 : vector<8x1024xf32>
    %70 = arith.truncf %69 : vector<8x1024xf32> to vector<8x1024xbf16>
    %cst_46 = arith.constant dense<0.000000e+00> : vector<8x1024xf32>
    %71 = tpu.matmul %70, %31, %cst_46 {dimension_numbers = #tpu.dot_dimension_numbers<[1], [0], [0], [1], [0, 0, 1, 1], [], []>} : vector<8x1024xbf16>, vector<1024x1024xbf16>, vector<8x1024xf32> -> vector<8x1024xf32>
    %72 = vector.broadcast %14 : vector<1x1024xf32> to vector<8x1024xf32>
    %73 = arith.mulf %71, %72 : vector<8x1024xf32>
    %74 = vector.broadcast %16 : vector<1x1024xf32> to vector<8x1024xf32>
    %75 = arith.addf %73, %74 : vector<8x1024xf32>
    %cst_47 = arith.constant 0.000000e+00 : f32
    %76 = vector.broadcast %cst_47 : f32 to vector<8x1024xf32>
    %77 = arith.maximumf %75, %76 : vector<8x1024xf32>
    %78 = arith.truncf %77 : vector<8x1024xf32> to vector<8x1024xbf16>
    %cst_48 = arith.constant dense<0.000000e+00> : vector<8x512xf32>
    %79 = tpu.matmul %78, %34, %cst_48 {dimension_numbers = #tpu.dot_dimension_numbers<[1], [0], [0], [1], [0, 0, 1, 1], [], []>} : vector<8x1024xbf16>, vector<1024x512xbf16>, vector<8x512xf32> -> vector<8x512xf32>
    %80 = vector.broadcast %18 : vector<1x512xf32> to vector<8x512xf32>
    %81 = arith.mulf %79, %80 : vector<8x512xf32>
    %82 = vector.broadcast %20 : vector<1x512xf32> to vector<8x512xf32>
    %83 = arith.addf %81, %82 : vector<8x512xf32>
    %c0_49 = arith.constant 0 : index
    %c0_50 = arith.constant 0 : index
    %c0_51 = arith.constant 0 : index
    %84 = vector.load %arg16[%c0_49, %c0_50, %c0_51] : memref<1x8x512xf32, #tpu.memory_space<vmem>>, vector<1x8x512xf32>
    %85 = vector.shape_cast %84 : vector<1x8x512xf32> to vector<8x512xf32>
    %86 = arith.addf %85, %83 : vector<8x512xf32>
    %c0_52 = arith.constant 0 : index
    %c0_53 = arith.constant 0 : index
    %c0_54 = arith.constant 0 : index
    %87 = vector.load %arg16[%c0_52, %c0_53, %c0_54] : memref<1x8x512xf32, #tpu.memory_space<vmem>>, vector<1x8x512xf32>
    %88 = vector.shape_cast %87 : vector<1x8x512xf32> to vector<8x512xf32>
    %89 = vector.shape_cast %86 : vector<8x512xf32> to vector<1x8x512xf32>
    tpu.vector_store %arg16[%c0_52, %c0_53, %c0_54], %89 {strides = array<i32>} : memref<1x8x512xf32, #tpu.memory_space<vmem>>, vector<1x8x512xf32>,
    return
  }
  func.func @transform_0(%arg0: i32, %arg1: i32) -> (i32, i32) {
    %c0_i32 = arith.constant 0 : i32
    %c0_i32_0 = arith.constant 0 : i32
    %c0_i32_1 = arith.constant 0 : i32
    return %c0_i32, %c0_i32_0 : i32, i32
  }
  func.func @transform_1(%arg0: i32, %arg1: i32) -> (i32, i32, i32) {
    %c3_i32 = arith.constant 3 : i32
    %0 = arith.muli %arg0, %c3_i32 : i32
    %1 = arith.addi %0, %arg1 : i32
    %c2_i32 = arith.constant 2 : i32
    %2 = arith.minsi %1, %c2_i32 : i32
    %c0_i32 = arith.constant 0 : i32
    %c0_i32_0 = arith.constant 0 : i32
    %c0_i32_1 = arith.constant 0 : i32
    return %2, %c0_i32, %c0_i32_0 : i32, i32, i32
  }
  func.func @transform_2(%arg0: i32, %arg1: i32) -> (i32, i32, i32) {
    %c3_i32 = arith.constant 3 : i32
    %0 = arith.muli %arg0, %c3_i32 : i32
    %1 = arith.addi %0, %arg1 : i32
    %c2_i32 = arith.constant 2 : i32
    %2 = arith.minsi %1, %c2_i32 : i32
    %c0_i32 = arith.constant 0 : i32
    %c0_i32_0 = arith.constant 0 : i32
    %c0_i32_1 = arith.constant 0 : i32
    return %2, %c0_i32, %c0_i32_0 : i32, i32, i32
  }
  func.func @transform_3(%arg0: i32, %arg1: i32) -> (i32, i32, i32) {
    %c3_i32 = arith.constant 3 : i32
    %0 = arith.muli %arg0, %c3_i32 : i32
    %1 = arith.addi %0, %arg1 : i32
    %c2_i32 = arith.constant 2 : i32
    %2 = arith.minsi %1, %c2_i32 : i32
    %c0_i32 = arith.constant 0 : i32
    %c0_i32_0 = arith.constant 0 : i32
    %c0_i32_1 = arith.constant 0 : i32
    return %2, %c0_i32, %c0_i32_0 : i32, i32, i32
  }
  func.func @transform_4(%arg0: i32, %arg1: i32) -> (i32, i32, i32) {
    %c3_i32 = arith.constant 3 : i32
    %0 = arith.muli %arg0, %c3_i32 : i32
    %1 = arith.addi %0, %arg1 : i32
    %c2_i32 = arith.constant 2 : i32
    %2 = arith.minsi %1, %c2_i32 : i32
    %c0_i32 = arith.constant 0 : i32
    %c0_i32_0 = arith.constant 0 : i32
    %c0_i32_1 = arith.constant 0 : i32
    return %2, %c0_i32, %c0_i32_0 : i32, i32, i32
  }
  func.func @transform_5(%arg0: i32, %arg1: i32) -> (i32, i32, i32) {
    %c3_i32 = arith.constant 3 : i32
    %0 = arith.muli %arg0, %c3_i32 : i32
    %1 = arith.addi %0, %arg1 : i32
    %c2_i32 = arith.constant 2 : i32
    %2 = arith.minsi %1, %c2_i32 : i32
    %c0_i32 = arith.constant 0 : i32
    %c0_i32_0 = arith.constant 0 : i32
    %c0_i32_1 = arith.constant 0 : i32
    return %2, %c0_i32, %c0_i32_0 : i32, i32, i32
  }
  func.func @transform_6(%arg0: i32, %arg1: i32) -> (i32, i32, i32) {
    %c3_i32 = arith.constant 3 : i32
    %0 = arith.muli %arg0, %c3_i32 : i32
    %1 = arith.addi %0, %arg1 : i32
    %c2_i32 = arith.constant 2 : i32
    %2 = arith.minsi %1, %c2_i32 : i32
    %c0_i32 = arith.constant 0 : i32
    %c0_i32_0 = arith.constant 0 : i32
    %c0_i32_1 = arith.constant 0 : i32
    return %2, %c0_i32, %c0_i32_0 : i32, i32, i32
  }
  func.func @transform_7(%arg0: i32, %arg1: i32) -> (i32, i32, i32) {
    %c3_i32 = arith.constant 3 : i32
    %0 = arith.muli %arg0, %c3_i32 : i32
    %1 = arith.addi %0, %arg1 : i32
    %c2_i32 = arith.constant 2 : i32
    %2 = arith.minsi %1, %c2_i32 : i32
    %c0_i32 = arith.constant 0 : i32
    %c0_i32_0 = arith.constant 0 : i32
    %c0_i32_1 = arith.constant 0 : i32
    return %2, %c0_i32, %c0_i32_0 : i32, i32, i32
  }
  func.func @transform_8(%arg0: i32, %arg1: i32) -> (i32, i32, i32) {
    %c3_i32 = arith.constant 3 : i32
    %0 = arith.muli %arg0, %c3_i32 : i32
    %1 = arith.addi %0, %arg1 : i32
    %c2_i32 = arith.constant 2 : i32
    %2 = arith.minsi %1, %c2_i32 : i32
    %c0_i32 = arith.constant 0 : i32
    %c0_i32_0 = arith.constant 0 : i32
    %c0_i32_1 = arith.constant 0 : i32
    return %2, %c0_i32, %c0_i32_0 : i32, i32, i32
  }
  func.func @transform_9(%arg0: i32, %arg1: i32) -> (i32, i32, i32) {
    %c3_i32 = arith.constant 3 : i32
    %0 = arith.muli %arg0, %c3_i32 : i32
    %1 = arith.addi %0, %arg1 : i32
    %c2_i32 = arith.constant 2 : i32
    %2 = arith.minsi %1, %c2_i32 : i32
    %c0_i32 = arith.constant 0 : i32
    %c0_i32_0 = arith.constant 0 : i32
    %c0_i32_1 = arith.constant 0 : i32
    return %2, %c0_i32, %c0_i32_0 : i32, i32, i32
  }
  func.func @transform_10(%arg0: i32, %arg1: i32) -> (i32, i32, i32) {
    %c3_i32 = arith.constant 3 : i32
    %0 = arith.muli %arg0, %c3_i32 : i32
    %1 = arith.addi %0, %arg1 : i32
    %c2_i32 = arith.constant 2 : i32
    %2 = arith.minsi %1, %c2_i32 : i32
    %c0_i32 = arith.constant 0 : i32
    %c0_i32_0 = arith.constant 0 : i32
    %c0_i32_1 = arith.constant 0 : i32
    return %2, %c0_i32, %c0_i32_0 : i32, i32, i32
  }
  func.func @transform_11(%arg0: i32, %arg1: i32) -> (i32, i32, i32) {
    %c3_i32 = arith.constant 3 : i32
    %0 = arith.muli %arg0, %c3_i32 : i32
    %1 = arith.addi %0, %arg1 : i32
    %c2_i32 = arith.constant 2 : i32
    %2 = arith.minsi %1, %c2_i32 : i32
    %c0_i32 = arith.constant 0 : i32
    %c0_i32_0 = arith.constant 0 : i32
    %c0_i32_1 = arith.constant 0 : i32
    return %2, %c0_i32, %c0_i32_0 : i32, i32, i32
  }
  func.func @transform_12(%arg0: i32, %arg1: i32) -> (i32, i32, i32) {
    %c3_i32 = arith.constant 3 : i32
    %0 = arith.muli %arg0, %c3_i32 : i32
    %1 = arith.addi %0, %arg1 : i32
    %c2_i32 = arith.constant 2 : i32
    %2 = arith.minsi %1, %c2_i32 : i32
    %c0_i32 = arith.constant 0 : i32
    %c0_i32_0 = arith.constant 0 : i32
    %c0_i32_1 = arith.constant 0 : i32
    return %2, %c0_i32, %c0_i32_0 : i32, i32, i32
  }
  func.func @transform_13(%arg0: i32, %arg1: i32) -> (i32, i32, i32) {
    %c3_i32 = arith.constant 3 : i32
    %0 = arith.muli %arg0, %c3_i32 : i32
    %1 = arith.addi %0, %arg1 : i32
    %c2_i32 = arith.constant 2 : i32
    %2 = arith.minsi %1, %c2_i32 : i32
    %c0_i32 = arith.constant 0 : i32
    %c0_i32_0 = arith.constant 0 : i32
    %c0_i32_1 = arith.constant 0 : i32
    return %2, %c0_i32, %c0_i32_0 : i32, i32, i32
  }
  func.func @transform_14(%arg0: i32, %arg1: i32) -> (i32, i32, i32) {
    %c0_i32 = arith.constant 0 : i32
    %c0_i32_0 = arith.constant 0 : i32
    %c0_i32_1 = arith.constant 0 : i32
    return %arg0, %c0_i32, %c0_i32_0 : i32, i32, i32
  }
}

</mosaic_0001>

<bundles_post_ra>
// kernel: tpu_custom_call.1
= control target key start
LH: loop header
LB: loop body
LE: loop exit
PB: predicated region body
PF: predicated region fallthrough
CT: control target
= control target key end

     0   :  { %s9360_s0 = inlined_call_operand.vmem [shape: f32[8,2], index: 0, kind: input, shape index: {}]   ;;  %s9361_s1 = inlined_call_operand.hbm [shape: f32[3,2,256], index: 1, kind: input, shape index: {}]   ;;  %s9362_s2 = inlined_call_operand.hbm [shape: s8[3,512,1024], index: 2, kind: input, shape index: {}]   ;;  %s9363_s3 = inlined_call_operand.hbm [shape: f32[3,1,1024], index: 3, kind: input, shape index: {}]   ;;  %s9364_s4 = inlined_call_operand.hbm [shape: f32[3,1,1024], index: 4, kind: input, shape index: {}]   ;;  %s9365_s5 = inlined_call_operand.hbm [shape: s8[3,1024,1024], index: 5, kind: input, shape index: {}]   ;;  %s9366_s6 = inlined_call_operand.hbm [shape: f32[3,1,1024], index: 6, kind: input, shape index: {}]   ;;  %s9367_s7 = inlined_call_operand.hbm [shape: f32[3,1,1024], index: 7, kind: input, shape index: {}]   ;;  %s9368_s8 = inlined_call_operand.hbm [shape: s8[3,1024,1024], index: 8, kind: input, shape index: {}]   ;;  %s9369_s9 = inlined_call_operand.hbm [shape: f32[3,1,1024], index: 9, kind: input, shape index: {}]   ;;  %s9370_s10 = inlined_call_operand.hbm [shape: f32[3,1,1024], index: 10, kind: input, shape index: {}]   ;;  %s9371_s11 = inlined_call_operand.hbm [shape: s8[3,1024,512], index: 11, kind: input, shape index: {}]   ;;  %s9372_s12 = inlined_call_operand.hbm [shape: f32[3,1,512], index: 12, kind: input, shape index: {}]   ;;  %s9373_s13 = inlined_call_operand.hbm [shape: f32[3,1,512], index: 13, kind: input, shape index: {}]   ;;  %s9374_s14 = inlined_call_operand.hbm [shape: f32[1,8,512], index: 14, kind: output, shape index: {}]  }
   0x1   :  { %9398 = sst [smem:[#allocation41_spill]] %s9360_s0 }
   0x2   :  { %9399 = sst [smem:[#allocation42_spill]] %s9362_s2 }
   0x3   :  { %9400 = sst [smem:[#allocation43_spill]] %s9364_s4 }
   0x4   :  { %9401 = sst [smem:[#allocation44_spill]] %s9366_s6 }
   0x5   :  { %9402 = sst [smem:[#allocation45_spill]] %s9368_s8 }
   0x6   :  { %9403 = sst [smem:[#allocation46_spill]] %s9370_s10 }
   0x7   :  { %9404 = sst [smem:[#allocation47_spill]] %s9373_s13 }
   0x8   :  { %9405 = sst [smem:[#allocation48_spill]] %s9374_s14 }
   0x9   :  { %19 = vsyncpa [#allocation3], 0 }
   0xa   :  { %21 = vsyncpa [#allocation3 + $0x1], 0 }
   0xb   :  { %22 = vsyncpa [#allocation6], 0 }
   0xc   :  { %24 = vsyncpa [#allocation6 + $0x1], 0 }
   0xd   :  { %25 = vsyncpa [#allocation9], 0 }
   0xe   :  { %27 = vsyncpa [#allocation9 + $0x1], 0 }
   0xf   :  { %28 = vsyncpa [#allocation12], 0 }
  0x10   :  { %30 = vsyncpa [#allocation12 + $0x1], 0 }
  0x11   :  { %31 = vsyncpa [#allocation15], 0 }
  0x12   :  { %33 = vsyncpa [#allocation15 + $0x1], 0 }
  0x13   :  { %34 = vsyncpa [#allocation18], 0 }
  0x14   :  { %36 = vsyncpa [#allocation18 + $0x1], 0 }
  0x15   :  { %37 = vsyncpa [#allocation21], 0 }
  0x16   :  { %39 = vsyncpa [#allocation21 + $0x1], 0 }
  0x17   :  { %40 = vsyncpa [#allocation4], 0  ;;  %s7554_s29 = smov 0   ;;  %s7556_s30 = smov 0  }
  0x18   :  { %s7558_s15 = smov 0   ;;  %s7560_s16 = smov 0  }
  0x19   :  { %s7562_s17 = smov 0   ;;  %s7564_s18 = smov 0  }
  0x1a LB: > { %9406 = sst [smem:[#allocation32_spill]] %s7434_s30  ;;  %s55_s19 = sadd.s32 1, %s7446_s17  ;;  %s7450_s18 = sphi %s7564_s18, %s46_s18   ;;  %s7446_s17 = sphi %s7562_s17, %s9451_s17   ;;  %s7442_s16 = sphi %s7560_s16, %s9450_s16   ;;  %s7438_s15 = sphi %s7558_s15, %s9449_s15   ;;  %s7434_s30 = sphi %s7556_s30, %s9448_s30   ;;  %s7430_s29 = sphi %s7554_s29, %s9447_s29  }
  0x1b   : > { %9407 = sst [smem:[#allocation33_spill]] %s7438_s15  ;;  %p56_p0 = scmp.ge.s32.totalorder %s55_s19, 3 }
  0x1c   : > { %9408 = sst [smem:[#allocation34_spill]] %s7442_s16  ;;  %p85_p1 = scmp.lt.s32.totalorder %s7446_s17, 2 }
  0x1d   : > { %9409 = sst [smem:[#allocation35_spill]] %s7446_s17  ;;  %s7585_s20 = sadd.s32 4294967295, %s7450_s18  }
  0x1e   : > { %9410 = sst [smem:[#allocation36_spill]] %s7450_s18  ;;  %p101_p2 = scmp.ne.s32.totalorder %s7438_s15, %s7434_s30 }
  0x1f   : > { %9411 = sst [smem:[#allocation37_spill]] %s7585_s20  ;;  %s9453_s19 = smov (%p56_p0, %s55_s19), 0 }
  0x20   : > { %9412 = sst [smem:[#allocation38_spill]] %s9453_s19  ;;  %p89_p3 = scmp.lt.s32.totalorder %s9453_s19, 2 }
  0x21   : > { %s7592_s21 = scalar_select %p85_p1, %s7446_s17, 2 }
  0x22   : > { %p102_p4 = scmp.eq.s32.totalorder %s7450_s18, 0  ;;  %p107_p5 = scmp.ne.s32.totalorder %s7434_s30, %s7430_s29 }
  0x23   : > { %p108_p6 = scmp.eq.s32.totalorder %s7585_s20, 0  ;;  %s94_s26 = sadd.s32 1, %s7438_s15 }
  0x24   : > { %s90_s22 = scalar_select %p89_p3, %s9453_s19, 2 }
  0x25   : > { %p7599_p7 = por %p102_p4, %p101_p2  ;;  %p7603_p8 = por %p108_p6, %p107_p5 }
  0x26   : > { %s91_s25 = ssub.s32 %s7592_s21, %s90_s22  ;;  %p6640_p10 = scmp.ge.s32.totalorder %s7450_s18, 3 }
  0x27   : > { %s9414_s24 = scalar_select %p7603_p8, 1, 0 }
  0x28   : > { %p92_p9 = scmp.eq.s32.totalorder %s91_s25, 0  ;;  %564 = sbr.rel (%p6640_p10) target bundleno = 384 (0x180), region = 20 }
  0x29   : > { %9415 = sst [smem:[#allocation39_spill]] %s9414_s24  ;;  %s7614_s28 = sand.u32 (!%p6640_p10), 1, %s7438_s15  }
  0x2a   : > { %s7610_s27 = scalar_select %p92_p9, %s7438_s15, %s94_s26  }
  0x2b   : > { %s7617_s29 = sand.u32 (!%p6640_p10), 1, %s7450_s18   ;;  %s6644_s22 = sshll.u32 (!%p6640_p10), %s7614_s28, 10 }
  0x2c   : > { %9416 = sst [smem:[#allocation40_spill]] %s7610_s27  ;;  %s9381_s19 = sshll.u32 (!%p6640_p10), %s7592_s21, 14 }
  0x2d   : > { %s9417_s2 = sld [smem:[#allocation42_spill]] (!%p6640_p10)  ;;  %s595_s27 = scalar_lea.vmem (!%p6640_p10), [#allocation5], %s6644_s22 }
  0x2e   : > { %s606_s15 = sshll.u32 (!%p6640_p10), %s595_s27, 4  ;;  %s9388_s14 = scalar_lea.sflag (!%p6640_p10), [#allocation6], %s7617_s29  ;;  %s7630_s15 = int_to_ptr.vmem [resolvable:$true] %s606_s15 }
  0x33   : > { %s7626_s17 = scalar_lea.hbm %s9417_s2, %s9381_s19  ;;  %s6986_s25 = scalar_lea.hbm %s9417_s2, 49152 }
  0x34   : > { %s6982_s0 = scalar_lea.hbm %s7626_s17, 16384  ;;  %p6987_p0 = scmp.lt.u32.totalorder %s7626_s17, %s9417_s2 }
  0x35   : > { %p6983_p11 = scmp.ne.s32.totalorder %s7626_s17, %s6982_s0  ;;  %p6988_p1 = scmp.lt.u32.totalorder %s6986_s25, %s6982_s0 }
  0x36   : > { %p6990_p3 = scmp.lt.u32.totalorder %s6982_s0, %s7626_s17 }
  0x37   : > { %p6984_p12 = pnand %p6983_p11, %p7599_p7  ;;  %p6989_p2 = por %p6988_p1, %p6987_p0 }
  0x39   : > { %p6985_p13 = pneg %p6984_p12  ;;  %p6991_p4 = por %p6990_p3, %p6989_p2 }
  0x3b   : > { %p6992_p5 = pnand %p6991_p4, %p6985_p13 }
  0x3d   : > { %6995 = shalt.err (!%p6992_p5)
}
  0x3e   : > { %s6996_s27 = scalar_lea.vmem %s7630_s15, 16384  ;;  %s7452_s16 = smov [#allocation5]  }
  0x3f   : > { %p6997_p6 = scmp.ne.s32.totalorder %s7630_s15, %s6996_s27  ;;  %s7000_s20 = sshll.u32 %s7452_s16, 4  ;;  %s7001_s20 = int_to_ptr.vmem [resolvable:$false] %s7000_s20 }
  0x40   : > { %s7002_s19 = scalar_lea.vmem %s7001_s20, 32768  ;;  %p7003_p11 = scmp.lt.s32.totalorder %s7630_s15, %s7001_s20 }
  0x41   : > { %p6998_p9 = pnand %p6997_p6, %p7599_p7  ;;  %p7004_p12 = scmp.lt.s32.totalorder %s7002_s19, %s6996_s27 }
  0x43   : > { %p6999_p10 = pneg %p6998_p9  ;;  %p7005_p0 = por %p7004_p12, %p7003_p11 }
  0x45   : > { %p7006_p1 = pnand %p7005_p0, %p6999_p10 }
  0x47   : > { %7009 = shalt.err (!%p7006_p1)
}
  0x48   : > { %s9389_s0 = smov 1024   ;;  %s9391_s25 = smov 64  }
  0x49   : > { %6873 = dma.hbm_to_vmem [thread:$0]  (%p7599_p7), %s7626_s17, 16384, %s7630_s15, %s9388_s14, %s9389_s0, %s9389_s0, %s9391_s25  }
  0x4a   : > { %s9418_s26 = sshll.u32 %s7592_s21, 14  ;;  %s7668_s19 = scalar_lea.vmem [#allocation19], %s6644_s22 }
  0x4b   : > { %s7664_s20 = scalar_lea.hbm %s9371_s11, %s9418_s26  ;;  %s7672_s24 = sshll.u32 %s7614_s28, 3 }
  0x4c   : > { %s7675_s30 = sshll.u32 %s7592_s21, 7  ;;  %s9419_s4 = sld [smem:[#allocation43_spill]] }
  0x4d   : > { %s643_s17 = scalar_lea.vmem [#allocation8], %s7672_s24  ;;  %s9394_s26 = scalar_lea.sflag [#allocation9], %s7617_s29 }
  0x4e   : > { %s655_s22 = sshll.u32 %s643_s17, 4  ;;  %s656_s22 = int_to_ptr.vmem [resolvable:$true] %s655_s22 }
  0x52   : > { %s7681_s15 = scalar_lea.hbm %s9419_s4, %s7675_s30  ;;  %s7014_s14 = scalar_lea.hbm %s9419_s4, 384 }
  0x53   : > { %s7010_s27 = scalar_lea.hbm %s7681_s15, 128  ;;  %p7015_p4 = scmp.lt.u32.totalorder %s7681_s15, %s9419_s4 }
  0x54   : > { %p7011_p13 = scmp.ne.s32.totalorder %s7681_s15, %s7010_s27  ;;  %p7016_p5 = scmp.lt.u32.totalorder %s7014_s14, %s7010_s27 }
  0x55   : > { %p7018_p9 = scmp.lt.u32.totalorder %s7010_s27, %s7681_s15 }
  0x56   : > { %p7012_p2 = pnand %p7011_p13, %p7599_p7  ;;  %p7017_p6 = por %p7016_p5, %p7015_p4 }
  0x58   : > { %p7013_p3 = pneg %p7012_p2  ;;  %p7019_p10 = por %p7018_p9, %p7017_p6 }
  0x5a   : > { %p7020_p11 = pnand %p7019_p10, %p7013_p3 }
  0x5c   : > { %7023 = shalt.err (!%p7020_p11)
}
  0x5d   : > { %s7024_s17 = scalar_lea.vmem %s656_s22, 128  ;;  %s7455_s0 = smov [#allocation8]  }
  0x5e   : > { %p7025_p12 = scmp.ne.s32.totalorder %s656_s22, %s7024_s17  ;;  %s7028_s25 = sshll.u32 %s7455_s0, 4  ;;  %s7029_s25 = int_to_ptr.vmem [resolvable:$false] %s7028_s25 }
  0x5f   : > { %s7030_s2 = scalar_lea.vmem %s7029_s25, 256  ;;  %p7031_p13 = scmp.lt.s32.totalorder %s656_s22, %s7029_s25 }
  0x60   : > { %p7026_p0 = pnand %p7025_p12, %p7599_p7  ;;  %p7032_p2 = scmp.lt.s32.totalorder %s7030_s2, %s7024_s17 }
  0x62   : > { %p7027_p1 = pneg %p7026_p0  ;;  %p7033_p8 = por %p7032_p2, %p7031_p13 }
  0x64   : > { %p7034_p4 = pnand %p7033_p8, %p7027_p1 }
  0x66   : > { %7037 = shalt.err (!%p7034_p4)
}
  0x67   : > { %6875 = dma.hbm_to_vmem [thread:$0]  (%p7599_p7), %s7681_s15, 128, %s656_s22, %s9394_s26  }
  0x68   : > { %s9420_s6 = sld [smem:[#allocation44_spill]]  ;;  %s691_s25 = scalar_lea.vmem [#allocation11], %s7672_s24 }
  0x69   : > { %s703_s16 = sshll.u32 %s691_s25, 4  ;;  %s9395_s18 = scalar_lea.sflag [#allocation12], %s7617_s29  ;;  %s704_s16 = int_to_ptr.vmem [resolvable:$true] %s703_s16 }
  0x6e   : > { %s7708_s27 = scalar_lea.hbm %s9420_s6, %s7675_s30  ;;  %s7042_s2 = scalar_lea.hbm %s9420_s6, 384 }
  0x6f   : > { %s7038_s17 = scalar_lea.hbm %s7708_s27, 128  ;;  %p7043_p6 = scmp.lt.u32.totalorder %s7708_s27, %s9420_s6 }
  0x70   : > { %p7039_p8 = scmp.ne.s32.totalorder %s7708_s27, %s7038_s17  ;;  %p7044_p9 = scmp.lt.u32.totalorder %s7042_s2, %s7038_s17 }
  0x71   : > { %p7046_p11 = scmp.lt.u32.totalorder %s7038_s17, %s7708_s27 }
  0x72   : > { %p7040_p3 = pnand %p7039_p8, %p7599_p7  ;;  %p7045_p10 = por %p7044_p9, %p7043_p6 }
  0x74   : > { %p7041_p5 = pneg %p7040_p3  ;;  %p7047_p12 = por %p7046_p11, %p7045_p10 }
  0x76   : > { %p7048_p0 = pnand %p7047_p12, %p7041_p5 }
  0x78   : > { %7051 = shalt.err (!%p7048_p0)
}
  0x79   : > { %s7052_s25 = scalar_lea.vmem %s704_s16, 128  ;;  %s7456_s26 = smov [#allocation11]  }
  0x7a   : > { %p7053_p1 = scmp.ne.s32.totalorder %s704_s16, %s7052_s25  ;;  %s7056_s13 = sshll.u32 %s7456_s26, 4  ;;  %s7057_s13 = int_to_ptr.vmem [resolvable:$false] %s7056_s13 }
  0x7b   : > { %s7058_s15 = scalar_lea.vmem %s7057_s13, 256  ;;  %p7059_p4 = scmp.lt.s32.totalorder %s704_s16, %s7057_s13 }
  0x7c   : > { %p7054_p13 = pnand %p7053_p1, %p7599_p7  ;;  %p7060_p8 = scmp.lt.s32.totalorder %s7058_s15, %s7052_s25 }
  0x7e   : > { %p7055_p2 = pneg %p7054_p13  ;;  %p7061_p3 = por %p7060_p8, %p7059_p4 }
  0x80   : > { %p7062_p6 = pnand %p7061_p3, %p7055_p2 }
  0x82   : > { %7065 = shalt.err (!%p7062_p6)
}
  0x83   : > { %6877 = dma.hbm_to_vmem [thread:$0]  (%p7599_p7), %s7708_s27, 128, %s704_s16, %s9395_s18  }
  0x84   : > { %s6719_s17 = sshll.u32 %s7592_s21, 15  ;;  %s9421_s26 = sshll.u32 %s7614_s28, 11 }
  0x85   : > { %s7735_s22 = scalar_lea.vmem [#allocation10], %s9421_s26  ;;  %s7741_s0 = scalar_lea.hbm %s9365_s5, %s6719_s17 }
  0x86   : > { %s9422_s8 = sld [smem:[#allocation45_spill]]  ;;  %s9423_s6 = smov %s9421_s26 }
  0x87   : > { %s737_s27 = scalar_lea.vmem [#allocation14], %s9423_s6  ;;  %s9396_s26 = scalar_lea.sflag [#allocation15], %s7617_s29 }
  0x88   : > { %s748_s16 = sshll.u32 %s737_s27, 4  ;;  %s7750_s16 = int_to_ptr.vmem [resolvable:$true] %s748_s16 }
  0x8c   : > { %s7746_s4 = scalar_lea.hbm %s9422_s8, %s6719_s17  ;;  %s7070_s17 = scalar_lea.hbm %s9422_s8, 98304 }
  0x8d   : > { %s7066_s18 = scalar_lea.hbm %s7746_s4, 32768  ;;  %p7071_p11 = scmp.lt.u32.totalorder %s7746_s4, %s9422_s8 }
  0x8e   : > { %p7067_p5 = scmp.ne.s32.totalorder %s7746_s4, %s7066_s18  ;;  %p7072_p12 = scmp.lt.u32.totalorder %s7070_s17, %s7066_s18 }
  0x8f   : > { %p7074_p1 = scmp.lt.u32.totalorder %s7066_s18, %s7746_s4 }
  0x90   : > { %p7068_p9 = pnand %p7067_p5, %p7599_p7  ;;  %p7073_p0 = por %p7072_p12, %p7071_p11 }
  0x92   : > { %p7069_p10 = pneg %p7068_p9  ;;  %p7075_p13 = por %p7074_p1, %p7073_p0 }
  0x94   : > { %p7076_p2 = pnand %p7075_p13, %p7069_p10 }
  0x96   : > { %7079 = shalt.err (!%p7076_p2)
}
  0x97   : > { %s7080_s6 = scalar_lea.vmem %s7750_s16, 32768  ;;  %s7457_s27 = smov [#allocation14]  }
  0x98   : > { %p7081_p4 = scmp.ne.s32.totalorder %s7750_s16, %s7080_s6  ;;  %s7084_s2 = sshll.u32 %s7457_s27, 4  ;;  %s7085_s2 = int_to_ptr.vmem [resolvable:$false] %s7084_s2 }
  0x99   : > { %s7086_s14 = scalar_lea.vmem %s7085_s2, 65536  ;;  %p7087_p6 = scmp.lt.s32.totalorder %s7750_s16, %s7085_s2 }
  0x9a   : > { %p7082_p8 = pnand %p7081_p4, %p7599_p7  ;;  %p7088_p5 = scmp.lt.s32.totalorder %s7086_s14, %s7080_s6 }
  0x9c   : > { %p7083_p3 = pneg %p7082_p8  ;;  %p7089_p9 = por %p7088_p5, %p7087_p6 }
  0x9e   : > { %p7090_p11 = pnand %p7089_p9, %p7083_p3 }
  0xa0   : > { %7093 = shalt.err (!%p7090_p11)
}
  0xa1   : > { %s9424_s18 = smov 64   ;;  %s9425_s17 = smov 1024  }
  0xa2   : > { %6879 = dma.hbm_to_vmem [thread:$0]  (%p7599_p7), %s7746_s4, 32768, %s7750_s16, %s9396_s26, %s9425_s17, %s9425_s17, %s9424_s18  }
  0xa3   : > { %s9426_s10 = sld [smem:[#allocation46_spill]]  ;;  %s785_s27 = scalar_lea.vmem [#allocation17], %s7672_s24 }
  0xa4   : > { %s797_s2 = sshll.u32 %s785_s27, 4  ;;  %s7789_s14 = sshll.u32 %s7614_s28, 2  ;;  %s7786_s2 = int_to_ptr.vmem [resolvable:$true] %s797_s2 }
  0xa5   : > { %s9397_s13 = scalar_lea.sflag [#allocation18], %s7617_s29 }
  0xa9   : > { %s7783_s6 = scalar_lea.hbm %s9426_s10, %s7675_s30  ;;  %s7098_s25 = scalar_lea.hbm %s9426_s10, 384 }
  0xaa   : > { %s7094_s8 = scalar_lea.hbm %s7783_s6, 128  ;;  %p7099_p1 = scmp.lt.u32.totalorder %s7783_s6, %s9426_s10 }
  0xab   : > { %p7095_p10 = scmp.ne.s32.totalorder %s7783_s6, %s7094_s8  ;;  %p7100_p13 = scmp.lt.u32.totalorder %s7098_s25, %s7094_s8 }
  0xac   : > { %p7102_p4 = scmp.lt.u32.totalorder %s7094_s8, %s7783_s6 }
  0xad   : > { %p7096_p12 = pnand %p7095_p10, %p7599_p7  ;;  %p7101_p2 = por %p7100_p13, %p7099_p1 }
  0xaf   : > { %p7097_p0 = pneg %p7096_p12  ;;  %p7103_p8 = por %p7102_p4, %p7101_p2 }
  0xb1   : > { %p7104_p3 = pnand %p7103_p8, %p7097_p0 }
  0xb3   : > { %7107 = shalt.err (!%p7104_p3)
}
  0xb4   : > { %s7108_s27 = scalar_lea.vmem %s7786_s2, 128  ;;  %s7458_s4 = smov [#allocation17]  }
  0xb5   : > { %p7109_p6 = scmp.ne.s32.totalorder %s7786_s2, %s7108_s27  ;;  %s7112_s16 = sshll.u32 %s7458_s4, 4  ;;  %s7113_s16 = int_to_ptr.vmem [resolvable:$false] %s7112_s16 }
  0xb6   : > { %s7114_s26 = scalar_lea.vmem %s7113_s16, 256  ;;  %p7115_p11 = scmp.lt.s32.totalorder %s7786_s2, %s7113_s16 }
  0xb7   : > { %p7110_p5 = pnand %p7109_p6, %p7599_p7  ;;  %p7116_p10 = scmp.lt.s32.totalorder %s7114_s26, %s7108_s27 }
  0xb9   : > { %p7111_p9 = pneg %p7110_p5  ;;  %p7117_p12 = por %p7116_p10, %p7115_p11 }
  0xbb   : > { %p7118_p1 = pnand %p7117_p12, %p7111_p9 }
  0xbd   : > { %7121 = shalt.err (!%p7118_p1)
}
  0xbe   : > { %6881 = dma.hbm_to_vmem [thread:$0]  (%p7599_p7), %s7783_s6, 128, %s7786_s2, %s9397_s13  }
  0xbf   : > { %s7816_s8 = sshll.u32 %s7592_s21, 6  ;;  %s833_s4 = scalar_lea.vmem [#allocation20], %s7789_s14 }
  0xc0   : > { %s7822_s27 = scalar_lea.hbm %s9372_s12, %s7816_s8  ;;  %s845_s16 = sshll.u32 %s833_s4, 4  ;;  %s846_s16 = int_to_ptr.vmem [resolvable:$true] %s845_s16 }
  0xc1   : > { %s7122_s10 = scalar_lea.hbm %s7822_s27, 64  ;;  %s7126_s2 = scalar_lea.hbm %s9372_s12, 192 }
  0xc2   : > { %p7123_p0 = scmp.ne.s32.totalorder %s7822_s27, %s7122_s10  ;;  %p7127_p4 = scmp.lt.u32.totalorder %s7822_s27, %s9372_s12 }
  0xc3   : > { %p7128_p8 = scmp.lt.u32.totalorder %s7126_s2, %s7122_s10  ;;  %p7130_p6 = scmp.lt.u32.totalorder %s7122_s10, %s7822_s27 }
  0xc4   : > { %p7124_p13 = pnand %p7123_p0, %p7599_p7 }
  0xc5   : > { %p7129_p3 = por %p7128_p8, %p7127_p4 }
  0xc6   : > { %p7125_p2 = pneg %p7124_p13 }
  0xc7   : > { %p7131_p5 = por %p7130_p6, %p7129_p3 }
  0xc9   : > { %p7132_p9 = pnand %p7131_p5, %p7125_p2 }
  0xcb   : > { %7135 = shalt.err (!%p7132_p9)
}
  0xcc   : > { %s7136_s4 = scalar_lea.vmem %s846_s16, 64  ;;  %s7459_s13 = smov [#allocation20]  }
  0xcd   : > { %p7137_p11 = scmp.ne.s32.totalorder %s846_s16, %s7136_s4  ;;  %s7140_s26 = sshll.u32 %s7459_s13, 4  ;;  %s7141_s26 = int_to_ptr.vmem [resolvable:$false] %s7140_s26 }
  0xce   : > { %s7142_s21 = scalar_lea.vmem %s7141_s26, 128  ;;  %p7143_p1 = scmp.lt.s32.totalorder %s846_s16, %s7141_s26 }
  0xcf   : > { %p7138_p10 = pnand %p7137_p11, %p7599_p7  ;;  %p7144_p0 = scmp.lt.s32.totalorder %s7142_s21, %s7136_s4 }
  0xd1   : > { %p7139_p12 = pneg %p7138_p10  ;;  %p7145_p13 = por %p7144_p0, %p7143_p1 }
  0xd3   : > { %p7146_p4 = pnand %p7145_p13, %p7139_p12 }
  0xd5   : > { %7149 = shalt.err (!%p7146_p4)
}
  0xd6   : > { %s9427_s10 = scalar_lea.sflag [#allocation21], %s7617_s29  ;;  %s7849_s13 = scalar_lea.hbm %s9361_s1, %s7816_s8 }
  0xd7   : > { %6883 = dma.hbm_to_vmem [thread:$0]  (%p7599_p7), %s7822_s27, 64, %s846_s16, %s9427_s10  }
  0xd8   : > { %s572_s26 = scalar_lea.vmem [#allocation2], %s7789_s14  ;;  %s569_s15 = scalar_lea.sflag [#allocation3], %s7614_s28 }
  0xd9   : > { %s584_s25 = sshll.u32 %s572_s26, 4  ;;  %s7150_s4 = scalar_lea.hbm %s7849_s13, 64  ;;  %s585_s25 = int_to_ptr.vmem [resolvable:$true] %s584_s25 }
  0xda   : > { %p7151_p2 = scmp.ne.s32.totalorder %s7849_s13, %s7150_s4  ;;  %s7154_s16 = scalar_lea.hbm %s9361_s1, 192 }
  0xdb   : > { %p7155_p6 = scmp.lt.u32.totalorder %s7849_s13, %s9361_s1  ;;  %p7156_p5 = scmp.lt.u32.totalorder %s7154_s16, %s7150_s4 }
  0xdc   : > { %p7152_p8 = pnand %p7151_p2, %p7599_p7  ;;  %p7158_p11 = scmp.lt.u32.totalorder %s7150_s4, %s7849_s13 }
  0xdd   : > { %p7157_p9 = por %p7156_p5, %p7155_p6 }
  0xde   : > { %p7153_p3 = pneg %p7152_p8 }
  0xdf   : > { %p7159_p10 = por %p7158_p11, %p7157_p9 }
  0xe1   : > { %p7160_p12 = pnand %p7159_p10, %p7153_p3 }
  0xe3   : > { %7163 = shalt.err (!%p7160_p12)
}
  0xe4   : > { %s7164_s28 = scalar_lea.vmem %s585_s25, 64  ;;  %s7460_s2 = smov [#allocation2]  }
  0xe5   : > { %p7165_p1 = scmp.ne.s32.totalorder %s585_s25, %s7164_s28  ;;  %s7168_s26 = sshll.u32 %s7460_s2, 4  ;;  %s7169_s26 = int_to_ptr.vmem [resolvable:$false] %s7168_s26 }
  0xe6   : > { %s7170_s21 = scalar_lea.vmem %s7169_s26, 128  ;;  %p7171_p4 = scmp.lt.s32.totalorder %s585_s25, %s7169_s26 }
  0xe7   : > { %p7166_p0 = pnand %p7165_p1, %p7599_p7  ;;  %p7172_p2 = scmp.lt.s32.totalorder %s7170_s21, %s7164_s28 }
  0xe9   : > { %p7167_p13 = pneg %p7166_p0  ;;  %p7173_p8 = por %p7172_p2, %p7171_p4 }
  0xeb   : > { %p7174_p5 = pnand %p7173_p8, %p7167_p13 }
  0xed   : > { %7177 = shalt.err (!%p7174_p5)
}
  0xee   : > { %6872 = dma.hbm_to_vmem [thread:$0]  (%p7599_p7), %s7849_s13, 64, %s585_s25, %s569_s15  }
  0xef   : > { %s7874_s16 = scalar_lea.hbm %s9363_s3, %s7675_s30  ;;  %s620_s10 = scalar_lea.vmem [#allocation7], %s7672_s24 }
  0xf0   : > { %s632_s6 = sshll.u32 %s620_s10, 4  ;;  %s9428_s28 = sshll.u32 %s7735_s22, 4  ;;  %s633_s6 = int_to_ptr.vmem [resolvable:$true] %s632_s6  ;;  %s7879_s28 = int_to_ptr.vmem [resolvable:$true] %s9428_s28 }
  0xf1   : > { %s7178_s2 = scalar_lea.hbm %s7874_s16, 128  ;;  %s7182_s15 = scalar_lea.hbm %s9363_s3, 384 }
  0xf2   : > { %p7179_p3 = scmp.ne.s32.totalorder %s7874_s16, %s7178_s2  ;;  %p7183_p11 = scmp.lt.u32.totalorder %s7874_s16, %s9363_s3 }
  0xf3   : > { %p7184_p10 = scmp.lt.u32.totalorder %s7182_s15, %s7178_s2  ;;  %p7186_p1 = scmp.lt.u32.totalorder %s7178_s2, %s7874_s16 }
  0xf4   : > { %p7180_p6 = pnand %p7179_p3, %p7599_p7 }
  0xf5   : > { %p7185_p12 = por %p7184_p10, %p7183_p11 }
  0xf6   : > { %p7181_p9 = pneg %p7180_p6 }
  0xf7   : > { %p7187_p0 = por %p7186_p1, %p7185_p12 }
  0xf9   : > { %p7188_p13 = pnand %p7187_p0, %p7181_p9 }
  0xfb   : > { %7191 = shalt.err (!%p7188_p13)
}
  0xfc   : > { %s7192_s22 = scalar_lea.vmem %s633_s6, 128  ;;  %s7461_s4 = smov [#allocation7]  }
  0xfd   : > { %p7193_p4 = scmp.ne.s32.totalorder %s633_s6, %s7192_s22  ;;  %s7196_s27 = sshll.u32 %s7461_s4, 4  ;;  %s7197_s27 = int_to_ptr.vmem [resolvable:$false] %s7196_s27 }
  0xfe   : > { %s7198_s10 = scalar_lea.vmem %s7197_s27, 256  ;;  %p7199_p5 = scmp.lt.s32.totalorder %s633_s6, %s7197_s27 }
  0xff   : > { %p7194_p2 = pnand %p7193_p4, %p7599_p7  ;;  %p7200_p3 = scmp.lt.s32.totalorder %s7198_s10, %s7192_s22 }
 0x101   : > { %p7195_p8 = pneg %p7194_p2  ;;  %p7201_p6 = por %p7200_p3, %p7199_p5 }
 0x103   : > { %p7202_p10 = pnand %p7201_p6, %p7195_p8 }
 0x105   : > { %7205 = shalt.err (!%p7202_p10)
}
 0x106   : > { %s9429_s2 = scalar_lea.sflag [#allocation6], %s7617_s29  ;;  %s7206_s13 = scalar_lea.hbm %s7741_s0, 32768 }
 0x107   : > { %6874 = dma.hbm_to_vmem [thread:$0]  (%p7599_p7), %s7874_s16, 128, %s633_s6, %s9429_s2  }
 0x108   : > { %p7207_p9 = scmp.ne.s32.totalorder %s7741_s0, %s7206_s13  ;;  %s7210_s26 = scalar_lea.hbm %s9365_s5, 98304 }
 0x109   : > { %p7211_p1 = scmp.lt.u32.totalorder %s7741_s0, %s9365_s5  ;;  %p7212_p0 = scmp.lt.u32.totalorder %s7210_s26, %s7206_s13 }
 0x10a   : > { %p7208_p11 = pnand %p7207_p9, %p7599_p7  ;;  %p7214_p4 = scmp.lt.u32.totalorder %s7206_s13, %s7741_s0 }
 0x10b   : > { %p7213_p13 = por %p7212_p0, %p7211_p1 }
 0x10c   : > { %p7209_p12 = pneg %p7208_p11 }
 0x10d   : > { %p7215_p2 = por %p7214_p4, %p7213_p13 }
 0x10f   : > { %p7216_p8 = pnand %p7215_p2, %p7209_p12 }
 0x111   : > { %7219 = shalt.err (!%p7216_p8)
}
 0x112   : > { %s7220_s16 = scalar_lea.vmem %s7879_s28, 32768  ;;  %s7462_s6 = smov [#allocation10]  }
 0x113   : > { %p7221_p5 = scmp.ne.s32.totalorder %s7879_s28, %s7220_s16  ;;  %s7224_s4 = sshll.u32 %s7462_s6, 4  ;;  %s7225_s4 = int_to_ptr.vmem [resolvable:$false] %s7224_s4 }
 0x114   : > { %s7226_s27 = scalar_lea.vmem %s7225_s4, 65536  ;;  %p7227_p10 = scmp.lt.s32.totalorder %s7879_s28, %s7225_s4 }
 0x115   : > { %p7222_p3 = pnand %p7221_p5, %p7599_p7  ;;  %p7228_p9 = scmp.lt.s32.totalorder %s7226_s27, %s7220_s16 }
 0x117   : > { %p7223_p6 = pneg %p7222_p3  ;;  %p7229_p11 = por %p7228_p9, %p7227_p10 }
 0x119   : > { %p7230_p1 = pnand %p7229_p11, %p7223_p6 }
 0x11b   : > { %7233 = shalt.err (!%p7230_p1)
}
 0x11c   : > { %s9430_s10 = scalar_lea.sflag [#allocation9], %s7617_s29  ;;  %s7930_s25 = scalar_lea.hbm %s9367_s7, %s7675_s30 }
 0x11d   : > { %6876 = dma.hbm_to_vmem [thread:$0]  (%p7599_p7), %s7741_s0, 32768, %s7879_s28, %s9430_s10, %s9425_s17, %s9425_s17, %s9424_s18  }
 0x11e   : > { %s714_s15 = scalar_lea.vmem [#allocation13], %s7672_s24  ;;  %s7937_s16 = scalar_lea.hbm %s9369_s9, %s7675_s30 }
 0x11f   : > { %s726_s26 = sshll.u32 %s714_s15, 4  ;;  %s7234_s6 = scalar_lea.hbm %s7930_s25, 128  ;;  %s727_s26 = int_to_ptr.vmem [resolvable:$true] %s726_s26 }
 0x120   : > { %p7235_p12 = scmp.ne.s32.totalorder %s7930_s25, %s7234_s6  ;;  %s7238_s17 = scalar_lea.hbm %s9367_s7, 384 }
 0x121   : > { %p7239_p4 = scmp.lt.u32.totalorder %s7930_s25, %s9367_s7  ;;  %p7240_p2 = scmp.lt.u32.totalorder %s7238_s17, %s7234_s6 }
 0x122   : > { %p7236_p0 = pnand %p7235_p12, %p7599_p7  ;;  %p7242_p5 = scmp.lt.u32.totalorder %s7234_s6, %s7930_s25 }
 0x123   : > { %p7241_p8 = por %p7240_p2, %p7239_p4 }
 0x124   : > { %p7237_p13 = pneg %p7236_p0 }
 0x125   : > { %p7243_p3 = por %p7242_p5, %p7241_p8 }
 0x127   : > { %p7244_p6 = pnand %p7243_p3, %p7237_p13 }
 0x129   : > { %7247 = shalt.err (!%p7244_p6)
}
 0x12a   : > { %s7248_s30 = scalar_lea.vmem %s727_s26, 128  ;;  %s7463_s27 = smov [#allocation13]  }
 0x12b   : > { %p7249_p10 = scmp.ne.s32.totalorder %s727_s26, %s7248_s30  ;;  %s7252_s10 = sshll.u32 %s7463_s27, 4  ;;  %s7253_s10 = int_to_ptr.vmem [resolvable:$false] %s7252_s10 }
 0x12c   : > { %s7254_s2 = scalar_lea.vmem %s7253_s10, 256  ;;  %p7255_p1 = scmp.lt.s32.totalorder %s727_s26, %s7253_s10 }
 0x12d   : > { %p7250_p9 = pnand %p7249_p10, %p7599_p7  ;;  %p7256_p12 = scmp.lt.s32.totalorder %s7254_s2, %s7248_s30 }
 0x12f   : > { %p7251_p11 = pneg %p7250_p9  ;;  %p7257_p0 = por %p7256_p12, %p7255_p1 }
 0x131   : > { %p7258_p2 = pnand %p7257_p0, %p7251_p11 }
 0x133   : > { %7261 = shalt.err (!%p7258_p2)
}
 0x134   : > { %s9431_s13 = scalar_lea.sflag [#allocation12], %s7617_s29  ;;  %s762_s15 = scalar_lea.vmem [#allocation16], %s7672_s24 }
 0x135   : > { %6878 = dma.hbm_to_vmem [thread:$0]  (%p7599_p7), %s7930_s25, 128, %s727_s26, %s9431_s13  }
 0x136   : > { %s774_s21 = sshll.u32 %s762_s15, 4  ;;  %s9432_s22 = sshll.u32 %s7668_s19, 4  ;;  %s7961_s22 = int_to_ptr.vmem [resolvable:$true] %s9432_s22  ;;  %s775_s21 = int_to_ptr.vmem [resolvable:$true] %s774_s21 }
 0x137   : > { %s7262_s6 = scalar_lea.hbm %s7937_s16, 128  ;;  %s7266_s17 = scalar_lea.hbm %s9369_s9, 384 }
 0x138   : > { %p7263_p13 = scmp.ne.s32.totalorder %s7937_s16, %s7262_s6  ;;  %p7267_p5 = scmp.lt.u32.totalorder %s7937_s16, %s9369_s9 }
 0x139   : > { %p7268_p3 = scmp.lt.u32.totalorder %s7266_s17, %s7262_s6  ;;  %p7270_p10 = scmp.lt.u32.totalorder %s7262_s6, %s7937_s16 }
 0x13a   : > { %p7264_p4 = pnand %p7263_p13, %p7599_p7 }
 0x13b   : > { %p7269_p6 = por %p7268_p3, %p7267_p5 }
 0x13c   : > { %p7265_p8 = pneg %p7264_p4 }
 0x13d   : > { %p7271_p9 = por %p7270_p10, %p7269_p6 }
 0x13f   : > { %p7272_p11 = pnand %p7271_p9, %p7265_p8 }
 0x141   : > { %7275 = shalt.err (!%p7272_p11)
}
 0x142   : > { %s7276_s24 = scalar_lea.vmem %s775_s21, 128  ;;  %s7464_s19 = smov [#allocation16]  }
 0x143   : > { %p7277_p1 = scmp.ne.s32.totalorder %s775_s21, %s7276_s24  ;;  %s7280_s25 = sshll.u32 %s7464_s19, 4  ;;  %s7281_s25 = int_to_ptr.vmem [resolvable:$false] %s7280_s25 }
 0x144   : > { %s7282_s26 = scalar_lea.vmem %s7281_s25, 256  ;;  %p7283_p2 = scmp.lt.s32.totalorder %s775_s21, %s7281_s25 }
 0x145   : > { %p7278_p12 = pnand %p7277_p1, %p7599_p7  ;;  %p7284_p13 = scmp.lt.s32.totalorder %s7282_s26, %s7276_s24 }
 0x147   : > { %p7279_p0 = pneg %p7278_p12  ;;  %p7285_p4 = por %p7284_p13, %p7283_p2 }
 0x149   : > { %p7286_p3 = pnand %p7285_p4, %p7279_p0 }
 0x14b   : > { %7289 = shalt.err (!%p7286_p3)
}
 0x14c   : > { %s9433_s30 = scalar_lea.sflag [#allocation15], %s7617_s29  ;;  %s7290_s27 = scalar_lea.hbm %s7664_s20, 16384 }
 0x14d   : > { %6880 = dma.hbm_to_vmem [thread:$0]  (%p7599_p7), %s7937_s16, 128, %s775_s21, %s9433_s30  }
 0x14e   : > { %p7291_p8 = scmp.ne.s32.totalorder %s7664_s20, %s7290_s27  ;;  %s7294_s13 = scalar_lea.hbm %s9371_s11, 49152 }
 0x14f   : > { %p7295_p10 = scmp.lt.u32.totalorder %s7664_s20, %s9371_s11  ;;  %p7296_p9 = scmp.lt.u32.totalorder %s7294_s13, %s7290_s27 }
 0x150   : > { %p7292_p5 = pnand %p7291_p8, %p7599_p7  ;;  %p7298_p1 = scmp.lt.u32.totalorder %s7290_s27, %s7664_s20 }
 0x151   : > { %p7297_p11 = por %p7296_p9, %p7295_p10 }
 0x152   : > { %p7293_p6 = pneg %p7292_p5 }
 0x153   : > { %p7299_p12 = por %p7298_p1, %p7297_p11 }
 0x155   : > { %p7300_p0 = pnand %p7299_p12, %p7293_p6 }
 0x157   : > { %7303 = shalt.err (!%p7300_p0)
}
 0x158   : > { %s7304_s16 = scalar_lea.vmem %s7961_s22, 16384  ;;  %s7465_s21 = smov [#allocation19]  }
 0x159   : > { %p7305_p2 = scmp.ne.s32.totalorder %s7961_s22, %s7304_s16  ;;  %s7308_s0 = sshll.u32 %s7465_s21, 4  ;;  %s7309_s0 = int_to_ptr.vmem [resolvable:$false] %s7308_s0 }
 0x15a   : > { %s7310_s18 = scalar_lea.vmem %s7309_s0, 32768  ;;  %p7311_p3 = scmp.lt.s32.totalorder %s7961_s22, %s7309_s0 }
 0x15b   : > { %p7306_p13 = pnand %p7305_p2, %p7599_p7  ;;  %p7312_p8 = scmp.lt.s32.totalorder %s7310_s18, %s7304_s16 }
 0x15d   : > { %p7307_p4 = pneg %p7306_p13  ;;  %p7313_p5 = por %p7312_p8, %p7311_p3 }
 0x15f   : > { %p7314_p10 = pnand %p7313_p5, %p7307_p4 }
 0x161   : > { %7317 = shalt.err (!%p7314_p10)
}
 0x162   : > { %s7466_s17 = smov 512   ;;  %s7467_s28 = smov 32  }
 0x163   : > { %s9434_s4 = scalar_lea.sflag [#allocation18], %s7617_s29  ;;  %s9435_s25 = sld [smem:[#allocation47_spill]] }
 0x164   : > { %6882 = dma.hbm_to_vmem [thread:$0]  (%p7599_p7), %s7664_s20, 16384, %s7961_s22, %s9434_s4, %s7466_s17, %s7466_s17, %s7467_s28  }
 0x165   : > { %s856_s30 = scalar_lea.vmem [#allocation22], %s7789_s14 }
 0x166   : > { %s868_s27 = sshll.u32 %s856_s30, 4  ;;  %s869_s27 = int_to_ptr.vmem [resolvable:$true] %s868_s27 }
 0x169   : > { %s8009_s26 = scalar_lea.hbm %s9435_s25, %s7816_s8  ;;  %s7322_s20 = scalar_lea.hbm %s9435_s25, 192 }
 0x16a   : > { %s7318_s10 = scalar_lea.hbm %s8009_s26, 64  ;;  %p7323_p1 = scmp.lt.u32.totalorder %s8009_s26, %s9435_s25 }
 0x16b   : > { %p7319_p6 = scmp.ne.s32.totalorder %s8009_s26, %s7318_s10  ;;  %p7324_p12 = scmp.lt.u32.totalorder %s7322_s20, %s7318_s10 }
 0x16c   : > { %p7326_p2 = scmp.lt.u32.totalorder %s7318_s10, %s8009_s26 }
 0x16d   : > { %p7320_p9 = pnand %p7319_p6, %p7599_p7  ;;  %p7325_p0 = por %p7324_p12, %p7323_p1 }
 0x16f   : > { %p7321_p11 = pneg %p7320_p9  ;;  %p7327_p13 = por %p7326_p2, %p7325_p0 }
 0x171   : > { %p7328_p4 = pnand %p7327_p13, %p7321_p11 }
 0x173   : > { %7331 = shalt.err (!%p7328_p4)
}
 0x174   : > { %s7332_s14 = scalar_lea.vmem %s869_s27, 64  ;;  %s7468_s8 = smov [#allocation22]  }
 0x175   : > { %p7333_p3 = scmp.ne.s32.totalorder %s869_s27, %s7332_s14  ;;  %s7336_s6 = sshll.u32 %s7468_s8, 4  ;;  %s7337_s6 = int_to_ptr.vmem [resolvable:$false] %s7336_s6 }
 0x176   : > { %s7338_s16 = scalar_lea.vmem %s7337_s6, 128  ;;  %p7339_p10 = scmp.lt.s32.totalorder %s869_s27, %s7337_s6 }
 0x177   : > { %p7334_p8 = pnand %p7333_p3, %p7599_p7  ;;  %p7340_p6 = scmp.lt.s32.totalorder %s7338_s16, %s7332_s14 }
 0x179   : > { %p7335_p5 = pneg %p7334_p8  ;;  %p7341_p9 = por %p7340_p6, %p7339_p10 }
 0x17b   : > { %p7342_p1 = pnand %p7341_p9, %p7335_p5 }
 0x17d   : > { %7345 = shalt.err (!%p7342_p1)
}
 0x17e   : > { %s9436_s21 = scalar_lea.sflag [#allocation21], %s7617_s29 }
 0x17f   : > { %6884 = dma.hbm_to_vmem [thread:$0]  (%p7599_p7), %s8009_s26, 64, %s869_s27, %s9436_s21  }
 0x180 PF: > { %s9437_s0 = sld [smem:[#allocation36_spill]] }
 0x186   : > { %p6680_p11 = scmp.ge.s32.totalorder %s9437_s0, 1  ;;  %p873_p12 = scmp.lt.s32.totalorder %s9437_s0, 4 }
 0x188   : > { %p874_p0 = pnand %p6680_p11, %p873_p12 }
 0x189   : > { %s9438_s18 = sld [smem:[#allocation32_spill]] (!%p874_p0) }
 0x18a   : > { %877 = sbr.rel (%p874_p0) target bundleno = 2547 (0x9f3), region = 76  ;;  %s9439_s17 = sld [smem:[#allocation39_spill]] (!%p874_p0) }
 0x18f   : > { %s8034_s28 = sand.u32 (!%p874_p0), 1, %s9438_s18  }
 0x190   : > { %s8037_s4 = sshll.u32 (!%p874_p0), %s8034_s28, 2  ;;  %s880_s23 = scalar_lea.sflag (!%p874_p0), [#allocation3], %s8034_s28 }
 0x191   : > { %s883_s29 = scalar_lea.vmem [#allocation2], %s8037_s4  ;;  %p9440_p2 = scmp.ne.s32.totalorder %s9439_s17, 0 }
 0x193   : > { %7397 = dma.done.wait (%p9440_p2), %s880_s23, 64  }
 0x194   : > { %7399 = vsyncadd (%p9440_p2), %s880_s23, 4294967232  ;;  %s9441_s24 = sld [smem:[#allocation37_spill]]  ;;  %s6682_s26 = sshll.u32 %s8034_s28, 10 }
 0x195   : > { %s8050_s27 = scalar_lea.vmem [#allocation5], %s6682_s26 }
 0x19a   : > { %s8046_s19 = sand.u32 1, %s9441_s24  }
 0x19b   : > { %s889_s30 = scalar_lea.sflag [#allocation6], %s8046_s19 }
 0x19c   : > { %7401 = dma.done.wait (%p9440_p2), %s889_s30, 16512  }
 0x19d   : > { %7403 = vsyncadd (%p9440_p2), %s889_s30, 4294950784  ;;  %s8057_s10 = sshll.u32 %s8034_s28, 3  ;;  %s907_s13 = scalar_lea.sflag [#allocation9], %s8046_s19 }
 0x19e   : > { %s901_s2 = scalar_lea.vmem [#allocation7], %s8057_s10  ;;  %s910_s20 = scalar_lea.vmem [#allocation8], %s8057_s10 }
 0x19f   : > { %7405 = dma.done.wait (%p9440_p2), %s907_s13, 32896  }
 0x1a0   : > { %7407 = vsyncadd (%p9440_p2), %s907_s13, 4294934400  ;;  %s6685_s22 = sshll.u32 %s8034_s28, 11  ;;  %s925_s14 = scalar_lea.sflag [#allocation12], %s8046_s19 }
 0x1a1   : > { %s8067_s15 = scalar_lea.vmem [#allocation10], %s6685_s22  ;;  %s928_s8 = scalar_lea.vmem [#allocation11], %s8057_s10 }
 0x1a2   : > { %7409 = dma.done.wait (%p9440_p2), %s925_s14, 256  }
 0x1a3   : > { %7411 = vsyncadd (%p9440_p2), %s925_s14, 4294967040  ;;  %s937_s6 = scalar_lea.vmem [#allocation13], %s8057_s10  ;;  %s943_s16 = scalar_lea.sflag [#allocation15], %s8046_s19 }
 0x1a4   : > { %s8077_s21 = scalar_lea.vmem [#allocation14], %s6685_s22 }
 0x1a5   : > { %7413 = dma.done.wait (%p9440_p2), %s943_s16, 32896  }
 0x1a6   : > { %7415 = vsyncadd (%p9440_p2), %s943_s16, 4294934400  ;;  %s955_s0 = scalar_lea.vmem [#allocation16], %s8057_s10  ;;  %s961_s18 = scalar_lea.sflag [#allocation18], %s8046_s19 }
 0x1a7   : > { %s964_s28 = scalar_lea.vmem [#allocation17], %s8057_s10 }
 0x1a8   : > { %7417 = dma.done.wait (%p9440_p2), %s961_s18, 16512  }
 0x1a9   : > { %7419 = vsyncadd (%p9440_p2), %s961_s18, 4294950784  ;;  %s8090_s23 = scalar_lea.vmem [#allocation19], %s6682_s26  ;;  %s979_s24 = scalar_lea.sflag [#allocation21], %s8046_s19 }
 0x1aa   : > { %s982_s30 = scalar_lea.vmem [#allocation20], %s8037_s4 }
 0x1ab   : > { %7421 = dma.done.wait (%p9440_p2), %s979_s24, 128  }
 0x1ac   : > { %7423 = vsyncadd (%p9440_p2), %s979_s24, 4294967168  ;;  %s991_s13 = scalar_lea.vmem [#allocation22], %s8037_s4  ;;  %s9442_s22 = sld [smem:[#allocation34_spill]] }
 0x1b2   : > { %p6694_p7 = scmp.ne.s32.totalorder %s9442_s22, 0 }
 0x1b3   : > { %v7469_v0 = vmov (!%p6694_p7), 0.0  }
 0x1b4   : > { %1146 = sbr.rel (%p6694_p7) target bundleno = 443 (0x1bb), region = 132  ;;  %1147 = vst [vmem:[#allocation23] sm:$0xff] (!%p6694_p7), %v7469_v0  ;;  %1148 = vst [vmem:[#allocation23 + $0x8] sm:$0xff] (!%p6694_p7), %v7469_v0 }
 0x1b5   : > { %1149 = vst [vmem:[#allocation23 + $0x10] sm:$0xff] (!%p6694_p7), %v7469_v0  ;;  %1150 = vst [vmem:[#allocation23 + $0x18] sm:$0xff] (!%p6694_p7), %v7469_v0 }
 0x1bb PF: > { %s9443_s19 = sld [smem:[#allocation41_spill]]  ;;  %v7470_v2 = vmov 0   ;;  %v7471_v3 = vmov 1   ;;  %v1225_v4 = vld [vmem:[%s8050_s27 + $0x208] sm:$0xff]  ;;  %v1227_v5 = vld [vmem:[%s8050_s27 + $0x218] sm:$0xff]  ;;  %v1224_v8 = vld [vmem:[%s8050_s27 + $0x200] sm:$0xff] }
 0x1bc   : > { %6966 = vset.pattern.permute.xlu0 %v7470_v2  ;;  %v1417_v6 = vunpack.c.l.s8.bf16 %v1225_v4  ;;  %v1419_v7 = vunpack.c.l.s8.bf16 %v1227_v5  ;;  %v1226_v9 = vld [vmem:[%s8050_s27 + $0x210] sm:$0xff]  ;;  %v1416_v10 = vunpack.c.l.s8.bf16 %v1224_v8  ;;  %v1425_v12 = vunpack.c.h.s8.bf16 %v1225_v4  ;;  %v1233_v16 = vld [vmem:[%s8050_s27 + $0x248] sm:$0xff]  ;;  %v1235_v17 = vld [vmem:[%s8050_s27 + $0x258] sm:$0xff]  ;;  %s9444_s17 = sld [smem:[#allocation37_spill]]  ;;  %s7478_s4 = smov [#allocation23]  }
 0x1bd   : > { %v1418_v11 = vunpack.c.l.s8.bf16 %v1226_v9  ;;  %v1427_v13 = vunpack.c.h.s8.bf16 %v1227_v5  ;;  %v1424_v14 = vunpack.c.h.s8.bf16 %v1224_v8  ;;  %v1426_v15 = vunpack.c.h.s8.bf16 %v1226_v9  ;;  %v1232_v20 = vld [vmem:[%s8050_s27 + $0x240] sm:$0xff]  ;;  %v1234_v21 = vld [vmem:[%s8050_s27 + $0x250] sm:$0xff]  ;;  %v1241_v28 = vld [vmem:[%s8050_s27 + $0x288] sm:$0xff] }
 0x1be   : > { %3937 = vmatprep.subr.bf16.mxu0 %v1417_v6  ;;  %3978 = vmatprep.subr.bf16.mxu1 %v1419_v7  ;;  %v1433_v18 = vunpack.c.l.s8.bf16 %v1233_v16  ;;  %v1435_v19 = vunpack.c.l.s8.bf16 %v1235_v17  ;;  %v1432_v22 = vunpack.c.l.s8.bf16 %v1232_v20  ;;  %v1434_v23 = vunpack.c.l.s8.bf16 %v1234_v21  ;;  %v1243_v29 = vld [vmem:[%s8050_s27 + $0x298] sm:$0xff]  ;;  %v1240_v32 = vld [vmem:[%s8050_s27 + $0x280] sm:$0xff]  ;;  %v1242_v33 = vld [vmem:[%s8050_s27 + $0x290] sm:$0xff] }
 0x1bf   : > { %3938 = vmatpush1.bf16.msra.mxu0 %v1416_v10  ;;  %3979 = vmatpush1.bf16.msra.mxu1 %v1418_v11  ;;  %v1441_v24 = vunpack.c.h.s8.bf16 %v1233_v16  ;;  %v1443_v25 = vunpack.c.h.s8.bf16 %v1235_v17  ;;  %v1440_v26 = vunpack.c.h.s8.bf16 %v1232_v20  ;;  %v1442_v27 = vunpack.c.h.s8.bf16 %v1234_v21  ;;  %v1249_v40 = vld [vmem:[%s8050_s27 + $0x2c8] sm:$0xff]  ;;  %v1251_v41 = vld [vmem:[%s8050_s27 + $0x2d8] sm:$0xff]  ;;  %v1248_v44 = vld [vmem:[%s8050_s27 + $0x2c0] sm:$0xff] }
 0x1c0   : > { %3939 = vmatprep.subr.bf16.mxu0 %v1425_v12  ;;  %3980 = vmatprep.subr.bf16.mxu1 %v1427_v13  ;;  %v1449_v30 = vunpack.c.l.s8.bf16 %v1241_v28  ;;  %v1451_v31 = vunpack.c.l.s8.bf16 %v1243_v29  ;;  %v1448_v34 = vunpack.c.l.s8.bf16 %v1240_v32  ;;  %v1450_v35 = vunpack.c.l.s8.bf16 %v1242_v33  ;;  %v1250_v45 = vld [vmem:[%s8050_s27 + $0x2d0] sm:$0xff]  ;;  %v1257_v52 = vld [vmem:[%s8050_s27 + $0x308] sm:$0xff]  ;;  %v1259_v53 = vld [vmem:[%s8050_s27 + $0x318] sm:$0xff] }
 0x1c1   : > { %v3464_v1 = vld [vmem:[%s9443_s19] sm:$0xff]  ;;  %v1457_v36 = vunpack.c.h.s8.bf16 %v1241_v28  ;;  %v1459_v37 = vunpack.c.h.s8.bf16 %v1243_v29  ;;  %v1456_v38 = vunpack.c.h.s8.bf16 %v1240_v32  ;;  %v1458_v39 = vunpack.c.h.s8.bf16 %v1242_v33  ;;  %v1256_v56 = vld [vmem:[%s8050_s27 + $0x300] sm:$0xff]  ;;  %v1258_v57 = vld [vmem:[%s8050_s27 + $0x310] sm:$0xff] }
 0x1c2   : > { %3467 = vperm.xlu0 %6966, %v3464_v1   ;;  %v1465_v42 = vunpack.c.l.s8.bf16 %v1249_v40  ;;  %v1467_v43 = vunpack.c.l.s8.bf16 %v1251_v41  ;;  %v1464_v46 = vunpack.c.l.s8.bf16 %v1248_v44  ;;  %v1466_v47 = vunpack.c.l.s8.bf16 %v1250_v45  ;;  %v1265_v0 = vld [vmem:[%s8050_s27 + $0x348] sm:$0xff]  ;;  %v1264_v4 = vld [vmem:[%s8050_s27 + $0x340] sm:$0xff]  ;;  %v1266_v5 = vld [vmem:[%s8050_s27 + $0x350] sm:$0xff]  ;;  %p6902_p13 = scmp.eq.s32.totalorder %s9444_s17, 2 }
 0x1c3   : > { %3940 = vmatpush1.bf16.msra.mxu0 %v1424_v14  ;;  %3981 = vmatpush1.bf16.msra.mxu1 %v1426_v15  ;;  %v1473_v48 = vunpack.c.h.s8.bf16 %v1249_v40  ;;  %v1475_v49 = vunpack.c.h.s8.bf16 %v1251_v41  ;;  %v1472_v50 = vunpack.c.h.s8.bf16 %v1248_v44  ;;  %v1474_v51 = vunpack.c.h.s8.bf16 %v1250_v45  ;;  %v1273_v12 = vld [vmem:[%s8050_s27 + $0x388] sm:$0xff]  ;;  %v1275_v13 = vld [vmem:[%s8050_s27 + $0x398] sm:$0xff]  ;;  %v1272_v14 = vld [vmem:[%s8050_s27 + $0x380] sm:$0xff] }
 0x1c4   : > { %3941 = vmatprep.subr.bf16.mxu0 %v1433_v18  ;;  %3982 = vmatprep.subr.bf16.mxu1 %v1435_v19  ;;  %v1481_v54 = vunpack.c.l.s8.bf16 %v1257_v52  ;;  %v1483_v55 = vunpack.c.l.s8.bf16 %v1259_v53  ;;  %v1480_v58 = vunpack.c.l.s8.bf16 %v1256_v56  ;;  %v1482_v59 = vunpack.c.l.s8.bf16 %v1258_v57  ;;  %v1274_v17 = vld [vmem:[%s8050_s27 + $0x390] sm:$0xff]  ;;  %v1280_v28 = vld [vmem:[%s8050_s27 + $0x3c0] sm:$0xff] }
 0x1c5   : > { %v1489_v60 = vunpack.c.h.s8.bf16 %v1257_v52  ;;  %v1491_v61 = vunpack.c.h.s8.bf16 %v1259_v53  ;;  %v1488_v62 = vunpack.c.h.s8.bf16 %v1256_v56  ;;  %v1490_v63 = vunpack.c.h.s8.bf16 %v1258_v57  ;;  %v1282_v29 = vld [vmem:[%s8050_s27 + $0x3d0] sm:$0xff] }
 0x1c6   : > { %6967 = vset.pattern.permute.xlu0 %v7471_v3  ;;  %v1497_v2 = vunpack.c.l.s8.bf16 %v1265_v0  ;;  %v1496_v6 = vunpack.c.l.s8.bf16 %v1264_v4  ;;  %v1498_v7 = vunpack.c.l.s8.bf16 %v1266_v5  ;;  %v1505_v8 = vunpack.c.h.s8.bf16 %v1265_v0 }
 0x1c7   : > { %3492 = vperm.xlu0 %6967, %v3464_v1   ;;  %3942 = vmatpush1.bf16.msra.mxu0 %v1432_v22  ;;  %v1267_v1 = vld [vmem:[%s8050_s27 + $0x358] sm:$0xff]  ;;  %v1504_v10 = vunpack.c.h.s8.bf16 %v1264_v4  ;;  %v1506_v11 = vunpack.c.h.s8.bf16 %v1266_v5  ;;  %v1513_v15 = vunpack.c.l.s8.bf16 %v1273_v12  ;;  %v1515_v16 = vunpack.c.l.s8.bf16 %v1275_v13  ;;  %v1281_v22 = vld [vmem:[%s8050_s27 + $0x3c8] sm:$0xff] }
 0x1c8   : > { %3983 = vmatpush1.bf16.msra.mxu1 %v1434_v23  ;;  %3943 = vmatprep.subr.bf16.mxu0 %v1441_v24  ;;  %v1499_v3 = vunpack.c.l.s8.bf16 %v1267_v1  ;;  %v1507_v9 = vunpack.c.h.s8.bf16 %v1267_v1  ;;  %v1512_v18 = vunpack.c.l.s8.bf16 %v1272_v14  ;;  %v1514_v19 = vunpack.c.l.s8.bf16 %v1274_v17  ;;  %v1283_v23 = vld [vmem:[%s8050_s27 + $0x3d8] sm:$0xff] }
 0x1c9   : > { %3984 = vmatprep.subr.bf16.mxu1 %v1443_v25  ;;  %v1521_v20 = vunpack.c.h.s8.bf16 %v1273_v12  ;;  %v1523_v21 = vunpack.c.h.s8.bf16 %v1275_v13  ;;  %v1520_v24 = vunpack.c.h.s8.bf16 %v1272_v14  ;;  %v1522_v25 = vunpack.c.h.s8.bf16 %v1274_v17 }
 0x1ca   : > { %v1537_v32 = vunpack.c.h.s8.bf16 %v1281_v22  ;;  %v1539_v33 = vunpack.c.h.s8.bf16 %v1283_v23  ;;  %v3471_v40 = vlaneseq }
 0x1cb   : > { %3944 = vmatpush1.bf16.msra.mxu0 %v1440_v26  ;;  %v1529_v26 = vunpack.c.l.s8.bf16 %v1281_v22 }
 0x1cc   : > { %3985 = vmatpush1.bf16.msra.mxu1 %v1442_v27  ;;  %3945 = vmatprep.subr.bf16.mxu0 %v1449_v30  ;;  %v1531_v27 = vunpack.c.l.s8.bf16 %v1283_v23  ;;  %v1528_v30 = vunpack.c.l.s8.bf16 %v1280_v28  ;;  %v8143_v41 = vshrl.u32 %v3471_v40, 7  ;;  %v7477_v40 = vmov 1326507024  }
 0x1cd   : > { %3986 = vmatprep.subr.bf16.mxu1 %v1451_v31  ;;  %v1530_v31 = vunpack.c.l.s8.bf16 %v1282_v29 }
 0x1ce   : > { %v8152_v44 = vsub.s32 1, %v8143_v41  ;;  %v8155_v45 = vsub.s32 3, %v8143_v41 }
 0x1cf   : > { %3946 = vmatpush1.bf16.msra.mxu0 %v1448_v34  ;;  %v1536_v34 = vunpack.c.h.s8.bf16 %v1280_v28 }
 0x1d0   : > { %3987 = vmatpush1.bf16.msra.mxu1 %v1450_v35  ;;  %3947 = vmatprep.subr.bf16.mxu0 %v1457_v36  ;;  %v1538_v35 = vunpack.c.h.s8.bf16 %v1282_v29  ;;  %v8136_v36 = vld [vmem:[%s8050_s27 + $0x228] sm:$0xff]  ;;  %v7475_v29 = vmov 2102212464  }
 0x1d1   : > { %3988 = vmatprep.subr.bf16.mxu1 %v1459_v37  ;;  %v8139_v37 = vld [vmem:[%s8050_s27 + $0x238] sm:$0xff] }
 0x1d3   : > { %3948 = vmatpush1.bf16.msra.mxu0 %v1456_v38  ;;  %v1421_v38 = vunpack.c.l.s8.bf16 %v8136_v36 }
 0x1d4   : > { %3989 = vmatpush1.bf16.msra.mxu1 %v1458_v39  ;;  %3949 = vmatprep.subr.bf16.mxu0 %v1465_v42  ;;  %v1423_v39 = vunpack.c.l.s8.bf16 %v8139_v37  ;;  %v8146_v42 = vsub.s32 0, %v8143_v41 }
 0x1d5   : > { %3990 = vmatprep.subr.bf16.mxu1 %v1467_v43  ;;  %v8149_v43 = vsub.s32 2, %v8143_v41 }
 0x1d7   : > { %3950 = vmatpush1.bf16.msra.mxu0 %v1464_v46  ;;  %v1151_v46 = vld [vmem:[%s883_s29] sm:$0xf]  ;;  %s6319_s29 = sshll.u32 %s7478_s4, 4  ;;  %s6320_s29 = int_to_ptr.vmem [resolvable:$true] %s6319_s29 }
 0x1d8   : > { %3991 = vmatpush1.bf16.msra.mxu1 %v1466_v47  ;;  %3951 = vmatprep.subr.bf16.mxu0 %v1473_v48  ;;  %v3474_v47 = vrot.slane %v1151_v46, %v8146_v42  ;;  %v3478_v48 = vrot.slane %v1151_v46, %v8149_v43  ;;  %p7353_p5 = scmp.lt.s32.totalorder %s6320_s29, %s6320_s29 }
 0x1d9   : > { %3992 = vmatprep.subr.bf16.mxu1 %v1475_v49  ;;  %v3498_v49 = vrot.slane %v1151_v46, %v8152_v44 }
 0x1da   : > { %v3484_v52 = vrot.slane %v3474_v47, %v8146_v42  ;;  %v3488_v53 = vrot.slane %v3478_v48, %v8146_v42 }
 0x1db   : > { %3952 = vmatpush1.bf16.msra.mxu0 %v1472_v50  ;;  %v3502_v50 = vrot.slane %v1151_v46, %v8155_v45 }
 0x1dc   : > { %3993 = vmatpush1.bf16.msra.mxu1 %v1474_v51  ;;  %3953 = vmatprep.subr.bf16.mxu0 %v1481_v54  ;;  %v3508_v54 = vrot.slane %v3498_v49, %v8152_v44 }
 0x1dd   : > { %3994 = vmatprep.subr.bf16.mxu1 %v1483_v55  ;;  %v3512_v55 = vrot.slane %v3502_v50, %v8152_v44 }
 0x1df   : > { %3954 = vmatpush1.bf16.msra.mxu0 %v1480_v58 }
 0x1e0   : > { %3995 = vmatpush1.bf16.msra.mxu1 %v1482_v59  ;;  %3955 = vmatprep.subr.bf16.mxu0 %v1489_v60 }
 0x1e1   : > { %3996 = vmatprep.subr.bf16.mxu1 %v1491_v61 }
 0x1e3   : > { %3956 = vmatpush1.bf16.msra.mxu0 %v1488_v62 }
 0x1e4   : > { %3997 = vmatpush1.bf16.msra.mxu1 %v1490_v63  ;;  %3957 = vmatprep.subr.bf16.mxu0 %v1497_v2 }
 0x1e5   : > { %3998 = vmatprep.subr.bf16.mxu1 %v1499_v3 }
 0x1e7   : > { %3958 = vmatpush1.bf16.msra.mxu0 %v1496_v6 }
 0x1e8   : > { %3999 = vmatpush1.bf16.msra.mxu1 %v1498_v7  ;;  %3959 = vmatprep.subr.bf16.mxu0 %v1505_v8 }
 0x1e9   : > { %4000 = vmatprep.subr.bf16.mxu1 %v1507_v9 }
 0x1eb   : > { %3960 = vmatpush1.bf16.msra.mxu0 %v1504_v10 }
 0x1ec   : > { %4001 = vmatpush1.bf16.msra.mxu1 %v1506_v11  ;;  %3961 = vmatprep.subr.bf16.mxu0 %v1513_v15 }
 0x1ed   : > { %4002 = vmatprep.subr.bf16.mxu1 %v1515_v16 }
 0x1ef   : > { %3962 = vmatpush1.bf16.msra.mxu0 %v1512_v18 }
 0x1f0   : > { %4003 = vmatpush1.bf16.msra.mxu1 %v1514_v19  ;;  %3963 = vmatprep.subr.bf16.mxu0 %v1521_v20 }
 0x1f1   : > { %4004 = vmatprep.subr.bf16.mxu1 %v1523_v21  ;;  %v7472_v21 = vmov 683565275  }
 0x1f3   : > { %3964 = vmatpush1.bf16.msra.mxu0 %v1520_v24 }
 0x1f4   : > { %4005 = vmatpush1.bf16.msra.mxu1 %v1522_v25  ;;  %3965 = vmatprep.subr.bf16.mxu0 %v1529_v26  ;;  %v7473_v25 = vmov 2475754826  }
 0x1f5   : > { %4006 = vmatprep.subr.bf16.mxu1 %v1531_v27  ;;  %v7474_v27 = vmov 2131351028  }
 0x1f7   : > { %3966 = vmatpush1.bf16.msra.mxu0 %v1528_v30 }
 0x1f8   : > { %4007 = vmatpush1.bf16.msra.mxu1 %v1530_v31  ;;  %3967 = vmatprep.subr.bf16.mxu0 %v1537_v32  ;;  %v7476_v31 = vmov 920167782  }
 0x1f9   : > { %4008 = vmatprep.subr.bf16.mxu1 %v1539_v33 }
 0x1fb   : > { %3968 = vmatpush1.bf16.msra.mxu0 %v1536_v34 }
 0x1fc   : > { %4009 = vmatpush1.bf16.msra.mxu1 %v1538_v35  ;;  %4019 = vmatprep.subr.bf16.mxu0 %v1421_v38 }
 0x1fd   : > { %4060 = vmatprep.subr.bf16.mxu1 %v1423_v39 }
 0x241   : > { %v3468_v51 = vpop.permute.xlu0 %3467 }
 0x242   : > { %v3489_v57 = vmul.f32 %v3484_v52, %v3468_v51  ;;  %v3490_v58 = vmul.f32 %v3488_v53, %v3468_v51 }
 0x246   : > { %v3493_v56 = vpop.permute.xlu0 %3492 }
 0x247   : > { %v3513_v59 = vmul.f32 %v3508_v54, %v3493_v56  ;;  %v3514_v60 = vmul.f32 %v3512_v55, %v3493_v56 }
 0x249   : > { %v3515_v61 = vadd.f32 %v3513_v59, %v3489_v57  ;;  %v3516_v62 = vadd.f32 %v3514_v60, %v3490_v58 }
 0x24b   : > { %v8167_v63 = vmul.f32 6.2831855, %v3515_v61  ;;  %v8169_v0 = vmul.f32 6.2831855, %v3516_v62 }
 0x24d   : > { %v3519_v1 = vand.u32 2147483647, %v8167_v63  ;;  %v3522_v2 = vand.u32 2139095040, %v8167_v63  ;;  %v3625_v3 = vand.u32 2139095040, %v8169_v0  ;;  %v3622_v6 = vand.u32 2147483647, %v8169_v0 }
 0x24e   : > { %vm3521_vm14 = vcmp.lt.s32.totalorder %v8167_v63, 0 }
 0x24f   : > { %v3523_v4 = vshrl.u32 %v3522_v2, 23  ;;  %v3526_v5 = vand.u32 8388607, %v3519_v1  ;;  %v3626_v7 = vshrl.u32 %v3625_v3, 23  ;;  %v8179_v12 = vand.u32 8388607, %v3622_v6 }
 0x250   : > { %vm3520_vm15 = vcmp.le.f32.partialorder %v3519_v1, 0.7853982 }
 0x251   : > { %v6695_v8 = vadd.s32 4294967169, %v3523_v4  ;;  %v6699_v9 = vadd.s32 4294967169, %v3626_v7  ;;  %v3527_v11 = vor.u32 8388608, %v3526_v5  ;;  %v3630_v19 = vor.u32 8388608, %v8179_v12 }
 0x253   : > { %v3529_v10 = vadd.s32 1, %v6695_v8  ;;  %v3632_v13 = vadd.s32 1, %v6699_v9  ;;  %v8181_v18 = vshll.u32 %v3527_v11, 8 }
 0x255   : > { %vm3530_vm0 = vcmp.gt.s32.totalorder %v3529_v10, 0  ;;  %vm3633_vm1 = vcmp.gt.s32.totalorder %v3632_v13, 0 }
 0x256   : > { %v3531_v14 = vsel %vm3530_vm0, %v3529_v10, 0  ;;  %v3634_v17 = vsel %vm3633_vm1, %v3632_v13, 0  ;;  %vm3624_vm0 = vcmp.lt.s32.totalorder %v8169_v0, 0  ;;  %vm3623_vm1 = vcmp.le.f32.partialorder %v3622_v6, 0.7853982 }
 0x257   : > { %v3532_v15 = vshrl.u32 %v3531_v14, 5  ;;  %v3533_v16 = vand.u32 31, %v3531_v14  ;;  %v8184_v23 = vshrl.u32 %v3634_v17, 5  ;;  %v3636_v24 = vand.u32 31, %v3634_v17 }
 0x259   : > { %v3534_v20 = vsub.s32 32, %v3533_v16  ;;  %v3536_v22 = vshll.u32 %v7472_v21, %v3533_v16  ;;  %v3539_v26 = vshll.u32 %v7473_v25, %v3533_v16  ;;  %v3542_v28 = vshll.u32 %v7474_v27, %v3533_v16 }
 0x25a   : > { %v3545_v30 = vshll.u32 %v7475_v29, %v3533_v16  ;;  %v3548_v32 = vshll.u32 %v7476_v31, %v3533_v16  ;;  %vm3551_vm2 = vcmp.lt.s32.totalorder %v3532_v15, 1  ;;  %vm3552_vm3 = vcmp.lt.s32.totalorder %v3532_v15, 2 }
 0x25b   : > { %v3537_v33 = vshrl.u32 %v7473_v25, %v3534_v20  ;;  %v3540_v34 = vshrl.u32 %v7474_v27, %v3534_v20  ;;  %v3543_v35 = vshrl.u32 %v7475_v29, %v3534_v20  ;;  %v3535_v38 = vshrl.u32 %v7472_v21, %v3534_v20 }
 0x25c   : > { %v3546_v39 = vshrl.u32 %v7476_v31, %v3534_v20  ;;  %v3549_v46 = vshrl.u32 %v7477_v40, %v3534_v20  ;;  %v3637_v50 = vsub.s32 32, %v3636_v24  ;;  %vm3553_vm4 = vcmp.lt.s32.totalorder %v3532_v15, 3 }
 0x25d   : > { %v3538_v47 = vor.u32 %v3537_v33, %v3536_v22  ;;  %v3541_v48 = vor.u32 %v3540_v34, %v3539_v26  ;;  %v3544_v49 = vor.u32 %v3543_v35, %v3542_v28  ;;  %vm3554_vm5 = vcmp.lt.s32.totalorder %v3532_v15, 4 }
 0x25e   : > { %v3547_v51 = vor.u32 %v3546_v39, %v3545_v30  ;;  %v3550_v52 = vor.u32 %v3549_v46, %v3548_v32  ;;  %v3639_v60 = vshll.u32 %v7472_v21, %v3636_v24  ;;  %v3640_v2 = vshrl.u32 %v7473_v25, %v3637_v50 }
 0x25f   : > { %v3555_v53 = vsel %vm3551_vm2, %v3535_v38, %v3538_v47  ;;  %v3556_v54 = vsel %vm3554_vm5, %v3544_v49, 2102212464  ;;  %v3559_v55 = vsel %vm3551_vm2, %v3538_v47, %v3541_v48  ;;  %v3563_v56 = vsel %vm3551_vm2, %v3541_v48, %v3544_v49 }
 0x260   : > { %v3557_v57 = vsel %vm3553_vm4, %v3541_v48, %v3556_v54  ;;  %v3560_v58 = vsel %vm3554_vm5, %v3547_v51, 920167782  ;;  %v3564_v59 = vsel %vm3554_vm5, %v3550_v52, 1326507024  ;;  %v3642_v3 = vshll.u32 %v7473_v25, %v3636_v24 }
 0x261   : > { %v3561_v61 = vsel %vm3553_vm4, %v3544_v49, %v3560_v58  ;;  %v3565_v62 = vsel %vm3553_vm4, %v3547_v51, %v3564_v59  ;;  %v3558_v4 = vsel %vm3552_vm3, %v3555_v53, %v3557_v57  ;;  %v3643_v8 = vshrl.u32 %v7474_v27, %v3637_v50 }
 0x262   : > { %v3562_v5 = vsel %vm3552_vm3, %v3559_v55, %v3561_v61  ;;  %v3566_v7 = vsel %vm3552_vm3, %v3563_v56, %v3565_v62  ;;  %v3641_v13 = vor.u32 %v3640_v2, %v3639_v60  ;;  %v3645_v16 = vshll.u32 %v7474_v27, %v3636_v24 }
 0x263   : > { %v8193_v9 = vmul.u32.u64.low %v8181_v18, %v3566_v7  ;;  %v8194_v10 = vmul.u32.u64.high %v8181_v18, %v3566_v7, %v8193_v9  ;;  %v8197_v11 = vmul.u32.u64.low %v8181_v18, %v3562_v5  ;;  %v8198_v12 = vmul.u32.u64.high %v8181_v18, %v3562_v5, %v8197_v11 }
 0x264   : > { %v3644_v14 = vor.u32 %v3643_v8, %v3642_v3  ;;  %v3646_v17 = vshrl.u32 %v7475_v29, %v3637_v50  ;;  %v3648_v20 = vshll.u32 %v7475_v29, %v3636_v24  ;;  %v3649_v22 = vshrl.u32 %v7476_v31, %v3637_v50 }
 0x265   : > { %v3652_v25 = vshrl.u32 %v7477_v40, %v3637_v50  ;;  %v3670_v26 = vshll.u32 %v3630_v19, 8  ;;  %v3574_v15 = vmul.u32 %v8181_v18, %v3558_v4  ;;  %v3638_v28 = vshrl.u32 %v7472_v21, %v3637_v50 }
 0x266   : > { %v3647_v30 = vor.u32 %v3646_v17, %v3645_v16  ;;  %v3651_v32 = vshll.u32 %v7476_v31, %v3636_v24  ;;  %vm3576_vm6 = vc.u32 %v8194_v10, %v8197_v11  ;;  %v3577_v33 = vadd.s32 1, %v8198_v12 }
 0x267   : > { %v3650_v34 = vor.u32 %v3649_v22, %v3648_v20  ;;  %vm3654_vm7 = vcmp.lt.s32.totalorder %v8184_v23, 1  ;;  %vm3656_vm8 = vcmp.lt.s32.totalorder %v8184_v23, 3  ;;  %vm3657_vm9 = vcmp.lt.s32.totalorder %v8184_v23, 4 }
 0x268   : > { %v3653_v35 = vor.u32 %v3652_v25, %v3651_v32  ;;  %v3662_v27 = vsel %vm3654_vm7, %v3641_v13, %v3644_v14  ;;  %v3578_v19 = vsel %vm3576_vm6, %v3577_v33, %v8198_v12  ;;  %v3659_v29 = vsel %vm3657_vm9, %v3647_v30, 2102212464 }
 0x269   : > { %v3663_v18 = vsel %vm3657_vm9, %v3650_v34, 920167782  ;;  %v3666_v21 = vsel %vm3654_vm7, %v3644_v14, %v3647_v30  ;;  %v3579_v38 = vadd.s32 %v3578_v19, %v3574_v15  ;;  %vm3655_vm10 = vcmp.lt.s32.totalorder %v8184_v23, 2 }
 0x26a   : > { %v3664_v24 = vsel %vm3656_vm8, %v3647_v30, %v3663_v18  ;;  %v3667_v31 = vsel %vm3657_vm9, %v3653_v35, 1326507024  ;;  %v3658_v39 = vsel %vm3654_vm7, %v3638_v28, %v3641_v13  ;;  %v3660_v40 = vsel %vm3656_vm8, %v3644_v14, %v3659_v29 }
 0x26b   : > { %v3665_v46 = vsel %vm3655_vm10, %v3662_v27, %v3664_v24  ;;  %v3668_v47 = vsel %vm3656_vm8, %v3650_v34, %v3667_v31  ;;  %v3580_v48 = vadd.s32 536870912, %v3579_v38  ;;  %v3661_v55 = vsel %vm3655_vm10, %v3658_v39, %v3660_v40 }
 0x26c   : > { %v3669_v49 = vsel %vm3655_vm10, %v3666_v21, %v3668_v47  ;;  %v8208_v50 = vmul.u32.u64.low %v3670_v26, %v3665_v46  ;;  %v8209_v51 = vmul.u32.u64.high %v3670_v26, %v3665_v46, %v8208_v50  ;;  %v3677_v23 = vmul.u32 %v3670_v26, %v3661_v55 }
 0x26d   : > { %v8211_v52 = vmul.u32.u64.low %v3670_v26, %v3669_v49  ;;  %v8212_v53 = vmul.u32.u64.high %v3670_v26, %v3669_v49, %v8211_v52  ;;  %v3581_v54 = vshrl.u32 %v3580_v48, 30  ;;  %v3575_v13 = vadd.s32 %v8197_v11, %v8194_v10 }
 0x26e   : > { %v3680_v57 = vadd.s32 1, %v8209_v51  ;;  %vm3611_vm7 = vweird.f32 %v8167_v63 }
 0x26f   : > { %v3582_v56 = vshll.u32 %v3581_v54, 30  ;;  %vm3679_vm11 = vc.u32 %v8212_v53, %v8208_v50  ;;  %v3678_v27 = vadd.s32 %v8208_v50, %v8212_v53  ;;  %v3605_v24 = vsub.s32 4, %v3581_v54 }
 0x270   : > { %v3681_v59 = vsel %vm3679_vm11, %v3680_v57, %v8209_v51 }
 0x271   : > { %v3583_v58 = vsub.s32 %v3579_v38, %v3582_v56  ;;  %v3682_v60 = vadd.s32 %v3681_v59, %v3677_v23  ;;  %v3606_v48 = vsel %vm3521_vm14, %v3605_v24, %v3581_v54 }
 0x272   : > { %v3608_v53 = vsel %vm3520_vm15, 0, %v3606_v48 }
 0x273   : > { %v3585_v61 = vsub.s32 0, %v3583_v58  ;;  %v3683_v62 = vadd.s32 536870912, %v3682_v60  ;;  %v3820_v57 = vadd.s32 3, %v3608_v53 }
 0x275   : > { %v6696_v2 = vmin.u32 %v3585_v61, %v3583_v58  ;;  %v3684_v3 = vshrl.u32 %v3683_v62, 30  ;;  %v3821_v62 = vand.u32 3, %v3820_v57  ;;  %v1246_v57 = vld [vmem:[%s8050_s27 + $0x2b0] sm:$0xff] }
 0x277   : > { %v3587_v4 = vclz %v6696_v2  ;;  %v3685_v5 = vshll.u32 %v3684_v3, 30  ;;  %v3708_v52 = vsub.s32 4, %v3684_v3  ;;  %vm3823_vm4 = vcmp.eq.s32.totalorder %v3821_v62, 0 }
 0x278   : > { %vm3826_vm5 = vcmp.eq.s32.totalorder %v3821_v62, 2  ;;  %vm3822_vm8 = vcmp.lt.s32.totalorder %v3821_v62, 2 }
 0x279   : > { %v6697_v7 = vadd.s32 4294967294, %v3587_v4  ;;  %v3686_v8 = vsub.s32 %v3682_v60, %v3685_v5  ;;  %v3709_v1 = vsel %vm3624_vm0, %v3708_v52, %v3684_v3 }
 0x27a   : > { %v3711_v59 = vsel %vm3623_vm1, 0, %v3709_v1  ;;  %v1244_v1 = vld [vmem:[%s8050_s27 + $0x2a0] sm:$0xff] }
 0x27b   : > { %vm6698_vm12 = vcmp.lt.s32.totalorder %v6697_v7, 0  ;;  %v3688_v12 = vsub.s32 0, %v3686_v8  ;;  %v3924_v4 = vadd.s32 3, %v3711_v59  ;;  %v1460_v62 = vunpack.c.h.s8.bf16 %v1244_v1 }
 0x27c   : > { %v3590_v9 = vsel %vm6698_vm12, 0, %v6697_v7 }
 0x27d   : > { %v3591_v14 = vsub.s32 32, %v3590_v9  ;;  %v3595_v16 = vsub.s32 4294967266, %v3590_v9  ;;  %v6700_v17 = vmin.u32 %v3688_v12, %v3686_v8  ;;  %v3592_v20 = vshll.u32 %v3583_v58, %v3590_v9 }
 0x27e   : > { %v3612_v58 = vand.u32 3, %v3608_v53  ;;  %v3925_v9 = vand.u32 3, %v3924_v4  ;;  %v3715_v12 = vand.u32 3, %v3711_v59 }
 0x27f   : > { %v3593_v22 = vshrl.u32 %v3575_v13, %v3591_v14  ;;  %v3596_v25 = vadd.s32 127, %v3595_v16  ;;  %v3690_v26 = vclz %v6700_v17 }
 0x280   : > { %vm3617_vm2 = vcmp.eq.s32.totalorder %v3612_v58, 2  ;;  %vm3614_vm3 = vcmp.eq.s32.totalorder %v3612_v58, 0  ;;  %vm3613_vm6 = vcmp.lt.s32.totalorder %v3612_v58, 2  ;;  %vm3930_vm9 = vcmp.eq.s32.totalorder %v3925_v9, 2 }
 0x281   : > { %v3594_v15 = vor.u32 %v3593_v22, %v3592_v20  ;;  %v3597_v28 = vshll.u32 %v3596_v25, 23  ;;  %v6701_v30 = vadd.s32 4294967294, %v3690_v26  ;;  %vm3717_vm10 = vcmp.eq.s32.totalorder %v3715_v12, 0 }
 0x282   : > { %vm3720_vm11 = vcmp.eq.s32.totalorder %v3715_v12, 2  ;;  %vm3927_vm12 = vcmp.eq.s32.totalorder %v3925_v9, 0  ;;  %v1454_v58 = vunpack.c.l.s8.bf16 %v1246_v57 }
 0x283   : > { %v3598_v32 = vor.u32 4788187, %v3597_v28  ;;  %vm6702_vm13 = vcmp.lt.s32.totalorder %v6701_v30, 0  ;;  %v3601_v34 = vcvt.s32.f32 %v3594_v15 }
 0x284   : > { %v3693_v35 = vsel %vm6702_vm13, 0, %v6701_v30  ;;  %vm3926_vm13 = vcmp.lt.s32.totalorder %v3925_v9, 2  ;;  %v1228_v30 = vld [vmem:[%s8050_s27 + $0x220] sm:$0xff] }
 0x285   : > { %v3599_v33 = vand.u32 2147483647, %v3598_v32  ;;  %v3694_v19 = vsub.s32 32, %v3693_v35  ;;  %v3698_v29 = vsub.s32 4294967266, %v3693_v35  ;;  %v3695_v11 = vshll.u32 %v3686_v8, %v3693_v35  ;;  %v1230_v32 = vld [vmem:[%s8050_s27 + $0x230] sm:$0xff] }
 0x286   : > { %v1428_v24 = vunpack.c.h.s8.bf16 %v1228_v30 }
 0x287   : > { %v3602_v10 = vmul.f32 %v3601_v34, %v3599_v33  ;;  %v3696_v18 = vshrl.u32 %v3678_v27, %v3694_v19  ;;  %v3699_v21 = vadd.s32 127, %v3698_v29 }
 0x289   : > { %v3603_v38 = vxor.u32 2147483648, %v3602_v10  ;;  %v3697_v31 = vor.u32 %v3696_v18, %v3695_v11  ;;  %v3700_v39 = vshll.u32 %v3699_v21, 23  ;;  %v1422_v11 = vunpack.c.l.s8.bf16 %v1230_v32 }
 0x28a   : > { %v1429_v18 = vunpack.c.h.s8.bf16 %v8136_v36  ;;  %v1431_v21 = vunpack.c.h.s8.bf16 %v8139_v37  ;;  %v1238_v36 = vld [vmem:[%s8050_s27 + $0x270] sm:$0xff] }
 0x28b   : > { %v3604_v40 = vsel %vm3521_vm14, %v3603_v38, %v3602_v10  ;;  %v3701_v47 = vor.u32 4788187, %v3700_v39  ;;  %v3704_v50 = vcvt.s32.f32 %v3697_v31  ;;  %vm3716_vm14 = vcmp.lt.s32.totalorder %v3715_v12, 2  ;;  %v1237_v38 = vld [vmem:[%s8050_s27 + $0x268] sm:$0xff] }
 0x28c   : > { %v3607_v46 = vsel %vm3520_vm15, %v8167_v63, %v3604_v40  ;;  %vm3714_vm15 = vweird.f32 %v8169_v0  ;;  %v1420_v10 = vunpack.c.l.s8.bf16 %v1228_v30  ;;  %v1430_v31 = vunpack.c.h.s8.bf16 %v1230_v32 }
 0x28d   : > { %6968 = vcosq.f32 %v3607_v46  ;;  %v3702_v49 = vand.u32 2147483647, %v3701_v47  ;;  %v1437_v39 = vunpack.c.l.s8.bf16 %v1237_v38  ;;  %v1438_v47 = vunpack.c.l.s8.bf16 %v1238_v36 }
 0x28e   : > { %6970 = vsinq.f32 %v3607_v46  ;;  %v1236_v46 = vld [vmem:[%s8050_s27 + $0x260] sm:$0xff]  ;;  %v1445_v48 = vunpack.c.h.s8.bf16 %v1237_v38  ;;  %v1446_v53 = vunpack.c.h.s8.bf16 %v1238_v36 }
 0x28f   : > { %v3705_v51 = vmul.f32 %v3704_v50, %v3702_v49  ;;  %v1436_v37 = vunpack.c.l.s8.bf16 %v1236_v46  ;;  %v1245_v50 = vld [vmem:[%s8050_s27 + $0x2a8] sm:$0xff]  ;;  %v1444_v52 = vunpack.c.h.s8.bf16 %v1236_v46 }
 0x291   : > { %v3706_v55 = vxor.u32 2147483648, %v3705_v51 }
 0x293   : > { %v3707_v56 = vsel %vm3624_vm0, %v3706_v55, %v3705_v51  ;;  %v1247_v51 = vld [vmem:[%s8050_s27 + $0x2b8] sm:$0xff]  ;;  %v1453_v55 = vunpack.c.l.s8.bf16 %v1245_v50 }
 0x294   : > { %v3710_v23 = vsel %vm3623_vm1, %v8169_v0, %v3707_v56  ;;  %v1239_v0 = vld [vmem:[%s8050_s27 + $0x278] sm:$0xff]  ;;  %v1455_v56 = vunpack.c.l.s8.bf16 %v1247_v51  ;;  %v1463_v59 = vunpack.c.h.s8.bf16 %v1247_v51 }
 0x295   : > { %6972 = vcosq.f32 %v3710_v23  ;;  %v1439_v40 = vunpack.c.l.s8.bf16 %v1239_v0  ;;  %v1447_v49 = vunpack.c.h.s8.bf16 %v1239_v0 }
 0x296   : > { %6974 = vsinq.f32 %v3710_v23  ;;  %v1452_v23 = vunpack.c.l.s8.bf16 %v1244_v1 }
 0x297   : > { %v6969_v54 = vpop.eup %6968 }
 0x298   : > { %v6971_v60 = vpop.eup %6970  ;;  %v3618_v61 = vxor.u32 2147483648, %v6969_v54 }
 0x299   : > { %v3615_v2 = vxor.u32 2147483648, %v6971_v60 }
 0x29a   : > { %v3619_v5 = vsel %vm3617_vm2, %v3618_v61, %v6971_v60  ;;  %v3828_v3 = vsel %vm3826_vm5, %v3618_v61, %v6971_v60  ;;  %v1253_v60 = vld [vmem:[%s8050_s27 + $0x2e8] sm:$0xff]  ;;  %v1255_v61 = vld [vmem:[%s8050_s27 + $0x2f8] sm:$0xff] }
 0x29b   : > { %v3616_v7 = vsel %vm3614_vm3, %v6969_v54, %v3615_v2  ;;  %v3825_v6 = vsel %vm3823_vm4, %v6969_v54, %v3615_v2  ;;  %v1461_v54 = vunpack.c.h.s8.bf16 %v1245_v50  ;;  %v1462_v2 = vunpack.c.h.s8.bf16 %v1246_v57 }
 0x29c   : > { %v3620_v8 = vsel %vm3613_vm6, %v3616_v7, %v3619_v5  ;;  %v3829_v16 = vsel %vm3822_vm8, %v3825_v6, %v3828_v3  ;;  %v1469_v4 = vunpack.c.l.s8.bf16 %v1253_v60  ;;  %v1471_v5 = vunpack.c.l.s8.bf16 %v1255_v61  ;;  %v1252_v7 = vld [vmem:[%s8050_s27 + $0x2e0] sm:$0xff]  ;;  %v1254_v6 = vld [vmem:[%s8050_s27 + $0x2f0] sm:$0xff] }
 0x29d   : > { %v8230_v13 = vsel %vm3611_vm7, nan, %v3620_v8  ;;  %v3830_v26 = vsel %vm3611_vm7, nan, %v3829_v16  ;;  %v1468_v3 = vunpack.c.l.s8.bf16 %v1252_v7  ;;  %v1470_v8 = vunpack.c.l.s8.bf16 %v1254_v6  ;;  %v1263_v16 = vld [vmem:[%s8050_s27 + $0x338] sm:$0xff] }
 0x29e   : > { %v8237_v19 = vpack.c.bf16 %v3830_v26, %v3830_v26  ;;  %v1477_v9 = vunpack.c.h.s8.bf16 %v1253_v60  ;;  %v1479_v12 = vunpack.c.h.s8.bf16 %v1255_v61  ;;  %v1260_v26 = vld [vmem:[%s8050_s27 + $0x320] sm:$0xff] }
 0x29f   : > { %v6973_v14 = vpop.eup %6972 }
 0x2a0   : > { %v6975_v17 = vpop.eup %6974  ;;  %v3721_v20 = vxor.u32 2147483648, %v6973_v14 }
 0x2a1   : > { %v3718_v22 = vxor.u32 2147483648, %v6975_v17 }
 0x2a2   : > { %v3932_v25 = vsel %vm3930_vm9, %v3721_v20, %v6975_v17  ;;  %v3722_v15 = vsel %vm3720_vm11, %v3721_v20, %v6975_v17  ;;  %v1476_v17 = vunpack.c.h.s8.bf16 %v1252_v7  ;;  %v1478_v20 = vunpack.c.h.s8.bf16 %v1254_v6 }
 0x2a3   : > { %v3929_v28 = vsel %vm3927_vm12, %v6973_v14, %v3718_v22  ;;  %v3719_v33 = vsel %vm3717_vm10, %v6973_v14, %v3718_v22  ;;  %v1261_v14 = vld [vmem:[%s8050_s27 + $0x328] sm:$0xff] }
 0x2a4   : > { %v3933_v34 = vsel %vm3926_vm13, %v3929_v28, %v3932_v25  ;;  %v3723_v35 = vsel %vm3716_vm14, %v3719_v33, %v3722_v15  ;;  %v1485_v22 = vunpack.c.l.s8.bf16 %v1261_v14  ;;  %v1487_v25 = vunpack.c.l.s8.bf16 %v1263_v16  ;;  %v1262_v15 = vld [vmem:[%s8050_s27 + $0x330] sm:$0xff] }
 0x2a5   : > { %v3934_v27 = vsel %vm3714_vm15, nan, %v3933_v34  ;;  %v8239_v29 = vsel %vm3714_vm15, nan, %v3723_v35  ;;  %v1484_v28 = vunpack.c.l.s8.bf16 %v1260_v26  ;;  %v1486_v30 = vunpack.c.l.s8.bf16 %v1262_v15  ;;  %v1269_v34 = vld [vmem:[%s8050_s27 + $0x368] sm:$0xff]  ;;  %v1271_v35 = vld [vmem:[%s8050_s27 + $0x378] sm:$0xff] }
 0x2a6   : > { %v3936_v63 = vpack.c.bf16 %v3934_v27, %v3934_v27  ;;  %v1493_v32 = vunpack.c.h.s8.bf16 %v1261_v14  ;;  %v1495_v33 = vunpack.c.h.s8.bf16 %v1263_v16  ;;  %v1492_v27 = vunpack.c.h.s8.bf16 %v1260_v26  ;;  %v1171_v26 = vld [vmem:[%s8050_s27 + $0x58] sm:$0xff] }
 0x2a8   : > { %3969 = vmatprep.mubr.bf16.mxu0 %v3936_v63  ;;  %4010 = vmatprep.mubr.bf16.mxu1 %v3936_v63 }
 0x2a9   : > { %3970 = vmatmul.mubr.bf16.vlgmr.msra.gmra.mrb[0].mxu0 %v8237_v19  ;;  %4011 = vmatmul.mubr.bf16.vlgmr.msra.gmra.mrb[0].mxu1 %v8237_v19 }
 0x2aa   : > { %4020 = vmatpush1.bf16.msra.mxu0 %v1420_v10  ;;  %4061 = vmatpush1.bf16.msra.mxu1 %v1422_v11  ;;  %v1501_v10 = vunpack.c.l.s8.bf16 %v1269_v34  ;;  %v1503_v11 = vunpack.c.l.s8.bf16 %v1271_v35 }
 0x2ab   : > { %4051 = vmatprep.mubr.bf16.mxu0 %v3936_v63  ;;  %4092 = vmatprep.mubr.bf16.mxu1 %v3936_v63  ;;  %v1494_v63 = vunpack.c.h.s8.bf16 %v1262_v15 }
 0x2ac   : > { %4021 = vmatprep.subr.bf16.mxu0 %v1429_v18  ;;  %4062 = vmatprep.subr.bf16.mxu1 %v1431_v21  ;;  %v1268_v18 = vld [vmem:[%s8050_s27 + $0x360] sm:$0xff]  ;;  %v1270_v21 = vld [vmem:[%s8050_s27 + $0x370] sm:$0xff] }
 0x2ad   : > { %v1500_v38 = vunpack.c.l.s8.bf16 %v1268_v18  ;;  %v1502_v0 = vunpack.c.l.s8.bf16 %v1270_v21  ;;  %v1508_v46 = vunpack.c.h.s8.bf16 %v1268_v18  ;;  %v1510_v36 = vunpack.c.h.s8.bf16 %v1270_v21 }
 0x2ae   : > { %4022 = vmatpush1.bf16.msra.mxu0 %v1428_v24  ;;  %4063 = vmatpush1.bf16.msra.mxu1 %v1430_v31  ;;  %v1509_v24 = vunpack.c.h.s8.bf16 %v1269_v34  ;;  %v1511_v31 = vunpack.c.h.s8.bf16 %v1271_v35 }
 0x2af   : > { %4023 = vmatprep.subr.bf16.mxu0 %v1437_v39  ;;  %4064 = vmatprep.subr.bf16.mxu1 %v1439_v40  ;;  %v1277_v39 = vld [vmem:[%s8050_s27 + $0x3a8] sm:$0xff]  ;;  %v1279_v40 = vld [vmem:[%s8050_s27 + $0x3b8] sm:$0xff] }
 0x2b2   : > { %4024 = vmatpush1.bf16.msra.mxu0 %v1436_v37  ;;  %4065 = vmatpush1.bf16.msra.mxu1 %v1438_v47  ;;  %v1517_v37 = vunpack.c.l.s8.bf16 %v1277_v39  ;;  %v1519_v47 = vunpack.c.l.s8.bf16 %v1279_v40 }
 0x2b3   : > { %4025 = vmatprep.subr.bf16.mxu0 %v1445_v48  ;;  %4066 = vmatprep.subr.bf16.mxu1 %v1447_v49  ;;  %v1276_v48 = vld [vmem:[%s8050_s27 + $0x3a0] sm:$0xff]  ;;  %v1278_v49 = vld [vmem:[%s8050_s27 + $0x3b0] sm:$0xff] }
 0x2b4   : > { %v1516_v50 = vunpack.c.l.s8.bf16 %v1276_v48  ;;  %v1518_v51 = vunpack.c.l.s8.bf16 %v1278_v49  ;;  %v1524_v1 = vunpack.c.h.s8.bf16 %v1276_v48  ;;  %v1526_v57 = vunpack.c.h.s8.bf16 %v1278_v49 }
 0x2b6   : > { %4026 = vmatpush1.bf16.msra.mxu0 %v1444_v52  ;;  %4067 = vmatpush1.bf16.msra.mxu1 %v1446_v53  ;;  %v1525_v52 = vunpack.c.h.s8.bf16 %v1277_v39  ;;  %v1527_v53 = vunpack.c.h.s8.bf16 %v1279_v40 }
 0x2b7   : > { %4027 = vmatprep.subr.bf16.mxu0 %v1453_v55  ;;  %4068 = vmatprep.subr.bf16.mxu1 %v1455_v56  ;;  %v1285_v55 = vld [vmem:[%s8050_s27 + $0x3e8] sm:$0xff]  ;;  %v1287_v56 = vld [vmem:[%s8050_s27 + $0x3f8] sm:$0xff] }
 0x2ba   : > { %4028 = vmatpush1.bf16.msra.mxu0 %v1452_v23  ;;  %4069 = vmatpush1.bf16.msra.mxu1 %v1454_v58  ;;  %v1533_v23 = vunpack.c.l.s8.bf16 %v1285_v55  ;;  %v1535_v58 = vunpack.c.l.s8.bf16 %v1287_v56 }
 0x2bb   : > { %4029 = vmatprep.subr.bf16.mxu0 %v1461_v54  ;;  %4070 = vmatprep.subr.bf16.mxu1 %v1463_v59  ;;  %v1284_v54 = vld [vmem:[%s8050_s27 + $0x3e0] sm:$0xff]  ;;  %v1286_v59 = vld [vmem:[%s8050_s27 + $0x3f0] sm:$0xff] }
 0x2bc   : > { %v1532_v60 = vunpack.c.l.s8.bf16 %v1284_v54  ;;  %v1534_v61 = vunpack.c.l.s8.bf16 %v1286_v59  ;;  %v1540_v7 = vunpack.c.h.s8.bf16 %v1284_v54  ;;  %v1542_v6 = vunpack.c.h.s8.bf16 %v1286_v59 }
 0x2be   : > { %4030 = vmatpush1.bf16.msra.mxu0 %v1460_v62  ;;  %4071 = vmatpush1.bf16.msra.mxu1 %v1462_v2  ;;  %v1541_v62 = vunpack.c.h.s8.bf16 %v1285_v55  ;;  %v1543_v2 = vunpack.c.h.s8.bf16 %v1287_v56 }
 0x2bf   : > { %4031 = vmatprep.subr.bf16.mxu0 %v1469_v4  ;;  %4072 = vmatprep.subr.bf16.mxu1 %v1471_v5  ;;  %v1161_v4 = vld [vmem:[%s8050_s27 + $0x8] sm:$0xff]  ;;  %v1163_v5 = vld [vmem:[%s8050_s27 + $0x18] sm:$0xff] }
 0x2c2   : > { %4032 = vmatpush1.bf16.msra.mxu0 %v1468_v3  ;;  %4073 = vmatpush1.bf16.msra.mxu1 %v1470_v8  ;;  %v1289_v3 = vunpack.c.l.s8.bf16 %v1161_v4  ;;  %v1291_v8 = vunpack.c.l.s8.bf16 %v1163_v5 }
 0x2c3   : > { %4033 = vmatprep.subr.bf16.mxu0 %v1477_v9  ;;  %4074 = vmatprep.subr.bf16.mxu1 %v1479_v12  ;;  %v1160_v9 = vld [vmem:[%s8050_s27] sm:$0xff]  ;;  %v1162_v12 = vld [vmem:[%s8050_s27 + $0x10] sm:$0xff] }
 0x2c4   : > { %v1288_v14 = vunpack.c.l.s8.bf16 %v1160_v9  ;;  %v1290_v16 = vunpack.c.l.s8.bf16 %v1162_v12  ;;  %v1296_v15 = vunpack.c.h.s8.bf16 %v1160_v9 }
 0x2c6   : > { %4034 = vmatpush1.bf16.msra.mxu0 %v1476_v17  ;;  %4075 = vmatpush1.bf16.msra.mxu1 %v1478_v20  ;;  %v8279_v17 = vpack.c.bf16 %v8239_v29, %v8239_v29  ;;  %v1297_v20 = vunpack.c.h.s8.bf16 %v1161_v4 }
 0x2c7   : > { %4035 = vmatprep.subr.bf16.mxu0 %v1485_v22  ;;  %4076 = vmatprep.subr.bf16.mxu1 %v1487_v25  ;;  %v1299_v22 = vunpack.c.h.s8.bf16 %v1163_v5  ;;  %v1169_v25 = vld [vmem:[%s8050_s27 + $0x48] sm:$0xff] }
 0x2c8   : > { %v1305_v29 = vunpack.c.l.s8.bf16 %v1169_v25  ;;  %v1313_v35 = vunpack.c.h.s8.bf16 %v1169_v25 }
 0x2ca   : > { %4036 = vmatpush1.bf16.msra.mxu0 %v1484_v28  ;;  %4077 = vmatpush1.bf16.msra.mxu1 %v1486_v30  ;;  %v1298_v28 = vunpack.c.h.s8.bf16 %v1162_v12  ;;  %v1168_v30 = vld [vmem:[%s8050_s27 + $0x40] sm:$0xff] }
 0x2cb   : > { %4037 = vmatprep.subr.bf16.mxu0 %v1493_v32  ;;  %4078 = vmatprep.subr.bf16.mxu1 %v1495_v33  ;;  %v1307_v32 = vunpack.c.l.s8.bf16 %v1171_v26  ;;  %v1170_v33 = vld [vmem:[%s8050_s27 + $0x50] sm:$0xff] }
 0x2cc   : > { %v1306_v34 = vunpack.c.l.s8.bf16 %v1170_v33  ;;  %v1314_v18 = vunpack.c.h.s8.bf16 %v1170_v33 }
 0x2ce   : > { %4038 = vmatpush1.bf16.msra.mxu0 %v1492_v27  ;;  %4079 = vmatpush1.bf16.msra.mxu1 %v1494_v63  ;;  %v1315_v27 = vunpack.c.h.s8.bf16 %v1171_v26  ;;  %v1177_v63 = vld [vmem:[%s8050_s27 + $0x88] sm:$0xff] }
 0x2cf   : > { %4039 = vmatprep.subr.bf16.mxu0 %v1501_v10  ;;  %4080 = vmatprep.subr.bf16.mxu1 %v1503_v11  ;;  %v1179_v10 = vld [vmem:[%s8050_s27 + $0x98] sm:$0xff]  ;;  %v1312_v11 = vunpack.c.h.s8.bf16 %v1168_v30  ;;  %v1321_v21 = vunpack.c.l.s8.bf16 %v1177_v63  ;;  %v1329_v40 = vunpack.c.h.s8.bf16 %v1177_v63 }
 0x2d2   : > { %4040 = vmatpush1.bf16.msra.mxu0 %v1500_v38  ;;  %4081 = vmatpush1.bf16.msra.mxu1 %v1502_v0  ;;  %v1176_v38 = vld [vmem:[%s8050_s27 + $0x80] sm:$0xff]  ;;  %v1323_v0 = vunpack.c.l.s8.bf16 %v1179_v10 }
 0x2d3   : > { %4041 = vmatprep.subr.bf16.mxu0 %v1509_v24  ;;  %4082 = vmatprep.subr.bf16.mxu1 %v1511_v31  ;;  %v1178_v24 = vld [vmem:[%s8050_s27 + $0x90] sm:$0xff]  ;;  %v1320_v31 = vunpack.c.l.s8.bf16 %v1176_v38 }
 0x2d4   : > { %v1322_v39 = vunpack.c.l.s8.bf16 %v1178_v24  ;;  %v1330_v48 = vunpack.c.h.s8.bf16 %v1178_v24 }
 0x2d6   : > { %4042 = vmatpush1.bf16.msra.mxu0 %v1508_v46  ;;  %4083 = vmatpush1.bf16.msra.mxu1 %v1510_v36  ;;  %v1331_v46 = vunpack.c.h.s8.bf16 %v1179_v10  ;;  %v1185_v36 = vld [vmem:[%s8050_s27 + $0xc8] sm:$0xff] }
 0x2d7   : > { %4043 = vmatprep.subr.bf16.mxu0 %v1517_v37  ;;  %4084 = vmatprep.subr.bf16.mxu1 %v1519_v47  ;;  %v1187_v37 = vld [vmem:[%s8050_s27 + $0xd8] sm:$0xff]  ;;  %v1328_v47 = vunpack.c.h.s8.bf16 %v1176_v38  ;;  %v1337_v49 = vunpack.c.l.s8.bf16 %v1185_v36  ;;  %v1345_v56 = vunpack.c.h.s8.bf16 %v1185_v36 }
 0x2da   : > { %4044 = vmatpush1.bf16.msra.mxu0 %v1516_v50  ;;  %4085 = vmatpush1.bf16.msra.mxu1 %v1518_v51  ;;  %v1184_v50 = vld [vmem:[%s8050_s27 + $0xc0] sm:$0xff]  ;;  %v1339_v51 = vunpack.c.l.s8.bf16 %v1187_v37 }
 0x2db   : > { %4045 = vmatprep.subr.bf16.mxu0 %v1525_v52  ;;  %4086 = vmatprep.subr.bf16.mxu1 %v1527_v53  ;;  %v1186_v52 = vld [vmem:[%s8050_s27 + $0xd0] sm:$0xff]  ;;  %v1336_v53 = vunpack.c.l.s8.bf16 %v1184_v50 }
 0x2dc   : > { %v1338_v55 = vunpack.c.l.s8.bf16 %v1186_v52  ;;  %v1346_v54 = vunpack.c.h.s8.bf16 %v1186_v52 }
 0x2de   : > { %4046 = vmatpush1.bf16.msra.mxu0 %v1524_v1  ;;  %4087 = vmatpush1.bf16.msra.mxu1 %v1526_v57  ;;  %v1347_v1 = vunpack.c.h.s8.bf16 %v1187_v37  ;;  %v1193_v57 = vld [vmem:[%s8050_s27 + $0x108] sm:$0xff] }
 0x2df   : > { %4047 = vmatprep.subr.bf16.mxu0 %v1533_v23  ;;  %4088 = vmatprep.subr.bf16.mxu1 %v1535_v58  ;;  %v1195_v23 = vld [vmem:[%s8050_s27 + $0x118] sm:$0xff]  ;;  %v1344_v58 = vunpack.c.h.s8.bf16 %v1184_v50  ;;  %v1353_v59 = vunpack.c.l.s8.bf16 %v1193_v57  ;;  %v1361_v5 = vunpack.c.h.s8.bf16 %v1193_v57  ;;  %v8319_v57 = vpack.c.bf16 %v8230_v13, %v8230_v13 }
 0x2e2   : > { %4048 = vmatpush1.bf16.msra.mxu0 %v1532_v60  ;;  %4089 = vmatpush1.bf16.msra.mxu1 %v1534_v61  ;;  %v1192_v60 = vld [vmem:[%s8050_s27 + $0x100] sm:$0xff]  ;;  %v1355_v61 = vunpack.c.l.s8.bf16 %v1195_v23 }
 0x2e3   : > { %4049 = vmatprep.subr.bf16.mxu0 %v1541_v62  ;;  %4090 = vmatprep.subr.bf16.mxu1 %v1543_v2  ;;  %v1194_v62 = vld [vmem:[%s8050_s27 + $0x110] sm:$0xff]  ;;  %v1352_v2 = vunpack.c.l.s8.bf16 %v1192_v60 }
 0x2e4   : > { %v1354_v4 = vunpack.c.l.s8.bf16 %v1194_v62  ;;  %v1362_v9 = vunpack.c.h.s8.bf16 %v1194_v62 }
 0x2e6   : > { %4050 = vmatpush1.bf16.msra.mxu0 %v1540_v7  ;;  %4091 = vmatpush1.bf16.msra.mxu1 %v1542_v6  ;;  %v1363_v7 = vunpack.c.h.s8.bf16 %v1195_v23  ;;  %v1201_v6 = vld [vmem:[%s8050_s27 + $0x148] sm:$0xff] }
 0x2e7   : > { %4101 = vmatprep.subr.bf16.mxu0 %v1289_v3  ;;  %4142 = vmatprep.subr.bf16.mxu1 %v1291_v8  ;;  %v1203_v3 = vld [vmem:[%s8050_s27 + $0x158] sm:$0xff]  ;;  %v1360_v8 = vunpack.c.h.s8.bf16 %v1192_v60  ;;  %v1369_v12 = vunpack.c.l.s8.bf16 %v1201_v6  ;;  %v1377_v26 = vunpack.c.h.s8.bf16 %v1201_v6 }
 0x2e8   : > { %v1175_v60 = vld [vmem:[%s8050_s27 + $0x78] sm:$0xff] }
 0x2e9   : > { %4052 = vmatmul.mubr.bf16.vlgmr.msra.gmra.mrb[4].mxu0 %v8237_v19  ;;  %4093 = vmatmul.mubr.bf16.vlgmr.msra.gmra.mrb[4].mxu1 %v8237_v19  ;;  %v1304_v19 = vunpack.c.l.s8.bf16 %v1168_v30 }
 0x2ea   : > { %4102 = vmatpush1.bf16.msra.mxu0 %v1288_v14  ;;  %4133 = vmatprep.mubr.bf16.mxu0 %v8279_v17  ;;  %v1200_v14 = vld [vmem:[%s8050_s27 + $0x140] sm:$0xff] }
 0x2eb   : > { %4143 = vmatpush1.bf16.msra.mxu1 %v1290_v16  ;;  %4174 = vmatprep.mubr.bf16.mxu1 %v8279_v17  ;;  %v1371_v16 = vunpack.c.l.s8.bf16 %v1203_v3  ;;  %v1376_v30 = vunpack.c.h.s8.bf16 %v1200_v14 }
 0x2ec   : > { %4103 = vmatprep.subr.bf16.mxu0 %v1297_v20  ;;  %4144 = vmatprep.subr.bf16.mxu1 %v1299_v22  ;;  %v1202_v20 = vld [vmem:[%s8050_s27 + $0x150] sm:$0xff]  ;;  %v1368_v22 = vunpack.c.l.s8.bf16 %v1200_v14 }
 0x2ed   : > { %v1370_v25 = vunpack.c.l.s8.bf16 %v1202_v20 }
 0x2ee   : > { %4104 = vmatpush1.bf16.msra.mxu0 %v1296_v15  ;;  %v1379_v15 = vunpack.c.h.s8.bf16 %v1203_v3 }
 0x2ef   : > { %4145 = vmatpush1.bf16.msra.mxu1 %v1298_v28  ;;  %4105 = vmatprep.subr.bf16.mxu0 %v1305_v29  ;;  %v1209_v28 = vld [vmem:[%s8050_s27 + $0x188] sm:$0xff]  ;;  %v1211_v29 = vld [vmem:[%s8050_s27 + $0x198] sm:$0xff] }
 0x2f0   : > { %4146 = vmatprep.subr.bf16.mxu1 %v1307_v32  ;;  %v1378_v32 = vunpack.c.h.s8.bf16 %v1202_v20  ;;  %v1385_v33 = vunpack.c.l.s8.bf16 %v1209_v28  ;;  %v1393_v10 = vunpack.c.h.s8.bf16 %v1209_v28  ;;  %v1180_v20 = vld [vmem:[%s8050_s27 + $0xa0] sm:$0xff] }
 0x2f2   : > { %4106 = vmatpush1.bf16.msra.mxu0 %v1304_v19  ;;  %v1208_v19 = vld [vmem:[%s8050_s27 + $0x180] sm:$0xff] }
 0x2f3   : > { %4147 = vmatpush1.bf16.msra.mxu1 %v1306_v34  ;;  %4107 = vmatprep.subr.bf16.mxu0 %v1313_v35  ;;  %v1387_v34 = vunpack.c.l.s8.bf16 %v1211_v29  ;;  %v1210_v35 = vld [vmem:[%s8050_s27 + $0x190] sm:$0xff]  ;;  %v1392_v38 = vunpack.c.h.s8.bf16 %v1208_v19 }
 0x2f4   : > { %4148 = vmatprep.subr.bf16.mxu1 %v1315_v27  ;;  %v1384_v27 = vunpack.c.l.s8.bf16 %v1208_v19  ;;  %v1386_v63 = vunpack.c.l.s8.bf16 %v1210_v35 }
 0x2f6   : > { %4108 = vmatpush1.bf16.msra.mxu0 %v1312_v11  ;;  %v1395_v11 = vunpack.c.h.s8.bf16 %v1211_v29 }
 0x2f7   : > { %4149 = vmatpush1.bf16.msra.mxu1 %v1314_v18  ;;  %4109 = vmatprep.subr.bf16.mxu0 %v1321_v21  ;;  %v1217_v18 = vld [vmem:[%s8050_s27 + $0x1c8] sm:$0xff]  ;;  %v1219_v21 = vld [vmem:[%s8050_s27 + $0x1d8] sm:$0xff] }
 0x2f8   : > { %4150 = vmatprep.subr.bf16.mxu1 %v1323_v0  ;;  %v1394_v0 = vunpack.c.h.s8.bf16 %v1210_v35  ;;  %v1401_v24 = vunpack.c.l.s8.bf16 %v1217_v18  ;;  %v1409_v37 = vunpack.c.h.s8.bf16 %v1217_v18  ;;  %v1188_v35 = vld [vmem:[%s8050_s27 + $0xe0] sm:$0xff] }
 0x2fa   : > { %4110 = vmatpush1.bf16.msra.mxu0 %v1320_v31  ;;  %v1216_v31 = vld [vmem:[%s8050_s27 + $0x1c0] sm:$0xff] }
 0x2fb   : > { %4151 = vmatpush1.bf16.msra.mxu1 %v1322_v39  ;;  %4111 = vmatprep.subr.bf16.mxu0 %v1329_v40  ;;  %v1403_v39 = vunpack.c.l.s8.bf16 %v1219_v21  ;;  %v1218_v40 = vld [vmem:[%s8050_s27 + $0x1d0] sm:$0xff]  ;;  %v1408_v50 = vunpack.c.h.s8.bf16 %v1216_v31 }
 0x2fc   : > { %4152 = vmatprep.subr.bf16.mxu1 %v1331_v46  ;;  %v1400_v46 = vunpack.c.l.s8.bf16 %v1216_v31  ;;  %v1402_v36 = vunpack.c.l.s8.bf16 %v1218_v40 }
 0x2fe   : > { %4112 = vmatpush1.bf16.msra.mxu0 %v1328_v47  ;;  %v1411_v47 = vunpack.c.h.s8.bf16 %v1219_v21 }
 0x2ff   : > { %4153 = vmatpush1.bf16.msra.mxu1 %v1330_v48  ;;  %4113 = vmatprep.subr.bf16.mxu0 %v1337_v49  ;;  %v1165_v48 = vld [vmem:[%s8050_s27 + $0x28] sm:$0xff]  ;;  %v1167_v49 = vld [vmem:[%s8050_s27 + $0x38] sm:$0xff] }
 0x300   : > { %4154 = vmatprep.subr.bf16.mxu1 %v1339_v51  ;;  %v1410_v51 = vunpack.c.h.s8.bf16 %v1218_v40  ;;  %v1293_v52 = vunpack.c.l.s8.bf16 %v1165_v48  ;;  %v1196_v40 = vld [vmem:[%s8050_s27 + $0x120] sm:$0xff] }
 0x302   : > { %4114 = vmatpush1.bf16.msra.mxu0 %v1336_v53  ;;  %v1164_v53 = vld [vmem:[%s8050_s27 + $0x20] sm:$0xff] }
 0x303   : > { %4155 = vmatpush1.bf16.msra.mxu1 %v1338_v55  ;;  %4115 = vmatprep.subr.bf16.mxu0 %v1345_v56  ;;  %v1295_v55 = vunpack.c.l.s8.bf16 %v1167_v49  ;;  %v1166_v56 = vld [vmem:[%s8050_s27 + $0x30] sm:$0xff] }
 0x304   : > { %4156 = vmatprep.subr.bf16.mxu1 %v1347_v1  ;;  %v1292_v1 = vunpack.c.l.s8.bf16 %v1164_v53  ;;  %v1294_v23 = vunpack.c.l.s8.bf16 %v1166_v56  ;;  %v1302_v13 = vunpack.c.h.s8.bf16 %v1166_v56  ;;  %v1204_v56 = vld [vmem:[%s8050_s27 + $0x160] sm:$0xff] }
 0x306   : > { %4116 = vmatpush1.bf16.msra.mxu0 %v1344_v58  ;;  %v1301_v58 = vunpack.c.h.s8.bf16 %v1165_v48 }
 0x307   : > { %4157 = vmatpush1.bf16.msra.mxu1 %v1346_v54  ;;  %4117 = vmatprep.subr.bf16.mxu0 %v1353_v59  ;;  %v1173_v54 = vld [vmem:[%s8050_s27 + $0x68] sm:$0xff]  ;;  %v1303_v59 = vunpack.c.h.s8.bf16 %v1167_v49 }
 0x308   : > { %4158 = vmatprep.subr.bf16.mxu1 %v1355_v61  ;;  %v1300_v61 = vunpack.c.h.s8.bf16 %v1164_v53  ;;  %v1309_v62 = vunpack.c.l.s8.bf16 %v1173_v54  ;;  %v1317_v3 = vunpack.c.h.s8.bf16 %v1173_v54 }
 0x30a   : > { %4118 = vmatpush1.bf16.msra.mxu0 %v1352_v2  ;;  %v1172_v2 = vld [vmem:[%s8050_s27 + $0x60] sm:$0xff] }
 0x30b   : > { %4159 = vmatpush1.bf16.msra.mxu1 %v1354_v4  ;;  %4119 = vmatprep.subr.bf16.mxu0 %v1361_v5  ;;  %v1311_v4 = vunpack.c.l.s8.bf16 %v1175_v60  ;;  %v1174_v5 = vld [vmem:[%s8050_s27 + $0x70] sm:$0xff]  ;;  %v1316_v14 = vunpack.c.h.s8.bf16 %v1172_v2 }
 0x30c   : > { %4160 = vmatprep.subr.bf16.mxu1 %v1363_v7  ;;  %v1308_v7 = vunpack.c.l.s8.bf16 %v1172_v2  ;;  %v1310_v6 = vunpack.c.l.s8.bf16 %v1174_v5 }
 0x30e   : > { %4120 = vmatpush1.bf16.msra.mxu0 %v1360_v8  ;;  %v1319_v8 = vunpack.c.h.s8.bf16 %v1175_v60 }
 0x30f   : > { %4161 = vmatpush1.bf16.msra.mxu1 %v1362_v9  ;;  %4121 = vmatprep.subr.bf16.mxu0 %v1369_v12  ;;  %v1181_v9 = vld [vmem:[%s8050_s27 + $0xa8] sm:$0xff]  ;;  %v1183_v12 = vld [vmem:[%s8050_s27 + $0xb8] sm:$0xff] }
 0x310   : > { %4162 = vmatprep.subr.bf16.mxu1 %v1371_v16  ;;  %v1325_v16 = vunpack.c.l.s8.bf16 %v1181_v9  ;;  %v1333_v28 = vunpack.c.h.s8.bf16 %v1181_v9  ;;  %v1335_v29 = vunpack.c.h.s8.bf16 %v1183_v12 }
 0x312   : > { %4122 = vmatpush1.bf16.msra.mxu0 %v1368_v22  ;;  %v1327_v22 = vunpack.c.l.s8.bf16 %v1183_v12 }
 0x313   : > { %4163 = vmatpush1.bf16.msra.mxu1 %v1370_v25  ;;  %4123 = vmatprep.subr.bf16.mxu0 %v1377_v26  ;;  %v1182_v25 = vld [vmem:[%s8050_s27 + $0xb0] sm:$0xff]  ;;  %v1324_v26 = vunpack.c.l.s8.bf16 %v1180_v20 }
 0x314   : > { %4164 = vmatprep.subr.bf16.mxu1 %v1379_v15  ;;  %v1326_v15 = vunpack.c.l.s8.bf16 %v1182_v25  ;;  %v1334_v19 = vunpack.c.h.s8.bf16 %v1182_v25  ;;  %v1220_v25 = vld [vmem:[%s8050_s27 + $0x1e0] sm:$0xff] }
 0x316   : > { %4124 = vmatpush1.bf16.msra.mxu0 %v1376_v30  ;;  %v1189_v30 = vld [vmem:[%s8050_s27 + $0xe8] sm:$0xff] }
 0x317   : > { %4165 = vmatpush1.bf16.msra.mxu1 %v1378_v32  ;;  %4125 = vmatprep.subr.bf16.mxu0 %v1385_v33  ;;  %v1191_v32 = vld [vmem:[%s8050_s27 + $0xf8] sm:$0xff]  ;;  %v1332_v33 = vunpack.c.h.s8.bf16 %v1180_v20  ;;  %v1349_v18 = vunpack.c.h.s8.bf16 %v1189_v30 }
 0x318   : > { %4166 = vmatprep.subr.bf16.mxu1 %v1387_v34  ;;  %v1341_v34 = vunpack.c.l.s8.bf16 %v1189_v30  ;;  %v1351_v21 = vunpack.c.h.s8.bf16 %v1191_v32 }
 0x31a   : > { %4126 = vmatpush1.bf16.msra.mxu0 %v1384_v27  ;;  %v1343_v27 = vunpack.c.l.s8.bf16 %v1191_v32 }
 0x31b   : > { %4167 = vmatpush1.bf16.msra.mxu1 %v1386_v63  ;;  %4127 = vmatprep.subr.bf16.mxu0 %v1393_v10  ;;  %v1190_v63 = vld [vmem:[%s8050_s27 + $0xf0] sm:$0xff]  ;;  %v1340_v10 = vunpack.c.l.s8.bf16 %v1188_v35 }
 0x31c   : > { %4168 = vmatprep.subr.bf16.mxu1 %v1395_v11  ;;  %v1342_v11 = vunpack.c.l.s8.bf16 %v1190_v63  ;;  %v1350_v31 = vunpack.c.h.s8.bf16 %v1190_v63  ;;  %v1544_v63 = vld [vmem:[%s8067_s15] sm:$0xff] }
 0x31e   : > { %4128 = vmatpush1.bf16.msra.mxu0 %v1392_v38  ;;  %v1197_v38 = vld [vmem:[%s8050_s27 + $0x128] sm:$0xff] }
 0x31f   : > { %4169 = vmatpush1.bf16.msra.mxu1 %v1394_v0  ;;  %4129 = vmatprep.subr.bf16.mxu0 %v1401_v24  ;;  %v1199_v0 = vld [vmem:[%s8050_s27 + $0x138] sm:$0xff]  ;;  %v1348_v24 = vunpack.c.h.s8.bf16 %v1188_v35  ;;  %v1365_v48 = vunpack.c.h.s8.bf16 %v1197_v38 }
 0x320   : > { %4170 = vmatprep.subr.bf16.mxu1 %v1403_v39  ;;  %v1357_v39 = vunpack.c.l.s8.bf16 %v1197_v38  ;;  %v1367_v49 = vunpack.c.h.s8.bf16 %v1199_v0 }
 0x322   : > { %4130 = vmatpush1.bf16.msra.mxu0 %v1400_v46  ;;  %v1359_v46 = vunpack.c.l.s8.bf16 %v1199_v0 }
 0x323   : > { %4171 = vmatpush1.bf16.msra.mxu1 %v1402_v36  ;;  %4131 = vmatprep.subr.bf16.mxu0 %v1409_v37  ;;  %v1198_v36 = vld [vmem:[%s8050_s27 + $0x130] sm:$0xff]  ;;  %v1356_v37 = vunpack.c.l.s8.bf16 %v1196_v40 }
 0x324   : > { %4172 = vmatprep.subr.bf16.mxu1 %v1411_v47  ;;  %v1358_v47 = vunpack.c.l.s8.bf16 %v1198_v36  ;;  %v1366_v53 = vunpack.c.h.s8.bf16 %v1198_v36  ;;  %v1552_v36 = vld [vmem:[%s8067_s15 + $0x40] sm:$0xff] }
 0x326   : > { %4132 = vmatpush1.bf16.msra.mxu0 %v1408_v50  ;;  %v1205_v50 = vld [vmem:[%s8050_s27 + $0x168] sm:$0xff] }
 0x327   : > { %4173 = vmatpush1.bf16.msra.mxu1 %v1410_v51  ;;  %4183 = vmatprep.subr.bf16.mxu0 %v1293_v52  ;;  %v1207_v51 = vld [vmem:[%s8050_s27 + $0x178] sm:$0xff]  ;;  %v1364_v52 = vunpack.c.h.s8.bf16 %v1196_v40 }
 0x328   : > { %4224 = vmatprep.subr.bf16.mxu1 %v1295_v55  ;;  %v1373_v55 = vunpack.c.l.s8.bf16 %v1205_v50  ;;  %v1383_v60 = vunpack.c.h.s8.bf16 %v1207_v51 }
 0x329   : > { %4134 = vmatmul.mubr.bf16.vlgmr.msra.gmra.mrb[0].mxu0 %v8319_v57 }
 0x32a   : > { %4175 = vmatmul.mubr.bf16.vlgmr.msra.gmra.mrb[0].mxu1 %v8319_v57  ;;  %4184 = vmatpush1.bf16.msra.mxu0 %v1292_v1  ;;  %v1375_v1 = vunpack.c.l.s8.bf16 %v1207_v51  ;;  %v1561_v51 = vld [vmem:[%s8067_s15 + $0x88] sm:$0xff] }
 0x32b   : > { %4215 = vmatprep.mubr.bf16.mxu0 %v8279_v17  ;;  %4225 = vmatpush1.bf16.msra.mxu1 %v1294_v23  ;;  %v1206_v23 = vld [vmem:[%s8050_s27 + $0x170] sm:$0xff] }
 0x32c   : > { %4256 = vmatprep.mubr.bf16.mxu1 %v8279_v17  ;;  %4185 = vmatprep.subr.bf16.mxu0 %v1301_v58  ;;  %v1318_v17 = vunpack.c.h.s8.bf16 %v1174_v5  ;;  %v1372_v58 = vunpack.c.l.s8.bf16 %v1204_v56  ;;  %v1374_v54 = vunpack.c.l.s8.bf16 %v1206_v23  ;;  %v1382_v2 = vunpack.c.h.s8.bf16 %v1206_v23  ;;  %v1212_v5 = vld [vmem:[%s8050_s27 + $0x1a0] sm:$0xff] }
 0x32d   : > { %4226 = vmatprep.subr.bf16.mxu1 %v1303_v59  ;;  %v1381_v59 = vunpack.c.h.s8.bf16 %v1205_v50 }
 0x32e   : > { %4186 = vmatpush1.bf16.msra.mxu0 %v1300_v61  ;;  %v1213_v61 = vld [vmem:[%s8050_s27 + $0x1a8] sm:$0xff] }
 0x32f   : > { %4227 = vmatpush1.bf16.msra.mxu1 %v1302_v13  ;;  %4187 = vmatprep.subr.bf16.mxu0 %v1309_v62  ;;  %v1215_v13 = vld [vmem:[%s8050_s27 + $0x1b8] sm:$0xff]  ;;  %v1380_v62 = vunpack.c.h.s8.bf16 %v1204_v56  ;;  %v1397_v9 = vunpack.c.h.s8.bf16 %v1213_v61  ;;  %v1833_v56 = vunpack.c.l.s8.bf16 %v1561_v51 }
 0x330   : > { %4228 = vmatprep.subr.bf16.mxu1 %v1311_v4  ;;  %v1389_v4 = vunpack.c.l.s8.bf16 %v1213_v61  ;;  %v1399_v12 = vunpack.c.h.s8.bf16 %v1215_v13 }
 0x332   : > { %4188 = vmatpush1.bf16.msra.mxu0 %v1308_v7  ;;  %v1391_v7 = vunpack.c.l.s8.bf16 %v1215_v13  ;;  %v1569_v13 = vld [vmem:[%s8067_s15 + $0xc8] sm:$0xff] }
 0x333   : > { %4229 = vmatpush1.bf16.msra.mxu1 %v1310_v6  ;;  %4189 = vmatprep.subr.bf16.mxu0 %v1317_v3  ;;  %v1214_v6 = vld [vmem:[%s8050_s27 + $0x1b0] sm:$0xff]  ;;  %v1388_v3 = vunpack.c.l.s8.bf16 %v1212_v5 }
 0x334   : > { %4230 = vmatprep.subr.bf16.mxu1 %v1319_v8  ;;  %v1390_v8 = vunpack.c.l.s8.bf16 %v1214_v6  ;;  %v1398_v20 = vunpack.c.h.s8.bf16 %v1214_v6 }
 0x336   : > { %4190 = vmatpush1.bf16.msra.mxu0 %v1316_v14  ;;  %v1221_v14 = vld [vmem:[%s8050_s27 + $0x1e8] sm:$0xff] }
 0x337   : > { %4231 = vmatpush1.bf16.msra.mxu1 %v1318_v17  ;;  %4191 = vmatprep.subr.bf16.mxu0 %v1325_v16  ;;  %v1223_v17 = vld [vmem:[%s8050_s27 + $0x1f8] sm:$0xff]  ;;  %v1396_v16 = vunpack.c.h.s8.bf16 %v1212_v5  ;;  %v1413_v30 = vunpack.c.h.s8.bf16 %v1221_v14  ;;  %v1849_v5 = vunpack.c.l.s8.bf16 %v1569_v13 }
 0x338   : > { %4232 = vmatprep.subr.bf16.mxu1 %v1327_v22  ;;  %v1405_v22 = vunpack.c.l.s8.bf16 %v1221_v14  ;;  %v1415_v32 = vunpack.c.h.s8.bf16 %v1223_v17 }
 0x33a   : > { %4192 = vmatpush1.bf16.msra.mxu0 %v1324_v26  ;;  %v1407_v26 = vunpack.c.l.s8.bf16 %v1223_v17  ;;  %v1577_v17 = vld [vmem:[%s8067_s15 + $0x108] sm:$0xff] }
 0x33b   : > { %4233 = vmatpush1.bf16.msra.mxu1 %v1326_v15  ;;  %4193 = vmatprep.subr.bf16.mxu0 %v1333_v28  ;;  %v1222_v15 = vld [vmem:[%s8050_s27 + $0x1f0] sm:$0xff]  ;;  %v1404_v28 = vunpack.c.l.s8.bf16 %v1220_v25  ;;  %s7346_s27 = scalar_lea.vmem %s6320_s29, 512 }
 0x33c   : > { %4234 = vmatprep.subr.bf16.mxu1 %v1335_v29  ;;  %v1406_v29 = vunpack.c.l.s8.bf16 %v1222_v15  ;;  %v1414_v35 = vunpack.c.h.s8.bf16 %v1222_v15  ;;  %p7347_p4 = scmp.ne.s32.totalorder %s6320_s29, %s7346_s27  ;;  %p7354_p10 = scmp.lt.s32.totalorder %s7346_s27, %s7346_s27 }
 0x33e   : > { %4194 = vmatpush1.bf16.msra.mxu0 %v1332_v33  ;;  %v1545_v33 = vld [vmem:[%s8067_s15 + $0x8] sm:$0xff]  ;;  %p7348_p3 = pnand %p7347_p4, %p6902_p13  ;;  %p7355_p6 = por %p7354_p10, %p7353_p5 }
 0x33f   : > { %4235 = vmatpush1.bf16.msra.mxu1 %v1334_v19  ;;  %4195 = vmatprep.subr.bf16.mxu0 %v1341_v34  ;;  %v1547_v19 = vld [vmem:[%s8067_s15 + $0x18] sm:$0xff]  ;;  %v1412_v34 = vunpack.c.h.s8.bf16 %v1220_v25  ;;  %v1809_v38 = vunpack.c.h.s8.bf16 %v1545_v33  ;;  %v1865_v25 = vunpack.c.l.s8.bf16 %v1577_v17 }
 0x340   : > { %4236 = vmatprep.subr.bf16.mxu1 %v1343_v27  ;;  %v1801_v27 = vunpack.c.l.s8.bf16 %v1545_v33  ;;  %v1811_v0 = vunpack.c.h.s8.bf16 %v1547_v19  ;;  %p7349_p8 = pneg %p7348_p3 }
 0x342   : > { %4196 = vmatpush1.bf16.msra.mxu0 %v1340_v10  ;;  %v1803_v10 = vunpack.c.l.s8.bf16 %v1547_v19  ;;  %v1585_v19 = vld [vmem:[%s8067_s15 + $0x148] sm:$0xff]  ;;  %p7356_p9 = pnand %p7355_p6, %p7349_p8 }
 0x343   : > { %4237 = vmatpush1.bf16.msra.mxu1 %v1342_v11  ;;  %4197 = vmatprep.subr.bf16.mxu0 %v1349_v18  ;;  %v1546_v11 = vld [vmem:[%s8067_s15 + $0x10] sm:$0xff]  ;;  %v1800_v18 = vunpack.c.l.s8.bf16 %v1544_v63 }
 0x344   : > { %4238 = vmatprep.subr.bf16.mxu1 %v1351_v21  ;;  %v1802_v21 = vunpack.c.l.s8.bf16 %v1546_v11  ;;  %v1810_v40 = vunpack.c.h.s8.bf16 %v1546_v11 }
 0x346   : > { %4198 = vmatpush1.bf16.msra.mxu0 %v1348_v24  ;;  %v1553_v24 = vld [vmem:[%s8067_s15 + $0x48] sm:$0xff] }
 0x347   : > { %4239 = vmatpush1.bf16.msra.mxu1 %v1350_v31  ;;  %4199 = vmatprep.subr.bf16.mxu0 %v1357_v39  ;;  %v1555_v31 = vld [vmem:[%s8067_s15 + $0x58] sm:$0xff]  ;;  %v1808_v39 = vunpack.c.h.s8.bf16 %v1544_v63  ;;  %v1881_v63 = vunpack.c.l.s8.bf16 %v1585_v19 }
 0x348   : > { %4240 = vmatprep.subr.bf16.mxu1 %v1359_v46  ;;  %v1817_v46 = vunpack.c.l.s8.bf16 %v1553_v24  ;;  %v1827_v50 = vunpack.c.h.s8.bf16 %v1555_v31 }
 0x34a   : > { %4200 = vmatpush1.bf16.msra.mxu0 %v1356_v37  ;;  %v1819_v37 = vunpack.c.l.s8.bf16 %v1555_v31  ;;  %v1593_v31 = vld [vmem:[%s8067_s15 + $0x188] sm:$0xff] }
 0x34b   : > { %4241 = vmatpush1.bf16.msra.mxu1 %v1358_v47  ;;  %4201 = vmatprep.subr.bf16.mxu0 %v1365_v48  ;;  %v1554_v47 = vld [vmem:[%s8067_s15 + $0x50] sm:$0xff]  ;;  %v1816_v48 = vunpack.c.l.s8.bf16 %v1552_v36 }
 0x34c   : > { %4242 = vmatprep.subr.bf16.mxu1 %v1367_v49  ;;  %v1818_v49 = vunpack.c.l.s8.bf16 %v1554_v47 }
 0x34e   : > { %4202 = vmatpush1.bf16.msra.mxu0 %v1364_v52  ;;  %v1563_v52 = vld [vmem:[%s8067_s15 + $0x98] sm:$0xff] }
 0x34f   : > { %4243 = vmatpush1.bf16.msra.mxu1 %v1366_v53  ;;  %4203 = vmatprep.subr.bf16.mxu0 %v1373_v55  ;;  %v1824_v53 = vunpack.c.h.s8.bf16 %v1552_v36  ;;  %v1826_v55 = vunpack.c.h.s8.bf16 %v1554_v47  ;;  %v1835_v23 = vunpack.c.l.s8.bf16 %v1563_v52  ;;  %v1843_v61 = vunpack.c.h.s8.bf16 %v1563_v52  ;;  %v1601_v52 = vld [vmem:[%s8067_s15 + $0x1c8] sm:$0xff] }
 0x350   : > { %4244 = vmatprep.subr.bf16.mxu1 %v1375_v1  ;;  %v1560_v1 = vld [vmem:[%s8067_s15 + $0x80] sm:$0xff]  ;;  %v1897_v36 = vunpack.c.l.s8.bf16 %v1593_v31 }
 0x352   : > { %4204 = vmatpush1.bf16.msra.mxu0 %v1372_v58  ;;  %v1562_v58 = vld [vmem:[%s8067_s15 + $0x90] sm:$0xff] }
 0x353   : > { %4245 = vmatpush1.bf16.msra.mxu1 %v1374_v54  ;;  %4205 = vmatprep.subr.bf16.mxu0 %v1381_v59  ;;  %v1832_v54 = vunpack.c.l.s8.bf16 %v1560_v1  ;;  %v1834_v59 = vunpack.c.l.s8.bf16 %v1562_v58 }
 0x354   : > { %4246 = vmatprep.subr.bf16.mxu1 %v1383_v60  ;;  %v1841_v60 = vunpack.c.h.s8.bf16 %v1561_v51 }
 0x356   : > { %4206 = vmatpush1.bf16.msra.mxu0 %v1380_v62  ;;  %v1571_v62 = vld [vmem:[%s8067_s15 + $0xd8] sm:$0xff] }
 0x357   : > { %4247 = vmatpush1.bf16.msra.mxu1 %v1382_v2  ;;  %4207 = vmatprep.subr.bf16.mxu0 %v1389_v4  ;;  %v1840_v2 = vunpack.c.h.s8.bf16 %v1560_v1  ;;  %v1842_v4 = vunpack.c.h.s8.bf16 %v1562_v58  ;;  %v1851_v6 = vunpack.c.l.s8.bf16 %v1571_v62  ;;  %v1859_v14 = vunpack.c.h.s8.bf16 %v1571_v62  ;;  %v8388_v62 = vld [vmem:[%s8067_s15 + $0x208] sm:$0xff] }
 0x358   : > { %4248 = vmatprep.subr.bf16.mxu1 %v1391_v7  ;;  %v1568_v7 = vld [vmem:[%s8067_s15 + $0xc0] sm:$0xff]  ;;  %v1913_v1 = vunpack.c.l.s8.bf16 %v1601_v52 }
 0x35a   : > { %4208 = vmatpush1.bf16.msra.mxu0 %v1388_v3  ;;  %v1570_v3 = vld [vmem:[%s8067_s15 + $0xd0] sm:$0xff] }
 0x35b   : > { %4249 = vmatpush1.bf16.msra.mxu1 %v1390_v8  ;;  %4209 = vmatprep.subr.bf16.mxu0 %v1397_v9  ;;  %v1848_v8 = vunpack.c.l.s8.bf16 %v1568_v7  ;;  %v1850_v9 = vunpack.c.l.s8.bf16 %v1570_v3 }
 0x35c   : > { %4250 = vmatprep.subr.bf16.mxu1 %v1399_v12  ;;  %v1857_v12 = vunpack.c.h.s8.bf16 %v1569_v13 }
 0x35e   : > { %4210 = vmatpush1.bf16.msra.mxu0 %v1396_v16  ;;  %v1579_v16 = vld [vmem:[%s8067_s15 + $0x118] sm:$0xff] }
 0x35f   : > { %4251 = vmatpush1.bf16.msra.mxu1 %v1398_v20  ;;  %4211 = vmatprep.subr.bf16.mxu0 %v1405_v22  ;;  %v1856_v20 = vunpack.c.h.s8.bf16 %v1568_v7  ;;  %v1858_v22 = vunpack.c.h.s8.bf16 %v1570_v3  ;;  %v1867_v15 = vunpack.c.l.s8.bf16 %v1579_v16  ;;  %v1875_v33 = vunpack.c.h.s8.bf16 %v1579_v16  ;;  %v8397_v3 = vld [vmem:[%s901_s2] sm:$0xff] }
 0x360   : > { %4252 = vmatprep.subr.bf16.mxu1 %v1407_v26  ;;  %v1576_v26 = vld [vmem:[%s8067_s15 + $0x100] sm:$0xff]  ;;  %v1929_v7 = vunpack.c.l.s8.bf16 %v8388_v62 }
 0x362   : > { %4212 = vmatpush1.bf16.msra.mxu0 %v1404_v28  ;;  %v1578_v28 = vld [vmem:[%s8067_s15 + $0x110] sm:$0xff] }
 0x363   : > { %4253 = vmatpush1.bf16.msra.mxu1 %v1406_v29  ;;  %4213 = vmatprep.subr.bf16.mxu0 %v1413_v30  ;;  %v1864_v29 = vunpack.c.l.s8.bf16 %v1576_v26  ;;  %v1866_v30 = vunpack.c.l.s8.bf16 %v1578_v28 }
 0x364   : > { %4254 = vmatprep.subr.bf16.mxu1 %v1415_v32  ;;  %v1873_v32 = vunpack.c.h.s8.bf16 %v1577_v17  ;;  %v4281_v17 = vrot.slane %v8397_v3, %v8155_v45 }
 0x366   : > { %4214 = vmatpush1.bf16.msra.mxu0 %v1412_v34  ;;  %v1587_v34 = vld [vmem:[%s8067_s15 + $0x158] sm:$0xff] }
 0x367   : > { %4255 = vmatpush1.bf16.msra.mxu1 %v1414_v35  ;;  %4379 = vmatprep.subr.bf16.mxu0 %v1801_v27  ;;  %v1872_v35 = vunpack.c.h.s8.bf16 %v1576_v26  ;;  %v1874_v27 = vunpack.c.h.s8.bf16 %v1578_v28  ;;  %v1883_v11 = vunpack.c.l.s8.bf16 %v1587_v34 }
 0x368   : > { %4543 = vmatprep.subr.bf16.mxu1 %v1803_v10  ;;  %v1584_v10 = vld [vmem:[%s8067_s15 + $0x140] sm:$0xff] }
 0x369   : > { %4216 = vmatmul.mubr.bf16.vlgmr.msra.gmra.mrb[4].mxu0 %v8319_v57 }
 0x36a   : > { %4257 = vmatmul.mubr.bf16.vlgmr.msra.gmra.mrb[4].mxu1 %v8319_v57  ;;  %4380 = vmatpush1.bf16.msra.mxu0 %v1800_v18  ;;  %v1825_v57 = vunpack.c.h.s8.bf16 %v1553_v24  ;;  %v1586_v18 = vld [vmem:[%s8067_s15 + $0x150] sm:$0xff]  ;;  %v1891_v24 = vunpack.c.h.s8.bf16 %v1587_v34 }
 0x36b   : > { %4544 = vmatpush1.bf16.msra.mxu1 %v1802_v21  ;;  %4381 = vmatprep.subr.bf16.mxu0 %v1809_v38  ;;  %v1880_v21 = vunpack.c.l.s8.bf16 %v1584_v10  ;;  %v1882_v38 = vunpack.c.l.s8.bf16 %v1586_v18 }
 0x36c   : > { %4545 = vmatprep.subr.bf16.mxu1 %v1811_v0  ;;  %v1889_v0 = vunpack.c.h.s8.bf16 %v1585_v19 }
 0x36e   : > { %4382 = vmatpush1.bf16.msra.mxu0 %v1808_v39  ;;  %v1595_v39 = vld [vmem:[%s8067_s15 + $0x198] sm:$0xff] }
 0x36f   : > { %4546 = vmatpush1.bf16.msra.mxu1 %v1810_v40  ;;  %4383 = vmatprep.subr.bf16.mxu0 %v1817_v46  ;;  %v1888_v40 = vunpack.c.h.s8.bf16 %v1584_v10  ;;  %v1890_v46 = vunpack.c.h.s8.bf16 %v1586_v18  ;;  %v1899_v47 = vunpack.c.l.s8.bf16 %v1595_v39  ;;  %v1907_v51 = vunpack.c.h.s8.bf16 %v1595_v39  ;;  %v1610_v18 = vld [vmem:[%s8067_s15 + $0x210] sm:$0xff] }
 0x370   : > { %4547 = vmatprep.subr.bf16.mxu1 %v1819_v37  ;;  %v1592_v37 = vld [vmem:[%s8067_s15 + $0x180] sm:$0xff] }
 0x372   : > { %4384 = vmatpush1.bf16.msra.mxu0 %v1816_v48  ;;  %v1594_v48 = vld [vmem:[%s8067_s15 + $0x190] sm:$0xff] }
 0x373   : > { %4548 = vmatpush1.bf16.msra.mxu1 %v1818_v49  ;;  %4385 = vmatprep.subr.bf16.mxu0 %v1825_v57  ;;  %v1896_v49 = vunpack.c.l.s8.bf16 %v1592_v37  ;;  %v1898_v57 = vunpack.c.l.s8.bf16 %v1594_v48 }
 0x374   : > { %4549 = vmatprep.subr.bf16.mxu1 %v1827_v50  ;;  %v1905_v50 = vunpack.c.h.s8.bf16 %v1593_v31  ;;  %v1930_v31 = vunpack.c.l.s8.bf16 %v1610_v18 }
 0x376   : > { %4386 = vmatpush1.bf16.msra.mxu0 %v1824_v53  ;;  %v1603_v53 = vld [vmem:[%s8067_s15 + $0x1d8] sm:$0xff] }
 0x377   : > { %4550 = vmatpush1.bf16.msra.mxu1 %v1826_v55  ;;  %4387 = vmatprep.subr.bf16.mxu0 %v1833_v56  ;;  %v1904_v55 = vunpack.c.h.s8.bf16 %v1592_v37  ;;  %v1906_v56 = vunpack.c.h.s8.bf16 %v1594_v48  ;;  %v1915_v58 = vunpack.c.l.s8.bf16 %v1603_v53  ;;  %v1923_v13 = vunpack.c.h.s8.bf16 %v1603_v53  ;;  %v1619_v37 = vld [vmem:[%s8067_s15 + $0x258] sm:$0xff] }
 0x378   : > { %4551 = vmatprep.subr.bf16.mxu1 %v1835_v23  ;;  %v1600_v23 = vld [vmem:[%s8067_s15 + $0x1c0] sm:$0xff] }
 0x37a   : > { %4388 = vmatpush1.bf16.msra.mxu0 %v1832_v54  ;;  %v1602_v54 = vld [vmem:[%s8067_s15 + $0x1d0] sm:$0xff] }
 0x37b   : > { %4552 = vmatpush1.bf16.msra.mxu1 %v1834_v59  ;;  %4389 = vmatprep.subr.bf16.mxu0 %v1841_v60  ;;  %v1912_v59 = vunpack.c.l.s8.bf16 %v1600_v23  ;;  %v1914_v60 = vunpack.c.l.s8.bf16 %v1602_v54 }
 0x37c   : > { %4553 = vmatprep.subr.bf16.mxu1 %v1843_v61  ;;  %v1921_v61 = vunpack.c.h.s8.bf16 %v1601_v52  ;;  %v1618_v52 = vld [vmem:[%s8067_s15 + $0x250] sm:$0xff] }
 0x37e   : > { %4390 = vmatpush1.bf16.msra.mxu0 %v1840_v2  ;;  %v8391_v2 = vld [vmem:[%s8067_s15 + $0x218] sm:$0xff] }
 0x37f   : > { %4554 = vmatpush1.bf16.msra.mxu1 %v1842_v4  ;;  %4391 = vmatprep.subr.bf16.mxu0 %v1849_v5  ;;  %v1920_v4 = vunpack.c.h.s8.bf16 %v1600_v23  ;;  %v1922_v5 = vunpack.c.h.s8.bf16 %v1602_v54  ;;  %v1625_v23 = vld [vmem:[%s8067_s15 + $0x288] sm:$0xff] }
 0x380   : > { %4555 = vmatprep.subr.bf16.mxu1 %v1851_v6  ;;  %v1931_v6 = vunpack.c.l.s8.bf16 %v8391_v2 }
 0x382   : > { %4392 = vmatpush1.bf16.msra.mxu0 %v1848_v8  ;;  %v8401_v8 = vld [vmem:[%s910_s20] sm:$0xff] }
 0x383   : > { %4556 = vmatpush1.bf16.msra.mxu1 %v1850_v9  ;;  %4393 = vmatprep.subr.bf16.mxu0 %v1857_v12  ;;  %v4269_v9 = vrot.slane %v8397_v3, %v8146_v42  ;;  %v4273_v12 = vrot.slane %v8397_v3, %v8152_v44 }
 0x384   : > { %4557 = vmatprep.subr.bf16.mxu1 %v1859_v14  ;;  %v4318_v14 = vrot.slane %v8401_v8, %v8146_v42 }
 0x386   : > { %4394 = vmatpush1.bf16.msra.mxu0 %v1856_v20  ;;  %v4322_v20 = vrot.slane %v8401_v8, %v8152_v44 }
 0x387   : > { %4558 = vmatpush1.bf16.msra.mxu1 %v1858_v22  ;;  %4395 = vmatprep.subr.bf16.mxu0 %v1865_v25 }
 0x388   : > { %4559 = vmatprep.subr.bf16.mxu1 %v1867_v15  ;;  %v4330_v15 = vrot.slane %v8401_v8, %v8155_v45 }
 0x38a   : > { %4396 = vmatpush1.bf16.msra.mxu0 %v1864_v29 }
 0x38b   : > { %4560 = vmatpush1.bf16.msra.mxu1 %v1866_v30  ;;  %4397 = vmatprep.subr.bf16.mxu0 %v1873_v32 }
 0x38c   : > { %4561 = vmatprep.subr.bf16.mxu1 %v1875_v33 }
 0x38e   : > { %4398 = vmatpush1.bf16.msra.mxu0 %v1872_v35 }
 0x38f   : > { %4562 = vmatpush1.bf16.msra.mxu1 %v1874_v27  ;;  %4399 = vmatprep.subr.bf16.mxu0 %v1881_v63 }
 0x390   : > { %4563 = vmatprep.subr.bf16.mxu1 %v1883_v11  ;;  %v1608_v11 = vld [vmem:[%s8067_s15 + $0x200] sm:$0xff] }
 0x391   : > { %v1936_v48 = vunpack.c.h.s8.bf16 %v1608_v11 }
 0x392   : > { %4400 = vmatpush1.bf16.msra.mxu0 %v1880_v21 }
 0x393   : > { %4564 = vmatpush1.bf16.msra.mxu1 %v1882_v38  ;;  %4401 = vmatprep.subr.bf16.mxu0 %v1889_v0 }
 0x394   : > { %4565 = vmatprep.subr.bf16.mxu1 %v1891_v24  ;;  %v1928_v24 = vunpack.c.l.s8.bf16 %v1608_v11 }
 0x396   : > { %4402 = vmatpush1.bf16.msra.mxu0 %v1888_v40  ;;  %v1937_v40 = vunpack.c.h.s8.bf16 %v8388_v62  ;;  %v1626_v62 = vld [vmem:[%s8067_s15 + $0x290] sm:$0xff] }
 0x397   : > { %4566 = vmatpush1.bf16.msra.mxu1 %v1890_v46  ;;  %4403 = vmatprep.subr.bf16.mxu0 %v1897_v36  ;;  %v1939_v46 = vunpack.c.h.s8.bf16 %v8391_v2  ;;  %v1617_v36 = vld [vmem:[%s8067_s15 + $0x248] sm:$0xff] }
 0x398   : > { %4567 = vmatprep.subr.bf16.mxu1 %v1899_v47 }
 0x39a   : > { %4404 = vmatpush1.bf16.msra.mxu0 %v1896_v49  ;;  %v1938_v49 = vunpack.c.h.s8.bf16 %v1610_v18 }
 0x39b   : > { %4568 = vmatpush1.bf16.msra.mxu1 %v1898_v57  ;;  %4405 = vmatprep.subr.bf16.mxu0 %v1905_v50  ;;  %v1945_v57 = vunpack.c.l.s8.bf16 %v1617_v36  ;;  %v1947_v50 = vunpack.c.l.s8.bf16 %v1619_v37 }
 0x39c   : > { %4569 = vmatprep.subr.bf16.mxu1 %v1907_v51  ;;  %v1616_v51 = vld [vmem:[%s8067_s15 + $0x240] sm:$0xff] }
 0x39d   : > { %v1944_v53 = vunpack.c.l.s8.bf16 %v1616_v51  ;;  %v1952_v54 = vunpack.c.h.s8.bf16 %v1616_v51 }
 0x39e   : > { %4406 = vmatpush1.bf16.msra.mxu0 %v1904_v55  ;;  %v1946_v55 = vunpack.c.l.s8.bf16 %v1618_v52 }
 0x39f   : > { %4570 = vmatpush1.bf16.msra.mxu1 %v1906_v56  ;;  %4407 = vmatprep.subr.bf16.mxu0 %v1913_v1  ;;  %v1953_v56 = vunpack.c.h.s8.bf16 %v1617_v36  ;;  %v1955_v1 = vunpack.c.h.s8.bf16 %v1619_v37  ;;  %v1648_v37 = vld [vmem:[%s8067_s15 + $0x340] sm:$0xff] }
 0x3a0   : > { %4571 = vmatprep.subr.bf16.mxu1 %v1915_v58  ;;  %v1627_v58 = vld [vmem:[%s8067_s15 + $0x298] sm:$0xff] }
 0x3a2   : > { %4408 = vmatpush1.bf16.msra.mxu0 %v1912_v59  ;;  %v1954_v59 = vunpack.c.h.s8.bf16 %v1618_v52  ;;  %v1657_v52 = vld [vmem:[%s8067_s15 + $0x388] sm:$0xff] }
 0x3a3   : > { %4572 = vmatpush1.bf16.msra.mxu1 %v1914_v60  ;;  %4409 = vmatprep.subr.bf16.mxu0 %v1921_v61  ;;  %v1961_v60 = vunpack.c.l.s8.bf16 %v1625_v23  ;;  %v1963_v61 = vunpack.c.l.s8.bf16 %v1627_v58 }
 0x3a4   : > { %4573 = vmatprep.subr.bf16.mxu1 %v1923_v13  ;;  %v1624_v13 = vld [vmem:[%s8067_s15 + $0x280] sm:$0xff] }
 0x3a5   : > { %v1960_v2 = vunpack.c.l.s8.bf16 %v1624_v13 }
 0x3a6   : > { %4410 = vmatpush1.bf16.msra.mxu0 %v1920_v4  ;;  %v1962_v4 = vunpack.c.l.s8.bf16 %v1626_v62 }
 0x3a7   : > { %4574 = vmatpush1.bf16.msra.mxu1 %v1922_v5  ;;  %4420 = vmatprep.subr.bf16.mxu0 %v1929_v7  ;;  %v1969_v5 = vunpack.c.h.s8.bf16 %v1625_v23  ;;  %v1971_v7 = vunpack.c.h.s8.bf16 %v1627_v58  ;;  %v1656_v58 = vld [vmem:[%s8067_s15 + $0x380] sm:$0xff] }
 0x3a8   : > { %4584 = vmatprep.subr.bf16.mxu1 %v1931_v6  ;;  %v1633_v6 = vld [vmem:[%s8067_s15 + $0x2c8] sm:$0xff] }
 0x3fc   : > { %v4135_v16 = vpop.f32.mrb[0].mxu0 }
 0x3fd   : > { %v4306_v22 = vmul.f32 %v4269_v9, %v4135_v16  ;;  %v8413_v25 = vpop.f32.mrb[0].mxu1  ;;  %v4137_v26 = vpop.f32.mrb[1].mxu0  ;;  %v1635_v9 = vld [vmem:[%s8067_s15 + $0x2d8] sm:$0xff] }
 0x3fe   : > { %v4307_v28 = vmul.f32 %v4273_v12, %v4137_v26  ;;  %v4178_v29 = vpop.f32.mrb[1].mxu1  ;;  %v4139_v30 = vpop.f32.mrb[2].mxu0  ;;  %v1968_v12 = vunpack.c.h.s8.bf16 %v1624_v13  ;;  %v1979_v16 = vunpack.c.l.s8.bf16 %v1635_v9  ;;  %v2033_v13 = vunpack.c.h.s8.bf16 %v1657_v52 }
 0x3ff   : > { %v4355_v32 = vadd.f32 %v4318_v14, %v4306_v22  ;;  %v4309_v33 = vmul.f32 %v4281_v17, %v4178_v29  ;;  %v4180_v19 = vpop.f32.mrb[2].mxu1  ;;  %v4140_v34 = vpop.f32.mrb[3].mxu0  ;;  %v1970_v14 = vunpack.c.h.s8.bf16 %v1626_v62  ;;  %v1977_v17 = vunpack.c.l.s8.bf16 %v1633_v6  ;;  %v1634_v22 = vld [vmem:[%s8067_s15 + $0x2d0] sm:$0xff]  ;;  %v1641_v30 = vld [vmem:[%s8067_s15 + $0x308] sm:$0xff] }
 0x400   : > { %v4356_v35 = vadd.f32 %v4322_v20, %v4307_v28  ;;  %v4181_v27 = vpop.f32.mrb[3].mxu1  ;;  %v1632_v20 = vld [vmem:[%s8067_s15 + $0x2c0] sm:$0xff]  ;;  %v1985_v28 = vunpack.c.h.s8.bf16 %v1633_v6  ;;  %v1987_v29 = vunpack.c.h.s8.bf16 %v1635_v9  ;;  %v1986_v19 = vunpack.c.h.s8.bf16 %v1634_v22 }
 0x401   : > { %v4363_v63 = vmax.f32 %v4355_v32, 0.0  ;;  %v4358_v10 = vadd.f32 %v4330_v15, %v4309_v33  ;;  %v1976_v26 = vunpack.c.l.s8.bf16 %v1632_v20  ;;  %v1978_v15 = vunpack.c.l.s8.bf16 %v1634_v22  ;;  %v1643_v32 = vld [vmem:[%s8067_s15 + $0x318] sm:$0xff]  ;;  %v1640_v27 = vld [vmem:[%s8067_s15 + $0x300] sm:$0xff] }
 0x402   : > { %v4364_v21 = vmax.f32 %v4356_v35, 0.0  ;;  %v1984_v33 = vunpack.c.h.s8.bf16 %v1632_v20  ;;  %v1993_v34 = vunpack.c.l.s8.bf16 %v1641_v30  ;;  %v1995_v35 = vunpack.c.l.s8.bf16 %v1643_v32  ;;  %v1666_v20 = vld [vmem:[%s8067_s15 + $0x3d0] sm:$0xff] }
 0x403   : > { %v4366_v38 = vmax.f32 %v4358_v10, 0.0  ;;  %v8421_v39 = vpack.c.bf16 %v4363_v63, %v4363_v63  ;;  %v1642_v63 = vld [vmem:[%s8067_s15 + $0x310] sm:$0xff]  ;;  %v1992_v10 = vunpack.c.l.s8.bf16 %v1640_v27  ;;  %v2001_v18 = vunpack.c.h.s8.bf16 %v1641_v30 }
 0x404   : > { %v8419_v0 = vpack.c.bf16 %v4364_v21, %v4364_v21  ;;  %v1994_v11 = vunpack.c.l.s8.bf16 %v1642_v63  ;;  %v2003_v21 = vunpack.c.h.s8.bf16 %v1643_v32 }
 0x405   : > { %v8429_v47 = vpack.c.bf16 %v4366_v38, %v4366_v38  ;;  %v1649_v38 = vld [vmem:[%s8067_s15 + $0x348] sm:$0xff] }
 0x406   : > { %4411 = vmatprep.mubr.bf16.mxu0 %v8419_v0  ;;  %4575 = vmatprep.mubr.bf16.mxu1 %v8419_v0 }
 0x407   : > { %4412 = vmatmul.mubr.bf16.vlgmr.msra.gmra.mrb[8].mxu0 %v8421_v39  ;;  %4576 = vmatmul.mubr.bf16.vlgmr.msra.gmra.mrb[8].mxu1 %v8421_v39 }
 0x408   : > { %4421 = vmatpush1.bf16.msra.mxu0 %v1928_v24  ;;  %4585 = vmatpush1.bf16.msra.mxu1 %v1930_v31  ;;  %v1651_v24 = vld [vmem:[%s8067_s15 + $0x358] sm:$0xff]  ;;  %v2000_v31 = vunpack.c.h.s8.bf16 %v1640_v27 }
 0x409   : > { %4452 = vmatprep.mubr.bf16.mxu0 %v8429_v47  ;;  %4616 = vmatprep.mubr.bf16.mxu1 %v8429_v47  ;;  %v2011_v36 = vunpack.c.l.s8.bf16 %v1651_v24  ;;  %v2019_v51 = vunpack.c.h.s8.bf16 %v1651_v24 }
 0x40a   : > { %4422 = vmatprep.subr.bf16.mxu0 %v1937_v40  ;;  %4586 = vmatprep.subr.bf16.mxu1 %v1939_v46  ;;  %v2002_v40 = vunpack.c.h.s8.bf16 %v1642_v63  ;;  %v2009_v46 = vunpack.c.l.s8.bf16 %v1649_v38  ;;  %v1673_v63 = vld [vmem:[%s8067_s15 + $0x408] sm:$0xff] }
 0x40c   : > { %4423 = vmatpush1.bf16.msra.mxu0 %v1936_v48  ;;  %4587 = vmatpush1.bf16.msra.mxu1 %v1938_v49  ;;  %v1650_v48 = vld [vmem:[%s8067_s15 + $0x350] sm:$0xff]  ;;  %v2008_v49 = vunpack.c.l.s8.bf16 %v1648_v37 }
 0x40d   : > { %4424 = vmatprep.subr.bf16.mxu0 %v1945_v57  ;;  %4588 = vmatprep.subr.bf16.mxu1 %v1947_v50  ;;  %v2010_v57 = vunpack.c.l.s8.bf16 %v1650_v48  ;;  %v2017_v50 = vunpack.c.h.s8.bf16 %v1649_v38 }
 0x410   : > { %4425 = vmatpush1.bf16.msra.mxu0 %v1944_v53  ;;  %4589 = vmatpush1.bf16.msra.mxu1 %v1946_v55  ;;  %v1659_v53 = vld [vmem:[%s8067_s15 + $0x398] sm:$0xff]  ;;  %v2016_v55 = vunpack.c.h.s8.bf16 %v1648_v37  ;;  %v1672_v37 = vld [vmem:[%s8067_s15 + $0x400] sm:$0xff] }
 0x411   : > { %4426 = vmatprep.subr.bf16.mxu0 %v1953_v56  ;;  %4590 = vmatprep.subr.bf16.mxu1 %v1955_v1  ;;  %v2018_v56 = vunpack.c.h.s8.bf16 %v1650_v48  ;;  %v2025_v1 = vunpack.c.l.s8.bf16 %v1657_v52  ;;  %v2027_v23 = vunpack.c.l.s8.bf16 %v1659_v53  ;;  %v2035_v62 = vunpack.c.h.s8.bf16 %v1659_v53 }
 0x412   : > { %v2065_v53 = vunpack.c.h.s8.bf16 %v1673_v63 }
 0x414   : > { %4427 = vmatpush1.bf16.msra.mxu0 %v1952_v54  ;;  %4591 = vmatpush1.bf16.msra.mxu1 %v1954_v59  ;;  %v1658_v54 = vld [vmem:[%s8067_s15 + $0x390] sm:$0xff]  ;;  %v2024_v59 = vunpack.c.l.s8.bf16 %v1656_v58 }
 0x415   : > { %4428 = vmatprep.subr.bf16.mxu0 %v1961_v60  ;;  %4592 = vmatprep.subr.bf16.mxu1 %v1963_v61  ;;  %v2026_v60 = vunpack.c.l.s8.bf16 %v1658_v54  ;;  %v4277_v61 = vrot.slane %v8397_v3, %v8149_v43  ;;  %v2034_v6 = vunpack.c.h.s8.bf16 %v1658_v54 }
 0x417   : > { %v4308_v9 = vmul.f32 %v4277_v61, %v8413_v25  ;;  %v1682_v61 = vld [vmem:[%s8067_s15 + $0x450] sm:$0xff] }
 0x418   : > { %4429 = vmatpush1.bf16.msra.mxu0 %v1960_v2  ;;  %4593 = vmatpush1.bf16.msra.mxu1 %v1962_v4  ;;  %v8460_v2 = vsub.s32 5, %v8143_v41  ;;  %v1665_v4 = vld [vmem:[%s8067_s15 + $0x3c8] sm:$0xff] }
 0x419   : > { %4430 = vmatprep.subr.bf16.mxu0 %v1969_v5  ;;  %4594 = vmatprep.subr.bf16.mxu1 %v1971_v7  ;;  %v1667_v5 = vld [vmem:[%s8067_s15 + $0x3d8] sm:$0xff]  ;;  %v2032_v7 = vunpack.c.h.s8.bf16 %v1656_v58 }
 0x41a   : > { %v4289_v22 = vrot.slane %v8397_v3, %v8460_v2  ;;  %v4338_v25 = vrot.slane %v8401_v8, %v8460_v2 }
 0x41c   : > { %4431 = vmatpush1.bf16.msra.mxu0 %v1968_v12  ;;  %4595 = vmatpush1.bf16.msra.mxu1 %v1970_v14  ;;  %v4326_v12 = vrot.slane %v8401_v8, %v8149_v43  ;;  %v2041_v14 = vunpack.c.l.s8.bf16 %v1665_v4 }
 0x41d   : > { %4432 = vmatprep.subr.bf16.mxu0 %v1977_v17  ;;  %4596 = vmatprep.subr.bf16.mxu1 %v1979_v16  ;;  %v2043_v17 = vunpack.c.l.s8.bf16 %v1667_v5  ;;  %v1664_v16 = vld [vmem:[%s8067_s15 + $0x3c0] sm:$0xff] }
 0x41e   : > { %v2048_v24 = vunpack.c.h.s8.bf16 %v1664_v16 }
 0x420   : > { %4433 = vmatpush1.bf16.msra.mxu0 %v1976_v26  ;;  %4597 = vmatpush1.bf16.msra.mxu1 %v1978_v15  ;;  %v2040_v15 = vunpack.c.l.s8.bf16 %v1664_v16 }
 0x421   : > { %4434 = vmatprep.subr.bf16.mxu0 %v1985_v28  ;;  %4598 = vmatprep.subr.bf16.mxu1 %v1987_v29  ;;  %v2042_v28 = vunpack.c.l.s8.bf16 %v1666_v20  ;;  %v4357_v29 = vadd.f32 %v4326_v12, %v4308_v9  ;;  %v2082_v12 = vunpack.c.h.s8.bf16 %v1682_v61 }
 0x424   : > { %4435 = vmatpush1.bf16.msra.mxu0 %v1984_v33  ;;  %4599 = vmatpush1.bf16.msra.mxu1 %v1986_v19  ;;  %v2049_v33 = vunpack.c.h.s8.bf16 %v1665_v4  ;;  %v2051_v19 = vunpack.c.h.s8.bf16 %v1667_v5 }
 0x425   : > { %4436 = vmatprep.subr.bf16.mxu0 %v1993_v34  ;;  %4600 = vmatprep.subr.bf16.mxu1 %v1995_v35 }
 0x428   : > { %4437 = vmatpush1.bf16.msra.mxu0 %v1992_v10  ;;  %4601 = vmatpush1.bf16.msra.mxu1 %v1994_v11  ;;  %v1675_v10 = vld [vmem:[%s8067_s15 + $0x418] sm:$0xff] }
 0x429   : > { %4438 = vmatprep.subr.bf16.mxu0 %v2001_v18  ;;  %4602 = vmatprep.subr.bf16.mxu1 %v2003_v21 }
 0x42c   : > { %4439 = vmatpush1.bf16.msra.mxu0 %v2000_v31  ;;  %4603 = vmatpush1.bf16.msra.mxu1 %v2002_v40  ;;  %v2050_v31 = vunpack.c.h.s8.bf16 %v1666_v20  ;;  %v4365_v40 = vmax.f32 %v4357_v29, 0.0  ;;  %v1690_v20 = vld [vmem:[%s8067_s15 + $0x490] sm:$0xff]  ;;  %v1697_v29 = vld [vmem:[%s8067_s15 + $0x4c8] sm:$0xff] }
 0x42d   : > { %4440 = vmatprep.subr.bf16.mxu0 %v2009_v46  ;;  %4604 = vmatprep.subr.bf16.mxu1 %v2011_v36  ;;  %v2057_v46 = vunpack.c.l.s8.bf16 %v1673_v63  ;;  %v2059_v36 = vunpack.c.l.s8.bf16 %v1675_v10 }
 0x430   : > { %4441 = vmatpush1.bf16.msra.mxu0 %v2008_v49  ;;  %4605 = vmatpush1.bf16.msra.mxu1 %v2010_v57  ;;  %v1674_v49 = vld [vmem:[%s8067_s15 + $0x410] sm:$0xff] }
 0x431   : > { %4442 = vmatprep.subr.bf16.mxu0 %v2017_v50  ;;  %4606 = vmatprep.subr.bf16.mxu1 %v2019_v51  ;;  %v2056_v50 = vunpack.c.l.s8.bf16 %v1672_v37  ;;  %v8485_v51 = vpack.c.bf16 %v4365_v40, %v4365_v40  ;;  %v2058_v52 = vunpack.c.l.s8.bf16 %v1674_v49  ;;  %v2066_v58 = vunpack.c.h.s8.bf16 %v1674_v49  ;;  %v1706_v49 = vld [vmem:[%s8067_s15 + $0x510] sm:$0xff] }
 0x434   : > { %4443 = vmatpush1.bf16.msra.mxu0 %v2016_v55  ;;  %4607 = vmatpush1.bf16.msra.mxu1 %v2018_v56  ;;  %v2067_v55 = vunpack.c.h.s8.bf16 %v1675_v10  ;;  %v1681_v56 = vld [vmem:[%s8067_s15 + $0x448] sm:$0xff]  ;;  %v1698_v10 = vld [vmem:[%s8067_s15 + $0x4d0] sm:$0xff] }
 0x435   : > { %4444 = vmatprep.subr.bf16.mxu0 %v2025_v1  ;;  %4608 = vmatprep.subr.bf16.mxu1 %v2027_v23  ;;  %v1683_v1 = vld [vmem:[%s8067_s15 + $0x458] sm:$0xff]  ;;  %v2064_v23 = vunpack.c.h.s8.bf16 %v1672_v37  ;;  %v2073_v54 = vunpack.c.l.s8.bf16 %v1681_v56  ;;  %v2081_v4 = vunpack.c.h.s8.bf16 %v1681_v56  ;;  %v1704_v37 = vld [vmem:[%s8067_s15 + $0x500] sm:$0xff]  ;;  %v1713_v56 = vld [vmem:[%s8067_s15 + $0x548] sm:$0xff] }
 0x436   : > { %v2083_v5 = vunpack.c.h.s8.bf16 %v1683_v1 }
 0x438   : > { %4445 = vmatpush1.bf16.msra.mxu0 %v2024_v59  ;;  %4609 = vmatpush1.bf16.msra.mxu1 %v2026_v60  ;;  %v1680_v59 = vld [vmem:[%s8067_s15 + $0x440] sm:$0xff]  ;;  %v2075_v60 = vunpack.c.l.s8.bf16 %v1683_v1  ;;  %v1715_v1 = vld [vmem:[%s8067_s15 + $0x558] sm:$0xff] }
 0x439   : > { %4446 = vmatprep.subr.bf16.mxu0 %v2033_v13  ;;  %4610 = vmatprep.subr.bf16.mxu1 %v2035_v62  ;;  %v2072_v13 = vunpack.c.l.s8.bf16 %v1680_v59  ;;  %v2074_v62 = vunpack.c.l.s8.bf16 %v1682_v61  ;;  %v2080_v9 = vunpack.c.h.s8.bf16 %v1680_v59  ;;  %v1712_v59 = vld [vmem:[%s8067_s15 + $0x540] sm:$0xff]  ;;  %v1714_v61 = vld [vmem:[%s8067_s15 + $0x550] sm:$0xff] }
 0x43c   : > { %4447 = vmatpush1.bf16.msra.mxu0 %v2032_v7  ;;  %4611 = vmatpush1.bf16.msra.mxu1 %v2034_v6  ;;  %v8471_v26 = vpop.f32.mrb[4].mxu0  ;;  %v1689_v7 = vld [vmem:[%s8067_s15 + $0x488] sm:$0xff]  ;;  %v1691_v6 = vld [vmem:[%s8067_s15 + $0x498] sm:$0xff] }
 0x43d   : > { %v8475_v30 = vpop.f32.mrb[4].mxu1  ;;  %v4219_v32 = vpop.f32.mrb[5].mxu0  ;;  %4448 = vmatprep.subr.bf16.mxu0 %v2041_v14  ;;  %4612 = vmatprep.subr.bf16.mxu1 %v2043_v17  ;;  %v2089_v14 = vunpack.c.l.s8.bf16 %v1689_v7  ;;  %v1688_v17 = vld [vmem:[%s8067_s15 + $0x480] sm:$0xff]  ;;  %v2091_v16 = vunpack.c.l.s8.bf16 %v1691_v6 }
 0x43e   : > { %v4311_v34 = vmul.f32 %v4289_v22, %v4219_v32  ;;  %v8477_v35 = vpop.f32.mrb[5].mxu1  ;;  %v4221_v27 = vpop.f32.mrb[6].mxu0  ;;  %v2088_v22 = vunpack.c.l.s8.bf16 %v1688_v17  ;;  %v1699_v32 = vld [vmem:[%s8067_s15 + $0x4d8] sm:$0xff] }
 0x43f   : > { %v4262_v11 = vpop.f32.mrb[6].mxu1  ;;  %v4222_v18 = vpop.f32.mrb[7].mxu0  ;;  %v1696_v27 = vld [vmem:[%s8067_s15 + $0x4c0] sm:$0xff]  ;;  %v2107_v63 = vunpack.c.l.s8.bf16 %v1699_v32 }
 0x440   : > { %v4360_v21 = vadd.f32 %v4338_v25, %v4311_v34  ;;  %v4263_v38 = vpop.f32.mrb[7].mxu1  ;;  %4449 = vmatpush1.bf16.msra.mxu0 %v2040_v15  ;;  %4613 = vmatpush1.bf16.msra.mxu1 %v2042_v28  ;;  %v2090_v25 = vunpack.c.l.s8.bf16 %v1690_v20  ;;  %v2097_v15 = vunpack.c.h.s8.bf16 %v1689_v7  ;;  %v2099_v28 = vunpack.c.h.s8.bf16 %v1691_v6  ;;  %v1721_v7 = vld [vmem:[%s8067_s15 + $0x588] sm:$0xff]  ;;  %v1723_v6 = vld [vmem:[%s8067_s15 + $0x598] sm:$0xff] }
 0x441   : > { %4450 = vmatprep.subr.bf16.mxu0 %v2049_v33  ;;  %4614 = vmatprep.subr.bf16.mxu1 %v2051_v19  ;;  %v2096_v33 = vunpack.c.h.s8.bf16 %v1688_v17  ;;  %v2098_v19 = vunpack.c.h.s8.bf16 %v1690_v20  ;;  %v2105_v34 = vunpack.c.l.s8.bf16 %v1697_v29  ;;  %v2104_v11 = vunpack.c.l.s8.bf16 %v1696_v27 }
 0x442   : > { %v4368_v48 = vmax.f32 %v4360_v21, 0.0  ;;  %v2106_v18 = vunpack.c.l.s8.bf16 %v1698_v10  ;;  %v2113_v21 = vunpack.c.h.s8.bf16 %v1697_v29  ;;  %v2115_v38 = vunpack.c.h.s8.bf16 %v1699_v32 }
 0x443   : > { %v2112_v40 = vunpack.c.h.s8.bf16 %v1696_v27  ;;  %v2153_v17 = vunpack.c.l.s8.bf16 %v1721_v7  ;;  %v2155_v20 = vunpack.c.l.s8.bf16 %v1723_v6  ;;  %v2161_v32 = vunpack.c.h.s8.bf16 %v1721_v7  ;;  %v1731_v27 = vld [vmem:[%s8067_s15 + $0x5d8] sm:$0xff] }
 0x444   : > { %v8483_v57 = vpack.c.bf16 %v4368_v48, %v4368_v48  ;;  %4451 = vmatpush1.bf16.msra.mxu0 %v2048_v24  ;;  %4615 = vmatpush1.bf16.msra.mxu1 %v2050_v31  ;;  %v1705_v24 = vld [vmem:[%s8067_s15 + $0x508] sm:$0xff]  ;;  %v1707_v31 = vld [vmem:[%s8067_s15 + $0x518] sm:$0xff] }
 0x445   : > { %4461 = vmatprep.subr.bf16.mxu0 %v2057_v46  ;;  %4625 = vmatprep.subr.bf16.mxu1 %v2059_v36  ;;  %v2114_v46 = vunpack.c.h.s8.bf16 %v1698_v10  ;;  %v2121_v36 = vunpack.c.l.s8.bf16 %v1705_v24  ;;  %v2123_v48 = vunpack.c.l.s8.bf16 %v1707_v31 }
 0x447   : > { %4453 = vmatmul.mubr.bf16.vlgmr.msra.gmra.mrb[8].mxu0 %v8485_v51  ;;  %4617 = vmatmul.mubr.bf16.vlgmr.msra.gmra.mrb[8].mxu1 %v8485_v51 }
 0x448   : > { %4462 = vmatpush1.bf16.msra.mxu0 %v2056_v50  ;;  %4493 = vmatprep.mubr.bf16.mxu0 %v8483_v57  ;;  %v2120_v50 = vunpack.c.l.s8.bf16 %v1704_v37 }
 0x449   : > { %4626 = vmatpush1.bf16.msra.mxu1 %v2058_v52  ;;  %4657 = vmatprep.mubr.bf16.mxu1 %v8483_v57  ;;  %v2122_v52 = vunpack.c.l.s8.bf16 %v1706_v49 }
 0x44a   : > { %4463 = vmatprep.subr.bf16.mxu0 %v2065_v53  ;;  %4627 = vmatprep.subr.bf16.mxu1 %v2067_v55  ;;  %v2129_v53 = vunpack.c.h.s8.bf16 %v1705_v24  ;;  %v2131_v55 = vunpack.c.h.s8.bf16 %v1707_v31  ;;  %v2171_v24 = vunpack.c.l.s8.bf16 %v1731_v27  ;;  %v1730_v31 = vld [vmem:[%s8067_s15 + $0x5d0] sm:$0xff] }
 0x44c   : > { %4464 = vmatpush1.bf16.msra.mxu0 %v2064_v23  ;;  %v2128_v23 = vunpack.c.h.s8.bf16 %v1704_v37 }
 0x44d   : > { %4628 = vmatpush1.bf16.msra.mxu1 %v2066_v58  ;;  %4465 = vmatprep.subr.bf16.mxu0 %v2073_v54  ;;  %v2130_v58 = vunpack.c.h.s8.bf16 %v1706_v49  ;;  %v2137_v54 = vunpack.c.l.s8.bf16 %v1713_v56  ;;  %v1737_v49 = vld [vmem:[%s8067_s15 + $0x608] sm:$0xff] }
 0x44e   : > { %4629 = vmatprep.subr.bf16.mxu1 %v2075_v60  ;;  %v2139_v60 = vunpack.c.l.s8.bf16 %v1715_v1 }
 0x450   : > { %4466 = vmatpush1.bf16.msra.mxu0 %v2072_v13  ;;  %v2136_v13 = vunpack.c.l.s8.bf16 %v1712_v59 }
 0x451   : > { %4630 = vmatpush1.bf16.msra.mxu1 %v2074_v62  ;;  %4467 = vmatprep.subr.bf16.mxu0 %v2081_v4  ;;  %v2138_v62 = vunpack.c.l.s8.bf16 %v1714_v61  ;;  %v2145_v4 = vunpack.c.h.s8.bf16 %v1713_v56  ;;  %v1736_v56 = vld [vmem:[%s8067_s15 + $0x600] sm:$0xff] }
 0x452   : > { %4631 = vmatprep.subr.bf16.mxu1 %v2083_v5  ;;  %v2147_v5 = vunpack.c.h.s8.bf16 %v1715_v1  ;;  %v2192_v7 = vunpack.c.h.s8.bf16 %v1736_v56 }
 0x454   : > { %4468 = vmatpush1.bf16.msra.mxu0 %v2080_v9  ;;  %v2144_v9 = vunpack.c.h.s8.bf16 %v1712_v59 }
 0x455   : > { %4632 = vmatpush1.bf16.msra.mxu1 %v2082_v12  ;;  %4469 = vmatprep.subr.bf16.mxu0 %v2089_v14  ;;  %v8514_v12 = vsub.s32 4, %v8143_v41  ;;  %v2146_v14 = vunpack.c.h.s8.bf16 %v1714_v61  ;;  %v2193_v61 = vunpack.c.h.s8.bf16 %v1737_v49 }
 0x456   : > { %4633 = vmatprep.subr.bf16.mxu1 %v2091_v16  ;;  %v1720_v16 = vld [vmem:[%s8067_s15 + $0x580] sm:$0xff] }
 0x458   : > { %4470 = vmatpush1.bf16.msra.mxu0 %v2088_v22  ;;  %v1722_v22 = vld [vmem:[%s8067_s15 + $0x590] sm:$0xff] }
 0x459   : > { %4634 = vmatpush1.bf16.msra.mxu1 %v2090_v25  ;;  %4471 = vmatprep.subr.bf16.mxu0 %v2097_v15  ;;  %v8519_v25 = vsub.s32 7, %v8143_v41  ;;  %v2152_v15 = vunpack.c.l.s8.bf16 %v1720_v16  ;;  %v2154_v29 = vunpack.c.l.s8.bf16 %v1722_v22 }
 0x45a   : > { %4635 = vmatprep.subr.bf16.mxu1 %v2099_v28  ;;  %v4285_v28 = vrot.slane %v8397_v3, %v8514_v12 }
 0x45c   : > { %4472 = vmatpush1.bf16.msra.mxu0 %v2096_v33  ;;  %v2163_v33 = vunpack.c.h.s8.bf16 %v1723_v6  ;;  %v4310_v10 = vmul.f32 %v4285_v28, %v8471_v26 }
 0x45d   : > { %4636 = vmatpush1.bf16.msra.mxu1 %v2098_v19  ;;  %4473 = vmatprep.subr.bf16.mxu0 %v2105_v34  ;;  %v1729_v19 = vld [vmem:[%s8067_s15 + $0x5c8] sm:$0xff]  ;;  %v4297_v34 = vrot.slane %v8397_v3, %v8519_v25 }
 0x45e   : > { %4637 = vmatprep.subr.bf16.mxu1 %v2107_v63  ;;  %v2160_v63 = vunpack.c.h.s8.bf16 %v1720_v16  ;;  %v2177_v37 = vunpack.c.h.s8.bf16 %v1729_v19  ;;  %v1746_v16 = vld [vmem:[%s8067_s15 + $0x650] sm:$0xff] }
 0x45f   : > { %v4313_v3 = vmul.f32 %v4297_v34, %v8477_v35 }
 0x460   : > { %4474 = vmatpush1.bf16.msra.mxu0 %v2104_v11  ;;  %v4334_v11 = vrot.slane %v8401_v8, %v8514_v12 }
 0x461   : > { %4638 = vmatpush1.bf16.msra.mxu1 %v2106_v18  ;;  %4475 = vmatprep.subr.bf16.mxu0 %v2113_v21  ;;  %v2162_v18 = vunpack.c.h.s8.bf16 %v1722_v22  ;;  %v2169_v21 = vunpack.c.l.s8.bf16 %v1729_v19  ;;  %v2202_v22 = vunpack.c.l.s8.bf16 %v1746_v16  ;;  %v2210_v19 = vunpack.c.h.s8.bf16 %v1746_v16  ;;  %v1778_v16 = vld [vmem:[%s8067_s15 + $0x750] sm:$0xff] }
 0x462   : > { %4639 = vmatprep.subr.bf16.mxu1 %v2115_v38  ;;  %v1728_v38 = vld [vmem:[%s8067_s15 + $0x5c0] sm:$0xff] }
 0x463   : > { %v2168_v26 = vunpack.c.l.s8.bf16 %v1728_v38 }
 0x464   : > { %4476 = vmatpush1.bf16.msra.mxu0 %v2112_v40  ;;  %v4346_v40 = vrot.slane %v8401_v8, %v8519_v25  ;;  %v2178_v8 = vunpack.c.h.s8.bf16 %v1730_v31 }
 0x465   : > { %4640 = vmatpush1.bf16.msra.mxu1 %v2114_v46  ;;  %4477 = vmatprep.subr.bf16.mxu0 %v2121_v36  ;;  %v4359_v46 = vadd.f32 %v4334_v11, %v4310_v10  ;;  %v2170_v36 = vunpack.c.l.s8.bf16 %v1730_v31  ;;  %v1754_v10 = vld [vmem:[%s8067_s15 + $0x690] sm:$0xff]  ;;  %v1763_v31 = vld [vmem:[%s8067_s15 + $0x6d8] sm:$0xff] }
 0x466   : > { %4641 = vmatprep.subr.bf16.mxu1 %v2123_v48  ;;  %v2179_v48 = vunpack.c.h.s8.bf16 %v1731_v27  ;;  %v1752_v27 = vld [vmem:[%s8067_s15 + $0x680] sm:$0xff] }
 0x467   : > { %v4367_v35 = vmax.f32 %v4359_v46, 0.0  ;;  %v2216_v11 = vunpack.c.l.s8.bf16 %v1752_v27  ;;  %v1760_v46 = vld [vmem:[%s8067_s15 + $0x6c0] sm:$0xff] }
 0x468   : > { %4478 = vmatpush1.bf16.msra.mxu0 %v2120_v50  ;;  %v4362_v50 = vadd.f32 %v4346_v40, %v4313_v3  ;;  %v2224_v3 = vunpack.c.h.s8.bf16 %v1752_v27  ;;  %v2226_v40 = vunpack.c.h.s8.bf16 %v1754_v10 }
 0x469   : > { %4642 = vmatpush1.bf16.msra.mxu1 %v2122_v52  ;;  %4479 = vmatprep.subr.bf16.mxu0 %v2129_v53  ;;  %v1739_v52 = vld [vmem:[%s8067_s15 + $0x618] sm:$0xff]  ;;  %v2176_v53 = vunpack.c.h.s8.bf16 %v1728_v38  ;;  %v8539_v59 = vpack.c.bf16 %v4367_v35, %v4367_v35 }
 0x46a   : > { %4643 = vmatprep.subr.bf16.mxu1 %v2131_v55  ;;  %v2185_v55 = vunpack.c.l.s8.bf16 %v1737_v49  ;;  %v2187_v1 = vunpack.c.l.s8.bf16 %v1739_v52  ;;  %v1771_v35 = vld [vmem:[%s8067_s15 + $0x718] sm:$0xff] }
 0x46c   : > { %4480 = vmatpush1.bf16.msra.mxu0 %v2128_v23  ;;  %v1738_v23 = vld [vmem:[%s8067_s15 + $0x610] sm:$0xff] }
 0x46d   : > { %4644 = vmatpush1.bf16.msra.mxu1 %v2130_v58  ;;  %4481 = vmatprep.subr.bf16.mxu0 %v2137_v54  ;;  %v4370_v58 = vmax.f32 %v4362_v50, 0.0  ;;  %v2184_v54 = vunpack.c.l.s8.bf16 %v1736_v56  ;;  %v2194_v6 = vunpack.c.h.s8.bf16 %v1738_v23 }
 0x46e   : > { %4645 = vmatprep.subr.bf16.mxu1 %v2139_v60  ;;  %v2186_v60 = vunpack.c.l.s8.bf16 %v1738_v23  ;;  %v2251_v23 = vunpack.c.l.s8.bf16 %v1771_v35 }
 0x470   : > { %4482 = vmatpush1.bf16.msra.mxu0 %v2136_v13  ;;  %v1745_v13 = vld [vmem:[%s8067_s15 + $0x648] sm:$0xff] }
 0x471   : > { %4646 = vmatpush1.bf16.msra.mxu1 %v2138_v62  ;;  %4483 = vmatprep.subr.bf16.mxu0 %v2145_v4  ;;  %v8542_v62 = vpack.c.bf16 %v4370_v58, %v4370_v58  ;;  %v2195_v4 = vunpack.c.h.s8.bf16 %v1739_v52  ;;  %v2243_v52 = vunpack.c.h.s8.bf16 %v1763_v31  ;;  %v1770_v58 = vld [vmem:[%s8067_s15 + $0x710] sm:$0xff] }
 0x472   : > { %4647 = vmatprep.subr.bf16.mxu1 %v2147_v5  ;;  %v1747_v5 = vld [vmem:[%s8067_s15 + $0x658] sm:$0xff] }
 0x473   : > { %v2211_v28 = vunpack.c.h.s8.bf16 %v1747_v5 }
 0x474   : > { %4484 = vmatpush1.bf16.msra.mxu0 %v2144_v9  ;;  %v2201_v9 = vunpack.c.l.s8.bf16 %v1745_v13 }
 0x475   : > { %4648 = vmatpush1.bf16.msra.mxu1 %v2146_v14  ;;  %4485 = vmatprep.subr.bf16.mxu0 %v2153_v17  ;;  %v1744_v14 = vld [vmem:[%s8067_s15 + $0x640] sm:$0xff]  ;;  %v2203_v17 = vunpack.c.l.s8.bf16 %v1747_v5  ;;  %v1779_v5 = vld [vmem:[%s8067_s15 + $0x758] sm:$0xff] }
 0x476   : > { %4649 = vmatprep.subr.bf16.mxu1 %v2155_v20  ;;  %v2200_v20 = vunpack.c.l.s8.bf16 %v1744_v14 }
 0x478   : > { %4486 = vmatpush1.bf16.msra.mxu0 %v2152_v15  ;;  %v2209_v15 = vunpack.c.h.s8.bf16 %v1745_v13  ;;  %v2259_v13 = vunpack.c.h.s8.bf16 %v1771_v35 }
 0x479   : > { %4650 = vmatpush1.bf16.msra.mxu1 %v2154_v29  ;;  %4487 = vmatprep.subr.bf16.mxu0 %v2161_v32  ;;  %v1753_v29 = vld [vmem:[%s8067_s15 + $0x688] sm:$0xff]  ;;  %v1755_v32 = vld [vmem:[%s8067_s15 + $0x698] sm:$0xff] }
 0x47a   : > { %4651 = vmatprep.subr.bf16.mxu1 %v2163_v33  ;;  %v2208_v33 = vunpack.c.h.s8.bf16 %v1744_v14  ;;  %v2217_v34 = vunpack.c.l.s8.bf16 %v1753_v29  ;;  %v2227_v38 = vunpack.c.h.s8.bf16 %v1755_v32  ;;  %v1776_v14 = vld [vmem:[%s8067_s15 + $0x740] sm:$0xff] }
 0x47c   : > { %4488 = vmatpush1.bf16.msra.mxu0 %v2160_v63  ;;  %v2219_v63 = vunpack.c.l.s8.bf16 %v1755_v32  ;;  %v1787_v32 = vld [vmem:[%s8067_s15 + $0x798] sm:$0xff] }
 0x47d   : > { %4652 = vmatpush1.bf16.msra.mxu1 %v2162_v18  ;;  %4489 = vmatprep.subr.bf16.mxu0 %v2169_v21  ;;  %v2218_v18 = vunpack.c.l.s8.bf16 %v1754_v10  ;;  %v2225_v21 = vunpack.c.h.s8.bf16 %v1753_v29  ;;  %v1785_v29 = vld [vmem:[%s8067_s15 + $0x788] sm:$0xff]  ;;  %v2283_v10 = vunpack.c.l.s8.bf16 %v1787_v32 }
 0x47e   : > { %4653 = vmatprep.subr.bf16.mxu1 %v2171_v24  ;;  %v1761_v24 = vld [vmem:[%s8067_s15 + $0x6c8] sm:$0xff]  ;;  %v2281_v27 = vunpack.c.l.s8.bf16 %v1785_v29 }
 0x47f   : > { %v2241_v50 = vunpack.c.h.s8.bf16 %v1761_v24 }
 0x480   : > { %4490 = vmatpush1.bf16.msra.mxu0 %v2168_v26  ;;  %v2233_v26 = vunpack.c.l.s8.bf16 %v1761_v24  ;;  %v2289_v24 = vunpack.c.h.s8.bf16 %v1785_v29  ;;  %v1556_v29 = vld [vmem:[%s8067_s15 + $0x60] sm:$0xff] }
 0x481   : > { %4654 = vmatpush1.bf16.msra.mxu1 %v2170_v36  ;;  %4491 = vmatprep.subr.bf16.mxu0 %v2177_v37  ;;  %v2235_v36 = vunpack.c.l.s8.bf16 %v1763_v31  ;;  %v1762_v37 = vld [vmem:[%s8067_s15 + $0x6d0] sm:$0xff]  ;;  %v2291_v31 = vunpack.c.h.s8.bf16 %v1787_v32 }
 0x482   : > { %4655 = vmatprep.subr.bf16.mxu1 %v2179_v48  ;;  %v2232_v48 = vunpack.c.l.s8.bf16 %v1760_v46  ;;  %v2234_v49 = vunpack.c.l.s8.bf16 %v1762_v37 }
 0x484   : > { %4492 = vmatpush1.bf16.msra.mxu0 %v2176_v53  ;;  %v1769_v53 = vld [vmem:[%s8067_s15 + $0x708] sm:$0xff] }
 0x485   : > { %4656 = vmatpush1.bf16.msra.mxu1 %v2178_v8  ;;  %4502 = vmatprep.subr.bf16.mxu0 %v2185_v55  ;;  %v2240_v8 = vunpack.c.h.s8.bf16 %v1760_v46  ;;  %v2242_v55 = vunpack.c.h.s8.bf16 %v1762_v37  ;;  %v2249_v56 = vunpack.c.l.s8.bf16 %v1769_v53 }
 0x486   : > { %4666 = vmatprep.subr.bf16.mxu1 %v2187_v1  ;;  %v1768_v1 = vld [vmem:[%s8067_s15 + $0x700] sm:$0xff] }
 0x487   : > { %4494 = vmatmul.mubr.bf16.vlgmr.msra.gmra.mrb[8].mxu0 %v8539_v59 }
 0x488   : > { %4658 = vmatmul.mubr.bf16.vlgmr.msra.gmra.mrb[8].mxu1 %v8539_v59  ;;  %4503 = vmatpush1.bf16.msra.mxu0 %v2184_v54  ;;  %v2248_v54 = vunpack.c.l.s8.bf16 %v1768_v1 }
 0x489   : > { %4534 = vmatprep.mubr.bf16.mxu0 %v8542_v62  ;;  %4667 = vmatpush1.bf16.msra.mxu1 %v2186_v60  ;;  %v2250_v60 = vunpack.c.l.s8.bf16 %v1770_v58 }
 0x48a   : > { %4698 = vmatprep.mubr.bf16.mxu1 %v8542_v62  ;;  %4504 = vmatprep.subr.bf16.mxu0 %v2193_v61  ;;  %v2257_v61 = vunpack.c.h.s8.bf16 %v1769_v53  ;;  %v1794_v53 = vld [vmem:[%s8067_s15 + $0x7d0] sm:$0xff] }
 0x48b   : > { %4668 = vmatprep.subr.bf16.mxu1 %v2195_v4  ;;  %v1777_v4 = vld [vmem:[%s8067_s15 + $0x748] sm:$0xff] }
 0x48c   : > { %4505 = vmatpush1.bf16.msra.mxu0 %v2192_v7  ;;  %v2256_v7 = vunpack.c.h.s8.bf16 %v1768_v1  ;;  %v1549_v1 = vld [vmem:[%s8067_s15 + $0x28] sm:$0xff] }
 0x48d   : > { %4669 = vmatpush1.bf16.msra.mxu1 %v2194_v6  ;;  %4506 = vmatprep.subr.bf16.mxu0 %v2201_v9  ;;  %v2258_v6 = vunpack.c.h.s8.bf16 %v1770_v58  ;;  %v2265_v9 = vunpack.c.l.s8.bf16 %v1777_v4 }
 0x48e   : > { %4670 = vmatprep.subr.bf16.mxu1 %v2203_v17  ;;  %v2267_v17 = vunpack.c.l.s8.bf16 %v1779_v5 }
 0x490   : > { %4507 = vmatpush1.bf16.msra.mxu0 %v2200_v20  ;;  %v2264_v20 = vunpack.c.l.s8.bf16 %v1776_v14 }
 0x491   : > { %4671 = vmatpush1.bf16.msra.mxu1 %v2202_v22  ;;  %4508 = vmatprep.subr.bf16.mxu0 %v2209_v15  ;;  %v2266_v22 = vunpack.c.l.s8.bf16 %v1778_v16  ;;  %v2273_v15 = vunpack.c.h.s8.bf16 %v1777_v4 }
 0x492   : > { %4672 = vmatprep.subr.bf16.mxu1 %v2211_v28  ;;  %v2275_v28 = vunpack.c.h.s8.bf16 %v1779_v5  ;;  %v1550_v5 = vld [vmem:[%s8067_s15 + $0x30] sm:$0xff] }
 0x494   : > { %4509 = vmatpush1.bf16.msra.mxu0 %v2208_v33  ;;  %v2272_v33 = vunpack.c.h.s8.bf16 %v1776_v14  ;;  %v1813_v14 = vunpack.c.h.s8.bf16 %v1549_v1 }
 0x495   : > { %4673 = vmatpush1.bf16.msra.mxu1 %v2210_v19  ;;  %4510 = vmatprep.subr.bf16.mxu0 %v2217_v34  ;;  %v8570_v19 = vsub.s32 6, %v8143_v41  ;;  %v2274_v34 = vunpack.c.h.s8.bf16 %v1778_v16 }
 0x496   : > { %4674 = vmatprep.subr.bf16.mxu1 %v2219_v63  ;;  %v1784_v63 = vld [vmem:[%s8067_s15 + $0x780] sm:$0xff] }
 0x498   : > { %4511 = vmatpush1.bf16.msra.mxu0 %v2216_v11  ;;  %v1786_v11 = vld [vmem:[%s8067_s15 + $0x790] sm:$0xff] }
 0x499   : > { %4675 = vmatpush1.bf16.msra.mxu1 %v2218_v18  ;;  %4512 = vmatprep.subr.bf16.mxu0 %v2225_v21  ;;  %v2280_v18 = vunpack.c.l.s8.bf16 %v1784_v63  ;;  %v6976_v21 = vld [vmem:[%s901_s2] sm:$0xff]  ;;  %v2282_v41 = vunpack.c.l.s8.bf16 %v1786_v11 }
 0x49a   : > { %4676 = vmatprep.subr.bf16.mxu1 %v2227_v38  ;;  %v4293_v38 = vrot.slane %v6976_v21, %v8570_v19  ;;  %v1828_v21 = vunpack.c.h.s8.bf16 %v1556_v29 }
 0x49c   : > { %4513 = vmatpush1.bf16.msra.mxu0 %v2224_v3  ;;  %v1793_v3 = vld [vmem:[%s8067_s15 + $0x7c8] sm:$0xff]  ;;  %v4312_v46 = vmul.f32 %v4293_v38, %v8475_v30  ;;  %v2298_v30 = vunpack.c.l.s8.bf16 %v1794_v53 }
 0x49d   : > { %4677 = vmatpush1.bf16.msra.mxu1 %v2226_v40  ;;  %4514 = vmatprep.subr.bf16.mxu0 %v2233_v26  ;;  %v1795_v40 = vld [vmem:[%s8067_s15 + $0x7d8] sm:$0xff]  ;;  %v2288_v26 = vunpack.c.h.s8.bf16 %v1784_v63 }
 0x49e   : > { %4678 = vmatprep.subr.bf16.mxu1 %v2235_v36  ;;  %v6977_v36 = vld [vmem:[%s910_s20] sm:$0xff] }
 0x49f   : > { %v4342_v37 = vrot.slane %v6977_v36, %v8570_v19  ;;  %v1573_v36 = vld [vmem:[%s8067_s15 + $0xe8] sm:$0xff] }
 0x4a0   : > { %4515 = vmatpush1.bf16.msra.mxu0 %v2232_v48  ;;  %v2290_v48 = vunpack.c.h.s8.bf16 %v1786_v11  ;;  %v1565_v11 = vld [vmem:[%s8067_s15 + $0xa8] sm:$0xff] }
 0x4a1   : > { %4679 = vmatpush1.bf16.msra.mxu1 %v2234_v49  ;;  %4516 = vmatprep.subr.bf16.mxu0 %v2241_v50  ;;  %v2297_v49 = vunpack.c.l.s8.bf16 %v1793_v3  ;;  %v1792_v50 = vld [vmem:[%s8067_s15 + $0x7c0] sm:$0xff]  ;;  %v1837_v38 = vunpack.c.l.s8.bf16 %v1565_v11 }
 0x4a2   : > { %4680 = vmatprep.subr.bf16.mxu1 %v2243_v52  ;;  %v2299_v52 = vunpack.c.l.s8.bf16 %v1795_v40  ;;  %v2296_v35 = vunpack.c.l.s8.bf16 %v1792_v50  ;;  %v2304_v58 = vunpack.c.h.s8.bf16 %v1792_v50  ;;  %v1853_v50 = vunpack.c.l.s8.bf16 %v1573_v36 }
 0x4a4   : > { %4517 = vmatpush1.bf16.msra.mxu0 %v2240_v8  ;;  %v4361_v8 = vadd.f32 %v4342_v37, %v4312_v46  ;;  %v1575_v37 = vld [vmem:[%s8067_s15 + $0xf8] sm:$0xff] }
 0x4a5   : > { %4681 = vmatpush1.bf16.msra.mxu1 %v2242_v55  ;;  %4518 = vmatprep.subr.bf16.mxu0 %v2249_v56  ;;  %v2305_v55 = vunpack.c.h.s8.bf16 %v1793_v3  ;;  %v2307_v56 = vunpack.c.h.s8.bf16 %v1795_v40 }
 0x4a6   : > { %4682 = vmatprep.subr.bf16.mxu1 %v2251_v23  ;;  %v1551_v23 = vld [vmem:[%s8067_s15 + $0x38] sm:$0xff] }
 0x4a7   : > { %v1807_v4 = vunpack.c.l.s8.bf16 %v1551_v23  ;;  %v1815_v16 = vunpack.c.h.s8.bf16 %v1551_v23  ;;  %v1583_v23 = vld [vmem:[%s8067_s15 + $0x138] sm:$0xff] }
 0x4a8   : > { %4519 = vmatpush1.bf16.msra.mxu0 %v2248_v54  ;;  %v4369_v54 = vmax.f32 %v4361_v8, 0.0 }
 0x4a9   : > { %4683 = vmatpush1.bf16.msra.mxu1 %v2250_v60  ;;  %4520 = vmatprep.subr.bf16.mxu0 %v2257_v61  ;;  %v2306_v60 = vunpack.c.h.s8.bf16 %v1794_v53  ;;  %v1805_v61 = vunpack.c.l.s8.bf16 %v1549_v1  ;;  %v1855_v53 = vunpack.c.l.s8.bf16 %v1575_v37  ;;  %v1581_v1 = vld [vmem:[%s8067_s15 + $0x128] sm:$0xff] }
 0x4aa   : > { %4684 = vmatprep.subr.bf16.mxu1 %v2259_v13  ;;  %v1548_v13 = vld [vmem:[%s8067_s15 + $0x20] sm:$0xff] }
 0x4ac   : > { %4521 = vmatpush1.bf16.msra.mxu0 %v2256_v7  ;;  %v1804_v7 = vunpack.c.l.s8.bf16 %v1548_v13 }
 0x4ad   : > { %4685 = vmatpush1.bf16.msra.mxu1 %v2258_v6  ;;  %4522 = vmatprep.subr.bf16.mxu0 %v2265_v9  ;;  %v8589_v6 = vpack.c.bf16 %v4369_v54, %v4369_v54  ;;  %v1806_v9 = vunpack.c.l.s8.bf16 %v1550_v5 }
 0x4ae   : > { %4686 = vmatprep.subr.bf16.mxu1 %v2267_v17  ;;  %v1557_v17 = vld [vmem:[%s8067_s15 + $0x68] sm:$0xff] }
 0x4af   : > { %v1829_v63 = vunpack.c.h.s8.bf16 %v1557_v17 }
 0x4b0   : > { %4523 = vmatpush1.bf16.msra.mxu0 %v2264_v20  ;;  %v1559_v20 = vld [vmem:[%s8067_s15 + $0x78] sm:$0xff] }
 0x4b1   : > { %4687 = vmatpush1.bf16.msra.mxu1 %v2266_v22  ;;  %4524 = vmatprep.subr.bf16.mxu0 %v2273_v15  ;;  %v1812_v22 = vunpack.c.h.s8.bf16 %v1548_v13  ;;  %v1814_v15 = vunpack.c.h.s8.bf16 %v1550_v5  ;;  %v1823_v32 = vunpack.c.l.s8.bf16 %v1559_v20  ;;  %v1871_v13 = vunpack.c.l.s8.bf16 %v1583_v23 }
 0x4b2   : > { %4688 = vmatprep.subr.bf16.mxu1 %v2275_v28  ;;  %v1821_v28 = vunpack.c.l.s8.bf16 %v1557_v17  ;;  %v1589_v17 = vld [vmem:[%s8067_s15 + $0x168] sm:$0xff] }
 0x4b4   : > { %4525 = vmatpush1.bf16.msra.mxu0 %v2272_v33  ;;  %v1558_v33 = vld [vmem:[%s8067_s15 + $0x70] sm:$0xff] }
 0x4b5   : > { %4689 = vmatpush1.bf16.msra.mxu1 %v2274_v34  ;;  %4526 = vmatprep.subr.bf16.mxu0 %v2281_v27  ;;  %v1820_v34 = vunpack.c.l.s8.bf16 %v1556_v29  ;;  %v1822_v27 = vunpack.c.l.s8.bf16 %v1558_v33 }
 0x4b6   : > { %4690 = vmatprep.subr.bf16.mxu1 %v2283_v10  ;;  %v1831_v10 = vunpack.c.h.s8.bf16 %v1559_v20 }
 0x4b8   : > { %4527 = vmatpush1.bf16.msra.mxu0 %v2280_v18  ;;  %v1567_v18 = vld [vmem:[%s8067_s15 + $0xb8] sm:$0xff] }
 0x4b9   : > { %4691 = vmatpush1.bf16.msra.mxu1 %v2282_v41  ;;  %4528 = vmatprep.subr.bf16.mxu0 %v2289_v24  ;;  %v1564_v41 = vld [vmem:[%s8067_s15 + $0xa0] sm:$0xff]  ;;  %v1839_v24 = vunpack.c.l.s8.bf16 %v1567_v18  ;;  %v1847_v46 = vunpack.c.h.s8.bf16 %v1567_v18 }
 0x4ba   : > { %4692 = vmatprep.subr.bf16.mxu1 %v2291_v31  ;;  %v1566_v31 = vld [vmem:[%s8067_s15 + $0xb0] sm:$0xff]  ;;  %v1836_v3 = vunpack.c.l.s8.bf16 %v1564_v41 }
 0x4bb   : > { %v1838_v40 = vunpack.c.l.s8.bf16 %v1566_v31 }
 0x4bc   : > { %4529 = vmatpush1.bf16.msra.mxu0 %v2288_v26  ;;  %v1845_v26 = vunpack.c.h.s8.bf16 %v1565_v11  ;;  %v1599_v11 = vld [vmem:[%s8067_s15 + $0x1b8] sm:$0xff] }
 0x4bd   : > { %4693 = vmatpush1.bf16.msra.mxu1 %v2290_v48  ;;  %4530 = vmatprep.subr.bf16.mxu0 %v2297_v49  ;;  %v1844_v48 = vunpack.c.h.s8.bf16 %v1564_v41  ;;  %v1846_v49 = vunpack.c.h.s8.bf16 %v1566_v31  ;;  %v1903_v41 = vunpack.c.l.s8.bf16 %v1599_v11 }
 0x4be   : > { %4694 = vmatprep.subr.bf16.mxu1 %v2299_v52  ;;  %v1572_v52 = vld [vmem:[%s8067_s15 + $0xe0] sm:$0xff] }
 0x4bf   : > { %v1852_v8 = vunpack.c.l.s8.bf16 %v1572_v52 }
 0x4c0   : > { %4531 = vmatpush1.bf16.msra.mxu0 %v2296_v35  ;;  %v1574_v35 = vld [vmem:[%s8067_s15 + $0xf0] sm:$0xff] }
 0x4c1   : > { %4695 = vmatpush1.bf16.msra.mxu1 %v2298_v30  ;;  %4532 = vmatprep.subr.bf16.mxu0 %v2305_v55  ;;  %v1854_v30 = vunpack.c.l.s8.bf16 %v1574_v35  ;;  %v1861_v55 = vunpack.c.h.s8.bf16 %v1573_v36  ;;  %v1862_v54 = vunpack.c.h.s8.bf16 %v1574_v35  ;;  %v1607_v36 = vld [vmem:[%s8067_s15 + $0x1f8] sm:$0xff] }
 0x4c2   : > { %4696 = vmatprep.subr.bf16.mxu1 %v2307_v56  ;;  %v1863_v56 = vunpack.c.h.s8.bf16 %v1575_v37 }
 0x4c4   : > { %4533 = vmatpush1.bf16.msra.mxu0 %v2304_v58  ;;  %v1860_v58 = vunpack.c.h.s8.bf16 %v1572_v52  ;;  %v1919_v52 = vunpack.c.l.s8.bf16 %v1607_v36 }
 0x4c5   : > { %4697 = vmatpush1.bf16.msra.mxu1 %v2306_v60  ;;  %4707 = vmatprep.subr.bf16.mxu0 %v1805_v61  ;;  %v1869_v60 = vunpack.c.l.s8.bf16 %v1581_v1  ;;  %v1580_v61 = vld [vmem:[%s8067_s15 + $0x120] sm:$0xff] }
 0x4c6   : > { %4871 = vmatprep.subr.bf16.mxu1 %v1807_v4  ;;  %v1582_v4 = vld [vmem:[%s8067_s15 + $0x130] sm:$0xff]  ;;  %v1868_v5 = vunpack.c.l.s8.bf16 %v1580_v61  ;;  %v1876_v20 = vunpack.c.h.s8.bf16 %v1580_v61 }
 0x4c7   : > { %4535 = vmatmul.mubr.bf16.vlgmr.msra.gmra.mrb[8].mxu0 %v8589_v6 }
 0x4c8   : > { %4699 = vmatmul.mubr.bf16.vlgmr.msra.gmra.mrb[8].mxu1 %v8589_v6  ;;  %4708 = vmatpush1.bf16.msra.mxu0 %v1804_v7  ;;  %v1870_v7 = vunpack.c.l.s8.bf16 %v1582_v4 }
 0x4c9   : > { %4739 = vmatprep.mubr.bf16.mxu0 %v8419_v0  ;;  %4872 = vmatpush1.bf16.msra.mxu1 %v1806_v9  ;;  %v1877_v9 = vunpack.c.h.s8.bf16 %v1581_v1  ;;  %v1615_v1 = vld [vmem:[%s8067_s15 + $0x238] sm:$0xff] }
 0x4ca   : > { %4903 = vmatprep.mubr.bf16.mxu1 %v8419_v0  ;;  %4709 = vmatprep.subr.bf16.mxu0 %v1813_v14  ;;  %v1830_v0 = vunpack.c.h.s8.bf16 %v1558_v33  ;;  %v1879_v14 = vunpack.c.h.s8.bf16 %v1583_v23  ;;  %v1935_v61 = vunpack.c.l.s8.bf16 %v1615_v1 }
 0x4cb   : > { %4873 = vmatprep.subr.bf16.mxu1 %v1815_v16  ;;  %v1591_v16 = vld [vmem:[%s8067_s15 + $0x178] sm:$0xff] }
 0x4cc   : > { %4710 = vmatpush1.bf16.msra.mxu0 %v1812_v22  ;;  %v1878_v22 = vunpack.c.h.s8.bf16 %v1582_v4  ;;  %v1887_v29 = vunpack.c.l.s8.bf16 %v1591_v16 }
 0x4cd   : > { %4874 = vmatpush1.bf16.msra.mxu1 %v1814_v15  ;;  %4711 = vmatprep.subr.bf16.mxu0 %v1821_v28  ;;  %v1885_v15 = vunpack.c.l.s8.bf16 %v1589_v17  ;;  %v1588_v28 = vld [vmem:[%s8067_s15 + $0x160] sm:$0xff] }
 0x4ce   : > { %4875 = vmatprep.subr.bf16.mxu1 %v1823_v32  ;;  %v1590_v32 = vld [vmem:[%s8067_s15 + $0x170] sm:$0xff]  ;;  %v1884_v33 = vunpack.c.l.s8.bf16 %v1588_v28  ;;  %v1892_v18 = vunpack.c.h.s8.bf16 %v1588_v28 }
 0x4d0   : > { %4712 = vmatpush1.bf16.msra.mxu0 %v1820_v34  ;;  %v1886_v34 = vunpack.c.l.s8.bf16 %v1590_v32 }
 0x4d1   : > { %4876 = vmatpush1.bf16.msra.mxu1 %v1822_v27  ;;  %4713 = vmatprep.subr.bf16.mxu0 %v1829_v63  ;;  %v1893_v27 = vunpack.c.h.s8.bf16 %v1589_v17  ;;  %v1895_v63 = vunpack.c.h.s8.bf16 %v1591_v16  ;;  %v1623_v17 = vld [vmem:[%s8067_s15 + $0x278] sm:$0xff] }
 0x4d2   : > { %4877 = vmatprep.subr.bf16.mxu1 %v1831_v10  ;;  %v1597_v10 = vld [vmem:[%s8067_s15 + $0x1a8] sm:$0xff]  ;;  %v1951_v28 = vunpack.c.l.s8.bf16 %v1623_v17 }
 0x4d4   : > { %4714 = vmatpush1.bf16.msra.mxu0 %v1828_v21  ;;  %v1894_v21 = vunpack.c.h.s8.bf16 %v1590_v32 }
 0x4d5   : > { %4878 = vmatpush1.bf16.msra.mxu1 %v1830_v0  ;;  %4715 = vmatprep.subr.bf16.mxu0 %v1837_v38  ;;  %v1901_v0 = vunpack.c.l.s8.bf16 %v1597_v10  ;;  %v1596_v38 = vld [vmem:[%s8067_s15 + $0x1a0] sm:$0xff] }
 0x4d6   : > { %4879 = vmatprep.subr.bf16.mxu1 %v1839_v24  ;;  %v1598_v24 = vld [vmem:[%s8067_s15 + $0x1b0] sm:$0xff]  ;;  %v1900_v31 = vunpack.c.l.s8.bf16 %v1596_v38  ;;  %v1908_v37 = vunpack.c.h.s8.bf16 %v1596_v38 }
 0x4d8   : > { %4716 = vmatpush1.bf16.msra.mxu0 %v1836_v3  ;;  %v1902_v3 = vunpack.c.l.s8.bf16 %v1598_v24 }
 0x4d9   : > { %4880 = vmatpush1.bf16.msra.mxu1 %v1838_v40  ;;  %4717 = vmatprep.subr.bf16.mxu0 %v1845_v26  ;;  %v1909_v40 = vunpack.c.h.s8.bf16 %v1597_v10  ;;  %v1911_v26 = vunpack.c.h.s8.bf16 %v1599_v11 }
 0x4da   : > { %4881 = vmatprep.subr.bf16.mxu1 %v1847_v46  ;;  %v1605_v46 = vld [vmem:[%s8067_s15 + $0x1e8] sm:$0xff] }
 0x4dc   : > { %4718 = vmatpush1.bf16.msra.mxu0 %v1844_v48  ;;  %v1910_v48 = vunpack.c.h.s8.bf16 %v1598_v24 }
 0x4dd   : > { %4882 = vmatpush1.bf16.msra.mxu1 %v1846_v49  ;;  %4719 = vmatprep.subr.bf16.mxu0 %v1853_v50  ;;  %v1917_v49 = vunpack.c.l.s8.bf16 %v1605_v46  ;;  %v1604_v50 = vld [vmem:[%s8067_s15 + $0x1e0] sm:$0xff] }
 0x4de   : > { %4883 = vmatprep.subr.bf16.mxu1 %v1855_v53  ;;  %v1606_v53 = vld [vmem:[%s8067_s15 + $0x1f0] sm:$0xff]  ;;  %v1916_v35 = vunpack.c.l.s8.bf16 %v1604_v50  ;;  %v1924_v23 = vunpack.c.h.s8.bf16 %v1604_v50 }
 0x4e0   : > { %4720 = vmatpush1.bf16.msra.mxu0 %v1852_v8  ;;  %v1918_v8 = vunpack.c.l.s8.bf16 %v1606_v53 }
 0x4e1   : > { %4884 = vmatpush1.bf16.msra.mxu1 %v1854_v30  ;;  %4721 = vmatprep.subr.bf16.mxu0 %v1861_v55  ;;  %v1925_v30 = vunpack.c.h.s8.bf16 %v1605_v46  ;;  %v1927_v55 = vunpack.c.h.s8.bf16 %v1607_v36 }
 0x4e2   : > { %4885 = vmatprep.subr.bf16.mxu1 %v1863_v56  ;;  %v1613_v56 = vld [vmem:[%s8067_s15 + $0x228] sm:$0xff] }
 0x4e4   : > { %4722 = vmatpush1.bf16.msra.mxu0 %v1860_v58  ;;  %v1926_v58 = vunpack.c.h.s8.bf16 %v1606_v53 }
 0x4e5   : > { %4886 = vmatpush1.bf16.msra.mxu1 %v1862_v54  ;;  %4723 = vmatprep.subr.bf16.mxu0 %v1869_v60  ;;  %v1933_v54 = vunpack.c.l.s8.bf16 %v1613_v56  ;;  %v1612_v60 = vld [vmem:[%s8067_s15 + $0x220] sm:$0xff] }
 0x4e6   : > { %4887 = vmatprep.subr.bf16.mxu1 %v1871_v13  ;;  %v1614_v13 = vld [vmem:[%s8067_s15 + $0x230] sm:$0xff]  ;;  %v1932_v4 = vunpack.c.l.s8.bf16 %v1612_v60  ;;  %v1940_v16 = vunpack.c.h.s8.bf16 %v1612_v60 }
 0x4e8   : > { %4724 = vmatpush1.bf16.msra.mxu0 %v1868_v5  ;;  %v1934_v5 = vunpack.c.l.s8.bf16 %v1614_v13 }
 0x4e9   : > { %4888 = vmatpush1.bf16.msra.mxu1 %v1870_v7  ;;  %4725 = vmatprep.subr.bf16.mxu0 %v1877_v9  ;;  %v1941_v7 = vunpack.c.h.s8.bf16 %v1613_v56  ;;  %v1621_v9 = vld [vmem:[%s8067_s15 + $0x268] sm:$0xff] }
 0x4ea   : > { %4889 = vmatprep.subr.bf16.mxu1 %v1879_v14  ;;  %v1943_v14 = vunpack.c.h.s8.bf16 %v1615_v1 }
 0x4ec   : > { %4726 = vmatpush1.bf16.msra.mxu0 %v1876_v20  ;;  %v1942_v20 = vunpack.c.h.s8.bf16 %v1614_v13 }
 0x4ed   : > { %4890 = vmatpush1.bf16.msra.mxu1 %v1878_v22  ;;  %4727 = vmatprep.subr.bf16.mxu0 %v1885_v15  ;;  %v1949_v22 = vunpack.c.l.s8.bf16 %v1621_v9  ;;  %v1620_v15 = vld [vmem:[%s8067_s15 + $0x260] sm:$0xff] }
 0x4ee   : > { %4891 = vmatprep.subr.bf16.mxu1 %v1887_v29  ;;  %v1622_v29 = vld [vmem:[%s8067_s15 + $0x270] sm:$0xff]  ;;  %v1948_v32 = vunpack.c.l.s8.bf16 %v1620_v15  ;;  %v1956_v10 = vunpack.c.h.s8.bf16 %v1620_v15 }
 0x4f0   : > { %4728 = vmatpush1.bf16.msra.mxu0 %v1884_v33  ;;  %v1957_v33 = vunpack.c.h.s8.bf16 %v1621_v9 }
 0x4f1   : > { %4892 = vmatpush1.bf16.msra.mxu1 %v1886_v34  ;;  %4729 = vmatprep.subr.bf16.mxu0 %v1893_v27  ;;  %v1959_v34 = vunpack.c.h.s8.bf16 %v1623_v17  ;;  %v1629_v27 = vld [vmem:[%s8067_s15 + $0x2a8] sm:$0xff] }
 0x4f2   : > { %4893 = vmatprep.subr.bf16.mxu1 %v1895_v63  ;;  %v1631_v63 = vld [vmem:[%s8067_s15 + $0x2b8] sm:$0xff]  ;;  %v1965_v11 = vunpack.c.l.s8.bf16 %v1629_v27  ;;  %v1973_v24 = vunpack.c.h.s8.bf16 %v1629_v27 }
 0x4f4   : > { %4730 = vmatpush1.bf16.msra.mxu0 %v1892_v18  ;;  %v1628_v18 = vld [vmem:[%s8067_s15 + $0x2a0] sm:$0xff] }
 0x4f5   : > { %4894 = vmatpush1.bf16.msra.mxu1 %v1894_v21  ;;  %4731 = vmatprep.subr.bf16.mxu0 %v1901_v0  ;;  %v1967_v21 = vunpack.c.l.s8.bf16 %v1631_v63  ;;  %v1630_v0 = vld [vmem:[%s8067_s15 + $0x2b0] sm:$0xff]  ;;  %v1964_v38 = vunpack.c.l.s8.bf16 %v1628_v18 }
 0x4f6   : > { %4895 = vmatprep.subr.bf16.mxu1 %v1903_v41  ;;  %v1966_v41 = vunpack.c.l.s8.bf16 %v1630_v0  ;;  %v1974_v46 = vunpack.c.h.s8.bf16 %v1630_v0 }
 0x4f8   : > { %4732 = vmatpush1.bf16.msra.mxu0 %v1900_v31  ;;  %v1975_v31 = vunpack.c.h.s8.bf16 %v1631_v63 }
 0x4f9   : > { %4896 = vmatpush1.bf16.msra.mxu1 %v1902_v3  ;;  %4733 = vmatprep.subr.bf16.mxu0 %v1909_v40  ;;  %v1637_v3 = vld [vmem:[%s8067_s15 + $0x2e8] sm:$0xff]  ;;  %v1639_v40 = vld [vmem:[%s8067_s15 + $0x2f8] sm:$0xff] }
 0x4fa   : > { %4897 = vmatprep.subr.bf16.mxu1 %v1911_v26  ;;  %v1972_v26 = vunpack.c.h.s8.bf16 %v1628_v18  ;;  %v1981_v36 = vunpack.c.l.s8.bf16 %v1637_v3  ;;  %v1989_v53 = vunpack.c.h.s8.bf16 %v1637_v3 }
 0x4fc   : > { %4734 = vmatpush1.bf16.msra.mxu0 %v1908_v37  ;;  %v1636_v37 = vld [vmem:[%s8067_s15 + $0x2e0] sm:$0xff] }
 0x4fd   : > { %4898 = vmatpush1.bf16.msra.mxu1 %v1910_v48  ;;  %4735 = vmatprep.subr.bf16.mxu0 %v1917_v49  ;;  %v1983_v48 = vunpack.c.l.s8.bf16 %v1639_v40  ;;  %v1638_v49 = vld [vmem:[%s8067_s15 + $0x2f0] sm:$0xff]  ;;  %v1980_v50 = vunpack.c.l.s8.bf16 %v1636_v37 }
 0x4fe   : > { %4899 = vmatprep.subr.bf16.mxu1 %v1919_v52  ;;  %v1982_v52 = vunpack.c.l.s8.bf16 %v1638_v49  ;;  %v1990_v56 = vunpack.c.h.s8.bf16 %v1638_v49 }
 0x500   : > { %4736 = vmatpush1.bf16.msra.mxu0 %v1916_v35  ;;  %v1991_v35 = vunpack.c.h.s8.bf16 %v1639_v40 }
 0x501   : > { %4900 = vmatpush1.bf16.msra.mxu1 %v1918_v8  ;;  %4737 = vmatprep.subr.bf16.mxu0 %v1925_v30  ;;  %v1645_v8 = vld [vmem:[%s8067_s15 + $0x328] sm:$0xff]  ;;  %v1647_v30 = vld [vmem:[%s8067_s15 + $0x338] sm:$0xff] }
 0x502   : > { %4901 = vmatprep.subr.bf16.mxu1 %v1927_v55  ;;  %v1988_v55 = vunpack.c.h.s8.bf16 %v1636_v37  ;;  %v1997_v1 = vunpack.c.l.s8.bf16 %v1645_v8  ;;  %v2005_v13 = vunpack.c.h.s8.bf16 %v1645_v8 }
 0x504   : > { %4738 = vmatpush1.bf16.msra.mxu0 %v1924_v23  ;;  %v1644_v23 = vld [vmem:[%s8067_s15 + $0x320] sm:$0xff] }
 0x505   : > { %4902 = vmatpush1.bf16.msra.mxu1 %v1926_v58  ;;  %4748 = vmatprep.subr.bf16.mxu0 %v1933_v54  ;;  %v1999_v58 = vunpack.c.l.s8.bf16 %v1647_v30  ;;  %v1646_v54 = vld [vmem:[%s8067_s15 + $0x330] sm:$0xff]  ;;  %v1996_v60 = vunpack.c.l.s8.bf16 %v1644_v23  ;;  %v2004_v9 = vunpack.c.h.s8.bf16 %v1644_v23 }
 0x506   : > { %4912 = vmatprep.subr.bf16.mxu1 %v1935_v61  ;;  %v1998_v61 = vunpack.c.l.s8.bf16 %v1646_v54 }
 0x507   : > { %4740 = vmatmul.mubr.bf16.vlgmr.msra.gmra.mrb[12].mxu0 %v8421_v39 }
 0x508   : > { %4904 = vmatmul.mubr.bf16.vlgmr.msra.gmra.mrb[12].mxu1 %v8421_v39  ;;  %4749 = vmatpush1.bf16.msra.mxu0 %v1932_v4  ;;  %v1950_v39 = vunpack.c.l.s8.bf16 %v1622_v29  ;;  %v2007_v4 = vunpack.c.h.s8.bf16 %v1647_v30 }
 0x509   : > { %4780 = vmatprep.mubr.bf16.mxu0 %v8429_v47  ;;  %4913 = vmatpush1.bf16.msra.mxu1 %v1934_v5  ;;  %v1653_v5 = vld [vmem:[%s8067_s15 + $0x368] sm:$0xff] }
 0x50a   : > { %4944 = vmatprep.mubr.bf16.mxu1 %v8429_v47  ;;  %4750 = vmatprep.subr.bf16.mxu0 %v1941_v7  ;;  %v1958_v47 = vunpack.c.h.s8.bf16 %v1622_v29  ;;  %v1655_v7 = vld [vmem:[%s8067_s15 + $0x378] sm:$0xff]  ;;  %v2013_v17 = vunpack.c.l.s8.bf16 %v1653_v5  ;;  %v2021_v29 = vunpack.c.h.s8.bf16 %v1653_v5 }
 0x50b   : > { %4914 = vmatprep.subr.bf16.mxu1 %v1943_v14  ;;  %v2006_v14 = vunpack.c.h.s8.bf16 %v1646_v54 }
 0x50c   : > { %4751 = vmatpush1.bf16.msra.mxu0 %v1940_v16  ;;  %v1652_v16 = vld [vmem:[%s8067_s15 + $0x360] sm:$0xff] }
 0x50d   : > { %4915 = vmatpush1.bf16.msra.mxu1 %v1942_v20  ;;  %4752 = vmatprep.subr.bf16.mxu0 %v1949_v22  ;;  %v2015_v20 = vunpack.c.l.s8.bf16 %v1655_v7  ;;  %v1654_v22 = vld [vmem:[%s8067_s15 + $0x370] sm:$0xff]  ;;  %v2012_v15 = vunpack.c.l.s8.bf16 %v1652_v16 }
 0x50e   : > { %4916 = vmatprep.subr.bf16.mxu1 %v1951_v28  ;;  %v2014_v28 = vunpack.c.l.s8.bf16 %v1654_v22  ;;  %v2022_v27 = vunpack.c.h.s8.bf16 %v1654_v22 }
 0x510   : > { %4753 = vmatpush1.bf16.msra.mxu0 %v1948_v32  ;;  %v2023_v32 = vunpack.c.h.s8.bf16 %v1655_v7 }
 0x511   : > { %4917 = vmatpush1.bf16.msra.mxu1 %v1950_v39  ;;  %4754 = vmatprep.subr.bf16.mxu0 %v1957_v33  ;;  %v1661_v39 = vld [vmem:[%s8067_s15 + $0x3a8] sm:$0xff]  ;;  %v1663_v33 = vld [vmem:[%s8067_s15 + $0x3b8] sm:$0xff] }
 0x512   : > { %4918 = vmatprep.subr.bf16.mxu1 %v1959_v34  ;;  %v2020_v34 = vunpack.c.h.s8.bf16 %v1652_v16  ;;  %v2029_v63 = vunpack.c.l.s8.bf16 %v1661_v39  ;;  %v2037_v0 = vunpack.c.h.s8.bf16 %v1661_v39  ;;  %v1692_v39 = vld [vmem:[%s8067_s15 + $0x4a0] sm:$0xff] }
 0x514   : > { %4755 = vmatpush1.bf16.msra.mxu0 %v1956_v10  ;;  %v1660_v10 = vld [vmem:[%s8067_s15 + $0x3a0] sm:$0xff] }
 0x515   : > { %4919 = vmatpush1.bf16.msra.mxu1 %v1958_v47  ;;  %4756 = vmatprep.subr.bf16.mxu0 %v1965_v11  ;;  %v2031_v47 = vunpack.c.l.s8.bf16 %v1663_v33  ;;  %v1662_v11 = vld [vmem:[%s8067_s15 + $0x3b0] sm:$0xff]  ;;  %v2028_v18 = vunpack.c.l.s8.bf16 %v1660_v10 }
 0x516   : > { %4920 = vmatprep.subr.bf16.mxu1 %v1967_v21  ;;  %v2030_v21 = vunpack.c.l.s8.bf16 %v1662_v11  ;;  %v2038_v3 = vunpack.c.h.s8.bf16 %v1662_v11  ;;  %v1701_v11 = vld [vmem:[%s8067_s15 + $0x4e8] sm:$0xff] }
 0x518   : > { %4757 = vmatpush1.bf16.msra.mxu0 %v1964_v38  ;;  %v2039_v38 = vunpack.c.h.s8.bf16 %v1663_v33 }
 0x519   : > { %4921 = vmatpush1.bf16.msra.mxu1 %v1966_v41  ;;  %4758 = vmatprep.subr.bf16.mxu0 %v1973_v24  ;;  %v1669_v41 = vld [vmem:[%s8067_s15 + $0x3e8] sm:$0xff]  ;;  %v1671_v24 = vld [vmem:[%s8067_s15 + $0x3f8] sm:$0xff] }
 0x51a   : > { %4922 = vmatprep.subr.bf16.mxu1 %v1975_v31  ;;  %v2036_v31 = vunpack.c.h.s8.bf16 %v1660_v10  ;;  %v2045_v40 = vunpack.c.l.s8.bf16 %v1669_v41  ;;  %v2053_v49 = vunpack.c.h.s8.bf16 %v1669_v41  ;;  %v1700_v41 = vld [vmem:[%s8067_s15 + $0x4e0] sm:$0xff] }
 0x51c   : > { %4759 = vmatpush1.bf16.msra.mxu0 %v1972_v26  ;;  %v1668_v26 = vld [vmem:[%s8067_s15 + $0x3e0] sm:$0xff] }
 0x51d   : > { %4923 = vmatpush1.bf16.msra.mxu1 %v1974_v46  ;;  %4760 = vmatprep.subr.bf16.mxu0 %v1981_v36  ;;  %v2047_v46 = vunpack.c.l.s8.bf16 %v1671_v24  ;;  %v1670_v36 = vld [vmem:[%s8067_s15 + $0x3f0] sm:$0xff]  ;;  %v2044_v37 = vunpack.c.l.s8.bf16 %v1668_v26 }
 0x51e   : > { %4924 = vmatprep.subr.bf16.mxu1 %v1983_v48  ;;  %v2046_v48 = vunpack.c.l.s8.bf16 %v1670_v36  ;;  %v2054_v8 = vunpack.c.h.s8.bf16 %v1670_v36  ;;  %v1709_v36 = vld [vmem:[%s8067_s15 + $0x528] sm:$0xff] }
 0x520   : > { %4761 = vmatpush1.bf16.msra.mxu0 %v1980_v50  ;;  %v2055_v50 = vunpack.c.h.s8.bf16 %v1671_v24 }
 0x521   : > { %4925 = vmatpush1.bf16.msra.mxu1 %v1982_v52  ;;  %4762 = vmatprep.subr.bf16.mxu0 %v1989_v53  ;;  %v1677_v52 = vld [vmem:[%s8067_s15 + $0x428] sm:$0xff]  ;;  %v1679_v53 = vld [vmem:[%s8067_s15 + $0x438] sm:$0xff] }
 0x522   : > { %4926 = vmatprep.subr.bf16.mxu1 %v1991_v35  ;;  %v2052_v35 = vunpack.c.h.s8.bf16 %v1668_v26  ;;  %v2061_v30 = vunpack.c.l.s8.bf16 %v1677_v52  ;;  %v2069_v54 = vunpack.c.h.s8.bf16 %v1677_v52  ;;  %v2117_v26 = vunpack.c.h.s8.bf16 %v1701_v11  ;;  %v1708_v52 = vld [vmem:[%s8067_s15 + $0x520] sm:$0xff] }
 0x524   : > { %4763 = vmatpush1.bf16.msra.mxu0 %v1988_v55  ;;  %v1676_v55 = vld [vmem:[%s8067_s15 + $0x420] sm:$0xff] }
 0x525   : > { %4927 = vmatpush1.bf16.msra.mxu1 %v1990_v56  ;;  %4764 = vmatprep.subr.bf16.mxu0 %v1997_v1  ;;  %v2063_v56 = vunpack.c.l.s8.bf16 %v1679_v53  ;;  %v1678_v1 = vld [vmem:[%s8067_s15 + $0x430] sm:$0xff]  ;;  %v2060_v23 = vunpack.c.l.s8.bf16 %v1676_v55 }
 0x526   : > { %4928 = vmatprep.subr.bf16.mxu1 %v1999_v58  ;;  %v2062_v58 = vunpack.c.l.s8.bf16 %v1678_v1  ;;  %v2070_v5 = vunpack.c.h.s8.bf16 %v1678_v1  ;;  %v1717_v1 = vld [vmem:[%s8067_s15 + $0x568] sm:$0xff] }
 0x528   : > { %4765 = vmatpush1.bf16.msra.mxu0 %v1996_v60  ;;  %v1685_v60 = vld [vmem:[%s8067_s15 + $0x468] sm:$0xff] }
 0x529   : > { %4929 = vmatpush1.bf16.msra.mxu1 %v1998_v61  ;;  %4766 = vmatprep.subr.bf16.mxu0 %v2005_v13  ;;  %v2071_v61 = vunpack.c.h.s8.bf16 %v1679_v53  ;;  %v1687_v13 = vld [vmem:[%s8067_s15 + $0x478] sm:$0xff]  ;;  %v2077_v7 = vunpack.c.l.s8.bf16 %v1685_v60 }
 0x52a   : > { %4930 = vmatprep.subr.bf16.mxu1 %v2007_v4  ;;  %v2068_v4 = vunpack.c.h.s8.bf16 %v1676_v55  ;;  %v2087_v22 = vunpack.c.h.s8.bf16 %v1687_v13  ;;  %v2133_v55 = vunpack.c.h.s8.bf16 %v1709_v36 }
 0x52c   : > { %4767 = vmatpush1.bf16.msra.mxu0 %v2004_v9  ;;  %v1684_v9 = vld [vmem:[%s8067_s15 + $0x460] sm:$0xff] }
 0x52d   : > { %4931 = vmatpush1.bf16.msra.mxu1 %v2006_v14  ;;  %4768 = vmatprep.subr.bf16.mxu0 %v2013_v17  ;;  %v2079_v14 = vunpack.c.l.s8.bf16 %v1687_v13  ;;  %v1686_v17 = vld [vmem:[%s8067_s15 + $0x470] sm:$0xff]  ;;  %v2076_v16 = vunpack.c.l.s8.bf16 %v1684_v9 }
 0x52e   : > { %4932 = vmatprep.subr.bf16.mxu1 %v2015_v20  ;;  %v2085_v20 = vunpack.c.h.s8.bf16 %v1685_v60  ;;  %v2141_v60 = vunpack.c.l.s8.bf16 %v1717_v1 }
 0x530   : > { %4769 = vmatpush1.bf16.msra.mxu0 %v2012_v15  ;;  %v1693_v15 = vld [vmem:[%s8067_s15 + $0x4a8] sm:$0xff] }
 0x531   : > { %4933 = vmatpush1.bf16.msra.mxu1 %v2014_v28  ;;  %4770 = vmatprep.subr.bf16.mxu0 %v2021_v29  ;;  %v1695_v28 = vld [vmem:[%s8067_s15 + $0x4b8] sm:$0xff]  ;;  %v2084_v29 = vunpack.c.h.s8.bf16 %v1684_v9  ;;  %v2101_v10 = vunpack.c.h.s8.bf16 %v1693_v15  ;;  %v2149_v9 = vunpack.c.h.s8.bf16 %v1717_v1  ;;  %v1748_v1 = vld [vmem:[%s8067_s15 + $0x660] sm:$0xff] }
 0x532   : > { %4934 = vmatprep.subr.bf16.mxu1 %v2023_v32  ;;  %v2093_v32 = vunpack.c.l.s8.bf16 %v1693_v15  ;;  %v2095_v33 = vunpack.c.l.s8.bf16 %v1695_v28  ;;  %v1724_v15 = vld [vmem:[%s8067_s15 + $0x5a0] sm:$0xff] }
 0x534   : > { %4771 = vmatpush1.bf16.msra.mxu0 %v2020_v34  ;;  %v1694_v34 = vld [vmem:[%s8067_s15 + $0x4b0] sm:$0xff] }
 0x535   : > { %4935 = vmatpush1.bf16.msra.mxu1 %v2022_v27  ;;  %4772 = vmatprep.subr.bf16.mxu0 %v2029_v63  ;;  %v2092_v27 = vunpack.c.l.s8.bf16 %v1692_v39  ;;  %v2094_v63 = vunpack.c.l.s8.bf16 %v1694_v34 }
 0x536   : > { %4936 = vmatprep.subr.bf16.mxu1 %v2031_v47  ;;  %v2103_v47 = vunpack.c.h.s8.bf16 %v1695_v28 }
 0x538   : > { %4773 = vmatpush1.bf16.msra.mxu0 %v2028_v18  ;;  %v1703_v18 = vld [vmem:[%s8067_s15 + $0x4f8] sm:$0xff] }
 0x539   : > { %4937 = vmatpush1.bf16.msra.mxu1 %v2030_v21  ;;  %4774 = vmatprep.subr.bf16.mxu0 %v2037_v0  ;;  %v2100_v21 = vunpack.c.h.s8.bf16 %v1692_v39  ;;  %v2102_v0 = vunpack.c.h.s8.bf16 %v1694_v34  ;;  %v2111_v24 = vunpack.c.l.s8.bf16 %v1703_v18  ;;  %v1733_v34 = vld [vmem:[%s8067_s15 + $0x5e8] sm:$0xff] }
 0x53a   : > { %4938 = vmatprep.subr.bf16.mxu1 %v2039_v38  ;;  %v2109_v38 = vunpack.c.l.s8.bf16 %v1701_v11  ;;  %v1732_v11 = vld [vmem:[%s8067_s15 + $0x5e0] sm:$0xff] }
 0x53c   : > { %4775 = vmatpush1.bf16.msra.mxu0 %v2036_v31  ;;  %v1702_v31 = vld [vmem:[%s8067_s15 + $0x4f0] sm:$0xff] }
 0x53d   : > { %4939 = vmatpush1.bf16.msra.mxu1 %v2038_v3  ;;  %4776 = vmatprep.subr.bf16.mxu0 %v2045_v40  ;;  %v2108_v3 = vunpack.c.l.s8.bf16 %v1700_v41  ;;  %v2110_v40 = vunpack.c.l.s8.bf16 %v1702_v31 }
 0x53e   : > { %4940 = vmatprep.subr.bf16.mxu1 %v2047_v46  ;;  %v2119_v46 = vunpack.c.h.s8.bf16 %v1703_v18 }
 0x540   : > { %4777 = vmatpush1.bf16.msra.mxu0 %v2044_v37  ;;  %v1711_v37 = vld [vmem:[%s8067_s15 + $0x538] sm:$0xff] }
 0x541   : > { %4941 = vmatpush1.bf16.msra.mxu1 %v2046_v48  ;;  %4778 = vmatprep.subr.bf16.mxu0 %v2053_v49  ;;  %v2116_v48 = vunpack.c.h.s8.bf16 %v1700_v41  ;;  %v2118_v49 = vunpack.c.h.s8.bf16 %v1702_v31  ;;  %v2127_v53 = vunpack.c.l.s8.bf16 %v1711_v37  ;;  %v2181_v41 = vunpack.c.h.s8.bf16 %v1733_v34  ;;  %v1741_v31 = vld [vmem:[%s8067_s15 + $0x628] sm:$0xff] }
 0x542   : > { %4942 = vmatprep.subr.bf16.mxu1 %v2055_v50  ;;  %v2125_v50 = vunpack.c.l.s8.bf16 %v1709_v36  ;;  %v1740_v36 = vld [vmem:[%s8067_s15 + $0x620] sm:$0xff] }
 0x544   : > { %4779 = vmatpush1.bf16.msra.mxu0 %v2052_v35  ;;  %v1710_v35 = vld [vmem:[%s8067_s15 + $0x530] sm:$0xff] }
 0x545   : > { %4943 = vmatpush1.bf16.msra.mxu1 %v2054_v8  ;;  %4789 = vmatprep.subr.bf16.mxu0 %v2061_v30  ;;  %v2124_v8 = vunpack.c.l.s8.bf16 %v1708_v52  ;;  %v2126_v30 = vunpack.c.l.s8.bf16 %v1710_v35 }
 0x546   : > { %4953 = vmatprep.subr.bf16.mxu1 %v2063_v56  ;;  %v2135_v56 = vunpack.c.h.s8.bf16 %v1711_v37 }
 0x547   : > { %4781 = vmatmul.mubr.bf16.vlgmr.msra.gmra.mrb[12].mxu0 %v8485_v51 }
 0x548   : > { %4945 = vmatmul.mubr.bf16.vlgmr.msra.gmra.mrb[12].mxu1 %v8485_v51  ;;  %4790 = vmatpush1.bf16.msra.mxu0 %v2060_v23  ;;  %v2078_v51 = vunpack.c.l.s8.bf16 %v1686_v17  ;;  %v1719_v23 = vld [vmem:[%s8067_s15 + $0x578] sm:$0xff] }
 0x549   : > { %4821 = vmatprep.mubr.bf16.mxu0 %v8483_v57  ;;  %4954 = vmatpush1.bf16.msra.mxu1 %v2062_v58  ;;  %v2132_v58 = vunpack.c.h.s8.bf16 %v1708_v52  ;;  %v2143_v13 = vunpack.c.l.s8.bf16 %v1719_v23  ;;  %v2197_v52 = vunpack.c.h.s8.bf16 %v1741_v31 }
 0x54a   : > { %4985 = vmatprep.mubr.bf16.mxu1 %v8483_v57  ;;  %4791 = vmatprep.subr.bf16.mxu0 %v2069_v54  ;;  %v2086_v57 = vunpack.c.h.s8.bf16 %v1686_v17  ;;  %v2134_v54 = vunpack.c.h.s8.bf16 %v1710_v35  ;;  %v1725_v17 = vld [vmem:[%s8067_s15 + $0x5a8] sm:$0xff] }
 0x54b   : > { %4955 = vmatprep.subr.bf16.mxu1 %v2071_v61  ;;  %v1716_v61 = vld [vmem:[%s8067_s15 + $0x560] sm:$0xff]  ;;  %v2165_v39 = vunpack.c.h.s8.bf16 %v1725_v17 }
 0x54c   : > { %4792 = vmatpush1.bf16.msra.mxu0 %v2068_v4  ;;  %v1718_v4 = vld [vmem:[%s8067_s15 + $0x570] sm:$0xff] }
 0x54d   : > { %4956 = vmatpush1.bf16.msra.mxu1 %v2070_v5  ;;  %4793 = vmatprep.subr.bf16.mxu0 %v2077_v7  ;;  %v2140_v5 = vunpack.c.l.s8.bf16 %v1716_v61  ;;  %v2142_v7 = vunpack.c.l.s8.bf16 %v1718_v4 }
 0x54e   : > { %4957 = vmatprep.subr.bf16.mxu1 %v2079_v14  ;;  %v2151_v14 = vunpack.c.h.s8.bf16 %v1719_v23 }
 0x550   : > { %4794 = vmatpush1.bf16.msra.mxu0 %v2076_v16  ;;  %v1727_v16 = vld [vmem:[%s8067_s15 + $0x5b8] sm:$0xff] }
 0x551   : > { %4958 = vmatpush1.bf16.msra.mxu1 %v2078_v51  ;;  %4795 = vmatprep.subr.bf16.mxu0 %v2085_v20  ;;  %v2148_v51 = vunpack.c.h.s8.bf16 %v1716_v61  ;;  %v2150_v20 = vunpack.c.h.s8.bf16 %v1718_v4  ;;  %v2159_v28 = vunpack.c.l.s8.bf16 %v1727_v16  ;;  %v1759_v4 = vld [vmem:[%s8067_s15 + $0x6b8] sm:$0xff] }
 0x552   : > { %4959 = vmatprep.subr.bf16.mxu1 %v2087_v22  ;;  %v2157_v22 = vunpack.c.l.s8.bf16 %v1725_v17  ;;  %v1758_v17 = vld [vmem:[%s8067_s15 + $0x6b0] sm:$0xff] }
 0x554   : > { %4796 = vmatpush1.bf16.msra.mxu0 %v2084_v29  ;;  %v1726_v29 = vld [vmem:[%s8067_s15 + $0x5b0] sm:$0xff] }
 0x555   : > { %4960 = vmatpush1.bf16.msra.mxu1 %v2086_v57  ;;  %4797 = vmatprep.subr.bf16.mxu0 %v2093_v32  ;;  %v2156_v57 = vunpack.c.l.s8.bf16 %v1724_v15  ;;  %v2158_v32 = vunpack.c.l.s8.bf16 %v1726_v29 }
 0x556   : > { %4961 = vmatprep.subr.bf16.mxu1 %v2095_v33  ;;  %v2167_v33 = vunpack.c.h.s8.bf16 %v1727_v16 }
 0x558   : > { %4798 = vmatpush1.bf16.msra.mxu0 %v2092_v27  ;;  %v1735_v27 = vld [vmem:[%s8067_s15 + $0x5f8] sm:$0xff] }
 0x559   : > { %4962 = vmatpush1.bf16.msra.mxu1 %v2094_v63  ;;  %4799 = vmatprep.subr.bf16.mxu0 %v2101_v10  ;;  %v2164_v63 = vunpack.c.h.s8.bf16 %v1724_v15  ;;  %v2166_v10 = vunpack.c.h.s8.bf16 %v1726_v29  ;;  %v2175_v18 = vunpack.c.l.s8.bf16 %v1735_v27  ;;  %v1765_v15 = vld [vmem:[%s8067_s15 + $0x6e8] sm:$0xff] }
 0x55a   : > { %4963 = vmatprep.subr.bf16.mxu1 %v2103_v47  ;;  %v2173_v47 = vunpack.c.l.s8.bf16 %v1733_v34 }
 0x55c   : > { %4800 = vmatpush1.bf16.msra.mxu0 %v2100_v21  ;;  %v1734_v21 = vld [vmem:[%s8067_s15 + $0x5f0] sm:$0xff] }
 0x55d   : > { %4964 = vmatpush1.bf16.msra.mxu1 %v2102_v0  ;;  %4801 = vmatprep.subr.bf16.mxu0 %v2109_v38  ;;  %v2172_v0 = vunpack.c.l.s8.bf16 %v1732_v11  ;;  %v2174_v38 = vunpack.c.l.s8.bf16 %v1734_v21 }
 0x55e   : > { %4965 = vmatprep.subr.bf16.mxu1 %v2111_v24  ;;  %v2183_v24 = vunpack.c.h.s8.bf16 %v1735_v27  ;;  %v1766_v27 = vld [vmem:[%s8067_s15 + $0x6f0] sm:$0xff] }
 0x560   : > { %4802 = vmatpush1.bf16.msra.mxu0 %v2108_v3  ;;  %v1743_v3 = vld [vmem:[%s8067_s15 + $0x638] sm:$0xff] }
 0x561   : > { %4966 = vmatpush1.bf16.msra.mxu1 %v2110_v40  ;;  %4803 = vmatprep.subr.bf16.mxu0 %v2117_v26  ;;  %v2180_v40 = vunpack.c.h.s8.bf16 %v1732_v11  ;;  %v2182_v26 = vunpack.c.h.s8.bf16 %v1734_v21  ;;  %v2191_v37 = vunpack.c.l.s8.bf16 %v1743_v3  ;;  %v2199_v35 = vunpack.c.h.s8.bf16 %v1743_v3  ;;  %v1773_v3 = vld [vmem:[%s8067_s15 + $0x728] sm:$0xff] }
 0x562   : > { %4967 = vmatprep.subr.bf16.mxu1 %v2119_v46  ;;  %v2189_v46 = vunpack.c.l.s8.bf16 %v1741_v31 }
 0x564   : > { %4804 = vmatpush1.bf16.msra.mxu0 %v2116_v48  ;;  %v1742_v48 = vld [vmem:[%s8067_s15 + $0x630] sm:$0xff] }
 0x565   : > { %4968 = vmatpush1.bf16.msra.mxu1 %v2118_v49  ;;  %4805 = vmatprep.subr.bf16.mxu0 %v2125_v50  ;;  %v2188_v49 = vunpack.c.l.s8.bf16 %v1740_v36  ;;  %v2190_v50 = vunpack.c.l.s8.bf16 %v1742_v48 }
 0x566   : > { %4969 = vmatprep.subr.bf16.mxu1 %v2127_v53  ;;  %v1749_v53 = vld [vmem:[%s8067_s15 + $0x668] sm:$0xff] }
 0x568   : > { %4806 = vmatpush1.bf16.msra.mxu0 %v2124_v8  ;;  %v1751_v8 = vld [vmem:[%s8067_s15 + $0x678] sm:$0xff] }
 0x569   : > { %4970 = vmatpush1.bf16.msra.mxu1 %v2126_v30  ;;  %4807 = vmatprep.subr.bf16.mxu0 %v2133_v55  ;;  %v2196_v30 = vunpack.c.h.s8.bf16 %v1740_v36  ;;  %v2198_v55 = vunpack.c.h.s8.bf16 %v1742_v48  ;;  %v2207_v23 = vunpack.c.l.s8.bf16 %v1751_v8  ;;  %v2215_v61 = vunpack.c.h.s8.bf16 %v1751_v8  ;;  %v1781_v8 = vld [vmem:[%s8067_s15 + $0x768] sm:$0xff] }
 0x56a   : > { %4971 = vmatprep.subr.bf16.mxu1 %v2135_v56  ;;  %v2205_v56 = vunpack.c.l.s8.bf16 %v1749_v53  ;;  %v2253_v36 = vunpack.c.l.s8.bf16 %v1773_v3 }
 0x56c   : > { %4808 = vmatpush1.bf16.msra.mxu0 %v2132_v58  ;;  %v1750_v58 = vld [vmem:[%s8067_s15 + $0x670] sm:$0xff] }
 0x56d   : > { %4972 = vmatpush1.bf16.msra.mxu1 %v2134_v54  ;;  %4809 = vmatprep.subr.bf16.mxu0 %v2141_v60  ;;  %v2204_v54 = vunpack.c.l.s8.bf16 %v1748_v1  ;;  %v2213_v60 = vunpack.c.h.s8.bf16 %v1749_v53  ;;  %v2261_v53 = vunpack.c.h.s8.bf16 %v1773_v3 }
 0x56e   : > { %4973 = vmatprep.subr.bf16.mxu1 %v2143_v13  ;;  %v1757_v13 = vld [vmem:[%s8067_s15 + $0x6a8] sm:$0xff] }
 0x570   : > { %4810 = vmatpush1.bf16.msra.mxu0 %v2140_v5  ;;  %v2212_v5 = vunpack.c.h.s8.bf16 %v1748_v1  ;;  %v2269_v1 = vunpack.c.l.s8.bf16 %v1781_v8 }
 0x571   : > { %4974 = vmatpush1.bf16.msra.mxu1 %v2142_v7  ;;  %4811 = vmatprep.subr.bf16.mxu0 %v2149_v9  ;;  %v2221_v7 = vunpack.c.l.s8.bf16 %v1757_v13  ;;  %v1756_v9 = vld [vmem:[%s8067_s15 + $0x6a0] sm:$0xff] }
 0x572   : > { %4975 = vmatprep.subr.bf16.mxu1 %v2151_v14  ;;  %v2223_v14 = vunpack.c.l.s8.bf16 %v1759_v4  ;;  %v2220_v16 = vunpack.c.l.s8.bf16 %v1756_v9  ;;  %v2228_v29 = vunpack.c.h.s8.bf16 %v1756_v9 }
 0x574   : > { %4812 = vmatpush1.bf16.msra.mxu0 %v2148_v51  ;;  %v2222_v51 = vunpack.c.l.s8.bf16 %v1758_v17 }
 0x575   : > { %4976 = vmatpush1.bf16.msra.mxu1 %v2150_v20  ;;  %4813 = vmatprep.subr.bf16.mxu0 %v2157_v22  ;;  %v2229_v20 = vunpack.c.h.s8.bf16 %v1757_v13  ;;  %v2231_v22 = vunpack.c.h.s8.bf16 %v1759_v4  ;;  %v1789_v4 = vld [vmem:[%s8067_s15 + $0x7a8] sm:$0xff] }
 0x576   : > { %4977 = vmatprep.subr.bf16.mxu1 %v2159_v28  ;;  %v1767_v28 = vld [vmem:[%s8067_s15 + $0x6f8] sm:$0xff]  ;;  %v2285_v9 = vunpack.c.l.s8.bf16 %v1789_v4 }
 0x577   : > { %v2239_v34 = vunpack.c.l.s8.bf16 %v1767_v28  ;;  %v2247_v31 = vunpack.c.h.s8.bf16 %v1767_v28 }
 0x578   : > { %4814 = vmatpush1.bf16.msra.mxu0 %v2156_v57  ;;  %v2230_v57 = vunpack.c.h.s8.bf16 %v1758_v17 }
 0x579   : > { %4978 = vmatpush1.bf16.msra.mxu1 %v2158_v32  ;;  %4815 = vmatprep.subr.bf16.mxu0 %v2165_v39  ;;  %v2237_v32 = vunpack.c.l.s8.bf16 %v1765_v15  ;;  %v1764_v39 = vld [vmem:[%s8067_s15 + $0x6e0] sm:$0xff] }
 0x57a   : > { %4979 = vmatprep.subr.bf16.mxu1 %v2167_v33 }
 0x57c   : > { %4816 = vmatpush1.bf16.msra.mxu0 %v2164_v63 }
 0x57d   : > { %4980 = vmatpush1.bf16.msra.mxu1 %v2166_v10  ;;  %4817 = vmatprep.subr.bf16.mxu0 %v2173_v47 }
 0x57e   : > { %4981 = vmatprep.subr.bf16.mxu1 %v2175_v18  ;;  %v2236_v18 = vunpack.c.l.s8.bf16 %v1764_v39 }
 0x580   : > { %4818 = vmatpush1.bf16.msra.mxu0 %v2172_v0 }
 0x581   : > { %4982 = vmatpush1.bf16.msra.mxu1 %v2174_v38  ;;  %4819 = vmatprep.subr.bf16.mxu0 %v2181_v41  ;;  %v2238_v38 = vunpack.c.l.s8.bf16 %v1766_v27  ;;  %v2245_v41 = vunpack.c.h.s8.bf16 %v1765_v15  ;;  %v2293_v15 = vunpack.c.h.s8.bf16 %v1789_v4 }
 0x582   : > { %4983 = vmatprep.subr.bf16.mxu1 %v2183_v24 }
 0x584   : > { %4820 = vmatpush1.bf16.msra.mxu0 %v2180_v40  ;;  %v1775_v40 = vld [vmem:[%s8067_s15 + $0x738] sm:$0xff] }
 0x585   : > { %4984 = vmatpush1.bf16.msra.mxu1 %v2182_v26  ;;  %4830 = vmatprep.subr.bf16.mxu0 %v2189_v46  ;;  %v2244_v26 = vunpack.c.h.s8.bf16 %v1764_v39  ;;  %v2246_v46 = vunpack.c.h.s8.bf16 %v1766_v27  ;;  %v2255_v48 = vunpack.c.l.s8.bf16 %v1775_v40  ;;  %v8745_v39 = vld [vmem:[%s937_s6] sm:$0xff] }
 0x586   : > { %4994 = vmatprep.subr.bf16.mxu1 %v2191_v37  ;;  %v1772_v37 = vld [vmem:[%s8067_s15 + $0x720] sm:$0xff] }
 0x587   : > { %4822 = vmatmul.mubr.bf16.vlgmr.msra.gmra.mrb[12].mxu0 %v8539_v59 }
 0x588   : > { %4986 = vmatmul.mubr.bf16.vlgmr.msra.gmra.mrb[12].mxu1 %v8539_v59  ;;  %4831 = vmatpush1.bf16.msra.mxu0 %v2188_v49  ;;  %v2206_v59 = vunpack.c.l.s8.bf16 %v1750_v58  ;;  %v1774_v49 = vld [vmem:[%s8067_s15 + $0x730] sm:$0xff] }
 0x589   : > { %4862 = vmatprep.mubr.bf16.mxu0 %v8542_v62  ;;  %4995 = vmatpush1.bf16.msra.mxu1 %v2190_v50  ;;  %v2252_v50 = vunpack.c.l.s8.bf16 %v1772_v37 }
 0x58a   : > { %5026 = vmatprep.mubr.bf16.mxu1 %v8542_v62  ;;  %4832 = vmatprep.subr.bf16.mxu0 %v2197_v52  ;;  %v2214_v62 = vunpack.c.h.s8.bf16 %v1750_v58  ;;  %v2254_v52 = vunpack.c.l.s8.bf16 %v1774_v49 }
 0x58b   : > { %4996 = vmatprep.subr.bf16.mxu1 %v2199_v35  ;;  %v2263_v35 = vunpack.c.h.s8.bf16 %v1775_v40 }
 0x58c   : > { %4833 = vmatpush1.bf16.msra.mxu0 %v2196_v30  ;;  %v1783_v30 = vld [vmem:[%s8067_s15 + $0x778] sm:$0xff] }
 0x58d   : > { %4997 = vmatpush1.bf16.msra.mxu1 %v2198_v55  ;;  %4834 = vmatprep.subr.bf16.mxu0 %v2205_v56  ;;  %v2260_v55 = vunpack.c.h.s8.bf16 %v1772_v37  ;;  %v2262_v56 = vunpack.c.h.s8.bf16 %v1774_v49  ;;  %v2271_v58 = vunpack.c.l.s8.bf16 %v1783_v30  ;;  %v2279_v13 = vunpack.c.h.s8.bf16 %v1783_v30  ;;  %v2312_v49 = vld [vmem:[%s8077_s21] sm:$0xff] }
 0x58e   : > { %4998 = vmatprep.subr.bf16.mxu1 %v2207_v23  ;;  %v1780_v23 = vld [vmem:[%s8067_s15 + $0x760] sm:$0xff] }
 0x590   : > { %4835 = vmatpush1.bf16.msra.mxu0 %v2204_v54  ;;  %v1782_v54 = vld [vmem:[%s8067_s15 + $0x770] sm:$0xff] }
 0x591   : > { %4999 = vmatpush1.bf16.msra.mxu1 %v2206_v59  ;;  %4836 = vmatprep.subr.bf16.mxu0 %v2213_v60  ;;  %v2268_v59 = vunpack.c.l.s8.bf16 %v1780_v23  ;;  %v2270_v60 = vunpack.c.l.s8.bf16 %v1782_v54 }
 0x592   : > { %5000 = vmatprep.subr.bf16.mxu1 %v2215_v61  ;;  %v2277_v61 = vunpack.c.h.s8.bf16 %v1781_v8 }
 0x594   : > { %4837 = vmatpush1.bf16.msra.mxu0 %v2212_v5  ;;  %v1791_v5 = vld [vmem:[%s8067_s15 + $0x7b8] sm:$0xff] }
 0x595   : > { %5001 = vmatpush1.bf16.msra.mxu1 %v2214_v62  ;;  %4838 = vmatprep.subr.bf16.mxu0 %v2221_v7  ;;  %v2276_v62 = vunpack.c.h.s8.bf16 %v1780_v23  ;;  %v2278_v7 = vunpack.c.h.s8.bf16 %v1782_v54  ;;  %v2287_v17 = vunpack.c.l.s8.bf16 %v1791_v5  ;;  %v2295_v28 = vunpack.c.h.s8.bf16 %v1791_v5  ;;  %v2323_v23 = vld [vmem:[%s8077_s21 + $0x58] sm:$0xff] }
 0x596   : > { %5002 = vmatprep.subr.bf16.mxu1 %v2223_v14  ;;  %v1788_v14 = vld [vmem:[%s8067_s15 + $0x7a0] sm:$0xff] }
 0x598   : > { %4839 = vmatpush1.bf16.msra.mxu0 %v2220_v16  ;;  %v1790_v16 = vld [vmem:[%s8067_s15 + $0x7b0] sm:$0xff] }
 0x599   : > { %5003 = vmatpush1.bf16.msra.mxu1 %v2222_v51  ;;  %4840 = vmatprep.subr.bf16.mxu0 %v2229_v20  ;;  %v8737_v51 = vld [vmem:[%s928_s8] sm:$0xff]  ;;  %v2284_v20 = vunpack.c.l.s8.bf16 %v1788_v14  ;;  %v2294_v27 = vunpack.c.h.s8.bf16 %v1790_v16 }
 0x59a   : > { %v8714_v33 = vpop.f32.mrb[8].mxu0  ;;  %5004 = vmatprep.subr.bf16.mxu1 %v2231_v22  ;;  %v2286_v22 = vunpack.c.l.s8.bf16 %v1790_v16 }
 0x59b   : > { %v8717_v63 = vpop.f32.mrb[8].mxu1  ;;  %v8719_v10 = vpop.f32.mrb[9].mxu0 }
 0x59c   : > { %v8721_v47 = vpop.f32.mrb[9].mxu1  ;;  %v4540_v11 = vpop.f32.mrb[10].mxu0  ;;  %4841 = vmatpush1.bf16.msra.mxu0 %v2228_v29  ;;  %v1797_v29 = vld [vmem:[%s8067_s15 + $0x7e8] sm:$0xff] }
 0x59d   : > { %v4704_v21 = vpop.f32.mrb[10].mxu1  ;;  %5005 = vmatpush1.bf16.msra.mxu1 %v2230_v57  ;;  %v4541_v0 = vpop.f32.mrb[11].mxu0  ;;  %4842 = vmatprep.subr.bf16.mxu0 %v2237_v32  ;;  %v5043_v57 = vrot.slane %v8737_v51, %v8152_v44  ;;  %v1799_v32 = vld [vmem:[%s8067_s15 + $0x7f8] sm:$0xff]  ;;  %v2301_v11 = vunpack.c.l.s8.bf16 %v1797_v29  ;;  %v2309_v3 = vunpack.c.h.s8.bf16 %v1797_v29 }
 0x59e   : > { %v4705_v24 = vpop.f32.mrb[11].mxu1  ;;  %5006 = vmatprep.subr.bf16.mxu1 %v2239_v34  ;;  %v2292_v34 = vunpack.c.h.s8.bf16 %v1788_v14  ;;  %v2303_v21 = vunpack.c.l.s8.bf16 %v1799_v32  ;;  %v1798_v0 = vld [vmem:[%s8067_s15 + $0x7f0] sm:$0xff]  ;;  %v2311_v40 = vunpack.c.h.s8.bf16 %v1799_v32 }
 0x5a0   : > { %4843 = vmatpush1.bf16.msra.mxu0 %v2236_v18  ;;  %v1796_v18 = vld [vmem:[%s8067_s15 + $0x7e0] sm:$0xff] }
 0x5a1   : > { %5007 = vmatpush1.bf16.msra.mxu1 %v2238_v38  ;;  %4844 = vmatprep.subr.bf16.mxu0 %v2245_v41  ;;  %v5077_v38 = vmul.f32 %v5043_v57, %v8719_v10  ;;  %v5092_v41 = vrot.slane %v8745_v39, %v8152_v44  ;;  %v2300_v24 = vunpack.c.l.s8.bf16 %v1796_v18  ;;  %v2308_v37 = vunpack.c.h.s8.bf16 %v1796_v18 }
 0x5a2   : > { %5008 = vmatprep.subr.bf16.mxu1 %v2247_v31  ;;  %v2302_v31 = vunpack.c.l.s8.bf16 %v1798_v0  ;;  %v2310_v10 = vunpack.c.h.s8.bf16 %v1798_v0  ;;  %v2336_v0 = vld [vmem:[%s8077_s21 + $0xc0] sm:$0xff] }
 0x5a4   : > { %4845 = vmatpush1.bf16.msra.mxu0 %v2244_v26  ;;  %v2313_v26 = vld [vmem:[%s8077_s21 + $0x8] sm:$0xff] }
 0x5a5   : > { %5009 = vmatpush1.bf16.msra.mxu1 %v2246_v46  ;;  %4846 = vmatprep.subr.bf16.mxu0 %v2253_v36  ;;  %v5126_v46 = vadd.f32 %v5092_v41, %v5077_v38  ;;  %v2315_v36 = vld [vmem:[%s8077_s21 + $0x18] sm:$0xff]  ;;  %v2577_v30 = vunpack.c.h.s8.bf16 %v2313_v26  ;;  %v2338_v41 = vld [vmem:[%s8077_s21 + $0xd0] sm:$0xff] }
 0x5a6   : > { %5010 = vmatprep.subr.bf16.mxu1 %v2255_v48  ;;  %v2569_v48 = vunpack.c.l.s8.bf16 %v2313_v26  ;;  %v2345_v26 = vld [vmem:[%s8077_s21 + $0x108] sm:$0xff] }
 0x5a8   : > { %4847 = vmatpush1.bf16.msra.mxu0 %v2252_v50  ;;  %v2571_v50 = vunpack.c.l.s8.bf16 %v2315_v36 }
 0x5a9   : > { %5011 = vmatpush1.bf16.msra.mxu1 %v2254_v52  ;;  %4848 = vmatprep.subr.bf16.mxu0 %v2261_v53  ;;  %v2314_v52 = vld [vmem:[%s8077_s21 + $0x10] sm:$0xff]  ;;  %v5134_v53 = vmax.f32 %v5126_v46, 0.0  ;;  %v2347_v46 = vld [vmem:[%s8077_s21 + $0x118] sm:$0xff] }
 0x5aa   : > { %5012 = vmatprep.subr.bf16.mxu1 %v2263_v35  ;;  %v2568_v35 = vunpack.c.l.s8.bf16 %v2312_v49  ;;  %v2570_v8 = vunpack.c.l.s8.bf16 %v2314_v52  ;;  %v2578_v54 = vunpack.c.h.s8.bf16 %v2314_v52 }
 0x5ac   : > { %4849 = vmatpush1.bf16.msra.mxu0 %v2260_v55  ;;  %v2321_v55 = vld [vmem:[%s8077_s21 + $0x48] sm:$0xff] }
 0x5ad   : > { %5013 = vmatpush1.bf16.msra.mxu1 %v2262_v56  ;;  %4850 = vmatprep.subr.bf16.mxu0 %v2269_v1  ;;  %v8757_v56 = vpack.c.bf16 %v5134_v53, %v5134_v53  ;;  %v2579_v1 = vunpack.c.h.s8.bf16 %v2315_v36  ;;  %v2593_v5 = vunpack.c.h.s8.bf16 %v2321_v55  ;;  %v2624_v36 = vunpack.c.h.s8.bf16 %v2336_v0 }
 0x5ae   : > { %5014 = vmatprep.subr.bf16.mxu1 %v2271_v58  ;;  %v2576_v58 = vunpack.c.h.s8.bf16 %v2312_v49  ;;  %v2635_v49 = vunpack.c.l.s8.bf16 %v2347_v46 }
 0x5b0   : > { %4851 = vmatpush1.bf16.msra.mxu0 %v2268_v59  ;;  %v2585_v59 = vunpack.c.l.s8.bf16 %v2321_v55  ;;  %v2355_v55 = vld [vmem:[%s8077_s21 + $0x158] sm:$0xff] }
 0x5b1   : > { %5015 = vmatpush1.bf16.msra.mxu1 %v2270_v60  ;;  %4852 = vmatprep.subr.bf16.mxu0 %v2277_v61  ;;  %v2320_v60 = vld [vmem:[%s8077_s21 + $0x40] sm:$0xff]  ;;  %v2587_v61 = vunpack.c.l.s8.bf16 %v2323_v23 }
 0x5b2   : > { %5016 = vmatprep.subr.bf16.mxu1 %v2279_v13  ;;  %v2322_v13 = vld [vmem:[%s8077_s21 + $0x50] sm:$0xff]  ;;  %v2584_v4 = vunpack.c.l.s8.bf16 %v2320_v60  ;;  %v2592_v14 = vunpack.c.h.s8.bf16 %v2320_v60 }
 0x5b3   : > { %v2354_v60 = vld [vmem:[%s8077_s21 + $0x150] sm:$0xff] }
 0x5b4   : > { %4853 = vmatpush1.bf16.msra.mxu0 %v2276_v62  ;;  %v2595_v62 = vunpack.c.h.s8.bf16 %v2323_v23 }
 0x5b5   : > { %5017 = vmatpush1.bf16.msra.mxu1 %v2278_v7  ;;  %4854 = vmatprep.subr.bf16.mxu0 %v2285_v9  ;;  %v2329_v7 = vld [vmem:[%s8077_s21 + $0x88] sm:$0xff]  ;;  %v2331_v9 = vld [vmem:[%s8077_s21 + $0x98] sm:$0xff] }
 0x5b6   : > { %5018 = vmatprep.subr.bf16.mxu1 %v2287_v17  ;;  %v2594_v17 = vunpack.c.h.s8.bf16 %v2322_v13  ;;  %v2601_v16 = vunpack.c.l.s8.bf16 %v2329_v7  ;;  %v2609_v57 = vunpack.c.h.s8.bf16 %v2329_v7  ;;  %v2611_v32 = vunpack.c.h.s8.bf16 %v2331_v9 }
 0x5b8   : > { %4855 = vmatpush1.bf16.msra.mxu0 %v2284_v20  ;;  %v2328_v20 = vld [vmem:[%s8077_s21 + $0x80] sm:$0xff] }
 0x5b9   : > { %5019 = vmatpush1.bf16.msra.mxu1 %v2286_v22  ;;  %4856 = vmatprep.subr.bf16.mxu0 %v2293_v15  ;;  %v2603_v22 = vunpack.c.l.s8.bf16 %v2331_v9  ;;  %v2330_v15 = vld [vmem:[%s8077_s21 + $0x90] sm:$0xff]  ;;  %v2658_v9 = vunpack.c.h.s8.bf16 %v2354_v60 }
 0x5ba   : > { %5020 = vmatprep.subr.bf16.mxu1 %v2295_v28  ;;  %v2600_v28 = vunpack.c.l.s8.bf16 %v2328_v20  ;;  %v2602_v29 = vunpack.c.l.s8.bf16 %v2330_v15  ;;  %v2610_v18 = vunpack.c.h.s8.bf16 %v2330_v15  ;;  %v5039_v15 = vrot.slane %v8737_v51, %v8146_v42 }
 0x5bc   : > { %4857 = vmatpush1.bf16.msra.mxu0 %v2292_v34  ;;  %v2337_v34 = vld [vmem:[%s8077_s21 + $0xc8] sm:$0xff] }
 0x5bd   : > { %5021 = vmatpush1.bf16.msra.mxu1 %v2294_v27  ;;  %4858 = vmatprep.subr.bf16.mxu0 %v2301_v11  ;;  %v2339_v27 = vld [vmem:[%s8077_s21 + $0xd8] sm:$0xff]  ;;  %v2608_v11 = vunpack.c.h.s8.bf16 %v2328_v20  ;;  %v2362_v20 = vld [vmem:[%s8077_s21 + $0x190] sm:$0xff] }
 0x5be   : > { %5022 = vmatprep.subr.bf16.mxu1 %v2303_v21  ;;  %v2617_v21 = vunpack.c.l.s8.bf16 %v2337_v34  ;;  %v2619_v38 = vunpack.c.l.s8.bf16 %v2339_v27 }
 0x5c0   : > { %4859 = vmatpush1.bf16.msra.mxu0 %v2300_v24  ;;  %v2616_v24 = vunpack.c.l.s8.bf16 %v2336_v0  ;;  %v2674_v0 = vunpack.c.h.s8.bf16 %v2362_v20 }
 0x5c1   : > { %5023 = vmatpush1.bf16.msra.mxu1 %v2302_v31  ;;  %4860 = vmatprep.subr.bf16.mxu0 %v2309_v3  ;;  %v2618_v31 = vunpack.c.l.s8.bf16 %v2338_v41  ;;  %v2625_v3 = vunpack.c.h.s8.bf16 %v2337_v34  ;;  %v5051_v34 = vrot.slane %v8737_v51, %v8155_v45 }
 0x5c2   : > { %5024 = vmatprep.subr.bf16.mxu1 %v2311_v40  ;;  %v2627_v40 = vunpack.c.h.s8.bf16 %v2339_v27  ;;  %v2371_v27 = vld [vmem:[%s8077_s21 + $0x1d8] sm:$0xff] }
 0x5c4   : > { %4861 = vmatpush1.bf16.msra.mxu0 %v2308_v37  ;;  %v2626_v37 = vunpack.c.h.s8.bf16 %v2338_v41  ;;  %v2368_v41 = vld [vmem:[%s8077_s21 + $0x1c0] sm:$0xff] }
 0x5c5   : > { %5025 = vmatpush1.bf16.msra.mxu1 %v2310_v10  ;;  %5149 = vmatprep.subr.bf16.mxu0 %v2569_v48  ;;  %v2633_v10 = vunpack.c.l.s8.bf16 %v2345_v26  ;;  %v2344_v48 = vld [vmem:[%s8077_s21 + $0x100] sm:$0xff] }
 0x5c6   : > { %5313 = vmatprep.subr.bf16.mxu1 %v2571_v50  ;;  %v2346_v50 = vld [vmem:[%s8077_s21 + $0x110] sm:$0xff]  ;;  %v2632_v52 = vunpack.c.l.s8.bf16 %v2344_v48 }
 0x5c7   : > { %4863 = vmatmul.mubr.bf16.vlgmr.msra.gmra.mrb[12].mxu0 %v8589_v6  ;;  %v2634_v53 = vunpack.c.l.s8.bf16 %v2346_v50  ;;  %v2642_v23 = vunpack.c.h.s8.bf16 %v2346_v50  ;;  %v2688_v50 = vunpack.c.h.s8.bf16 %v2368_v41 }
 0x5c8   : > { %5027 = vmatmul.mubr.bf16.vlgmr.msra.gmra.mrb[12].mxu1 %v8589_v6  ;;  %5150 = vmatpush1.bf16.msra.mxu0 %v2568_v35  ;;  %v2586_v6 = vunpack.c.l.s8.bf16 %v2322_v13  ;;  %v2641_v35 = vunpack.c.h.s8.bf16 %v2345_v26  ;;  %v2650_v13 = vunpack.c.l.s8.bf16 %v2354_v60 }
 0x5c9   : > { %5181 = vmatprep.mubr.bf16.mxu0 %v8757_v56  ;;  %5314 = vmatpush1.bf16.msra.mxu1 %v2570_v8  ;;  %v2643_v8 = vunpack.c.h.s8.bf16 %v2347_v46 }
 0x5ca   : > { %5345 = vmatprep.mubr.bf16.mxu1 %v8757_v56  ;;  %5151 = vmatprep.subr.bf16.mxu0 %v2577_v30  ;;  %v2353_v30 = vld [vmem:[%s8077_s21 + $0x148] sm:$0xff] }
 0x5cb   : > { %5315 = vmatprep.subr.bf16.mxu1 %v2579_v1  ;;  %v2640_v1 = vunpack.c.h.s8.bf16 %v2344_v48 }
 0x5cc   : > { %5152 = vmatpush1.bf16.msra.mxu0 %v2576_v58  ;;  %v2649_v58 = vunpack.c.l.s8.bf16 %v2353_v30 }
 0x5cd   : > { %5316 = vmatpush1.bf16.msra.mxu1 %v2578_v54  ;;  %5153 = vmatprep.subr.bf16.mxu0 %v2585_v59  ;;  %v2352_v54 = vld [vmem:[%s8077_s21 + $0x140] sm:$0xff]  ;;  %v2651_v59 = vunpack.c.l.s8.bf16 %v2355_v55 }
 0x5ce   : > { %5317 = vmatprep.subr.bf16.mxu1 %v2587_v61  ;;  %v2648_v61 = vunpack.c.l.s8.bf16 %v2352_v54  ;;  %v2656_v7 = vunpack.c.h.s8.bf16 %v2352_v54 }
 0x5d0   : > { %5154 = vmatpush1.bf16.msra.mxu0 %v2584_v4  ;;  %v2657_v4 = vunpack.c.h.s8.bf16 %v2353_v30  ;;  %v2378_v30 = vld [vmem:[%s8077_s21 + $0x210] sm:$0xff] }
 0x5d1   : > { %5318 = vmatpush1.bf16.msra.mxu1 %v2586_v6  ;;  %5155 = vmatprep.subr.bf16.mxu0 %v2593_v5  ;;  %v2659_v6 = vunpack.c.h.s8.bf16 %v2355_v55  ;;  %v2361_v5 = vld [vmem:[%s8077_s21 + $0x188] sm:$0xff] }
 0x5d2   : > { %5319 = vmatprep.subr.bf16.mxu1 %v2595_v62  ;;  %v2363_v62 = vld [vmem:[%s8077_s21 + $0x198] sm:$0xff] }
 0x5d4   : > { %5156 = vmatpush1.bf16.msra.mxu0 %v2592_v14  ;;  %v2665_v14 = vunpack.c.l.s8.bf16 %v2361_v5 }
 0x5d5   : > { %5320 = vmatpush1.bf16.msra.mxu1 %v2594_v17  ;;  %5157 = vmatprep.subr.bf16.mxu0 %v2601_v16  ;;  %v2360_v17 = vld [vmem:[%s8077_s21 + $0x180] sm:$0xff]  ;;  %v2667_v16 = vunpack.c.l.s8.bf16 %v2363_v62 }
 0x5d6   : > { %5321 = vmatprep.subr.bf16.mxu1 %v2603_v22  ;;  %v2664_v22 = vunpack.c.l.s8.bf16 %v2360_v17 }
 0x5d8   : > { %5158 = vmatpush1.bf16.msra.mxu0 %v2600_v28  ;;  %v2666_v28 = vunpack.c.l.s8.bf16 %v2362_v20 }
 0x5d9   : > { %5322 = vmatpush1.bf16.msra.mxu1 %v2602_v29  ;;  %5159 = vmatprep.subr.bf16.mxu0 %v2609_v57  ;;  %v2673_v29 = vunpack.c.h.s8.bf16 %v2361_v5  ;;  %v2675_v57 = vunpack.c.h.s8.bf16 %v2363_v62  ;;  %v2384_v62 = vld [vmem:[%s8077_s21 + $0x240] sm:$0xff] }
 0x5da   : > { %5323 = vmatprep.subr.bf16.mxu1 %v2611_v32  ;;  %v2369_v32 = vld [vmem:[%s8077_s21 + $0x1c8] sm:$0xff] }
 0x5dc   : > { %5160 = vmatpush1.bf16.msra.mxu0 %v2608_v11  ;;  %v2672_v11 = vunpack.c.h.s8.bf16 %v2360_v17 }
 0x5dd   : > { %5324 = vmatpush1.bf16.msra.mxu1 %v2610_v18  ;;  %5161 = vmatprep.subr.bf16.mxu0 %v2617_v21  ;;  %v5076_v18 = vmul.f32 %v5039_v15, %v8714_v33  ;;  %v5088_v21 = vrot.slane %v8745_v39, %v8146_v42  ;;  %v2680_v33 = vunpack.c.l.s8.bf16 %v2368_v41  ;;  %v2395_v15 = vld [vmem:[%s8077_s21 + $0x298] sm:$0xff] }
 0x5de   : > { %5325 = vmatprep.subr.bf16.mxu1 %v2619_v38  ;;  %v2681_v38 = vunpack.c.l.s8.bf16 %v2369_v32  ;;  %v2403_v41 = vld [vmem:[%s8077_s21 + $0x2d8] sm:$0xff] }
 0x5df   : > { %v5125_v26 = vadd.f32 %v5088_v21, %v5076_v18 }
 0x5e0   : > { %5162 = vmatpush1.bf16.msra.mxu0 %v2616_v24  ;;  %v2683_v24 = vunpack.c.l.s8.bf16 %v2371_v27 }
 0x5e1   : > { %5326 = vmatpush1.bf16.msra.mxu1 %v2618_v31  ;;  %5163 = vmatprep.subr.bf16.mxu0 %v2625_v3  ;;  %v2370_v31 = vld [vmem:[%s8077_s21 + $0x1d0] sm:$0xff]  ;;  %v5079_v3 = vmul.f32 %v5051_v34, %v8721_v47  ;;  %v5133_v47 = vmax.f32 %v5125_v26, 0.0  ;;  %v2731_v34 = vunpack.c.l.s8.bf16 %v2395_v15 }
 0x5e2   : > { %5327 = vmatprep.subr.bf16.mxu1 %v2627_v40  ;;  %v5100_v40 = vrot.slane %v8745_v39, %v8155_v45  ;;  %v2682_v46 = vunpack.c.l.s8.bf16 %v2370_v31  ;;  %v2402_v26 = vld [vmem:[%s8077_s21 + $0x2d0] sm:$0xff] }
 0x5e4   : > { %5164 = vmatpush1.bf16.msra.mxu0 %v2624_v36  ;;  %v2689_v36 = vunpack.c.h.s8.bf16 %v2369_v32  ;;  %v5128_v48 = vadd.f32 %v5100_v40, %v5079_v3  ;;  %v2392_v32 = vld [vmem:[%s8077_s21 + $0x280] sm:$0xff] }
 0x5e5   : > { %5328 = vmatpush1.bf16.msra.mxu1 %v2626_v37  ;;  %5165 = vmatprep.subr.bf16.mxu0 %v2633_v10  ;;  %v2691_v37 = vunpack.c.h.s8.bf16 %v2371_v27  ;;  %v2377_v10 = vld [vmem:[%s8077_s21 + $0x208] sm:$0xff]  ;;  %v2394_v27 = vld [vmem:[%s8077_s21 + $0x290] sm:$0xff]  ;;  %v2400_v40 = vld [vmem:[%s8077_s21 + $0x2c0] sm:$0xff] }
 0x5e6   : > { %5329 = vmatprep.subr.bf16.mxu1 %v2635_v49  ;;  %v2379_v49 = vld [vmem:[%s8077_s21 + $0x218] sm:$0xff]  ;;  %v5136_v55 = vmax.f32 %v5128_v48, 0.0  ;;  %v2705_v54 = vunpack.c.h.s8.bf16 %v2377_v10  ;;  %v2730_v18 = vunpack.c.l.s8.bf16 %v2394_v27  ;;  %v2409_v48 = vld [vmem:[%s8077_s21 + $0x308] sm:$0xff] }
 0x5e8   : > { %5166 = vmatpush1.bf16.msra.mxu0 %v2632_v52  ;;  %v2690_v52 = vunpack.c.h.s8.bf16 %v2370_v31  ;;  %v8807_v60 = vpack.c.bf16 %v5136_v55, %v5136_v55  ;;  %v2738_v31 = vunpack.c.h.s8.bf16 %v2394_v27  ;;  %v5047_v27 = vrot.slane %v8737_v51, %v8149_v43 }
 0x5e9   : > { %5330 = vmatpush1.bf16.msra.mxu1 %v2634_v53  ;;  %5167 = vmatprep.subr.bf16.mxu0 %v2641_v35  ;;  %v2697_v53 = vunpack.c.l.s8.bf16 %v2377_v10  ;;  %v2376_v35 = vld [vmem:[%s8077_s21 + $0x200] sm:$0xff]  ;;  %v2755_v10 = vunpack.c.h.s8.bf16 %v2403_v41 }
 0x5ea   : > { %5331 = vmatprep.subr.bf16.mxu1 %v2643_v8  ;;  %v2699_v8 = vunpack.c.l.s8.bf16 %v2379_v49 }
 0x5ec   : > { %5168 = vmatpush1.bf16.msra.mxu0 %v2640_v1  ;;  %v2696_v1 = vunpack.c.l.s8.bf16 %v2376_v35 }
 0x5ed   : > { %5332 = vmatpush1.bf16.msra.mxu1 %v2642_v23  ;;  %5169 = vmatprep.subr.bf16.mxu0 %v2649_v58  ;;  %v8804_v23 = vpack.c.bf16 %v5133_v47, %v5133_v47  ;;  %v2698_v58 = vunpack.c.l.s8.bf16 %v2378_v30  ;;  %v2754_v47 = vunpack.c.h.s8.bf16 %v2402_v26 }
 0x5ee   : > { %5333 = vmatprep.subr.bf16.mxu1 %v2651_v59  ;;  %v2385_v59 = vld [vmem:[%s8077_s21 + $0x248] sm:$0xff] }
 0x5ef   : > { %v2713_v5 = vunpack.c.l.s8.bf16 %v2385_v59 }
 0x5f0   : > { %5170 = vmatpush1.bf16.msra.mxu0 %v2648_v61  ;;  %v2707_v61 = vunpack.c.h.s8.bf16 %v2379_v49  ;;  %v2411_v49 = vld [vmem:[%s8077_s21 + $0x318] sm:$0xff] }
 0x5f1   : > { %5334 = vmatpush1.bf16.msra.mxu1 %v2650_v13  ;;  %5171 = vmatprep.subr.bf16.mxu0 %v2657_v4  ;;  %v2387_v13 = vld [vmem:[%s8077_s21 + $0x258] sm:$0xff]  ;;  %v2704_v4 = vunpack.c.h.s8.bf16 %v2376_v35  ;;  %v2763_v35 = vunpack.c.l.s8.bf16 %v2411_v49 }
 0x5f2   : > { %5335 = vmatprep.subr.bf16.mxu1 %v2659_v6  ;;  %v2706_v6 = vunpack.c.h.s8.bf16 %v2378_v30  ;;  %v2723_v20 = vunpack.c.h.s8.bf16 %v2387_v13 }
 0x5f4   : > { %5172 = vmatpush1.bf16.msra.mxu0 %v2656_v7  ;;  %v2715_v7 = vunpack.c.l.s8.bf16 %v2387_v13 }
 0x5f5   : > { %5336 = vmatpush1.bf16.msra.mxu1 %v2658_v9  ;;  %5173 = vmatprep.subr.bf16.mxu0 %v2665_v14  ;;  %v2386_v9 = vld [vmem:[%s8077_s21 + $0x250] sm:$0xff]  ;;  %v2712_v14 = vunpack.c.l.s8.bf16 %v2384_v62 }
 0x5f6   : > { %5337 = vmatprep.subr.bf16.mxu1 %v2667_v16  ;;  %v2714_v17 = vunpack.c.l.s8.bf16 %v2386_v9  ;;  %v2721_v16 = vunpack.c.h.s8.bf16 %v2385_v59  ;;  %v2419_v59 = vld [vmem:[%s8077_s21 + $0x358] sm:$0xff] }
 0x5f8   : > { %5174 = vmatpush1.bf16.msra.mxu0 %v2664_v22  ;;  %v2393_v22 = vld [vmem:[%s8077_s21 + $0x288] sm:$0xff] }
 0x5f9   : > { %5338 = vmatpush1.bf16.msra.mxu1 %v2666_v28  ;;  %5175 = vmatprep.subr.bf16.mxu0 %v2673_v29  ;;  %v2720_v28 = vunpack.c.h.s8.bf16 %v2384_v62  ;;  %v2722_v29 = vunpack.c.h.s8.bf16 %v2386_v9  ;;  %v2737_v21 = vunpack.c.h.s8.bf16 %v2393_v22  ;;  %v2418_v62 = vld [vmem:[%s8077_s21 + $0x350] sm:$0xff] }
 0x5fa   : > { %5339 = vmatprep.subr.bf16.mxu1 %v2675_v57  ;;  %v2729_v57 = vunpack.c.l.s8.bf16 %v2393_v22  ;;  %v2778_v9 = vunpack.c.l.s8.bf16 %v2418_v62 }
 0x5fc   : > { %5176 = vmatpush1.bf16.msra.mxu0 %v2672_v11  ;;  %v2728_v11 = vunpack.c.l.s8.bf16 %v2392_v32 }
 0x5fd   : > { %5340 = vmatpush1.bf16.msra.mxu1 %v2674_v0  ;;  %5177 = vmatprep.subr.bf16.mxu0 %v2681_v38  ;;  %v2739_v0 = vunpack.c.h.s8.bf16 %v2395_v15  ;;  %v2401_v38 = vld [vmem:[%s8077_s21 + $0x2c8] sm:$0xff]  ;;  %v2786_v15 = vunpack.c.h.s8.bf16 %v2418_v62 }
 0x5fe   : > { %5341 = vmatprep.subr.bf16.mxu1 %v2683_v24  ;;  %v2736_v24 = vunpack.c.h.s8.bf16 %v2392_v32  ;;  %v2745_v3 = vunpack.c.l.s8.bf16 %v2401_v38  ;;  %v2426_v32 = vld [vmem:[%s8077_s21 + $0x390] sm:$0xff] }
 0x5ff   : > { %v2802_v51 = vunpack.c.h.s8.bf16 %v2426_v32 }
 0x600   : > { %5178 = vmatpush1.bf16.msra.mxu0 %v2680_v33  ;;  %v2747_v33 = vunpack.c.l.s8.bf16 %v2403_v41 }
 0x601   : > { %5342 = vmatpush1.bf16.msra.mxu1 %v2682_v46  ;;  %5179 = vmatprep.subr.bf16.mxu0 %v2689_v36  ;;  %v2744_v46 = vunpack.c.l.s8.bf16 %v2400_v40  ;;  %v2746_v36 = vunpack.c.l.s8.bf16 %v2402_v26  ;;  %v2434_v26 = vld [vmem:[%s8077_s21 + $0x3d0] sm:$0xff] }
 0x602   : > { %5343 = vmatprep.subr.bf16.mxu1 %v2691_v37  ;;  %v2753_v37 = vunpack.c.h.s8.bf16 %v2401_v38  ;;  %v2435_v38 = vld [vmem:[%s8077_s21 + $0x3d8] sm:$0xff] }
 0x604   : > { %5180 = vmatpush1.bf16.msra.mxu0 %v2688_v50  ;;  %v2752_v50 = vunpack.c.h.s8.bf16 %v2400_v40  ;;  %v2432_v40 = vld [vmem:[%s8077_s21 + $0x3c0] sm:$0xff] }
 0x605   : > { %5344 = vmatpush1.bf16.msra.mxu1 %v2690_v52  ;;  %5190 = vmatprep.subr.bf16.mxu0 %v2697_v53  ;;  %v2761_v52 = vunpack.c.l.s8.bf16 %v2409_v48  ;;  %v2408_v53 = vld [vmem:[%s8077_s21 + $0x300] sm:$0xff] }
 0x606   : > { %5354 = vmatprep.subr.bf16.mxu1 %v2699_v8  ;;  %v2410_v8 = vld [vmem:[%s8077_s21 + $0x310] sm:$0xff]  ;;  %v2760_v30 = vunpack.c.l.s8.bf16 %v2408_v53 }
 0x607   : > { %5182 = vmatmul.mubr.bf16.vlgmr.msra.gmra.mrb[16].mxu0 %v8804_v23  ;;  %v2762_v55 = vunpack.c.l.s8.bf16 %v2410_v8  ;;  %v2770_v13 = vunpack.c.h.s8.bf16 %v2410_v8  ;;  %v2442_v8 = vld [vmem:[%s8077_s21 + $0x410] sm:$0xff] }
 0x608   : > { %5346 = vmatmul.mubr.bf16.vlgmr.msra.gmra.mrb[16].mxu1 %v8804_v23  ;;  %5191 = vmatpush1.bf16.msra.mxu0 %v2696_v1  ;;  %v2769_v1 = vunpack.c.h.s8.bf16 %v2409_v48  ;;  %v2443_v48 = vld [vmem:[%s8077_s21 + $0x418] sm:$0xff] }
 0x609   : > { %5222 = vmatprep.mubr.bf16.mxu0 %v8807_v60  ;;  %5355 = vmatpush1.bf16.msra.mxu1 %v2698_v58  ;;  %v2771_v58 = vunpack.c.h.s8.bf16 %v2411_v49  ;;  %v2816_v49 = vunpack.c.h.s8.bf16 %v2432_v40 }
 0x60a   : > { %5386 = vmatprep.mubr.bf16.mxu1 %v8807_v60  ;;  %5192 = vmatprep.subr.bf16.mxu0 %v2705_v54  ;;  %v2417_v54 = vld [vmem:[%s8077_s21 + $0x348] sm:$0xff] }
 0x60b   : > { %5356 = vmatprep.subr.bf16.mxu1 %v2707_v61  ;;  %v2768_v61 = vunpack.c.h.s8.bf16 %v2408_v53  ;;  %v2440_v53 = vld [vmem:[%s8077_s21 + $0x400] sm:$0xff] }
 0x60c   : > { %5193 = vmatpush1.bf16.msra.mxu0 %v2704_v4  ;;  %v2777_v4 = vunpack.c.l.s8.bf16 %v2417_v54 }
 0x60d   : > { %5357 = vmatpush1.bf16.msra.mxu1 %v2706_v6  ;;  %5194 = vmatprep.subr.bf16.mxu0 %v2713_v5  ;;  %v2416_v6 = vld [vmem:[%s8077_s21 + $0x340] sm:$0xff]  ;;  %v2779_v5 = vunpack.c.l.s8.bf16 %v2419_v59 }
 0x60e   : > { %5358 = vmatprep.subr.bf16.mxu1 %v2715_v7  ;;  %v2776_v7 = vunpack.c.l.s8.bf16 %v2416_v6  ;;  %v2784_v22 = vunpack.c.h.s8.bf16 %v2416_v6 }
 0x610   : > { %5195 = vmatpush1.bf16.msra.mxu0 %v2712_v14  ;;  %v2785_v14 = vunpack.c.h.s8.bf16 %v2417_v54  ;;  %v2835_v54 = vunpack.c.h.s8.bf16 %v2443_v48 }
 0x611   : > { %5359 = vmatpush1.bf16.msra.mxu1 %v2714_v17  ;;  %5196 = vmatprep.subr.bf16.mxu0 %v2721_v16  ;;  %v2787_v17 = vunpack.c.h.s8.bf16 %v2419_v59  ;;  %v2425_v16 = vld [vmem:[%s8077_s21 + $0x388] sm:$0xff] }
 0x612   : > { %5360 = vmatprep.subr.bf16.mxu1 %v2723_v20  ;;  %v2427_v20 = vld [vmem:[%s8077_s21 + $0x398] sm:$0xff]  ;;  %v2449_v59 = vld [vmem:[%s8077_s21 + $0x448] sm:$0xff] }
 0x613   : > { %v2841_v6 = vunpack.c.l.s8.bf16 %v2449_v59 }
 0x614   : > { %5197 = vmatpush1.bf16.msra.mxu0 %v2720_v28  ;;  %v2793_v28 = vunpack.c.l.s8.bf16 %v2425_v16 }
 0x615   : > { %5361 = vmatpush1.bf16.msra.mxu1 %v2722_v29  ;;  %5198 = vmatprep.subr.bf16.mxu0 %v2729_v57  ;;  %v2424_v29 = vld [vmem:[%s8077_s21 + $0x380] sm:$0xff]  ;;  %v2795_v57 = vunpack.c.l.s8.bf16 %v2427_v20 }
 0x616   : > { %5362 = vmatprep.subr.bf16.mxu1 %v2731_v34  ;;  %v2792_v34 = vunpack.c.l.s8.bf16 %v2424_v29  ;;  %v2800_v41 = vunpack.c.h.s8.bf16 %v2424_v29 }
 0x618   : > { %5199 = vmatpush1.bf16.msra.mxu0 %v2728_v11  ;;  %v2794_v11 = vunpack.c.l.s8.bf16 %v2426_v32 }
 0x619   : > { %5363 = vmatpush1.bf16.msra.mxu1 %v2730_v18  ;;  %5200 = vmatprep.subr.bf16.mxu0 %v2737_v21  ;;  %v2801_v18 = vunpack.c.h.s8.bf16 %v2425_v16  ;;  %v2803_v21 = vunpack.c.h.s8.bf16 %v2427_v20  ;;  %v2457_v20 = vld [vmem:[%s8077_s21 + $0x488] sm:$0xff] }
 0x61a   : > { %5364 = vmatprep.subr.bf16.mxu1 %v2739_v0  ;;  %v2433_v0 = vld [vmem:[%s8077_s21 + $0x3c8] sm:$0xff]  ;;  %v2857_v29 = vunpack.c.l.s8.bf16 %v2457_v20 }
 0x61c   : > { %5201 = vmatpush1.bf16.msra.mxu0 %v2736_v24  ;;  %v5078_v24 = vmul.f32 %v5047_v27, %v8717_v63  ;;  %v2810_v63 = vunpack.c.l.s8.bf16 %v2434_v26 }
 0x61d   : > { %5365 = vmatpush1.bf16.msra.mxu1 %v2738_v31  ;;  %5202 = vmatprep.subr.bf16.mxu0 %v2745_v3  ;;  %v5096_v31 = vrot.slane %v8745_v39, %v8149_v43  ;;  %v2809_v3 = vunpack.c.l.s8.bf16 %v2433_v0  ;;  %v2819_v39 = vunpack.c.h.s8.bf16 %v2435_v38 }
 0x61e   : > { %5366 = vmatprep.subr.bf16.mxu1 %v2747_v33  ;;  %v2811_v33 = vunpack.c.l.s8.bf16 %v2435_v38  ;;  %v2467_v38 = vld [vmem:[%s8077_s21 + $0x4d8] sm:$0xff] }
 0x620   : > { %5203 = vmatpush1.bf16.msra.mxu0 %v2744_v46  ;;  %v2808_v46 = vunpack.c.l.s8.bf16 %v2432_v40  ;;  %v2466_v40 = vld [vmem:[%s8077_s21 + $0x4d0] sm:$0xff] }
 0x621   : > { %5367 = vmatpush1.bf16.msra.mxu1 %v2746_v36  ;;  %5204 = vmatprep.subr.bf16.mxu0 %v2753_v37  ;;  %v5127_v36 = vadd.f32 %v5096_v31, %v5078_v24  ;;  %v2817_v37 = vunpack.c.h.s8.bf16 %v2433_v0  ;;  %v2465_v0 = vld [vmem:[%s8077_s21 + $0x4c8] sm:$0xff] }
 0x622   : > { %5368 = vmatprep.subr.bf16.mxu1 %v2755_v10  ;;  %v2441_v10 = vld [vmem:[%s8077_s21 + $0x408] sm:$0xff]  ;;  %v2873_v31 = vunpack.c.l.s8.bf16 %v2465_v0 }
 0x624   : > { %5205 = vmatpush1.bf16.msra.mxu0 %v2752_v50  ;;  %v5135_v50 = vmax.f32 %v5127_v36, 0.0  ;;  %v2883_v36 = vunpack.c.h.s8.bf16 %v2467_v38 }
 0x625   : > { %5369 = vmatpush1.bf16.msra.mxu1 %v2754_v47  ;;  %5206 = vmatprep.subr.bf16.mxu0 %v2761_v52  ;;  %v2818_v47 = vunpack.c.h.s8.bf16 %v2434_v26  ;;  %v2825_v52 = vunpack.c.l.s8.bf16 %v2441_v10  ;;  %v2874_v26 = vunpack.c.l.s8.bf16 %v2466_v40 }
 0x626   : > { %5370 = vmatprep.subr.bf16.mxu1 %v2763_v35  ;;  %v2827_v35 = vunpack.c.l.s8.bf16 %v2443_v48 }
 0x628   : > { %5207 = vmatpush1.bf16.msra.mxu0 %v2760_v30  ;;  %v2824_v30 = vunpack.c.l.s8.bf16 %v2440_v53 }
 0x629   : > { %5371 = vmatpush1.bf16.msra.mxu1 %v2762_v55  ;;  %5208 = vmatprep.subr.bf16.mxu0 %v2769_v1  ;;  %v8849_v55 = vpack.c.bf16 %v5135_v50, %v5135_v50  ;;  %v2826_v1 = vunpack.c.l.s8.bf16 %v2442_v8 }
 0x62a   : > { %5372 = vmatprep.subr.bf16.mxu1 %v2771_v58  ;;  %v2833_v58 = vunpack.c.h.s8.bf16 %v2441_v10  ;;  %v2882_v10 = vunpack.c.h.s8.bf16 %v2466_v40 }
 0x62c   : > { %5209 = vmatpush1.bf16.msra.mxu0 %v2768_v61  ;;  %v2451_v61 = vld [vmem:[%s8077_s21 + $0x458] sm:$0xff] }
 0x62d   : > { %5373 = vmatpush1.bf16.msra.mxu1 %v2770_v13  ;;  %5210 = vmatprep.subr.bf16.mxu0 %v2777_v4  ;;  %v2832_v13 = vunpack.c.h.s8.bf16 %v2440_v53  ;;  %v2834_v4 = vunpack.c.h.s8.bf16 %v2442_v8  ;;  %v2843_v62 = vunpack.c.l.s8.bf16 %v2451_v61  ;;  %v2851_v16 = vunpack.c.h.s8.bf16 %v2451_v61  ;;  %v2480_v61 = vld [vmem:[%s8077_s21 + $0x540] sm:$0xff] }
 0x62e   : > { %5374 = vmatprep.subr.bf16.mxu1 %v2779_v5  ;;  %v2448_v5 = vld [vmem:[%s8077_s21 + $0x440] sm:$0xff] }
 0x630   : > { %5211 = vmatpush1.bf16.msra.mxu0 %v2776_v7  ;;  %v2450_v7 = vld [vmem:[%s8077_s21 + $0x450] sm:$0xff] }
 0x631   : > { %5375 = vmatpush1.bf16.msra.mxu1 %v2778_v9  ;;  %5212 = vmatprep.subr.bf16.mxu0 %v2785_v14  ;;  %v2840_v9 = vunpack.c.l.s8.bf16 %v2448_v5  ;;  %v2842_v14 = vunpack.c.l.s8.bf16 %v2450_v7 }
 0x632   : > { %5376 = vmatprep.subr.bf16.mxu1 %v2787_v17  ;;  %v2849_v17 = vunpack.c.h.s8.bf16 %v2449_v59 }
 0x634   : > { %5213 = vmatpush1.bf16.msra.mxu0 %v2784_v22  ;;  %v2459_v22 = vld [vmem:[%s8077_s21 + $0x498] sm:$0xff] }
 0x635   : > { %5377 = vmatpush1.bf16.msra.mxu1 %v2786_v15  ;;  %5214 = vmatprep.subr.bf16.mxu0 %v2793_v28  ;;  %v2848_v15 = vunpack.c.h.s8.bf16 %v2448_v5  ;;  %v2850_v28 = vunpack.c.h.s8.bf16 %v2450_v7  ;;  %v2859_v32 = vunpack.c.l.s8.bf16 %v2459_v22 }
 0x636   : > { %5378 = vmatprep.subr.bf16.mxu1 %v2795_v57  ;;  %v2456_v57 = vld [vmem:[%s8077_s21 + $0x480] sm:$0xff] }
 0x637   : > { %v2856_v27 = vunpack.c.l.s8.bf16 %v2456_v57 }
 0x638   : > { %5215 = vmatpush1.bf16.msra.mxu0 %v2792_v34  ;;  %v2458_v34 = vld [vmem:[%s8077_s21 + $0x490] sm:$0xff] }
 0x639   : > { %5379 = vmatpush1.bf16.msra.mxu1 %v2794_v11  ;;  %5216 = vmatprep.subr.bf16.mxu0 %v2801_v18  ;;  %v2858_v11 = vunpack.c.l.s8.bf16 %v2458_v34  ;;  %v2865_v18 = vunpack.c.h.s8.bf16 %v2457_v20  ;;  %v2866_v24 = vunpack.c.h.s8.bf16 %v2458_v34 }
 0x63a   : > { %5380 = vmatprep.subr.bf16.mxu1 %v2803_v21  ;;  %v2867_v21 = vunpack.c.h.s8.bf16 %v2459_v22  ;;  %v2488_v22 = vld [vmem:[%s8077_s21 + $0x580] sm:$0xff] }
 0x63c   : > { %5217 = vmatpush1.bf16.msra.mxu0 %v2800_v41  ;;  %v2864_v41 = vunpack.c.h.s8.bf16 %v2456_v57 }
 0x63d   : > { %5381 = vmatpush1.bf16.msra.mxu1 %v2802_v51  ;;  %5218 = vmatprep.subr.bf16.mxu0 %v2809_v3  ;;  %v2464_v51 = vld [vmem:[%s8077_s21 + $0x4c0] sm:$0xff]  ;;  %v2875_v3 = vunpack.c.l.s8.bf16 %v2467_v38 }
 0x63e   : > { %5382 = vmatprep.subr.bf16.mxu1 %v2811_v33  ;;  %v2872_v33 = vunpack.c.l.s8.bf16 %v2464_v51  ;;  %v2496_v38 = vld [vmem:[%s8077_s21 + $0x5c0] sm:$0xff] }
 0x640   : > { %5219 = vmatpush1.bf16.msra.mxu0 %v2808_v46  ;;  %v2881_v46 = vunpack.c.h.s8.bf16 %v2465_v0 }
 0x641   : > { %5383 = vmatpush1.bf16.msra.mxu1 %v2810_v63  ;;  %5220 = vmatprep.subr.bf16.mxu0 %v2817_v37  ;;  %v2473_v63 = vld [vmem:[%s8077_s21 + $0x508] sm:$0xff]  ;;  %v2475_v37 = vld [vmem:[%s8077_s21 + $0x518] sm:$0xff] }
 0x642   : > { %5384 = vmatprep.subr.bf16.mxu1 %v2819_v39  ;;  %v2880_v39 = vunpack.c.h.s8.bf16 %v2464_v51  ;;  %v2889_v48 = vunpack.c.l.s8.bf16 %v2473_v63  ;;  %v2891_v50 = vunpack.c.l.s8.bf16 %v2475_v37  ;;  %v2899_v8 = vunpack.c.h.s8.bf16 %v2475_v37 }
 0x644   : > { %5221 = vmatpush1.bf16.msra.mxu0 %v2816_v49  ;;  %v2472_v49 = vld [vmem:[%s8077_s21 + $0x500] sm:$0xff] }
 0x645   : > { %5385 = vmatpush1.bf16.msra.mxu1 %v2818_v47  ;;  %5231 = vmatprep.subr.bf16.mxu0 %v2825_v52  ;;  %v2474_v47 = vld [vmem:[%s8077_s21 + $0x510] sm:$0xff]  ;;  %v2888_v52 = vunpack.c.l.s8.bf16 %v2472_v49 }
 0x646   : > { %5395 = vmatprep.subr.bf16.mxu1 %v2827_v35  ;;  %v2890_v53 = vunpack.c.l.s8.bf16 %v2474_v47  ;;  %v2897_v35 = vunpack.c.h.s8.bf16 %v2473_v63 }
 0x647   : > { %5223 = vmatmul.mubr.bf16.vlgmr.msra.gmra.mrb[16].mxu0 %v8849_v55 }
 0x648   : > { %5387 = vmatmul.mubr.bf16.vlgmr.msra.gmra.mrb[16].mxu1 %v8849_v55  ;;  %5232 = vmatpush1.bf16.msra.mxu0 %v2824_v30  ;;  %v2481_v30 = vld [vmem:[%s8077_s21 + $0x548] sm:$0xff] }
 0x649   : > { %5396 = vmatpush1.bf16.msra.mxu1 %v2826_v1  ;;  %5233 = vmatprep.subr.bf16.mxu0 %v2833_v58  ;;  %v2483_v1 = vld [vmem:[%s8077_s21 + $0x558] sm:$0xff]  ;;  %v2896_v58 = vunpack.c.h.s8.bf16 %v2472_v49  ;;  %v2905_v59 = vunpack.c.l.s8.bf16 %v2481_v30 }
 0x64a   : > { %5397 = vmatprep.subr.bf16.mxu1 %v2835_v54  ;;  %v2898_v54 = vunpack.c.h.s8.bf16 %v2474_v47  ;;  %v2915_v7 = vunpack.c.h.s8.bf16 %v2483_v1  ;;  %v8899_v49 = vld [vmem:[%s937_s6] sm:$0xff] }
 0x64c   : > { %5234 = vmatpush1.bf16.msra.mxu0 %v2832_v13  ;;  %v2907_v13 = vunpack.c.l.s8.bf16 %v2483_v1  ;;  %v5116_v1 = vrot.slane %v8899_v49, %v8519_v25 }
 0x64d   : > { %5398 = vmatpush1.bf16.msra.mxu1 %v2834_v4  ;;  %5235 = vmatprep.subr.bf16.mxu0 %v2841_v6  ;;  %v2482_v4 = vld [vmem:[%s8077_s21 + $0x550] sm:$0xff]  ;;  %v2904_v6 = vunpack.c.l.s8.bf16 %v2480_v61 }
 0x64e   : > { %5399 = vmatprep.subr.bf16.mxu1 %v2843_v62  ;;  %v2906_v5 = vunpack.c.l.s8.bf16 %v2482_v4  ;;  %v2913_v62 = vunpack.c.h.s8.bf16 %v2481_v30 }
 0x650   : > { %5236 = vmatpush1.bf16.msra.mxu0 %v2840_v9  ;;  %v2489_v9 = vld [vmem:[%s8077_s21 + $0x588] sm:$0xff] }
 0x651   : > { %5400 = vmatpush1.bf16.msra.mxu1 %v2842_v14  ;;  %5237 = vmatprep.subr.bf16.mxu0 %v2849_v17  ;;  %v2491_v14 = vld [vmem:[%s8077_s21 + $0x598] sm:$0xff]  ;;  %v2912_v17 = vunpack.c.h.s8.bf16 %v2480_v61  ;;  %v2921_v20 = vunpack.c.l.s8.bf16 %v2489_v9 }
 0x652   : > { %5401 = vmatprep.subr.bf16.mxu1 %v2851_v16  ;;  %v2914_v16 = vunpack.c.h.s8.bf16 %v2482_v4  ;;  %v2931_v34 = vunpack.c.h.s8.bf16 %v2491_v14 }
 0x654   : > { %5238 = vmatpush1.bf16.msra.mxu0 %v2848_v15  ;;  %v2923_v15 = vunpack.c.l.s8.bf16 %v2491_v14  ;;  %v2504_v14 = vld [vmem:[%s8077_s21 + $0x600] sm:$0xff] }
 0x655   : > { %5402 = vmatpush1.bf16.msra.mxu1 %v2850_v28  ;;  %5239 = vmatprep.subr.bf16.mxu0 %v2857_v29  ;;  %v2490_v28 = vld [vmem:[%s8077_s21 + $0x590] sm:$0xff]  ;;  %v2920_v29 = vunpack.c.l.s8.bf16 %v2488_v22 }
 0x656   : > { %5403 = vmatprep.subr.bf16.mxu1 %v2859_v32  ;;  %v2922_v57 = vunpack.c.l.s8.bf16 %v2490_v28  ;;  %v2929_v32 = vunpack.c.h.s8.bf16 %v2489_v9 }
 0x658   : > { %5240 = vmatpush1.bf16.msra.mxu0 %v2856_v27  ;;  %v2497_v27 = vld [vmem:[%s8077_s21 + $0x5c8] sm:$0xff] }
 0x659   : > { %5404 = vmatpush1.bf16.msra.mxu1 %v2858_v11  ;;  %5241 = vmatprep.subr.bf16.mxu0 %v2865_v18  ;;  %v2499_v11 = vld [vmem:[%s8077_s21 + $0x5d8] sm:$0xff]  ;;  %v2928_v18 = vunpack.c.h.s8.bf16 %v2488_v22  ;;  %v2937_v0 = vunpack.c.l.s8.bf16 %v2497_v27 }
 0x65a   : > { %5405 = vmatprep.subr.bf16.mxu1 %v2867_v21  ;;  %v2930_v21 = vunpack.c.h.s8.bf16 %v2490_v28  ;;  %v2947_v40 = vunpack.c.h.s8.bf16 %v2499_v11 }
 0x65c   : > { %5242 = vmatpush1.bf16.msra.mxu0 %v2864_v41  ;;  %v2939_v41 = vunpack.c.l.s8.bf16 %v2499_v11 }
 0x65d   : > { %5406 = vmatpush1.bf16.msra.mxu1 %v2866_v24  ;;  %5243 = vmatprep.subr.bf16.mxu0 %v2873_v31  ;;  %v2498_v24 = vld [vmem:[%s8077_s21 + $0x5d0] sm:$0xff]  ;;  %v2936_v31 = vunpack.c.l.s8.bf16 %v2496_v38 }
 0x65e   : > { %5407 = vmatprep.subr.bf16.mxu1 %v2875_v3  ;;  %v2938_v51 = vunpack.c.l.s8.bf16 %v2498_v24  ;;  %v2945_v3 = vunpack.c.h.s8.bf16 %v2497_v27  ;;  %v2515_v27 = vld [vmem:[%s8077_s21 + $0x658] sm:$0xff] }
 0x660   : > { %5244 = vmatpush1.bf16.msra.mxu0 %v2872_v33  ;;  %v8882_v33 = vld [vmem:[%s8077_s21 + $0x608] sm:$0xff] }
 0x661   : > { %5408 = vmatpush1.bf16.msra.mxu1 %v2874_v26  ;;  %5245 = vmatprep.subr.bf16.mxu0 %v2881_v46  ;;  %v8885_v26 = vld [vmem:[%s8077_s21 + $0x618] sm:$0xff]  ;;  %v2944_v46 = vunpack.c.h.s8.bf16 %v2496_v38  ;;  %v2953_v63 = vunpack.c.l.s8.bf16 %v8882_v33  ;;  %v2971_v38 = vunpack.c.l.s8.bf16 %v2515_v27 }
 0x662   : > { %5409 = vmatprep.subr.bf16.mxu1 %v2883_v36  ;;  %v2946_v36 = vunpack.c.h.s8.bf16 %v2498_v24  ;;  %v2955_v37 = vunpack.c.l.s8.bf16 %v8885_v26  ;;  %v2514_v24 = vld [vmem:[%s8077_s21 + $0x650] sm:$0xff] }
 0x664   : > { %5246 = vmatpush1.bf16.msra.mxu0 %v2880_v39  ;;  %v8891_v39 = vld [vmem:[%s928_s8] sm:$0xff] }
 0x665   : > { %5410 = vmatpush1.bf16.msra.mxu1 %v2882_v10  ;;  %5247 = vmatprep.subr.bf16.mxu0 %v2889_v48  ;;  %v5055_v10 = vrot.slane %v8891_v39, %v8514_v12  ;;  %v5059_v48 = vrot.slane %v8891_v39, %v8460_v2  ;;  %v5067_v47 = vrot.slane %v8891_v39, %v8519_v25 }
 0x666   : > { %5411 = vmatprep.subr.bf16.mxu1 %v2891_v50  ;;  %v5104_v50 = vrot.slane %v8899_v49, %v8514_v12 }
 0x668   : > { %5248 = vmatpush1.bf16.msra.mxu0 %v2888_v52 }
 0x669   : > { %5412 = vmatpush1.bf16.msra.mxu1 %v2890_v53  ;;  %5249 = vmatprep.subr.bf16.mxu0 %v2897_v35  ;;  %v5108_v53 = vrot.slane %v8899_v49, %v8460_v2 }
 0x66a   : > { %5413 = vmatprep.subr.bf16.mxu1 %v2899_v8 }
 0x66c   : > { %5250 = vmatpush1.bf16.msra.mxu0 %v2896_v58 }
 0x66d   : > { %5414 = vmatpush1.bf16.msra.mxu1 %v2898_v54  ;;  %5251 = vmatprep.subr.bf16.mxu0 %v2905_v59 }
 0x66e   : > { %5415 = vmatprep.subr.bf16.mxu1 %v2907_v13 }
 0x670   : > { %5252 = vmatpush1.bf16.msra.mxu0 %v2904_v6 }
 0x671   : > { %5416 = vmatpush1.bf16.msra.mxu1 %v2906_v5  ;;  %5253 = vmatprep.subr.bf16.mxu0 %v2913_v62 }
 0x672   : > { %5417 = vmatprep.subr.bf16.mxu1 %v2915_v7 }
 0x674   : > { %5254 = vmatpush1.bf16.msra.mxu0 %v2912_v17  ;;  %v2506_v17 = vld [vmem:[%s8077_s21 + $0x610] sm:$0xff] }
 0x675   : > { %5418 = vmatpush1.bf16.msra.mxu1 %v2914_v16  ;;  %5255 = vmatprep.subr.bf16.mxu0 %v2921_v20  ;;  %v2954_v28 = vunpack.c.l.s8.bf16 %v2506_v17 }
 0x676   : > { %5419 = vmatprep.subr.bf16.mxu1 %v2923_v15  ;;  %v2952_v15 = vunpack.c.l.s8.bf16 %v2504_v14 }
 0x678   : > { %5256 = vmatpush1.bf16.msra.mxu0 %v2920_v29 }
 0x679   : > { %5420 = vmatpush1.bf16.msra.mxu1 %v2922_v57  ;;  %5257 = vmatprep.subr.bf16.mxu0 %v2929_v32  ;;  %v2961_v57 = vunpack.c.h.s8.bf16 %v8882_v33  ;;  %v2963_v32 = vunpack.c.h.s8.bf16 %v8885_v26  ;;  %v2521_v33 = vld [vmem:[%s8077_s21 + $0x688] sm:$0xff]  ;;  %v2523_v26 = vld [vmem:[%s8077_s21 + $0x698] sm:$0xff] }
 0x67a   : > { %5421 = vmatprep.subr.bf16.mxu1 %v2931_v34  ;;  %v2513_v34 = vld [vmem:[%s8077_s21 + $0x648] sm:$0xff] }
 0x67c   : > { %5258 = vmatpush1.bf16.msra.mxu0 %v2928_v18  ;;  %v2960_v18 = vunpack.c.h.s8.bf16 %v2504_v14 }
 0x67d   : > { %5422 = vmatpush1.bf16.msra.mxu1 %v2930_v21  ;;  %5259 = vmatprep.subr.bf16.mxu0 %v2937_v0  ;;  %v2962_v21 = vunpack.c.h.s8.bf16 %v2506_v17  ;;  %v2969_v0 = vunpack.c.l.s8.bf16 %v2513_v34 }
 0x67e   : > { %5423 = vmatprep.subr.bf16.mxu1 %v2939_v41  ;;  %v2512_v41 = vld [vmem:[%s8077_s21 + $0x640] sm:$0xff] }
 0x680   : > { %5260 = vmatpush1.bf16.msra.mxu0 %v2936_v31  ;;  %v2968_v31 = vunpack.c.l.s8.bf16 %v2512_v41 }
 0x681   : > { %5424 = vmatpush1.bf16.msra.mxu1 %v2938_v51  ;;  %5261 = vmatprep.subr.bf16.mxu0 %v2945_v3  ;;  %v2970_v51 = vunpack.c.l.s8.bf16 %v2514_v24  ;;  %v2977_v3 = vunpack.c.h.s8.bf16 %v2513_v34 }
 0x682   : > { %5425 = vmatprep.subr.bf16.mxu1 %v2947_v40  ;;  %v2979_v40 = vunpack.c.h.s8.bf16 %v2515_v27 }
 0x684   : > { %5262 = vmatpush1.bf16.msra.mxu0 %v2944_v46  ;;  %v2976_v46 = vunpack.c.h.s8.bf16 %v2512_v41 }
 0x685   : > { %5426 = vmatpush1.bf16.msra.mxu1 %v2946_v36  ;;  %5272 = vmatprep.subr.bf16.mxu0 %v2953_v63  ;;  %v2978_v36 = vunpack.c.h.s8.bf16 %v2514_v24  ;;  %v2985_v63 = vunpack.c.l.s8.bf16 %v2521_v33 }
 0x686   : > { %5436 = vmatprep.subr.bf16.mxu1 %v2955_v37  ;;  %v2987_v37 = vunpack.c.l.s8.bf16 %v2523_v26 }
 0x69a   : > { %v4864_v52 = vpop.f32.mrb[12].mxu0 }
 0x69b   : > { %v5080_v35 = vmul.f32 %v5055_v10, %v4864_v52  ;;  %v8907_v8 = vpop.f32.mrb[12].mxu1  ;;  %v4866_v30 = vpop.f32.mrb[13].mxu0  ;;  %v2520_v10 = vld [vmem:[%s8077_s21 + $0x680] sm:$0xff]  ;;  %v2993_v52 = vunpack.c.h.s8.bf16 %v2521_v33 }
 0x69c   : > { %v5081_v58 = vmul.f32 %v5059_v48, %v4866_v30  ;;  %v5030_v54 = vpop.f32.mrb[13].mxu1  ;;  %v4868_v59 = vpop.f32.mrb[14].mxu0  ;;  %v2522_v48 = vld [vmem:[%s8077_s21 + $0x690] sm:$0xff]  ;;  %v2531_v30 = vld [vmem:[%s8077_s21 + $0x6d8] sm:$0xff] }
 0x69d   : > { %v5129_v61 = vadd.f32 %v5104_v50, %v5080_v35  ;;  %v5083_v13 = vmul.f32 %v5067_v47, %v5030_v54  ;;  %v5032_v4 = vpop.f32.mrb[14].mxu1  ;;  %v4869_v6 = vpop.f32.mrb[15].mxu0  ;;  %v2984_v50 = vunpack.c.l.s8.bf16 %v2520_v10  ;;  %v2986_v47 = vunpack.c.l.s8.bf16 %v2522_v48  ;;  %v2529_v35 = vld [vmem:[%s8077_s21 + $0x6c8] sm:$0xff] }
 0x69e   : > { %v5130_v5 = vadd.f32 %v5108_v53, %v5081_v58  ;;  %v5033_v62 = vpop.f32.mrb[15].mxu1  ;;  %v2995_v53 = vunpack.c.h.s8.bf16 %v2523_v26  ;;  %v2994_v58 = vunpack.c.h.s8.bf16 %v2522_v48  ;;  %v3001_v54 = vunpack.c.l.s8.bf16 %v2529_v35 }
 0x69f   : > { %v5137_v7 = vmax.f32 %v5129_v61, 0.0  ;;  %v5132_v9 = vadd.f32 %v5116_v1, %v5083_v13  ;;  %v2992_v1 = vunpack.c.h.s8.bf16 %v2520_v10  ;;  %v3003_v59 = vunpack.c.l.s8.bf16 %v2531_v30  ;;  %v2528_v61 = vld [vmem:[%s8077_s21 + $0x6c0] sm:$0xff]  ;;  %v2530_v13 = vld [vmem:[%s8077_s21 + $0x6d0] sm:$0xff] }
 0x6a0   : > { %v5138_v16 = vmax.f32 %v5130_v5, 0.0  ;;  %v3000_v4 = vunpack.c.l.s8.bf16 %v2528_v61  ;;  %v3002_v6 = vunpack.c.l.s8.bf16 %v2530_v13  ;;  %v3009_v5 = vunpack.c.h.s8.bf16 %v2529_v35 }
 0x6a1   : > { %v5140_v20 = vmax.f32 %v5132_v9, 0.0  ;;  %v8915_v29 = vpack.c.bf16 %v5137_v7, %v5137_v7  ;;  %v3011_v62 = vunpack.c.h.s8.bf16 %v2531_v30  ;;  %v2537_v7 = vld [vmem:[%s8077_s21 + $0x708] sm:$0xff]  ;;  %v2539_v9 = vld [vmem:[%s8077_s21 + $0x718] sm:$0xff]  ;;  %v3008_v14 = vunpack.c.h.s8.bf16 %v2528_v61 }
 0x6a2   : > { %v8913_v22 = vpack.c.bf16 %v5138_v16, %v5138_v16  ;;  %v3010_v17 = vunpack.c.h.s8.bf16 %v2530_v13  ;;  %v3017_v16 = vunpack.c.l.s8.bf16 %v2537_v7  ;;  %v3025_v34 = vunpack.c.h.s8.bf16 %v2537_v7 }
 0x6a3   : > { %v8923_v11 = vpack.c.bf16 %v5140_v20, %v5140_v20  ;;  %v3019_v20 = vunpack.c.l.s8.bf16 %v2539_v9  ;;  %v3027_v27 = vunpack.c.h.s8.bf16 %v2539_v9  ;;  %v5063_v35 = vrot.slane %v8891_v39, %v8570_v19 }
 0x6a4   : > { %5263 = vmatprep.mubr.bf16.mxu0 %v8913_v22  ;;  %5427 = vmatprep.mubr.bf16.mxu1 %v8913_v22 }
 0x6a5   : > { %5264 = vmatmul.mubr.bf16.vlgmr.msra.gmra.mrb[16].mxu0 %v8915_v29  ;;  %5428 = vmatmul.mubr.bf16.vlgmr.msra.gmra.mrb[16].mxu1 %v8915_v29  ;;  %v5082_v13 = vmul.f32 %v5063_v35, %v8907_v8 }
 0x6a6   : > { %5273 = vmatpush1.bf16.msra.mxu0 %v2952_v15  ;;  %5437 = vmatpush1.bf16.msra.mxu1 %v2954_v28  ;;  %v2536_v15 = vld [vmem:[%s8077_s21 + $0x700] sm:$0xff]  ;;  %v2538_v28 = vld [vmem:[%s8077_s21 + $0x710] sm:$0xff] }
 0x6a7   : > { %5304 = vmatprep.mubr.bf16.mxu0 %v8923_v11  ;;  %5468 = vmatprep.mubr.bf16.mxu1 %v8923_v11 }
 0x6a8   : > { %5274 = vmatprep.subr.bf16.mxu0 %v2961_v57  ;;  %5438 = vmatprep.subr.bf16.mxu1 %v2963_v32  ;;  %v3016_v57 = vunpack.c.l.s8.bf16 %v2536_v15  ;;  %v3018_v32 = vunpack.c.l.s8.bf16 %v2538_v28 }
 0x6aa   : > { %5275 = vmatpush1.bf16.msra.mxu0 %v2960_v18  ;;  %5439 = vmatpush1.bf16.msra.mxu1 %v2962_v21  ;;  %v2545_v18 = vld [vmem:[%s8077_s21 + $0x748] sm:$0xff]  ;;  %v2547_v21 = vld [vmem:[%s8077_s21 + $0x758] sm:$0xff] }
 0x6ab   : > { %5276 = vmatprep.subr.bf16.mxu0 %v2969_v0  ;;  %5440 = vmatprep.subr.bf16.mxu1 %v2971_v38  ;;  %v3024_v0 = vunpack.c.h.s8.bf16 %v2536_v15  ;;  %v3026_v38 = vunpack.c.h.s8.bf16 %v2538_v28  ;;  %v3033_v41 = vunpack.c.l.s8.bf16 %v2545_v18  ;;  %v3035_v24 = vunpack.c.l.s8.bf16 %v2547_v21 }
 0x6ac   : > { %v3041_v33 = vunpack.c.h.s8.bf16 %v2545_v18  ;;  %v3043_v26 = vunpack.c.h.s8.bf16 %v2547_v21 }
 0x6ae   : > { %5277 = vmatpush1.bf16.msra.mxu0 %v2968_v31  ;;  %5441 = vmatpush1.bf16.msra.mxu1 %v2970_v51  ;;  %v2544_v31 = vld [vmem:[%s8077_s21 + $0x740] sm:$0xff]  ;;  %v2546_v51 = vld [vmem:[%s8077_s21 + $0x750] sm:$0xff] }
 0x6af   : > { %5278 = vmatprep.subr.bf16.mxu0 %v2977_v3  ;;  %5442 = vmatprep.subr.bf16.mxu1 %v2979_v40  ;;  %v3032_v3 = vunpack.c.l.s8.bf16 %v2544_v31  ;;  %v3034_v40 = vunpack.c.l.s8.bf16 %v2546_v51 }
 0x6b2   : > { %5279 = vmatpush1.bf16.msra.mxu0 %v2976_v46  ;;  %5443 = vmatpush1.bf16.msra.mxu1 %v2978_v36  ;;  %v2553_v46 = vld [vmem:[%s8077_s21 + $0x788] sm:$0xff]  ;;  %v2555_v36 = vld [vmem:[%s8077_s21 + $0x798] sm:$0xff] }
 0x6b3   : > { %5280 = vmatprep.subr.bf16.mxu0 %v2985_v63  ;;  %5444 = vmatprep.subr.bf16.mxu1 %v2987_v37  ;;  %v3040_v63 = vunpack.c.h.s8.bf16 %v2544_v31  ;;  %v3042_v37 = vunpack.c.h.s8.bf16 %v2546_v51  ;;  %v3049_v10 = vunpack.c.l.s8.bf16 %v2553_v46  ;;  %v3051_v48 = vunpack.c.l.s8.bf16 %v2555_v36  ;;  %v2327_v31 = vld [vmem:[%s8077_s21 + $0x78] sm:$0xff] }
 0x6b4   : > { %v3057_v30 = vunpack.c.h.s8.bf16 %v2553_v46  ;;  %v2326_v46 = vld [vmem:[%s8077_s21 + $0x70] sm:$0xff] }
 0x6b6   : > { %5281 = vmatpush1.bf16.msra.mxu0 %v2984_v50  ;;  %5445 = vmatpush1.bf16.msra.mxu1 %v2986_v47  ;;  %v2552_v50 = vld [vmem:[%s8077_s21 + $0x780] sm:$0xff]  ;;  %v2554_v47 = vld [vmem:[%s8077_s21 + $0x790] sm:$0xff] }
 0x6b7   : > { %5282 = vmatprep.subr.bf16.mxu0 %v2993_v52  ;;  %5446 = vmatprep.subr.bf16.mxu1 %v2995_v53  ;;  %v3048_v52 = vunpack.c.l.s8.bf16 %v2552_v50  ;;  %v3050_v53 = vunpack.c.l.s8.bf16 %v2554_v47  ;;  %v3058_v61 = vunpack.c.h.s8.bf16 %v2554_v47  ;;  %v2598_v47 = vunpack.c.h.s8.bf16 %v2326_v46 }
 0x6ba   : > { %5283 = vmatpush1.bf16.msra.mxu0 %v2992_v1  ;;  %5447 = vmatpush1.bf16.msra.mxu1 %v2994_v58  ;;  %v3059_v1 = vunpack.c.h.s8.bf16 %v2555_v36  ;;  %v2561_v58 = vld [vmem:[%s8077_s21 + $0x7c8] sm:$0xff] }
 0x6bb   : > { %5284 = vmatprep.subr.bf16.mxu0 %v3001_v54  ;;  %5448 = vmatprep.subr.bf16.mxu1 %v3003_v59  ;;  %v2563_v54 = vld [vmem:[%s8077_s21 + $0x7d8] sm:$0xff]  ;;  %v3056_v59 = vunpack.c.h.s8.bf16 %v2552_v50  ;;  %v3065_v39 = vunpack.c.l.s8.bf16 %v2561_v58  ;;  %v3073_v8 = vunpack.c.h.s8.bf16 %v2561_v58 }
 0x6be   : > { %5285 = vmatpush1.bf16.msra.mxu0 %v3000_v4  ;;  %5449 = vmatpush1.bf16.msra.mxu1 %v3002_v6  ;;  %v5112_v4 = vrot.slane %v8899_v49, %v8570_v19  ;;  %v3067_v6 = vunpack.c.l.s8.bf16 %v2563_v54  ;;  %v2317_v49 = vld [vmem:[%s8077_s21 + $0x28] sm:$0xff] }
 0x6bf   : > { %5286 = vmatprep.subr.bf16.mxu0 %v3009_v5  ;;  %5450 = vmatprep.subr.bf16.mxu1 %v3011_v62  ;;  %v2560_v5 = vld [vmem:[%s8077_s21 + $0x7c0] sm:$0xff]  ;;  %v2562_v62 = vld [vmem:[%s8077_s21 + $0x7d0] sm:$0xff] }
 0x6c0   : > { %v3064_v7 = vunpack.c.l.s8.bf16 %v2560_v5  ;;  %v3066_v9 = vunpack.c.l.s8.bf16 %v2562_v62  ;;  %v3074_v15 = vunpack.c.h.s8.bf16 %v2562_v62 }
 0x6c2   : > { %5287 = vmatpush1.bf16.msra.mxu0 %v3008_v14  ;;  %5451 = vmatpush1.bf16.msra.mxu1 %v3010_v17  ;;  %v5131_v14 = vadd.f32 %v5112_v4, %v5082_v13  ;;  %v3075_v17 = vunpack.c.h.s8.bf16 %v2563_v54  ;;  %v2343_v13 = vld [vmem:[%s8077_s21 + $0xf8] sm:$0xff] }
 0x6c3   : > { %5288 = vmatprep.subr.bf16.mxu0 %v3017_v16  ;;  %5452 = vmatprep.subr.bf16.mxu1 %v3019_v20  ;;  %v2319_v16 = vld [vmem:[%s8077_s21 + $0x38] sm:$0xff]  ;;  %v3072_v20 = vunpack.c.h.s8.bf16 %v2560_v5  ;;  %v2340_v5 = vld [vmem:[%s8077_s21 + $0xe0] sm:$0xff]  ;;  %v2623_v62 = vunpack.c.l.s8.bf16 %v2343_v13 }
 0x6c4   : > { %v5139_v28 = vmax.f32 %v5131_v14, 0.0 }
 0x6c6   : > { %5289 = vmatpush1.bf16.msra.mxu0 %v3016_v57  ;;  %5453 = vmatpush1.bf16.msra.mxu1 %v3018_v32  ;;  %v2573_v57 = vunpack.c.l.s8.bf16 %v2317_v49  ;;  %v2575_v32 = vunpack.c.l.s8.bf16 %v2319_v16  ;;  %v8964_v21 = vpack.c.bf16 %v5139_v28, %v5139_v28 }
 0x6c7   : > { %5290 = vmatprep.subr.bf16.mxu0 %v3025_v34  ;;  %5454 = vmatprep.subr.bf16.mxu1 %v3027_v27  ;;  %v2316_v34 = vld [vmem:[%s8077_s21 + $0x20] sm:$0xff]  ;;  %v2318_v27 = vld [vmem:[%s8077_s21 + $0x30] sm:$0xff] }
 0x6c8   : > { %v2572_v18 = vunpack.c.l.s8.bf16 %v2316_v34  ;;  %v2580_v51 = vunpack.c.h.s8.bf16 %v2316_v34  ;;  %v2350_v34 = vld [vmem:[%s8077_s21 + $0x130] sm:$0xff] }
 0x6ca   : > { %5291 = vmatpush1.bf16.msra.mxu0 %v3024_v0  ;;  %5455 = vmatpush1.bf16.msra.mxu1 %v3026_v38  ;;  %v2574_v0 = vunpack.c.l.s8.bf16 %v2318_v27  ;;  %v2581_v38 = vunpack.c.h.s8.bf16 %v2317_v49  ;;  %v2349_v49 = vld [vmem:[%s8077_s21 + $0x128] sm:$0xff] }
 0x6cb   : > { %5292 = vmatprep.subr.bf16.mxu0 %v3033_v41  ;;  %5456 = vmatprep.subr.bf16.mxu1 %v3035_v24  ;;  %v2583_v41 = vunpack.c.h.s8.bf16 %v2319_v16  ;;  %v2325_v24 = vld [vmem:[%s8077_s21 + $0x68] sm:$0xff]  ;;  %v2351_v16 = vld [vmem:[%s8077_s21 + $0x138] sm:$0xff]  ;;  %v2637_v28 = vunpack.c.l.s8.bf16 %v2349_v49 }
 0x6ce   : > { %5293 = vmatpush1.bf16.msra.mxu0 %v3032_v3  ;;  %5457 = vmatpush1.bf16.msra.mxu1 %v3034_v40  ;;  %v2582_v3 = vunpack.c.h.s8.bf16 %v2318_v27  ;;  %v2589_v40 = vunpack.c.l.s8.bf16 %v2325_v24 }
 0x6cf   : > { %5294 = vmatprep.subr.bf16.mxu0 %v3041_v33  ;;  %5458 = vmatprep.subr.bf16.mxu1 %v3043_v26  ;;  %v2324_v33 = vld [vmem:[%s8077_s21 + $0x60] sm:$0xff]  ;;  %v2591_v26 = vunpack.c.l.s8.bf16 %v2327_v31 }
 0x6d0   : > { %v2588_v36 = vunpack.c.l.s8.bf16 %v2324_v33  ;;  %v2596_v50 = vunpack.c.h.s8.bf16 %v2324_v33 }
 0x6d2   : > { %5295 = vmatpush1.bf16.msra.mxu0 %v3040_v63  ;;  %5459 = vmatpush1.bf16.msra.mxu1 %v3042_v37  ;;  %v2590_v63 = vunpack.c.l.s8.bf16 %v2326_v46  ;;  %v2597_v37 = vunpack.c.h.s8.bf16 %v2325_v24  ;;  %v2359_v24 = vld [vmem:[%s8077_s21 + $0x178] sm:$0xff] }
 0x6d3   : > { %5296 = vmatprep.subr.bf16.mxu0 %v3049_v10  ;;  %5460 = vmatprep.subr.bf16.mxu1 %v3051_v48  ;;  %v2599_v10 = vunpack.c.h.s8.bf16 %v2327_v31  ;;  %v2335_v48 = vld [vmem:[%s8077_s21 + $0xb8] sm:$0xff]  ;;  %v2655_v33 = vunpack.c.l.s8.bf16 %v2359_v24 }
 0x6d4   : > { %v2607_v35 = vunpack.c.l.s8.bf16 %v2335_v48 }
 0x6d6   : > { %5297 = vmatpush1.bf16.msra.mxu0 %v3048_v52  ;;  %5461 = vmatpush1.bf16.msra.mxu1 %v3050_v53  ;;  %v2332_v53 = vld [vmem:[%s8077_s21 + $0xa0] sm:$0xff] }
 0x6d7   : > { %5298 = vmatprep.subr.bf16.mxu0 %v3057_v30  ;;  %5462 = vmatprep.subr.bf16.mxu1 %v3059_v1  ;;  %v2334_v30 = vld [vmem:[%s8077_s21 + $0xb0] sm:$0xff]  ;;  %v2604_v1 = vunpack.c.l.s8.bf16 %v2332_v53  ;;  %v2612_v4 = vunpack.c.h.s8.bf16 %v2332_v53 }
 0x6d8   : > { %v2606_v58 = vunpack.c.l.s8.bf16 %v2334_v30 }
 0x6da   : > { %5299 = vmatpush1.bf16.msra.mxu0 %v3056_v59  ;;  %5463 = vmatpush1.bf16.msra.mxu1 %v3058_v61  ;;  %v2615_v59 = vunpack.c.h.s8.bf16 %v2335_v48  ;;  %v2341_v61 = vld [vmem:[%s8077_s21 + $0xe8] sm:$0xff] }
 0x6db   : > { %5300 = vmatprep.subr.bf16.mxu0 %v3065_v39  ;;  %5464 = vmatprep.subr.bf16.mxu1 %v3067_v6  ;;  %v2614_v39 = vunpack.c.h.s8.bf16 %v2334_v30  ;;  %v2621_v6 = vunpack.c.l.s8.bf16 %v2341_v61 }
 0x6de   : > { %5301 = vmatpush1.bf16.msra.mxu0 %v3064_v7  ;;  %5465 = vmatpush1.bf16.msra.mxu1 %v3066_v9  ;;  %v2342_v7 = vld [vmem:[%s8077_s21 + $0xf0] sm:$0xff]  ;;  %v2620_v9 = vunpack.c.l.s8.bf16 %v2340_v5 }
 0x6df   : > { %5302 = vmatprep.subr.bf16.mxu0 %v3073_v8  ;;  %5466 = vmatprep.subr.bf16.mxu1 %v3075_v17  ;;  %v2622_v14 = vunpack.c.l.s8.bf16 %v2342_v7  ;;  %v2629_v8 = vunpack.c.h.s8.bf16 %v2341_v61  ;;  %v2631_v17 = vunpack.c.h.s8.bf16 %v2343_v13  ;;  %v2375_v61 = vld [vmem:[%s8077_s21 + $0x1f8] sm:$0xff] }
 0x6e2   : > { %5303 = vmatpush1.bf16.msra.mxu0 %v3072_v20  ;;  %5467 = vmatpush1.bf16.msra.mxu1 %v3074_v15  ;;  %v2628_v20 = vunpack.c.h.s8.bf16 %v2340_v5  ;;  %v2630_v15 = vunpack.c.h.s8.bf16 %v2342_v7  ;;  %v2687_v5 = vunpack.c.l.s8.bf16 %v2375_v61 }
 0x6e3   : > { %5477 = vmatprep.subr.bf16.mxu0 %v2573_v57  ;;  %5641 = vmatprep.subr.bf16.mxu1 %v2575_v32  ;;  %v2348_v57 = vld [vmem:[%s8077_s21 + $0x120] sm:$0xff]  ;;  %v2639_v32 = vunpack.c.l.s8.bf16 %v2351_v16 }
 0x6e4   : > { %v2636_v27 = vunpack.c.l.s8.bf16 %v2348_v57  ;;  %v2644_v31 = vunpack.c.h.s8.bf16 %v2348_v57 }
 0x6e5   : > { %5305 = vmatmul.mubr.bf16.vlgmr.msra.gmra.mrb[16].mxu0 %v8964_v21  ;;  %5469 = vmatmul.mubr.bf16.vlgmr.msra.gmra.mrb[16].mxu1 %v8964_v21 }
 0x6e6   : > { %5478 = vmatpush1.bf16.msra.mxu0 %v2572_v18  ;;  %5509 = vmatprep.mubr.bf16.mxu0 %v8757_v56  ;;  %v2638_v18 = vunpack.c.l.s8.bf16 %v2350_v34 }
 0x6e7   : > { %5642 = vmatpush1.bf16.msra.mxu1 %v2574_v0  ;;  %5673 = vmatprep.mubr.bf16.mxu1 %v8757_v56  ;;  %v2333_v56 = vld [vmem:[%s8077_s21 + $0xa8] sm:$0xff]  ;;  %v2645_v0 = vunpack.c.h.s8.bf16 %v2349_v49  ;;  %v2383_v49 = vld [vmem:[%s8077_s21 + $0x238] sm:$0xff] }
 0x6e8   : > { %5479 = vmatprep.subr.bf16.mxu0 %v2581_v38  ;;  %5643 = vmatprep.subr.bf16.mxu1 %v2583_v41  ;;  %v2605_v52 = vunpack.c.l.s8.bf16 %v2333_v56  ;;  %v2613_v54 = vunpack.c.h.s8.bf16 %v2333_v56  ;;  %v2647_v38 = vunpack.c.h.s8.bf16 %v2351_v16  ;;  %v2357_v41 = vld [vmem:[%s8077_s21 + $0x168] sm:$0xff]  ;;  %v2367_v56 = vld [vmem:[%s8077_s21 + $0x1b8] sm:$0xff]  ;;  %v2703_v57 = vunpack.c.l.s8.bf16 %v2383_v49 }
 0x6e9   : > { %v2671_v53 = vunpack.c.l.s8.bf16 %v2367_v56 }
 0x6ea   : > { %5480 = vmatpush1.bf16.msra.mxu0 %v2580_v51  ;;  %v2646_v51 = vunpack.c.h.s8.bf16 %v2350_v34 }
 0x6eb   : > { %5644 = vmatpush1.bf16.msra.mxu1 %v2582_v3  ;;  %5481 = vmatprep.subr.bf16.mxu0 %v2589_v40  ;;  %v2653_v3 = vunpack.c.l.s8.bf16 %v2357_v41  ;;  %v2356_v40 = vld [vmem:[%s8077_s21 + $0x160] sm:$0xff] }
 0x6ec   : > { %5645 = vmatprep.subr.bf16.mxu1 %v2591_v26  ;;  %v2358_v26 = vld [vmem:[%s8077_s21 + $0x170] sm:$0xff]  ;;  %v2652_v46 = vunpack.c.l.s8.bf16 %v2356_v40  ;;  %v2660_v48 = vunpack.c.h.s8.bf16 %v2356_v40 }
 0x6ee   : > { %5482 = vmatpush1.bf16.msra.mxu0 %v2588_v36  ;;  %v2654_v36 = vunpack.c.l.s8.bf16 %v2358_v26 }
 0x6ef   : > { %5646 = vmatpush1.bf16.msra.mxu1 %v2590_v63  ;;  %5483 = vmatprep.subr.bf16.mxu0 %v2597_v37  ;;  %v2661_v63 = vunpack.c.h.s8.bf16 %v2357_v41  ;;  %v2663_v37 = vunpack.c.h.s8.bf16 %v2359_v24  ;;  %v2391_v41 = vld [vmem:[%s8077_s21 + $0x278] sm:$0xff] }
 0x6f0   : > { %5647 = vmatprep.subr.bf16.mxu1 %v2599_v10  ;;  %v2365_v10 = vld [vmem:[%s8077_s21 + $0x1a8] sm:$0xff]  ;;  %v2719_v40 = vunpack.c.l.s8.bf16 %v2391_v41 }
 0x6f2   : > { %5484 = vmatpush1.bf16.msra.mxu0 %v2596_v50  ;;  %v2662_v50 = vunpack.c.h.s8.bf16 %v2358_v26 }
 0x6f3   : > { %5648 = vmatpush1.bf16.msra.mxu1 %v2598_v47  ;;  %5485 = vmatprep.subr.bf16.mxu0 %v2605_v52  ;;  %v2669_v47 = vunpack.c.l.s8.bf16 %v2365_v10  ;;  %v2364_v52 = vld [vmem:[%s8077_s21 + $0x1a0] sm:$0xff] }
 0x6f4   : > { %5649 = vmatprep.subr.bf16.mxu1 %v2607_v35  ;;  %v2366_v35 = vld [vmem:[%s8077_s21 + $0x1b0] sm:$0xff]  ;;  %v2668_v30 = vunpack.c.l.s8.bf16 %v2364_v52  ;;  %v2676_v13 = vunpack.c.h.s8.bf16 %v2364_v52 }
 0x6f6   : > { %5486 = vmatpush1.bf16.msra.mxu0 %v2604_v1  ;;  %v2670_v1 = vunpack.c.l.s8.bf16 %v2366_v35 }
 0x6f7   : > { %5650 = vmatpush1.bf16.msra.mxu1 %v2606_v58  ;;  %5487 = vmatprep.subr.bf16.mxu0 %v2613_v54  ;;  %v2677_v58 = vunpack.c.h.s8.bf16 %v2365_v10  ;;  %v2679_v54 = vunpack.c.h.s8.bf16 %v2367_v56 }
 0x6f8   : > { %5651 = vmatprep.subr.bf16.mxu1 %v2615_v59  ;;  %v2373_v59 = vld [vmem:[%s8077_s21 + $0x1e8] sm:$0xff] }
 0x6fa   : > { %5488 = vmatpush1.bf16.msra.mxu0 %v2612_v4  ;;  %v2678_v4 = vunpack.c.h.s8.bf16 %v2366_v35 }
 0x6fb   : > { %5652 = vmatpush1.bf16.msra.mxu1 %v2614_v39  ;;  %5489 = vmatprep.subr.bf16.mxu0 %v2621_v6  ;;  %v2685_v39 = vunpack.c.l.s8.bf16 %v2373_v59  ;;  %v2372_v6 = vld [vmem:[%s8077_s21 + $0x1e0] sm:$0xff] }
 0x6fc   : > { %5653 = vmatprep.subr.bf16.mxu1 %v2623_v62  ;;  %v2374_v62 = vld [vmem:[%s8077_s21 + $0x1f0] sm:$0xff]  ;;  %v2684_v7 = vunpack.c.l.s8.bf16 %v2372_v6  ;;  %v2692_v16 = vunpack.c.h.s8.bf16 %v2372_v6 }
 0x6fe   : > { %5490 = vmatpush1.bf16.msra.mxu0 %v2620_v9  ;;  %v2686_v9 = vunpack.c.l.s8.bf16 %v2374_v62 }
 0x6ff   : > { %5654 = vmatpush1.bf16.msra.mxu1 %v2622_v14  ;;  %5491 = vmatprep.subr.bf16.mxu0 %v2629_v8  ;;  %v2693_v14 = vunpack.c.h.s8.bf16 %v2373_v59  ;;  %v2695_v8 = vunpack.c.h.s8.bf16 %v2375_v61 }
 0x700   : > { %5655 = vmatprep.subr.bf16.mxu1 %v2631_v17  ;;  %v2381_v17 = vld [vmem:[%s8077_s21 + $0x228] sm:$0xff] }
 0x702   : > { %5492 = vmatpush1.bf16.msra.mxu0 %v2628_v20  ;;  %v2694_v20 = vunpack.c.h.s8.bf16 %v2374_v62 }
 0x703   : > { %5656 = vmatpush1.bf16.msra.mxu1 %v2630_v15  ;;  %5493 = vmatprep.subr.bf16.mxu0 %v2637_v28  ;;  %v2701_v15 = vunpack.c.l.s8.bf16 %v2381_v17  ;;  %v2380_v28 = vld [vmem:[%s8077_s21 + $0x220] sm:$0xff] }
 0x704   : > { %5657 = vmatprep.subr.bf16.mxu1 %v2639_v32  ;;  %v2382_v32 = vld [vmem:[%s8077_s21 + $0x230] sm:$0xff]  ;;  %v2700_v34 = vunpack.c.l.s8.bf16 %v2380_v28  ;;  %v2708_v24 = vunpack.c.h.s8.bf16 %v2380_v28 }
 0x706   : > { %5494 = vmatpush1.bf16.msra.mxu0 %v2636_v27  ;;  %v2702_v27 = vunpack.c.l.s8.bf16 %v2382_v32 }
 0x707   : > { %5658 = vmatpush1.bf16.msra.mxu1 %v2638_v18  ;;  %5495 = vmatprep.subr.bf16.mxu0 %v2645_v0  ;;  %v2709_v18 = vunpack.c.h.s8.bf16 %v2381_v17  ;;  %v2389_v0 = vld [vmem:[%s8077_s21 + $0x268] sm:$0xff] }
 0x708   : > { %5659 = vmatprep.subr.bf16.mxu1 %v2647_v38  ;;  %v2711_v38 = vunpack.c.h.s8.bf16 %v2383_v49 }
 0x70a   : > { %5496 = vmatpush1.bf16.msra.mxu0 %v2644_v31  ;;  %v2710_v31 = vunpack.c.h.s8.bf16 %v2382_v32 }
 0x70b   : > { %5660 = vmatpush1.bf16.msra.mxu1 %v2646_v51  ;;  %5497 = vmatprep.subr.bf16.mxu0 %v2653_v3  ;;  %v2717_v51 = vunpack.c.l.s8.bf16 %v2389_v0  ;;  %v2388_v3 = vld [vmem:[%s8077_s21 + $0x260] sm:$0xff] }
 0x70c   : > { %5661 = vmatprep.subr.bf16.mxu1 %v2655_v33  ;;  %v2390_v33 = vld [vmem:[%s8077_s21 + $0x270] sm:$0xff]  ;;  %v2716_v26 = vunpack.c.l.s8.bf16 %v2388_v3  ;;  %v2724_v10 = vunpack.c.h.s8.bf16 %v2388_v3 }
 0x70e   : > { %5498 = vmatpush1.bf16.msra.mxu0 %v2652_v46  ;;  %v2725_v46 = vunpack.c.h.s8.bf16 %v2389_v0 }
 0x70f   : > { %5662 = vmatpush1.bf16.msra.mxu1 %v2654_v36  ;;  %5499 = vmatprep.subr.bf16.mxu0 %v2661_v63  ;;  %v2727_v36 = vunpack.c.h.s8.bf16 %v2391_v41  ;;  %v2397_v63 = vld [vmem:[%s8077_s21 + $0x2a8] sm:$0xff] }
 0x710   : > { %5663 = vmatprep.subr.bf16.mxu1 %v2663_v37  ;;  %v2399_v37 = vld [vmem:[%s8077_s21 + $0x2b8] sm:$0xff]  ;;  %v2733_v56 = vunpack.c.l.s8.bf16 %v2397_v63  ;;  %v2741_v35 = vunpack.c.h.s8.bf16 %v2397_v63 }
 0x712   : > { %5500 = vmatpush1.bf16.msra.mxu0 %v2660_v48  ;;  %v2396_v48 = vld [vmem:[%s8077_s21 + $0x2a0] sm:$0xff] }
 0x713   : > { %5664 = vmatpush1.bf16.msra.mxu1 %v2662_v50  ;;  %5501 = vmatprep.subr.bf16.mxu0 %v2669_v47  ;;  %v2735_v50 = vunpack.c.l.s8.bf16 %v2399_v37  ;;  %v2398_v47 = vld [vmem:[%s8077_s21 + $0x2b0] sm:$0xff]  ;;  %v2732_v52 = vunpack.c.l.s8.bf16 %v2396_v48 }
 0x714   : > { %5665 = vmatprep.subr.bf16.mxu1 %v2671_v53  ;;  %v2734_v53 = vunpack.c.l.s8.bf16 %v2398_v47  ;;  %v2742_v59 = vunpack.c.h.s8.bf16 %v2398_v47 }
 0x716   : > { %5502 = vmatpush1.bf16.msra.mxu0 %v2668_v30  ;;  %v2743_v30 = vunpack.c.h.s8.bf16 %v2399_v37 }
 0x717   : > { %5666 = vmatpush1.bf16.msra.mxu1 %v2670_v1  ;;  %5503 = vmatprep.subr.bf16.mxu0 %v2677_v58  ;;  %v2405_v1 = vld [vmem:[%s8077_s21 + $0x2e8] sm:$0xff]  ;;  %v2407_v58 = vld [vmem:[%s8077_s21 + $0x2f8] sm:$0xff] }
 0x718   : > { %5667 = vmatprep.subr.bf16.mxu1 %v2679_v54  ;;  %v2740_v54 = vunpack.c.h.s8.bf16 %v2396_v48  ;;  %v2749_v61 = vunpack.c.l.s8.bf16 %v2405_v1  ;;  %v2757_v62 = vunpack.c.h.s8.bf16 %v2405_v1 }
 0x71a   : > { %5504 = vmatpush1.bf16.msra.mxu0 %v2676_v13  ;;  %v2404_v13 = vld [vmem:[%s8077_s21 + $0x2e0] sm:$0xff] }
 0x71b   : > { %5668 = vmatpush1.bf16.msra.mxu1 %v2678_v4  ;;  %5505 = vmatprep.subr.bf16.mxu0 %v2685_v39  ;;  %v2751_v4 = vunpack.c.l.s8.bf16 %v2407_v58  ;;  %v2406_v39 = vld [vmem:[%s8077_s21 + $0x2f0] sm:$0xff]  ;;  %v2748_v6 = vunpack.c.l.s8.bf16 %v2404_v13 }
 0x71c   : > { %5669 = vmatprep.subr.bf16.mxu1 %v2687_v5  ;;  %v2750_v5 = vunpack.c.l.s8.bf16 %v2406_v39  ;;  %v2758_v17 = vunpack.c.h.s8.bf16 %v2406_v39 }
 0x71e   : > { %5506 = vmatpush1.bf16.msra.mxu0 %v2684_v7  ;;  %v2759_v7 = vunpack.c.h.s8.bf16 %v2407_v58 }
 0x71f   : > { %5670 = vmatpush1.bf16.msra.mxu1 %v2686_v9  ;;  %5507 = vmatprep.subr.bf16.mxu0 %v2693_v14  ;;  %v2413_v9 = vld [vmem:[%s8077_s21 + $0x328] sm:$0xff]  ;;  %v2415_v14 = vld [vmem:[%s8077_s21 + $0x338] sm:$0xff] }
 0x720   : > { %5671 = vmatprep.subr.bf16.mxu1 %v2695_v8  ;;  %v2756_v8 = vunpack.c.h.s8.bf16 %v2404_v13  ;;  %v2765_v49 = vunpack.c.l.s8.bf16 %v2413_v9  ;;  %v2773_v32 = vunpack.c.h.s8.bf16 %v2413_v9 }
 0x722   : > { %5508 = vmatpush1.bf16.msra.mxu0 %v2692_v16  ;;  %v2412_v16 = vld [vmem:[%s8077_s21 + $0x320] sm:$0xff] }
 0x723   : > { %5672 = vmatpush1.bf16.msra.mxu1 %v2694_v20  ;;  %5518 = vmatprep.subr.bf16.mxu0 %v2701_v15  ;;  %v2767_v20 = vunpack.c.l.s8.bf16 %v2415_v14  ;;  %v2414_v15 = vld [vmem:[%s8077_s21 + $0x330] sm:$0xff]  ;;  %v2764_v28 = vunpack.c.l.s8.bf16 %v2412_v16  ;;  %v2772_v0 = vunpack.c.h.s8.bf16 %v2412_v16 }
 0x724   : > { %5682 = vmatprep.subr.bf16.mxu1 %v2703_v57  ;;  %v2766_v57 = vunpack.c.l.s8.bf16 %v2414_v15 }
 0x725   : > { %5510 = vmatmul.mubr.bf16.vlgmr.msra.gmra.mrb[20].mxu0 %v8804_v23 }
 0x726   : > { %5674 = vmatmul.mubr.bf16.vlgmr.msra.gmra.mrb[20].mxu1 %v8804_v23  ;;  %5519 = vmatpush1.bf16.msra.mxu0 %v2700_v34  ;;  %v2718_v23 = vunpack.c.l.s8.bf16 %v2390_v33  ;;  %v2775_v34 = vunpack.c.h.s8.bf16 %v2415_v14 }
 0x727   : > { %5550 = vmatprep.mubr.bf16.mxu0 %v8807_v60  ;;  %5683 = vmatpush1.bf16.msra.mxu1 %v2702_v27  ;;  %v2421_v27 = vld [vmem:[%s8077_s21 + $0x368] sm:$0xff] }
 0x728   : > { %5714 = vmatprep.mubr.bf16.mxu1 %v8807_v60  ;;  %5520 = vmatprep.subr.bf16.mxu0 %v2709_v18  ;;  %v2726_v60 = vunpack.c.h.s8.bf16 %v2390_v33  ;;  %v2423_v18 = vld [vmem:[%s8077_s21 + $0x378] sm:$0xff]  ;;  %v2781_v41 = vunpack.c.l.s8.bf16 %v2421_v27  ;;  %v2789_v33 = vunpack.c.h.s8.bf16 %v2421_v27 }
 0x729   : > { %5684 = vmatprep.subr.bf16.mxu1 %v2711_v38  ;;  %v2774_v38 = vunpack.c.h.s8.bf16 %v2414_v15 }
 0x72a   : > { %5521 = vmatpush1.bf16.msra.mxu0 %v2708_v24  ;;  %v2420_v24 = vld [vmem:[%s8077_s21 + $0x360] sm:$0xff] }
 0x72b   : > { %5685 = vmatpush1.bf16.msra.mxu1 %v2710_v31  ;;  %5522 = vmatprep.subr.bf16.mxu0 %v2717_v51  ;;  %v2783_v31 = vunpack.c.l.s8.bf16 %v2423_v18  ;;  %v2422_v51 = vld [vmem:[%s8077_s21 + $0x370] sm:$0xff]  ;;  %v2780_v3 = vunpack.c.l.s8.bf16 %v2420_v24 }
 0x72c   : > { %5686 = vmatprep.subr.bf16.mxu1 %v2719_v40  ;;  %v2782_v40 = vunpack.c.l.s8.bf16 %v2422_v51  ;;  %v2790_v63 = vunpack.c.h.s8.bf16 %v2422_v51 }
 0x72e   : > { %5523 = vmatpush1.bf16.msra.mxu0 %v2716_v26  ;;  %v2791_v26 = vunpack.c.h.s8.bf16 %v2423_v18 }
 0x72f   : > { %5687 = vmatpush1.bf16.msra.mxu1 %v2718_v23  ;;  %5524 = vmatprep.subr.bf16.mxu0 %v2725_v46  ;;  %v2429_v23 = vld [vmem:[%s8077_s21 + $0x3a8] sm:$0xff]  ;;  %v2431_v46 = vld [vmem:[%s8077_s21 + $0x3b8] sm:$0xff] }
 0x730   : > { %5688 = vmatprep.subr.bf16.mxu1 %v2727_v36  ;;  %v2788_v36 = vunpack.c.h.s8.bf16 %v2420_v24  ;;  %v2797_v37 = vunpack.c.l.s8.bf16 %v2429_v23  ;;  %v2805_v47 = vunpack.c.h.s8.bf16 %v2429_v23  ;;  %v2460_v23 = vld [vmem:[%s8077_s21 + $0x4a0] sm:$0xff] }
 0x732   : > { %5525 = vmatpush1.bf16.msra.mxu0 %v2724_v10  ;;  %v2428_v10 = vld [vmem:[%s8077_s21 + $0x3a0] sm:$0xff] }
 0x733   : > { %5689 = vmatpush1.bf16.msra.mxu1 %v2726_v60  ;;  %5526 = vmatprep.subr.bf16.mxu0 %v2733_v56  ;;  %v2799_v60 = vunpack.c.l.s8.bf16 %v2431_v46  ;;  %v2430_v56 = vld [vmem:[%s8077_s21 + $0x3b0] sm:$0xff]  ;;  %v2796_v48 = vunpack.c.l.s8.bf16 %v2428_v10 }
 0x734   : > { %5690 = vmatprep.subr.bf16.mxu1 %v2735_v50  ;;  %v2798_v50 = vunpack.c.l.s8.bf16 %v2430_v56  ;;  %v2806_v1 = vunpack.c.h.s8.bf16 %v2430_v56  ;;  %v2469_v56 = vld [vmem:[%s8077_s21 + $0x4e8] sm:$0xff] }
 0x736   : > { %5527 = vmatpush1.bf16.msra.mxu0 %v2732_v52  ;;  %v2807_v52 = vunpack.c.h.s8.bf16 %v2431_v46 }
 0x737   : > { %5691 = vmatpush1.bf16.msra.mxu1 %v2734_v53  ;;  %5528 = vmatprep.subr.bf16.mxu0 %v2741_v35  ;;  %v2437_v53 = vld [vmem:[%s8077_s21 + $0x3e8] sm:$0xff]  ;;  %v2439_v35 = vld [vmem:[%s8077_s21 + $0x3f8] sm:$0xff] }
 0x738   : > { %5692 = vmatprep.subr.bf16.mxu1 %v2743_v30  ;;  %v2804_v30 = vunpack.c.h.s8.bf16 %v2428_v10  ;;  %v2813_v58 = vunpack.c.l.s8.bf16 %v2437_v53  ;;  %v2821_v39 = vunpack.c.h.s8.bf16 %v2437_v53  ;;  %v2468_v53 = vld [vmem:[%s8077_s21 + $0x4e0] sm:$0xff] }
 0x73a   : > { %5529 = vmatpush1.bf16.msra.mxu0 %v2740_v54  ;;  %v2436_v54 = vld [vmem:[%s8077_s21 + $0x3e0] sm:$0xff] }
 0x73b   : > { %5693 = vmatpush1.bf16.msra.mxu1 %v2742_v59  ;;  %5530 = vmatprep.subr.bf16.mxu0 %v2749_v61  ;;  %v2815_v59 = vunpack.c.l.s8.bf16 %v2439_v35  ;;  %v2438_v61 = vld [vmem:[%s8077_s21 + $0x3f0] sm:$0xff]  ;;  %v2812_v13 = vunpack.c.l.s8.bf16 %v2436_v54 }
 0x73c   : > { %5694 = vmatprep.subr.bf16.mxu1 %v2751_v4  ;;  %v2814_v4 = vunpack.c.l.s8.bf16 %v2438_v61  ;;  %v2822_v9 = vunpack.c.h.s8.bf16 %v2438_v61  ;;  %v2477_v61 = vld [vmem:[%s8077_s21 + $0x528] sm:$0xff] }
 0x73e   : > { %5531 = vmatpush1.bf16.msra.mxu0 %v2748_v6  ;;  %v2823_v6 = vunpack.c.h.s8.bf16 %v2439_v35 }
 0x73f   : > { %5695 = vmatpush1.bf16.msra.mxu1 %v2750_v5  ;;  %5532 = vmatprep.subr.bf16.mxu0 %v2757_v62  ;;  %v2445_v5 = vld [vmem:[%s8077_s21 + $0x428] sm:$0xff]  ;;  %v2447_v62 = vld [vmem:[%s8077_s21 + $0x438] sm:$0xff] }
 0x740   : > { %5696 = vmatprep.subr.bf16.mxu1 %v2759_v7  ;;  %v2820_v7 = vunpack.c.h.s8.bf16 %v2436_v54  ;;  %v2829_v14 = vunpack.c.l.s8.bf16 %v2445_v5  ;;  %v2837_v15 = vunpack.c.h.s8.bf16 %v2445_v5  ;;  %v2885_v54 = vunpack.c.h.s8.bf16 %v2469_v56  ;;  %v2476_v5 = vld [vmem:[%s8077_s21 + $0x520] sm:$0xff] }
 0x742   : > { %5533 = vmatpush1.bf16.msra.mxu0 %v2756_v8  ;;  %v2444_v8 = vld [vmem:[%s8077_s21 + $0x420] sm:$0xff] }
 0x743   : > { %5697 = vmatpush1.bf16.msra.mxu1 %v2758_v17  ;;  %5534 = vmatprep.subr.bf16.mxu0 %v2765_v49  ;;  %v2831_v17 = vunpack.c.l.s8.bf16 %v2447_v62  ;;  %v2446_v49 = vld [vmem:[%s8077_s21 + $0x430] sm:$0xff]  ;;  %v2828_v16 = vunpack.c.l.s8.bf16 %v2444_v8 }
 0x744   : > { %5698 = vmatprep.subr.bf16.mxu1 %v2767_v20  ;;  %v2830_v20 = vunpack.c.l.s8.bf16 %v2446_v49  ;;  %v2838_v27 = vunpack.c.h.s8.bf16 %v2446_v49  ;;  %v2485_v49 = vld [vmem:[%s8077_s21 + $0x568] sm:$0xff] }
 0x746   : > { %5535 = vmatpush1.bf16.msra.mxu0 %v2764_v28  ;;  %v2453_v28 = vld [vmem:[%s8077_s21 + $0x468] sm:$0xff] }
 0x747   : > { %5699 = vmatpush1.bf16.msra.mxu1 %v2766_v57  ;;  %5536 = vmatprep.subr.bf16.mxu0 %v2773_v32  ;;  %v2839_v57 = vunpack.c.h.s8.bf16 %v2447_v62  ;;  %v2455_v32 = vld [vmem:[%s8077_s21 + $0x478] sm:$0xff]  ;;  %v2845_v18 = vunpack.c.l.s8.bf16 %v2453_v28 }
 0x748   : > { %5700 = vmatprep.subr.bf16.mxu1 %v2775_v34  ;;  %v2836_v34 = vunpack.c.h.s8.bf16 %v2444_v8  ;;  %v2855_v51 = vunpack.c.h.s8.bf16 %v2455_v32  ;;  %v2901_v8 = vunpack.c.h.s8.bf16 %v2477_v61 }
 0x74a   : > { %5537 = vmatpush1.bf16.msra.mxu0 %v2772_v0  ;;  %v2452_v0 = vld [vmem:[%s8077_s21 + $0x460] sm:$0xff] }
 0x74b   : > { %5701 = vmatpush1.bf16.msra.mxu1 %v2774_v38  ;;  %5538 = vmatprep.subr.bf16.mxu0 %v2781_v41  ;;  %v2847_v38 = vunpack.c.l.s8.bf16 %v2455_v32  ;;  %v2454_v41 = vld [vmem:[%s8077_s21 + $0x470] sm:$0xff]  ;;  %v2844_v24 = vunpack.c.l.s8.bf16 %v2452_v0 }
 0x74c   : > { %5702 = vmatprep.subr.bf16.mxu1 %v2783_v31  ;;  %v2853_v31 = vunpack.c.h.s8.bf16 %v2453_v28  ;;  %v2909_v28 = vunpack.c.l.s8.bf16 %v2485_v49 }
 0x74e   : > { %5539 = vmatpush1.bf16.msra.mxu0 %v2780_v3  ;;  %v2461_v3 = vld [vmem:[%s8077_s21 + $0x4a8] sm:$0xff] }
 0x74f   : > { %5703 = vmatpush1.bf16.msra.mxu1 %v2782_v40  ;;  %5540 = vmatprep.subr.bf16.mxu0 %v2789_v33  ;;  %v2463_v40 = vld [vmem:[%s8077_s21 + $0x4b8] sm:$0xff]  ;;  %v2852_v33 = vunpack.c.h.s8.bf16 %v2452_v0  ;;  %v2869_v10 = vunpack.c.h.s8.bf16 %v2461_v3  ;;  %v2917_v0 = vunpack.c.h.s8.bf16 %v2485_v49  ;;  %v2516_v49 = vld [vmem:[%s8077_s21 + $0x660] sm:$0xff] }
 0x750   : > { %5704 = vmatprep.subr.bf16.mxu1 %v2791_v26  ;;  %v2861_v26 = vunpack.c.l.s8.bf16 %v2461_v3  ;;  %v2863_v46 = vunpack.c.l.s8.bf16 %v2463_v40  ;;  %v2492_v3 = vld [vmem:[%s8077_s21 + $0x5a0] sm:$0xff] }
 0x752   : > { %5541 = vmatpush1.bf16.msra.mxu0 %v2788_v36  ;;  %v2462_v36 = vld [vmem:[%s8077_s21 + $0x4b0] sm:$0xff] }
 0x753   : > { %5705 = vmatpush1.bf16.msra.mxu1 %v2790_v63  ;;  %5542 = vmatprep.subr.bf16.mxu0 %v2797_v37  ;;  %v2860_v63 = vunpack.c.l.s8.bf16 %v2460_v23  ;;  %v2862_v37 = vunpack.c.l.s8.bf16 %v2462_v36 }
 0x754   : > { %5706 = vmatprep.subr.bf16.mxu1 %v2799_v60  ;;  %v2871_v60 = vunpack.c.h.s8.bf16 %v2463_v40 }
 0x756   : > { %5543 = vmatpush1.bf16.msra.mxu0 %v2796_v48  ;;  %v2471_v48 = vld [vmem:[%s8077_s21 + $0x4f8] sm:$0xff] }
 0x757   : > { %5707 = vmatpush1.bf16.msra.mxu1 %v2798_v50  ;;  %5544 = vmatprep.subr.bf16.mxu0 %v2805_v47  ;;  %v2868_v50 = vunpack.c.h.s8.bf16 %v2460_v23  ;;  %v2870_v47 = vunpack.c.h.s8.bf16 %v2462_v36  ;;  %v2879_v35 = vunpack.c.l.s8.bf16 %v2471_v48  ;;  %v2501_v36 = vld [vmem:[%s8077_s21 + $0x5e8] sm:$0xff] }
 0x758   : > { %5708 = vmatprep.subr.bf16.mxu1 %v2807_v52  ;;  %v2877_v52 = vunpack.c.l.s8.bf16 %v2469_v56  ;;  %v2500_v56 = vld [vmem:[%s8077_s21 + $0x5e0] sm:$0xff] }
 0x75a   : > { %5545 = vmatpush1.bf16.msra.mxu0 %v2804_v30  ;;  %v2470_v30 = vld [vmem:[%s8077_s21 + $0x4f0] sm:$0xff] }
 0x75b   : > { %5709 = vmatpush1.bf16.msra.mxu1 %v2806_v1  ;;  %5546 = vmatprep.subr.bf16.mxu0 %v2813_v58  ;;  %v2876_v1 = vunpack.c.l.s8.bf16 %v2468_v53  ;;  %v2878_v58 = vunpack.c.l.s8.bf16 %v2470_v30 }
 0x75c   : > { %5710 = vmatprep.subr.bf16.mxu1 %v2815_v59  ;;  %v2887_v59 = vunpack.c.h.s8.bf16 %v2471_v48 }
 0x75e   : > { %5547 = vmatpush1.bf16.msra.mxu0 %v2812_v13  ;;  %v2479_v13 = vld [vmem:[%s8077_s21 + $0x538] sm:$0xff] }
 0x75f   : > { %5711 = vmatpush1.bf16.msra.mxu1 %v2814_v4  ;;  %5548 = vmatprep.subr.bf16.mxu0 %v2821_v39  ;;  %v2884_v4 = vunpack.c.h.s8.bf16 %v2468_v53  ;;  %v2886_v39 = vunpack.c.h.s8.bf16 %v2470_v30  ;;  %v2895_v62 = vunpack.c.l.s8.bf16 %v2479_v13  ;;  %v2949_v53 = vunpack.c.h.s8.bf16 %v2501_v36  ;;  %v2509_v30 = vld [vmem:[%s8077_s21 + $0x628] sm:$0xff] }
 0x760   : > { %5712 = vmatprep.subr.bf16.mxu1 %v2823_v6  ;;  %v2893_v6 = vunpack.c.l.s8.bf16 %v2477_v61  ;;  %v2508_v61 = vld [vmem:[%s8077_s21 + $0x620] sm:$0xff] }
 0x762   : > { %5549 = vmatpush1.bf16.msra.mxu0 %v2820_v7  ;;  %v2478_v7 = vld [vmem:[%s8077_s21 + $0x530] sm:$0xff] }
 0x763   : > { %5713 = vmatpush1.bf16.msra.mxu1 %v2822_v9  ;;  %5559 = vmatprep.subr.bf16.mxu0 %v2829_v14  ;;  %v2892_v9 = vunpack.c.l.s8.bf16 %v2476_v5  ;;  %v2894_v14 = vunpack.c.l.s8.bf16 %v2478_v7 }
 0x764   : > { %5723 = vmatprep.subr.bf16.mxu1 %v2831_v17  ;;  %v2903_v17 = vunpack.c.h.s8.bf16 %v2479_v13 }
 0x765   : > { %5551 = vmatmul.mubr.bf16.vlgmr.msra.gmra.mrb[20].mxu0 %v8849_v55 }
 0x766   : > { %5715 = vmatmul.mubr.bf16.vlgmr.msra.gmra.mrb[20].mxu1 %v8849_v55  ;;  %5560 = vmatpush1.bf16.msra.mxu0 %v2828_v16  ;;  %v2846_v55 = vunpack.c.l.s8.bf16 %v2454_v41  ;;  %v2487_v16 = vld [vmem:[%s8077_s21 + $0x578] sm:$0xff] }
 0x767   : > { %5591 = vmatprep.mubr.bf16.mxu0 %v8913_v22  ;;  %5724 = vmatpush1.bf16.msra.mxu1 %v2830_v20  ;;  %v2900_v20 = vunpack.c.h.s8.bf16 %v2476_v5  ;;  %v2911_v32 = vunpack.c.l.s8.bf16 %v2487_v16  ;;  %v2965_v5 = vunpack.c.h.s8.bf16 %v2509_v30 }
 0x768   : > { %5755 = vmatprep.mubr.bf16.mxu1 %v8913_v22  ;;  %5561 = vmatprep.subr.bf16.mxu0 %v2837_v15  ;;  %v2854_v22 = vunpack.c.h.s8.bf16 %v2454_v41  ;;  %v2902_v15 = vunpack.c.h.s8.bf16 %v2478_v7  ;;  %v2493_v41 = vld [vmem:[%s8077_s21 + $0x5a8] sm:$0xff] }
 0x769   : > { %5725 = vmatprep.subr.bf16.mxu1 %v2839_v57  ;;  %v2484_v57 = vld [vmem:[%s8077_s21 + $0x560] sm:$0xff]  ;;  %v2933_v23 = vunpack.c.h.s8.bf16 %v2493_v41 }
 0x76a   : > { %5562 = vmatpush1.bf16.msra.mxu0 %v2836_v34  ;;  %v2486_v34 = vld [vmem:[%s8077_s21 + $0x570] sm:$0xff] }
 0x76b   : > { %5726 = vmatpush1.bf16.msra.mxu1 %v2838_v27  ;;  %5563 = vmatprep.subr.bf16.mxu0 %v2845_v18  ;;  %v2908_v27 = vunpack.c.l.s8.bf16 %v2484_v57  ;;  %v2910_v18 = vunpack.c.l.s8.bf16 %v2486_v34 }
 0x76c   : > { %5727 = vmatprep.subr.bf16.mxu1 %v2847_v38  ;;  %v2919_v38 = vunpack.c.h.s8.bf16 %v2487_v16 }
 0x76e   : > { %5564 = vmatpush1.bf16.msra.mxu0 %v2844_v24  ;;  %v2495_v24 = vld [vmem:[%s8077_s21 + $0x5b8] sm:$0xff] }
 0x76f   : > { %5728 = vmatpush1.bf16.msra.mxu1 %v2846_v55  ;;  %5565 = vmatprep.subr.bf16.mxu0 %v2853_v31  ;;  %v2916_v55 = vunpack.c.h.s8.bf16 %v2484_v57  ;;  %v2918_v31 = vunpack.c.h.s8.bf16 %v2486_v34  ;;  %v2927_v40 = vunpack.c.l.s8.bf16 %v2495_v24  ;;  %v2527_v34 = vld [vmem:[%s8077_s21 + $0x6b8] sm:$0xff] }
 0x770   : > { %5729 = vmatprep.subr.bf16.mxu1 %v2855_v51  ;;  %v2925_v51 = vunpack.c.l.s8.bf16 %v2493_v41  ;;  %v2526_v41 = vld [vmem:[%s8077_s21 + $0x6b0] sm:$0xff] }
 0x772   : > { %5566 = vmatpush1.bf16.msra.mxu0 %v2852_v33  ;;  %v2494_v33 = vld [vmem:[%s8077_s21 + $0x5b0] sm:$0xff] }
 0x773   : > { %5730 = vmatpush1.bf16.msra.mxu1 %v2854_v22  ;;  %5567 = vmatprep.subr.bf16.mxu0 %v2861_v26  ;;  %v2924_v22 = vunpack.c.l.s8.bf16 %v2492_v3  ;;  %v2926_v26 = vunpack.c.l.s8.bf16 %v2494_v33 }
 0x774   : > { %5731 = vmatprep.subr.bf16.mxu1 %v2863_v46  ;;  %v2935_v46 = vunpack.c.h.s8.bf16 %v2495_v24 }
 0x776   : > { %5568 = vmatpush1.bf16.msra.mxu0 %v2860_v63  ;;  %v2503_v63 = vld [vmem:[%s8077_s21 + $0x5f8] sm:$0xff] }
 0x777   : > { %5732 = vmatpush1.bf16.msra.mxu1 %v2862_v37  ;;  %5569 = vmatprep.subr.bf16.mxu0 %v2869_v10  ;;  %v2932_v37 = vunpack.c.h.s8.bf16 %v2492_v3  ;;  %v2934_v10 = vunpack.c.h.s8.bf16 %v2494_v33  ;;  %v2943_v48 = vunpack.c.l.s8.bf16 %v2503_v63  ;;  %v2533_v3 = vld [vmem:[%s8077_s21 + $0x6e8] sm:$0xff] }
 0x778   : > { %5733 = vmatprep.subr.bf16.mxu1 %v2871_v60  ;;  %v2941_v60 = vunpack.c.l.s8.bf16 %v2501_v36 }
 0x77a   : > { %5570 = vmatpush1.bf16.msra.mxu0 %v2868_v50  ;;  %v2502_v50 = vld [vmem:[%s8077_s21 + $0x5f0] sm:$0xff] }
 0x77b   : > { %5734 = vmatpush1.bf16.msra.mxu1 %v2870_v47  ;;  %5571 = vmatprep.subr.bf16.mxu0 %v2877_v52  ;;  %v2940_v47 = vunpack.c.l.s8.bf16 %v2500_v56  ;;  %v2942_v52 = vunpack.c.l.s8.bf16 %v2502_v50 }
 0x77c   : > { %5735 = vmatprep.subr.bf16.mxu1 %v2879_v35  ;;  %v2951_v35 = vunpack.c.h.s8.bf16 %v2503_v63 }
 0x77e   : > { %5572 = vmatpush1.bf16.msra.mxu0 %v2876_v1  ;;  %v2511_v1 = vld [vmem:[%s8077_s21 + $0x638] sm:$0xff] }
 0x77f   : > { %5736 = vmatpush1.bf16.msra.mxu1 %v2878_v58  ;;  %5573 = vmatprep.subr.bf16.mxu0 %v2885_v54  ;;  %v2948_v58 = vunpack.c.h.s8.bf16 %v2500_v56  ;;  %v2950_v54 = vunpack.c.h.s8.bf16 %v2502_v50  ;;  %v2959_v13 = vunpack.c.l.s8.bf16 %v2511_v1  ;;  %v2967_v7 = vunpack.c.h.s8.bf16 %v2511_v1  ;;  %v2541_v1 = vld [vmem:[%s8077_s21 + $0x728] sm:$0xff] }
 0x780   : > { %5737 = vmatprep.subr.bf16.mxu1 %v2887_v59  ;;  %v2957_v59 = vunpack.c.l.s8.bf16 %v2509_v30 }
 0x782   : > { %5574 = vmatpush1.bf16.msra.mxu0 %v2884_v4  ;;  %v2510_v4 = vld [vmem:[%s8077_s21 + $0x630] sm:$0xff] }
 0x783   : > { %5738 = vmatpush1.bf16.msra.mxu1 %v2886_v39  ;;  %5575 = vmatprep.subr.bf16.mxu0 %v2893_v6  ;;  %v2956_v39 = vunpack.c.l.s8.bf16 %v2508_v61  ;;  %v2958_v6 = vunpack.c.l.s8.bf16 %v2510_v4 }
 0x784   : > { %5739 = vmatprep.subr.bf16.mxu1 %v2895_v62  ;;  %v2517_v62 = vld [vmem:[%s8077_s21 + $0x668] sm:$0xff] }
 0x786   : > { %5576 = vmatpush1.bf16.msra.mxu0 %v2892_v9  ;;  %v2519_v9 = vld [vmem:[%s8077_s21 + $0x678] sm:$0xff] }
 0x787   : > { %5740 = vmatpush1.bf16.msra.mxu1 %v2894_v14  ;;  %5577 = vmatprep.subr.bf16.mxu0 %v2901_v8  ;;  %v2964_v14 = vunpack.c.h.s8.bf16 %v2508_v61  ;;  %v2966_v8 = vunpack.c.h.s8.bf16 %v2510_v4  ;;  %v2975_v16 = vunpack.c.l.s8.bf16 %v2519_v9  ;;  %v2983_v57 = vunpack.c.h.s8.bf16 %v2519_v9  ;;  %v2549_v9 = vld [vmem:[%s8077_s21 + $0x768] sm:$0xff] }
 0x788   : > { %5741 = vmatprep.subr.bf16.mxu1 %v2903_v17  ;;  %v2973_v17 = vunpack.c.l.s8.bf16 %v2517_v62  ;;  %v3021_v61 = vunpack.c.l.s8.bf16 %v2541_v1 }
 0x78a   : > { %5578 = vmatpush1.bf16.msra.mxu0 %v2900_v20  ;;  %v2518_v20 = vld [vmem:[%s8077_s21 + $0x670] sm:$0xff] }
 0x78b   : > { %5742 = vmatpush1.bf16.msra.mxu1 %v2902_v15  ;;  %5579 = vmatprep.subr.bf16.mxu0 %v2909_v28  ;;  %v2972_v15 = vunpack.c.l.s8.bf16 %v2516_v49  ;;  %v2981_v28 = vunpack.c.h.s8.bf16 %v2517_v62  ;;  %v3029_v62 = vunpack.c.h.s8.bf16 %v2541_v1 }
 0x78c   : > { %5743 = vmatprep.subr.bf16.mxu1 %v2911_v32  ;;  %v2525_v32 = vld [vmem:[%s8077_s21 + $0x6a8] sm:$0xff] }
 0x78e   : > { %5580 = vmatpush1.bf16.msra.mxu0 %v2908_v27  ;;  %v2980_v27 = vunpack.c.h.s8.bf16 %v2516_v49  ;;  %v3037_v49 = vunpack.c.l.s8.bf16 %v2549_v9 }
 0x78f   : > { %5744 = vmatpush1.bf16.msra.mxu1 %v2910_v18  ;;  %5581 = vmatprep.subr.bf16.mxu0 %v2917_v0  ;;  %v2989_v18 = vunpack.c.l.s8.bf16 %v2525_v32  ;;  %v2524_v0 = vld [vmem:[%s8077_s21 + $0x6a0] sm:$0xff] }
 0x790   : > { %5745 = vmatprep.subr.bf16.mxu1 %v2919_v38  ;;  %v2991_v38 = vunpack.c.l.s8.bf16 %v2527_v34  ;;  %v2988_v24 = vunpack.c.l.s8.bf16 %v2524_v0  ;;  %v2996_v33 = vunpack.c.h.s8.bf16 %v2524_v0 }
 0x792   : > { %5582 = vmatpush1.bf16.msra.mxu0 %v2916_v55  ;;  %v2990_v55 = vunpack.c.l.s8.bf16 %v2526_v41 }
 0x793   : > { %5746 = vmatpush1.bf16.msra.mxu1 %v2918_v31  ;;  %5583 = vmatprep.subr.bf16.mxu0 %v2925_v51  ;;  %v2997_v31 = vunpack.c.h.s8.bf16 %v2525_v32  ;;  %v2999_v51 = vunpack.c.h.s8.bf16 %v2527_v34  ;;  %v2557_v34 = vld [vmem:[%s8077_s21 + $0x7a8] sm:$0xff] }
 0x794   : > { %5747 = vmatprep.subr.bf16.mxu1 %v2927_v40  ;;  %v2535_v40 = vld [vmem:[%s8077_s21 + $0x6f8] sm:$0xff]  ;;  %v3053_v0 = vunpack.c.l.s8.bf16 %v2557_v34 }
 0x795   : > { %v3007_v63 = vunpack.c.l.s8.bf16 %v2535_v40  ;;  %v3015_v30 = vunpack.c.h.s8.bf16 %v2535_v40 }
 0x796   : > { %5584 = vmatpush1.bf16.msra.mxu0 %v2924_v22  ;;  %v2998_v22 = vunpack.c.h.s8.bf16 %v2526_v41 }
 0x797   : > { %5748 = vmatpush1.bf16.msra.mxu1 %v2926_v26  ;;  %5585 = vmatprep.subr.bf16.mxu0 %v2933_v23  ;;  %v3005_v26 = vunpack.c.l.s8.bf16 %v2533_v3  ;;  %v2532_v23 = vld [vmem:[%s8077_s21 + $0x6e0] sm:$0xff] }
 0x798   : > { %5749 = vmatprep.subr.bf16.mxu1 %v2935_v46  ;;  %v3004_v50 = vunpack.c.l.s8.bf16 %v2532_v23 }
 0x79a   : > { %5586 = vmatpush1.bf16.msra.mxu0 %v2932_v37  ;;  %v2534_v37 = vld [vmem:[%s8077_s21 + $0x6f0] sm:$0xff] }
 0x79b   : > { %5750 = vmatpush1.bf16.msra.mxu1 %v2934_v10  ;;  %5587 = vmatprep.subr.bf16.mxu0 %v2941_v60 }
 0x79c   : > { %5751 = vmatprep.subr.bf16.mxu1 %v2943_v48 }
 0x79e   : > { %5588 = vmatpush1.bf16.msra.mxu0 %v2940_v47 }
 0x79f   : > { %5752 = vmatpush1.bf16.msra.mxu1 %v2942_v52  ;;  %5589 = vmatprep.subr.bf16.mxu0 %v2949_v53  ;;  %v3006_v53 = vunpack.c.l.s8.bf16 %v2534_v37 }
 0x7a0   : > { %5753 = vmatprep.subr.bf16.mxu1 %v2951_v35  ;;  %v3013_v35 = vunpack.c.h.s8.bf16 %v2533_v3  ;;  %v3061_v3 = vunpack.c.h.s8.bf16 %v2557_v34 }
 0x7a2   : > { %5590 = vmatpush1.bf16.msra.mxu0 %v2948_v58  ;;  %v2543_v58 = vld [vmem:[%s8077_s21 + $0x738] sm:$0xff] }
 0x7a3   : > { %5754 = vmatpush1.bf16.msra.mxu1 %v2950_v54  ;;  %5600 = vmatprep.subr.bf16.mxu0 %v2957_v59  ;;  %v3012_v54 = vunpack.c.h.s8.bf16 %v2532_v23  ;;  %v3014_v59 = vunpack.c.h.s8.bf16 %v2534_v37  ;;  %v3023_v4 = vunpack.c.l.s8.bf16 %v2543_v58  ;;  %v9120_v23 = vld [vmem:[%s964_s28] sm:$0xff] }
 0x7a4   : > { %5764 = vmatprep.subr.bf16.mxu1 %v2959_v13  ;;  %v2540_v13 = vld [vmem:[%s8077_s21 + $0x720] sm:$0xff] }
 0x7a5   : > { %5592 = vmatmul.mubr.bf16.vlgmr.msra.gmra.mrb[20].mxu0 %v8915_v29 }
 0x7a6   : > { %5756 = vmatmul.mubr.bf16.vlgmr.msra.gmra.mrb[20].mxu1 %v8915_v29  ;;  %5601 = vmatpush1.bf16.msra.mxu0 %v2956_v39  ;;  %v2974_v29 = vunpack.c.l.s8.bf16 %v2518_v20  ;;  %v2542_v39 = vld [vmem:[%s8077_s21 + $0x730] sm:$0xff] }
 0x7a7   : > { %5632 = vmatprep.mubr.bf16.mxu0 %v8923_v11  ;;  %5765 = vmatpush1.bf16.msra.mxu1 %v2958_v6  ;;  %v3020_v6 = vunpack.c.l.s8.bf16 %v2540_v13 }
 0x7a8   : > { %5796 = vmatprep.mubr.bf16.mxu1 %v8923_v11  ;;  %5602 = vmatprep.subr.bf16.mxu0 %v2965_v5  ;;  %v2982_v11 = vunpack.c.h.s8.bf16 %v2518_v20  ;;  %v3022_v5 = vunpack.c.l.s8.bf16 %v2542_v39 }
 0x7a9   : > { %5766 = vmatprep.subr.bf16.mxu1 %v2967_v7  ;;  %v3031_v7 = vunpack.c.h.s8.bf16 %v2543_v58 }
 0x7aa   : > { %5603 = vmatpush1.bf16.msra.mxu0 %v2964_v14  ;;  %v2551_v14 = vld [vmem:[%s8077_s21 + $0x778] sm:$0xff] }
 0x7ab   : > { %5767 = vmatpush1.bf16.msra.mxu1 %v2966_v8  ;;  %5604 = vmatprep.subr.bf16.mxu0 %v2973_v17  ;;  %v3028_v8 = vunpack.c.h.s8.bf16 %v2540_v13  ;;  %v3030_v17 = vunpack.c.h.s8.bf16 %v2542_v39  ;;  %v3039_v20 = vunpack.c.l.s8.bf16 %v2551_v14  ;;  %v3047_v32 = vunpack.c.h.s8.bf16 %v2551_v14  ;;  %v3080_v39 = vld [vmem:[%s8090_s23] sm:$0xff] }
 0x7ac   : > { %5768 = vmatprep.subr.bf16.mxu1 %v2975_v16  ;;  %v2548_v16 = vld [vmem:[%s8077_s21 + $0x760] sm:$0xff] }
 0x7ae   : > { %5605 = vmatpush1.bf16.msra.mxu0 %v2972_v15  ;;  %v2550_v15 = vld [vmem:[%s8077_s21 + $0x770] sm:$0xff] }
 0x7af   : > { %5769 = vmatpush1.bf16.msra.mxu1 %v2974_v29  ;;  %5606 = vmatprep.subr.bf16.mxu0 %v2981_v28  ;;  %v3036_v29 = vunpack.c.l.s8.bf16 %v2548_v16  ;;  %v3038_v28 = vunpack.c.l.s8.bf16 %v2550_v15 }
 0x7b0   : > { %5770 = vmatprep.subr.bf16.mxu1 %v2983_v57  ;;  %v3045_v57 = vunpack.c.h.s8.bf16 %v2549_v9 }
 0x7b2   : > { %5607 = vmatpush1.bf16.msra.mxu0 %v2980_v27  ;;  %v2559_v27 = vld [vmem:[%s8077_s21 + $0x7b8] sm:$0xff] }
 0x7b3   : > { %5771 = vmatpush1.bf16.msra.mxu1 %v2982_v11  ;;  %5608 = vmatprep.subr.bf16.mxu0 %v2989_v18  ;;  %v3044_v11 = vunpack.c.h.s8.bf16 %v2548_v16  ;;  %v3046_v18 = vunpack.c.h.s8.bf16 %v2550_v15  ;;  %v3055_v41 = vunpack.c.l.s8.bf16 %v2559_v27  ;;  %v3063_v40 = vunpack.c.h.s8.bf16 %v2559_v27  ;;  %v3087_v16 = vld [vmem:[%s8090_s23 + $0x38] sm:$0xff] }
 0x7b4   : > { %5772 = vmatprep.subr.bf16.mxu1 %v2991_v38  ;;  %v2556_v38 = vld [vmem:[%s8077_s21 + $0x7a0] sm:$0xff] }
 0x7b6   : > { %5609 = vmatpush1.bf16.msra.mxu0 %v2988_v24  ;;  %v2558_v24 = vld [vmem:[%s8077_s21 + $0x7b0] sm:$0xff] }
 0x7b7   : > { %5773 = vmatpush1.bf16.msra.mxu1 %v2990_v55  ;;  %5610 = vmatprep.subr.bf16.mxu0 %v2997_v31  ;;  %v9112_v55 = vld [vmem:[%s955_s0] sm:$0xff]  ;;  %v3052_v31 = vunpack.c.l.s8.bf16 %v2556_v38  ;;  %v3062_v37 = vunpack.c.h.s8.bf16 %v2558_v24 }
 0x7b8   : > { %v9089_v46 = vpop.f32.mrb[16].mxu0  ;;  %v9091_v36 = vpop.f32.mrb[16].mxu1  ;;  %5774 = vmatprep.subr.bf16.mxu1 %v2999_v51  ;;  %v3054_v51 = vunpack.c.l.s8.bf16 %v2558_v24 }
 0x7b9   : > { %v9094_v10 = vpop.f32.mrb[17].mxu0  ;;  %v9096_v60 = vpop.f32.mrb[17].mxu1 }
 0x7ba   : > { %v5310_v56 = vpop.f32.mrb[18].mxu0  ;;  %v5474_v48 = vpop.f32.mrb[18].mxu1  ;;  %5611 = vmatpush1.bf16.msra.mxu0 %v2996_v33  ;;  %v2565_v33 = vld [vmem:[%s8077_s21 + $0x7e8] sm:$0xff] }
 0x7bb   : > { %5775 = vmatpush1.bf16.msra.mxu1 %v2998_v22  ;;  %v5311_v47 = vpop.f32.mrb[19].mxu0  ;;  %v5475_v52 = vpop.f32.mrb[19].mxu1  ;;  %5612 = vmatprep.subr.bf16.mxu0 %v3005_v26  ;;  %v5813_v22 = vrot.slane %v9112_v55, %v8152_v44  ;;  %v2567_v26 = vld [vmem:[%s8077_s21 + $0x7f8] sm:$0xff]  ;;  %v3069_v56 = vunpack.c.l.s8.bf16 %v2565_v33  ;;  %v2564_v48 = vld [vmem:[%s8077_s21 + $0x7e0] sm:$0xff]  ;;  %v3077_v1 = vunpack.c.h.s8.bf16 %v2565_v33 }
 0x7bc   : > { %5776 = vmatprep.subr.bf16.mxu1 %v3007_v63  ;;  %v3060_v63 = vunpack.c.h.s8.bf16 %v2556_v38  ;;  %v2566_v47 = vld [vmem:[%s8077_s21 + $0x7f0] sm:$0xff]  ;;  %v3079_v58 = vunpack.c.h.s8.bf16 %v2567_v26  ;;  %v3076_v13 = vunpack.c.h.s8.bf16 %v2564_v48 }
 0x7bd   : > { %v5847_v52 = vmul.f32 %v5813_v22, %v9094_v10  ;;  %v3078_v10 = vunpack.c.h.s8.bf16 %v2566_v47 }
 0x7be   : > { %5613 = vmatpush1.bf16.msra.mxu0 %v3004_v50  ;;  %v3071_v50 = vunpack.c.l.s8.bf16 %v2567_v26 }
 0x7bf   : > { %5777 = vmatpush1.bf16.msra.mxu1 %v3006_v53  ;;  %5614 = vmatprep.subr.bf16.mxu0 %v3013_v35  ;;  %v5862_v53 = vrot.slane %v9120_v23, %v8152_v44  ;;  %v3068_v35 = vunpack.c.l.s8.bf16 %v2564_v48 }
 0x7c0   : > { %5778 = vmatprep.subr.bf16.mxu1 %v3015_v30  ;;  %v3070_v30 = vunpack.c.l.s8.bf16 %v2566_v47  ;;  %v3092_v47 = vld [vmem:[%s8090_s23 + $0x60] sm:$0xff] }
 0x7c2   : > { %5615 = vmatpush1.bf16.msra.mxu0 %v3012_v54  ;;  %v3081_v54 = vld [vmem:[%s8090_s23 + $0x8] sm:$0xff] }
 0x7c3   : > { %5779 = vmatpush1.bf16.msra.mxu1 %v3014_v59  ;;  %5616 = vmatprep.subr.bf16.mxu0 %v3021_v61  ;;  %v5896_v59 = vadd.f32 %v5862_v53, %v5847_v52  ;;  %v3083_v61 = vld [vmem:[%s8090_s23 + $0x18] sm:$0xff]  ;;  %v3213_v14 = vunpack.c.h.s8.bf16 %v3081_v54  ;;  %v3094_v53 = vld [vmem:[%s8090_s23 + $0x70] sm:$0xff] }
 0x7c4   : > { %5780 = vmatprep.subr.bf16.mxu1 %v3023_v4  ;;  %v3209_v4 = vunpack.c.l.s8.bf16 %v3081_v54  ;;  %v3097_v54 = vld [vmem:[%s8090_s23 + $0x88] sm:$0xff] }
 0x7c6   : > { %5617 = vmatpush1.bf16.msra.mxu0 %v3020_v6  ;;  %v3211_v6 = vunpack.c.l.s8.bf16 %v3083_v61 }
 0x7c7   : > { %5781 = vmatpush1.bf16.msra.mxu1 %v3022_v5  ;;  %5618 = vmatprep.subr.bf16.mxu0 %v3029_v62  ;;  %v3082_v5 = vld [vmem:[%s8090_s23 + $0x10] sm:$0xff]  ;;  %v5904_v62 = vmax.f32 %v5896_v59, 0.0  ;;  %v3099_v59 = vld [vmem:[%s8090_s23 + $0x98] sm:$0xff] }
 0x7c8   : > { %5782 = vmatprep.subr.bf16.mxu1 %v3031_v7  ;;  %v3208_v7 = vunpack.c.l.s8.bf16 %v3080_v39  ;;  %v3210_v9 = vunpack.c.l.s8.bf16 %v3082_v5  ;;  %v3214_v15 = vunpack.c.h.s8.bf16 %v3082_v5 }
 0x7ca   : > { %5619 = vmatpush1.bf16.msra.mxu0 %v3028_v8  ;;  %v3085_v8 = vld [vmem:[%s8090_s23 + $0x28] sm:$0xff] }
 0x7cb   : > { %5783 = vmatpush1.bf16.msra.mxu1 %v3030_v17  ;;  %5620 = vmatprep.subr.bf16.mxu0 %v3037_v49  ;;  %v5912_v17 = vpack.c.bf16 %v5904_v62, %v5904_v62  ;;  %v3215_v49 = vunpack.c.h.s8.bf16 %v3083_v61  ;;  %v3221_v27 = vunpack.c.h.s8.bf16 %v3085_v8  ;;  %v3236_v61 = vunpack.c.h.s8.bf16 %v3092_v47 }
 0x7cc   : > { %5784 = vmatprep.subr.bf16.mxu1 %v3039_v20  ;;  %v3212_v20 = vunpack.c.h.s8.bf16 %v3080_v39  ;;  %v3243_v39 = vunpack.c.l.s8.bf16 %v3099_v59 }
 0x7ce   : > { %5621 = vmatpush1.bf16.msra.mxu0 %v3036_v29  ;;  %v3217_v29 = vunpack.c.l.s8.bf16 %v3085_v8  ;;  %v3103_v8 = vld [vmem:[%s8090_s23 + $0xb8] sm:$0xff] }
 0x7cf   : > { %5785 = vmatpush1.bf16.msra.mxu1 %v3038_v28  ;;  %5622 = vmatprep.subr.bf16.mxu0 %v3045_v57  ;;  %v3084_v28 = vld [vmem:[%s8090_s23 + $0x20] sm:$0xff]  ;;  %v3219_v57 = vunpack.c.l.s8.bf16 %v3087_v16 }
 0x7d0   : > { %5786 = vmatprep.subr.bf16.mxu1 %v3047_v32  ;;  %v3086_v32 = vld [vmem:[%s8090_s23 + $0x30] sm:$0xff]  ;;  %v3216_v34 = vunpack.c.l.s8.bf16 %v3084_v28  ;;  %v3220_v38 = vunpack.c.h.s8.bf16 %v3084_v28 }
 0x7d2   : > { %5623 = vmatpush1.bf16.msra.mxu0 %v3044_v11  ;;  %v3223_v11 = vunpack.c.h.s8.bf16 %v3087_v16 }
 0x7d3   : > { %5787 = vmatpush1.bf16.msra.mxu1 %v3046_v18  ;;  %5624 = vmatprep.subr.bf16.mxu0 %v3053_v0  ;;  %v3089_v18 = vld [vmem:[%s8090_s23 + $0x48] sm:$0xff]  ;;  %v3091_v0 = vld [vmem:[%s8090_s23 + $0x58] sm:$0xff] }
 0x7d4   : > { %5788 = vmatprep.subr.bf16.mxu1 %v3055_v41  ;;  %v3222_v41 = vunpack.c.h.s8.bf16 %v3086_v32  ;;  %v3225_v24 = vunpack.c.l.s8.bf16 %v3089_v18  ;;  %v3229_v22 = vunpack.c.h.s8.bf16 %v3089_v18  ;;  %v3231_v26 = vunpack.c.h.s8.bf16 %v3091_v0 }
 0x7d6   : > { %5625 = vmatpush1.bf16.msra.mxu0 %v3052_v31  ;;  %v3088_v31 = vld [vmem:[%s8090_s23 + $0x40] sm:$0xff] }
 0x7d7   : > { %5789 = vmatpush1.bf16.msra.mxu1 %v3054_v51  ;;  %5626 = vmatprep.subr.bf16.mxu0 %v3061_v3  ;;  %v3227_v51 = vunpack.c.l.s8.bf16 %v3091_v0  ;;  %v3090_v3 = vld [vmem:[%s8090_s23 + $0x50] sm:$0xff] }
 0x7d8   : > { %5790 = vmatprep.subr.bf16.mxu1 %v3063_v40  ;;  %v3224_v40 = vunpack.c.l.s8.bf16 %v3088_v31  ;;  %v3226_v33 = vunpack.c.l.s8.bf16 %v3090_v3  ;;  %v3230_v48 = vunpack.c.h.s8.bf16 %v3090_v3 }
 0x7da   : > { %5627 = vmatpush1.bf16.msra.mxu0 %v3060_v63  ;;  %v3093_v63 = vld [vmem:[%s8090_s23 + $0x68] sm:$0xff] }
 0x7db   : > { %5791 = vmatpush1.bf16.msra.mxu1 %v3062_v37  ;;  %5628 = vmatprep.subr.bf16.mxu0 %v3069_v56  ;;  %v3095_v37 = vld [vmem:[%s8090_s23 + $0x78] sm:$0xff]  ;;  %v3228_v56 = vunpack.c.h.s8.bf16 %v3088_v31 }
 0x7dc   : > { %5792 = vmatprep.subr.bf16.mxu1 %v3071_v50  ;;  %v3233_v50 = vunpack.c.l.s8.bf16 %v3093_v63  ;;  %v3235_v52 = vunpack.c.l.s8.bf16 %v3095_v37 }
 0x7de   : > { %5629 = vmatpush1.bf16.msra.mxu0 %v3068_v35  ;;  %v3232_v35 = vunpack.c.l.s8.bf16 %v3092_v47 }
 0x7df   : > { %5793 = vmatpush1.bf16.msra.mxu1 %v3070_v30  ;;  %5630 = vmatprep.subr.bf16.mxu0 %v3077_v1  ;;  %v3234_v30 = vunpack.c.l.s8.bf16 %v3094_v53  ;;  %v3237_v1 = vunpack.c.h.s8.bf16 %v3093_v63  ;;  %v3111_v63 = vld [vmem:[%s8090_s23 + $0xf8] sm:$0xff] }
 0x7e0   : > { %5794 = vmatprep.subr.bf16.mxu1 %v3079_v58  ;;  %v3239_v58 = vunpack.c.h.s8.bf16 %v3095_v37 }
 0x7e2   : > { %5631 = vmatpush1.bf16.msra.mxu0 %v3076_v13  ;;  %v3238_v13 = vunpack.c.h.s8.bf16 %v3094_v53  ;;  %v3267_v53 = vunpack.c.l.s8.bf16 %v3111_v63 }
 0x7e3   : > { %5795 = vmatpush1.bf16.msra.mxu1 %v3078_v10  ;;  %5919 = vmatprep.subr.bf16.mxu0 %v3209_v4  ;;  %v3241_v10 = vunpack.c.l.s8.bf16 %v3097_v54  ;;  %v3096_v4 = vld [vmem:[%s8090_s23 + $0x80] sm:$0xff] }
 0x7e4   : > { %6083 = vmatprep.subr.bf16.mxu1 %v3211_v6  ;;  %v3098_v6 = vld [vmem:[%s8090_s23 + $0x90] sm:$0xff]  ;;  %v3240_v5 = vunpack.c.l.s8.bf16 %v3096_v4 }
 0x7e5   : > { %5633 = vmatmul.mubr.bf16.vlgmr.msra.gmra.mrb[20].mxu0 %v8964_v21  ;;  %v3242_v62 = vunpack.c.l.s8.bf16 %v3098_v6 }
 0x7e6   : > { %5797 = vmatmul.mubr.bf16.vlgmr.msra.gmra.mrb[20].mxu1 %v8964_v21  ;;  %5920 = vmatpush1.bf16.msra.mxu0 %v3208_v7  ;;  %v3218_v21 = vunpack.c.l.s8.bf16 %v3086_v32  ;;  %v3245_v7 = vunpack.c.h.s8.bf16 %v3097_v54 }
 0x7e7   : > { %5951 = vmatprep.mubr.bf16.mxu0 %v5912_v17  ;;  %6084 = vmatpush1.bf16.msra.mxu1 %v3210_v9  ;;  %v3247_v9 = vunpack.c.h.s8.bf16 %v3099_v59 }
 0x7e8   : > { %6115 = vmatprep.mubr.bf16.mxu1 %v5912_v17  ;;  %5921 = vmatprep.subr.bf16.mxu0 %v3213_v14  ;;  %v3101_v14 = vld [vmem:[%s8090_s23 + $0xa8] sm:$0xff]  ;;  %v3244_v17 = vunpack.c.h.s8.bf16 %v3096_v4  ;;  %v3115_v4 = vld [vmem:[%s8090_s23 + $0x118] sm:$0xff] }
 0x7e9   : > { %6085 = vmatprep.subr.bf16.mxu1 %v3215_v49  ;;  %v3246_v49 = vunpack.c.h.s8.bf16 %v3098_v6  ;;  %v3249_v16 = vunpack.c.l.s8.bf16 %v3101_v14  ;;  %v3253_v32 = vunpack.c.h.s8.bf16 %v3101_v14 }
 0x7ea   : > { %5922 = vmatpush1.bf16.msra.mxu0 %v3212_v20  ;;  %v3100_v20 = vld [vmem:[%s8090_s23 + $0xa0] sm:$0xff] }
 0x7eb   : > { %6086 = vmatpush1.bf16.msra.mxu1 %v3214_v15  ;;  %5923 = vmatprep.subr.bf16.mxu0 %v3217_v29  ;;  %v3251_v15 = vunpack.c.l.s8.bf16 %v3103_v8  ;;  %v3102_v29 = vld [vmem:[%s8090_s23 + $0xb0] sm:$0xff]  ;;  %v3248_v28 = vunpack.c.l.s8.bf16 %v3100_v20 }
 0x7ec   : > { %6087 = vmatprep.subr.bf16.mxu1 %v3219_v57  ;;  %v3250_v57 = vunpack.c.l.s8.bf16 %v3102_v29  ;;  %v3254_v18 = vunpack.c.h.s8.bf16 %v3102_v29  ;;  %v3279_v29 = vunpack.c.h.s8.bf16 %v3115_v4 }
 0x7ee   : > { %5924 = vmatpush1.bf16.msra.mxu0 %v3216_v34  ;;  %v3255_v34 = vunpack.c.h.s8.bf16 %v3103_v8 }
 0x7ef   : > { %6088 = vmatpush1.bf16.msra.mxu1 %v3218_v21  ;;  %5925 = vmatprep.subr.bf16.mxu0 %v3221_v27  ;;  %v3105_v21 = vld [vmem:[%s8090_s23 + $0xc8] sm:$0xff]  ;;  %v3107_v27 = vld [vmem:[%s8090_s23 + $0xd8] sm:$0xff] }
 0x7f0   : > { %6089 = vmatprep.subr.bf16.mxu1 %v3223_v11  ;;  %v3252_v11 = vunpack.c.h.s8.bf16 %v3100_v20  ;;  %v3257_v0 = vunpack.c.l.s8.bf16 %v3105_v21  ;;  %v3117_v20 = vld [vmem:[%s8090_s23 + $0x128] sm:$0xff] }
 0x7f2   : > { %5926 = vmatpush1.bf16.msra.mxu0 %v3220_v38  ;;  %v3104_v38 = vld [vmem:[%s8090_s23 + $0xc0] sm:$0xff] }
 0x7f3   : > { %6090 = vmatpush1.bf16.msra.mxu1 %v3222_v41  ;;  %5927 = vmatprep.subr.bf16.mxu0 %v3225_v24  ;;  %v3259_v41 = vunpack.c.l.s8.bf16 %v3107_v27  ;;  %v3106_v24 = vld [vmem:[%s8090_s23 + $0xd0] sm:$0xff]  ;;  %v3256_v31 = vunpack.c.l.s8.bf16 %v3104_v38  ;;  %v3260_v37 = vunpack.c.h.s8.bf16 %v3104_v38  ;;  %v3285_v38 = vunpack.c.h.s8.bf16 %v3117_v20 }
 0x7f4   : > { %6091 = vmatprep.subr.bf16.mxu1 %v3227_v51  ;;  %v5809_v51 = vrot.slane %v9112_v55, %v8146_v42  ;;  %v3258_v3 = vunpack.c.l.s8.bf16 %v3106_v24 }
 0x7f6   : > { %5928 = vmatpush1.bf16.msra.mxu0 %v3224_v40  ;;  %v3261_v40 = vunpack.c.h.s8.bf16 %v3105_v21  ;;  %v3116_v21 = vld [vmem:[%s8090_s23 + $0x120] sm:$0xff] }
 0x7f7   : > { %6092 = vmatpush1.bf16.msra.mxu1 %v3226_v33  ;;  %5929 = vmatprep.subr.bf16.mxu0 %v3229_v22  ;;  %v3263_v33 = vunpack.c.h.s8.bf16 %v3107_v27  ;;  %v3109_v22 = vld [vmem:[%s8090_s23 + $0xe8] sm:$0xff] }
 0x7f8   : > { %6093 = vmatprep.subr.bf16.mxu1 %v3231_v26  ;;  %v5821_v26 = vrot.slane %v9112_v55, %v8155_v45  ;;  %v3265_v47 = vunpack.c.l.s8.bf16 %v3109_v22  ;;  %v3269_v59 = vunpack.c.h.s8.bf16 %v3109_v22 }
 0x7fa   : > { %5930 = vmatpush1.bf16.msra.mxu0 %v3228_v56  ;;  %v5846_v56 = vmul.f32 %v5809_v51, %v9089_v46  ;;  %v3284_v51 = vunpack.c.h.s8.bf16 %v3116_v21 }
 0x7fb   : > { %6094 = vmatpush1.bf16.msra.mxu1 %v3230_v48  ;;  %5931 = vmatprep.subr.bf16.mxu0 %v3233_v50  ;;  %v5858_v48 = vrot.slane %v9120_v23, %v8146_v42  ;;  %v3262_v50 = vunpack.c.h.s8.bf16 %v3106_v24  ;;  %v3121_v24 = vld [vmem:[%s8090_s23 + $0x148] sm:$0xff] }
 0x7fc   : > { %6095 = vmatprep.subr.bf16.mxu1 %v3235_v52  ;;  %v3108_v52 = vld [vmem:[%s8090_s23 + $0xe0] sm:$0xff] }
 0x7fd   : > { %v3264_v46 = vunpack.c.l.s8.bf16 %v3108_v52 }
 0x7fe   : > { %5932 = vmatpush1.bf16.msra.mxu0 %v3232_v35  ;;  %v3110_v35 = vld [vmem:[%s8090_s23 + $0xf0] sm:$0xff] }
 0x7ff   : > { %6096 = vmatpush1.bf16.msra.mxu1 %v3234_v30  ;;  %5933 = vmatprep.subr.bf16.mxu0 %v3237_v1  ;;  %v5849_v30 = vmul.f32 %v5821_v26, %v9096_v60  ;;  %v5870_v1 = vrot.slane %v9120_v23, %v8155_v45  ;;  %v3266_v54 = vunpack.c.l.s8.bf16 %v3110_v35  ;;  %v3270_v6 = vunpack.c.h.s8.bf16 %v3110_v35  ;;  %v3122_v26 = vld [vmem:[%s8090_s23 + $0x150] sm:$0xff] }
 0x800   : > { %6097 = vmatprep.subr.bf16.mxu1 %v3239_v58  ;;  %v5895_v58 = vadd.f32 %v5858_v48, %v5846_v56  ;;  %v3293_v56 = vunpack.c.h.s8.bf16 %v3121_v24 }
 0x802   : > { %5934 = vmatpush1.bf16.msra.mxu0 %v3236_v61  ;;  %v3271_v61 = vunpack.c.h.s8.bf16 %v3111_v63  ;;  %v5903_v60 = vmax.f32 %v5895_v58, 0.0 }
 0x803   : > { %6098 = vmatpush1.bf16.msra.mxu1 %v3238_v13  ;;  %5935 = vmatprep.subr.bf16.mxu0 %v3241_v10  ;;  %v3113_v13 = vld [vmem:[%s8090_s23 + $0x108] sm:$0xff]  ;;  %v5898_v10 = vadd.f32 %v5870_v1, %v5849_v30  ;;  %v3124_v30 = vld [vmem:[%s8090_s23 + $0x160] sm:$0xff] }
 0x804   : > { %6099 = vmatprep.subr.bf16.mxu1 %v3243_v39  ;;  %v3268_v39 = vunpack.c.h.s8.bf16 %v3108_v52  ;;  %v3296_v58 = vunpack.c.l.s8.bf16 %v3124_v30 }
 0x805   : > { %v5906_v14 = vmax.f32 %v5898_v10, 0.0  ;;  %v3131_v10 = vld [vmem:[%s8090_s23 + $0x198] sm:$0xff] }
 0x806   : > { %5936 = vmatpush1.bf16.msra.mxu0 %v3240_v5  ;;  %v3273_v5 = vunpack.c.l.s8.bf16 %v3113_v13 }
 0x807   : > { %6100 = vmatpush1.bf16.msra.mxu1 %v3242_v62  ;;  %5937 = vmatprep.subr.bf16.mxu0 %v3245_v7  ;;  %v3112_v62 = vld [vmem:[%s8090_s23 + $0x100] sm:$0xff]  ;;  %v3275_v7 = vunpack.c.l.s8.bf16 %v3115_v4  ;;  %v3300_v4 = vunpack.c.h.s8.bf16 %v3124_v30 }
 0x808   : > { %6101 = vmatprep.subr.bf16.mxu1 %v3247_v9  ;;  %v3114_v9 = vld [vmem:[%s8090_s23 + $0x110] sm:$0xff]  ;;  %v3272_v8 = vunpack.c.l.s8.bf16 %v3112_v62 }
 0x80a   : > { %5938 = vmatpush1.bf16.msra.mxu0 %v3244_v17  ;;  %v5911_v17 = vpack.c.bf16 %v5903_v60, %v5903_v60 }
 0x80b   : > { %6102 = vmatpush1.bf16.msra.mxu1 %v3246_v49  ;;  %5939 = vmatprep.subr.bf16.mxu0 %v3249_v16  ;;  %v3274_v49 = vunpack.c.l.s8.bf16 %v3114_v9  ;;  %v3277_v16 = vunpack.c.h.s8.bf16 %v3113_v13  ;;  %v3129_v13 = vld [vmem:[%s8090_s23 + $0x188] sm:$0xff] }
 0x80c   : > { %6103 = vmatprep.subr.bf16.mxu1 %v3251_v15  ;;  %v5914_v15 = vpack.c.bf16 %v5906_v14, %v5906_v14  ;;  %v3305_v60 = vunpack.c.l.s8.bf16 %v3129_v13  ;;  %v3309_v14 = vunpack.c.h.s8.bf16 %v3129_v13 }
 0x80e   : > { %5940 = vmatpush1.bf16.msra.mxu0 %v3248_v28  ;;  %v3119_v28 = vld [vmem:[%s8090_s23 + $0x138] sm:$0xff] }
 0x80f   : > { %6104 = vmatpush1.bf16.msra.mxu1 %v3250_v57  ;;  %5941 = vmatprep.subr.bf16.mxu0 %v3253_v32  ;;  %v3276_v57 = vunpack.c.h.s8.bf16 %v3112_v62  ;;  %v3278_v32 = vunpack.c.h.s8.bf16 %v3114_v9  ;;  %v3283_v27 = vunpack.c.l.s8.bf16 %v3119_v28  ;;  %v3130_v62 = vld [vmem:[%s8090_s23 + $0x190] sm:$0xff] }
 0x810   : > { %6105 = vmatprep.subr.bf16.mxu1 %v3255_v34  ;;  %v3281_v34 = vunpack.c.l.s8.bf16 %v3117_v20  ;;  %v3306_v9 = vunpack.c.l.s8.bf16 %v3130_v62  ;;  %v3310_v20 = vunpack.c.h.s8.bf16 %v3130_v62 }
 0x812   : > { %5942 = vmatpush1.bf16.msra.mxu0 %v3252_v11  ;;  %v3118_v11 = vld [vmem:[%s8090_s23 + $0x130] sm:$0xff] }
 0x813   : > { %6106 = vmatpush1.bf16.msra.mxu1 %v3254_v18  ;;  %5943 = vmatprep.subr.bf16.mxu0 %v3257_v0  ;;  %v3280_v18 = vunpack.c.l.s8.bf16 %v3116_v21  ;;  %v3282_v0 = vunpack.c.l.s8.bf16 %v3118_v11 }
 0x814   : > { %6107 = vmatprep.subr.bf16.mxu1 %v3259_v41  ;;  %v3287_v41 = vunpack.c.h.s8.bf16 %v3119_v28 }
 0x816   : > { %5944 = vmatpush1.bf16.msra.mxu0 %v3256_v31  ;;  %v3123_v31 = vld [vmem:[%s8090_s23 + $0x158] sm:$0xff] }
 0x817   : > { %6108 = vmatpush1.bf16.msra.mxu1 %v3258_v3  ;;  %5945 = vmatprep.subr.bf16.mxu0 %v3261_v40  ;;  %v3286_v3 = vunpack.c.h.s8.bf16 %v3118_v11  ;;  %v3289_v40 = vunpack.c.l.s8.bf16 %v3121_v24  ;;  %v3291_v22 = vunpack.c.l.s8.bf16 %v3123_v31  ;;  %v3295_v48 = vunpack.c.h.s8.bf16 %v3123_v31  ;;  %v3137_v11 = vld [vmem:[%s8090_s23 + $0x1c8] sm:$0xff]  ;;  %v3136_v24 = vld [vmem:[%s8090_s23 + $0x1c0] sm:$0xff] }
 0x818   : > { %6109 = vmatprep.subr.bf16.mxu1 %v3263_v33  ;;  %v3120_v33 = vld [vmem:[%s8090_s23 + $0x140] sm:$0xff] }
 0x819   : > { %v3288_v63 = vunpack.c.l.s8.bf16 %v3120_v33  ;;  %v3292_v52 = vunpack.c.h.s8.bf16 %v3120_v33 }
 0x81a   : > { %5946 = vmatpush1.bf16.msra.mxu0 %v3260_v37  ;;  %v3290_v37 = vunpack.c.l.s8.bf16 %v3122_v26 }
 0x81b   : > { %6110 = vmatpush1.bf16.msra.mxu1 %v3262_v50  ;;  %5947 = vmatprep.subr.bf16.mxu0 %v3265_v47  ;;  %v3125_v50 = vld [vmem:[%s8090_s23 + $0x168] sm:$0xff]  ;;  %v3127_v47 = vld [vmem:[%s8090_s23 + $0x178] sm:$0xff] }
 0x81c   : > { %6111 = vmatprep.subr.bf16.mxu1 %v3267_v53  ;;  %v3294_v53 = vunpack.c.h.s8.bf16 %v3122_v26  ;;  %v3297_v35 = vunpack.c.l.s8.bf16 %v3125_v50  ;;  %v3299_v1 = vunpack.c.l.s8.bf16 %v3127_v47 }
 0x81e   : > { %5948 = vmatpush1.bf16.msra.mxu0 %v3264_v46  ;;  %v3126_v46 = vld [vmem:[%s8090_s23 + $0x170] sm:$0xff] }
 0x81f   : > { %6112 = vmatpush1.bf16.msra.mxu1 %v3266_v54  ;;  %5949 = vmatprep.subr.bf16.mxu0 %v3269_v59  ;;  %v3298_v54 = vunpack.c.l.s8.bf16 %v3126_v46  ;;  %v3301_v59 = vunpack.c.h.s8.bf16 %v3125_v50  ;;  %v5866_v50 = vrot.slane %v9120_v23, %v8149_v43 }
 0x820   : > { %6113 = vmatprep.subr.bf16.mxu1 %v3271_v61  ;;  %v3303_v61 = vunpack.c.h.s8.bf16 %v3127_v47 }
 0x822   : > { %5950 = vmatpush1.bf16.msra.mxu0 %v3268_v39  ;;  %v3302_v39 = vunpack.c.h.s8.bf16 %v3126_v46 }
 0x823   : > { %6114 = vmatpush1.bf16.msra.mxu1 %v3270_v6  ;;  %5960 = vmatprep.subr.bf16.mxu0 %v3273_v5  ;;  %v3128_v6 = vld [vmem:[%s8090_s23 + $0x180] sm:$0xff]  ;;  %v3307_v5 = vunpack.c.l.s8.bf16 %v3131_v10 }
 0x824   : > { %6124 = vmatprep.subr.bf16.mxu1 %v3275_v7  ;;  %v3304_v7 = vunpack.c.l.s8.bf16 %v3128_v6 }
 0x825   : > { %5952 = vmatmul.mubr.bf16.vlgmr.msra.gmra.mrb[24].mxu0 %v5911_v17 }
 0x826   : > { %6116 = vmatmul.mubr.bf16.vlgmr.msra.gmra.mrb[24].mxu1 %v5911_v17  ;;  %5961 = vmatpush1.bf16.msra.mxu0 %v3272_v8  ;;  %v3311_v8 = vunpack.c.h.s8.bf16 %v3131_v10  ;;  %v3133_v17 = vld [vmem:[%s8090_s23 + $0x1a8] sm:$0xff] }
 0x827   : > { %5992 = vmatprep.mubr.bf16.mxu0 %v5914_v15  ;;  %6125 = vmatpush1.bf16.msra.mxu1 %v3274_v49  ;;  %v3135_v49 = vld [vmem:[%s8090_s23 + $0x1b8] sm:$0xff]  ;;  %v3317_v21 = vunpack.c.h.s8.bf16 %v3133_v17 }
 0x828   : > { %6156 = vmatprep.mubr.bf16.mxu1 %v5914_v15  ;;  %5962 = vmatprep.subr.bf16.mxu0 %v3277_v16  ;;  %v3308_v16 = vunpack.c.h.s8.bf16 %v3128_v6  ;;  %v3313_v15 = vunpack.c.l.s8.bf16 %v3133_v17  ;;  %v3315_v28 = vunpack.c.l.s8.bf16 %v3135_v49 }
 0x829   : > { %6126 = vmatprep.subr.bf16.mxu1 %v3279_v29  ;;  %v3132_v29 = vld [vmem:[%s8090_s23 + $0x1a0] sm:$0xff] }
 0x82a   : > { %5963 = vmatpush1.bf16.msra.mxu0 %v3276_v57  ;;  %v3134_v57 = vld [vmem:[%s8090_s23 + $0x1b0] sm:$0xff] }
 0x82b   : > { %6127 = vmatpush1.bf16.msra.mxu1 %v3278_v32  ;;  %5964 = vmatprep.subr.bf16.mxu0 %v3281_v34  ;;  %v3312_v32 = vunpack.c.l.s8.bf16 %v3132_v29  ;;  %v3314_v34 = vunpack.c.l.s8.bf16 %v3134_v57 }
 0x82c   : > { %6128 = vmatprep.subr.bf16.mxu1 %v3283_v27  ;;  %v3319_v27 = vunpack.c.h.s8.bf16 %v3135_v49 }
 0x82e   : > { %5965 = vmatpush1.bf16.msra.mxu0 %v3280_v18  ;;  %v3139_v18 = vld [vmem:[%s8090_s23 + $0x1d8] sm:$0xff] }
 0x82f   : > { %6129 = vmatpush1.bf16.msra.mxu1 %v3282_v0  ;;  %5966 = vmatprep.subr.bf16.mxu0 %v3285_v38  ;;  %v3316_v0 = vunpack.c.h.s8.bf16 %v3132_v29  ;;  %v3318_v38 = vunpack.c.h.s8.bf16 %v3134_v57  ;;  %v3323_v31 = vunpack.c.l.s8.bf16 %v3139_v18  ;;  %v3327_v26 = vunpack.c.h.s8.bf16 %v3139_v18  ;;  %v3150_v29 = vld [vmem:[%s8090_s23 + $0x230] sm:$0xff] }
 0x830   : > { %6130 = vmatprep.subr.bf16.mxu1 %v3287_v41  ;;  %v3321_v41 = vunpack.c.l.s8.bf16 %v3137_v11  ;;  %v3346_v57 = vunpack.c.l.s8.bf16 %v3150_v29  ;;  %v3350_v18 = vunpack.c.h.s8.bf16 %v3150_v29 }
 0x832   : > { %5967 = vmatpush1.bf16.msra.mxu0 %v3284_v51  ;;  %v3138_v51 = vld [vmem:[%s8090_s23 + $0x1d0] sm:$0xff] }
 0x833   : > { %6131 = vmatpush1.bf16.msra.mxu1 %v3286_v3  ;;  %5968 = vmatprep.subr.bf16.mxu0 %v3289_v40  ;;  %v3320_v3 = vunpack.c.l.s8.bf16 %v3136_v24  ;;  %v5817_v40 = vrot.slane %v9112_v55, %v8149_v43  ;;  %v3322_v33 = vunpack.c.l.s8.bf16 %v3138_v51  ;;  %v3326_v55 = vunpack.c.h.s8.bf16 %v3138_v51 }
 0x834   : > { %6132 = vmatprep.subr.bf16.mxu1 %v3291_v22  ;;  %v3325_v22 = vunpack.c.h.s8.bf16 %v3137_v11 }
 0x836   : > { %5969 = vmatpush1.bf16.msra.mxu0 %v3288_v63  ;;  %v3141_v63 = vld [vmem:[%s8090_s23 + $0x1e8] sm:$0xff] }
 0x837   : > { %6133 = vmatpush1.bf16.msra.mxu1 %v3290_v37  ;;  %5970 = vmatprep.subr.bf16.mxu0 %v3293_v56  ;;  %v3143_v37 = vld [vmem:[%s8090_s23 + $0x1f8] sm:$0xff]  ;;  %v3324_v56 = vunpack.c.h.s8.bf16 %v3136_v24  ;;  %v3329_v47 = vunpack.c.l.s8.bf16 %v3141_v63  ;;  %v3333_v46 = vunpack.c.h.s8.bf16 %v3141_v63  ;;  %v3154_v24 = vld [vmem:[%s8090_s23 + $0x250] sm:$0xff] }
 0x838   : > { %6134 = vmatprep.subr.bf16.mxu1 %v3295_v48  ;;  %v5848_v48 = vmul.f32 %v5817_v40, %v9091_v36  ;;  %v3335_v23 = vunpack.c.h.s8.bf16 %v3143_v37  ;;  %v3354_v51 = vunpack.c.l.s8.bf16 %v3154_v24  ;;  %v3358_v63 = vunpack.c.h.s8.bf16 %v3154_v24 }
 0x83a   : > { %5971 = vmatpush1.bf16.msra.mxu0 %v3292_v52  ;;  %v3140_v52 = vld [vmem:[%s8090_s23 + $0x1e0] sm:$0xff] }
 0x83b   : > { %6135 = vmatpush1.bf16.msra.mxu1 %v3294_v53  ;;  %5972 = vmatprep.subr.bf16.mxu0 %v3297_v35  ;;  %v3331_v53 = vunpack.c.l.s8.bf16 %v3143_v37  ;;  %v3142_v35 = vld [vmem:[%s8090_s23 + $0x1f0] sm:$0xff]  ;;  %v3328_v30 = vunpack.c.l.s8.bf16 %v3140_v52 }
 0x83c   : > { %6136 = vmatprep.subr.bf16.mxu1 %v3299_v1  ;;  %v5897_v1 = vadd.f32 %v5866_v50, %v5848_v48  ;;  %v3330_v36 = vunpack.c.l.s8.bf16 %v3142_v35  ;;  %v3334_v13 = vunpack.c.h.s8.bf16 %v3142_v35  ;;  %v3158_v50 = vld [vmem:[%s8090_s23 + $0x270] sm:$0xff]  ;;  %v3161_v35 = vld [vmem:[%s8090_s23 + $0x288] sm:$0xff] }
 0x83e   : > { %5973 = vmatpush1.bf16.msra.mxu0 %v3296_v58  ;;  %v3145_v58 = vld [vmem:[%s8090_s23 + $0x208] sm:$0xff] }
 0x83f   : > { %6137 = vmatpush1.bf16.msra.mxu1 %v3298_v54  ;;  %5974 = vmatprep.subr.bf16.mxu0 %v3301_v59  ;;  %v3147_v54 = vld [vmem:[%s8090_s23 + $0x218] sm:$0xff]  ;;  %v3332_v59 = vunpack.c.h.s8.bf16 %v3140_v52  ;;  %v3337_v10 = vunpack.c.l.s8.bf16 %v3145_v58 }
 0x840   : > { %6138 = vmatprep.subr.bf16.mxu1 %v3303_v61  ;;  %v5905_v61 = vmax.f32 %v5897_v1, 0.0 }
 0x842   : > { %5975 = vmatpush1.bf16.msra.mxu0 %v3300_v4  ;;  %v3144_v4 = vld [vmem:[%s8090_s23 + $0x200] sm:$0xff] }
 0x843   : > { %6139 = vmatpush1.bf16.msra.mxu1 %v3302_v39  ;;  %5976 = vmatprep.subr.bf16.mxu0 %v3305_v60  ;;  %v3339_v39 = vunpack.c.l.s8.bf16 %v3147_v54  ;;  %v3146_v60 = vld [vmem:[%s8090_s23 + $0x210] sm:$0xff]  ;;  %v3336_v6 = vunpack.c.l.s8.bf16 %v3144_v4  ;;  %v3340_v17 = vunpack.c.h.s8.bf16 %v3144_v4  ;;  %v3165_v4 = vld [vmem:[%s8090_s23 + $0x2a8] sm:$0xff] }
 0x844   : > { %6140 = vmatprep.subr.bf16.mxu1 %v3307_v5  ;;  %v5913_v5 = vpack.c.bf16 %v5905_v61, %v5905_v61  ;;  %v3338_v62 = vunpack.c.l.s8.bf16 %v3146_v60  ;;  %v3342_v49 = vunpack.c.h.s8.bf16 %v3146_v60 }
 0x846   : > { %5977 = vmatpush1.bf16.msra.mxu0 %v3304_v7  ;;  %v3341_v7 = vunpack.c.h.s8.bf16 %v3145_v58 }
 0x847   : > { %6141 = vmatpush1.bf16.msra.mxu1 %v3306_v9  ;;  %5978 = vmatprep.subr.bf16.mxu0 %v3309_v14  ;;  %v3343_v9 = vunpack.c.h.s8.bf16 %v3147_v54  ;;  %v3149_v14 = vld [vmem:[%s8090_s23 + $0x228] sm:$0xff]  ;;  %v3162_v54 = vld [vmem:[%s8090_s23 + $0x290] sm:$0xff] }
 0x848   : > { %6142 = vmatprep.subr.bf16.mxu1 %v3311_v8  ;;  %v3151_v8 = vld [vmem:[%s8090_s23 + $0x238] sm:$0xff]  ;;  %v3370_v61 = vunpack.c.l.s8.bf16 %v3162_v54 }
 0x84a   : > { %5979 = vmatpush1.bf16.msra.mxu0 %v3308_v16  ;;  %v3345_v16 = vunpack.c.l.s8.bf16 %v3149_v14 }
 0x84b   : > { %6143 = vmatpush1.bf16.msra.mxu1 %v3310_v20  ;;  %5980 = vmatprep.subr.bf16.mxu0 %v3313_v15  ;;  %v3148_v20 = vld [vmem:[%s8090_s23 + $0x220] sm:$0xff]  ;;  %v3347_v15 = vunpack.c.l.s8.bf16 %v3151_v8 }
 0x84c   : > { %6144 = vmatprep.subr.bf16.mxu1 %v3315_v28  ;;  %v3344_v28 = vunpack.c.l.s8.bf16 %v3148_v20  ;;  %v3348_v11 = vunpack.c.h.s8.bf16 %v3148_v20  ;;  %v3171_v20 = vld [vmem:[%s8090_s23 + $0x2d8] sm:$0xff] }
 0x84e   : > { %5981 = vmatpush1.bf16.msra.mxu0 %v3312_v32  ;;  %v3349_v32 = vunpack.c.h.s8.bf16 %v3149_v14 }
 0x84f   : > { %6145 = vmatpush1.bf16.msra.mxu1 %v3314_v34  ;;  %5982 = vmatprep.subr.bf16.mxu0 %v3317_v21  ;;  %v3351_v34 = vunpack.c.h.s8.bf16 %v3151_v8  ;;  %v3153_v21 = vld [vmem:[%s8090_s23 + $0x248] sm:$0xff] }
 0x850   : > { %6146 = vmatprep.subr.bf16.mxu1 %v3319_v27  ;;  %v3155_v27 = vld [vmem:[%s8090_s23 + $0x258] sm:$0xff] }
 0x851   : > { %v3359_v40 = vunpack.c.h.s8.bf16 %v3155_v27 }
 0x852   : > { %5983 = vmatpush1.bf16.msra.mxu0 %v3316_v0  ;;  %v3353_v0 = vunpack.c.l.s8.bf16 %v3153_v21 }
 0x853   : > { %6147 = vmatpush1.bf16.msra.mxu1 %v3318_v38  ;;  %5984 = vmatprep.subr.bf16.mxu0 %v3321_v41  ;;  %v3152_v38 = vld [vmem:[%s8090_s23 + $0x240] sm:$0xff]  ;;  %v3355_v41 = vunpack.c.l.s8.bf16 %v3155_v27 }
 0x854   : > { %6148 = vmatprep.subr.bf16.mxu1 %v3323_v31  ;;  %v3352_v31 = vunpack.c.l.s8.bf16 %v3152_v38 }
 0x856   : > { %5985 = vmatpush1.bf16.msra.mxu0 %v3320_v3  ;;  %v3357_v3 = vunpack.c.h.s8.bf16 %v3153_v21 }
 0x857   : > { %6149 = vmatpush1.bf16.msra.mxu1 %v3322_v33  ;;  %5986 = vmatprep.subr.bf16.mxu0 %v3325_v22  ;;  %v3157_v33 = vld [vmem:[%s8090_s23 + $0x268] sm:$0xff]  ;;  %v3159_v22 = vld [vmem:[%s8090_s23 + $0x278] sm:$0xff] }
 0x858   : > { %6150 = vmatprep.subr.bf16.mxu1 %v3327_v26  ;;  %v3356_v26 = vunpack.c.h.s8.bf16 %v3152_v38  ;;  %v3361_v37 = vunpack.c.l.s8.bf16 %v3157_v33  ;;  %v3363_v48 = vunpack.c.l.s8.bf16 %v3159_v22  ;;  %v3365_v52 = vunpack.c.h.s8.bf16 %v3157_v33  ;;  %v3175_v38 = vld [vmem:[%s8090_s23 + $0x2f8] sm:$0xff] }
 0x85a   : > { %5987 = vmatpush1.bf16.msra.mxu0 %v3324_v56  ;;  %v3156_v56 = vld [vmem:[%s8090_s23 + $0x260] sm:$0xff] }
 0x85b   : > { %6151 = vmatpush1.bf16.msra.mxu1 %v3326_v55  ;;  %5988 = vmatprep.subr.bf16.mxu0 %v3329_v47  ;;  %v3360_v55 = vunpack.c.l.s8.bf16 %v3156_v56  ;;  %v3362_v47 = vunpack.c.l.s8.bf16 %v3158_v50  ;;  %v3364_v1 = vunpack.c.h.s8.bf16 %v3156_v56  ;;  %v9244_v56 = vld [vmem:[%s8090_s23 + $0x318] sm:$0xff] }
 0x85c   : > { %6152 = vmatprep.subr.bf16.mxu1 %v3331_v53  ;;  %v3367_v53 = vunpack.c.h.s8.bf16 %v3159_v22 }
 0x85e   : > { %5989 = vmatpush1.bf16.msra.mxu0 %v3328_v30  ;;  %v3163_v30 = vld [vmem:[%s8090_s23 + $0x298] sm:$0xff] }
 0x85f   : > { %6153 = vmatpush1.bf16.msra.mxu1 %v3330_v36  ;;  %5990 = vmatprep.subr.bf16.mxu0 %v3333_v46  ;;  %v3366_v36 = vunpack.c.h.s8.bf16 %v3158_v50  ;;  %v3369_v46 = vunpack.c.l.s8.bf16 %v3161_v35  ;;  %v3371_v58 = vunpack.c.l.s8.bf16 %v3163_v30 }
 0x860   : > { %6154 = vmatprep.subr.bf16.mxu1 %v3335_v23  ;;  %v3160_v23 = vld [vmem:[%s8090_s23 + $0x280] sm:$0xff] }
 0x861   : > { %v3372_v60 = vunpack.c.h.s8.bf16 %v3160_v23 }
 0x862   : > { %5991 = vmatpush1.bf16.msra.mxu0 %v3332_v59  ;;  %v3368_v59 = vunpack.c.l.s8.bf16 %v3160_v23 }
 0x863   : > { %6155 = vmatpush1.bf16.msra.mxu1 %v3334_v13  ;;  %6001 = vmatprep.subr.bf16.mxu0 %v3337_v10  ;;  %v3373_v13 = vunpack.c.h.s8.bf16 %v3161_v35  ;;  %v3375_v10 = vunpack.c.h.s8.bf16 %v3163_v30  ;;  %v9258_v30 = vld [vmem:[%s964_s28] sm:$0xff] }
 0x864   : > { %6165 = vmatprep.subr.bf16.mxu1 %v3339_v39  ;;  %v3167_v39 = vld [vmem:[%s8090_s23 + $0x2b8] sm:$0xff]  ;;  %v5878_v23 = vrot.slane %v9258_v30, %v8460_v2 }
 0x865   : > { %5993 = vmatmul.mubr.bf16.vlgmr.msra.gmra.mrb[24].mxu0 %v5913_v5 }
 0x866   : > { %6157 = vmatmul.mubr.bf16.vlgmr.msra.gmra.mrb[24].mxu1 %v5913_v5  ;;  %6002 = vmatpush1.bf16.msra.mxu0 %v3336_v6  ;;  %v3374_v6 = vunpack.c.h.s8.bf16 %v3162_v54  ;;  %v3377_v5 = vunpack.c.l.s8.bf16 %v3165_v4 }
 0x867   : > { %6166 = vmatpush1.bf16.msra.mxu1 %v3338_v62  ;;  %6003 = vmatprep.subr.bf16.mxu0 %v3341_v7  ;;  %v3164_v62 = vld [vmem:[%s8090_s23 + $0x2a0] sm:$0xff]  ;;  %v3379_v7 = vunpack.c.l.s8.bf16 %v3167_v39 }
 0x868   : > { %6167 = vmatprep.subr.bf16.mxu1 %v3343_v9  ;;  %v3166_v9 = vld [vmem:[%s8090_s23 + $0x2b0] sm:$0xff]  ;;  %v3376_v14 = vunpack.c.l.s8.bf16 %v3164_v62 }
 0x869   : > { %v3378_v8 = vunpack.c.l.s8.bf16 %v3166_v9  ;;  %v3382_v29 = vunpack.c.h.s8.bf16 %v3166_v9  ;;  %v3176_v9 = vld [vmem:[%s8090_s23 + $0x300] sm:$0xff] }
 0x86a   : > { %6004 = vmatpush1.bf16.msra.mxu0 %v3340_v17  ;;  %v3381_v17 = vunpack.c.h.s8.bf16 %v3165_v4 }
 0x86b   : > { %6168 = vmatpush1.bf16.msra.mxu1 %v3342_v49  ;;  %6005 = vmatprep.subr.bf16.mxu0 %v3345_v16  ;;  %v3383_v49 = vunpack.c.h.s8.bf16 %v3167_v39  ;;  %v3169_v16 = vld [vmem:[%s8090_s23 + $0x2c8] sm:$0xff] }
 0x86c   : > { %6169 = vmatprep.subr.bf16.mxu1 %v3347_v15  ;;  %v3380_v15 = vunpack.c.h.s8.bf16 %v3164_v62 }
 0x86e   : > { %6006 = vmatpush1.bf16.msra.mxu0 %v3344_v28  ;;  %v3385_v28 = vunpack.c.l.s8.bf16 %v3169_v16 }
 0x86f   : > { %6170 = vmatpush1.bf16.msra.mxu1 %v3346_v57  ;;  %6007 = vmatprep.subr.bf16.mxu0 %v3349_v32  ;;  %v3168_v57 = vld [vmem:[%s8090_s23 + $0x2c0] sm:$0xff]  ;;  %v3387_v32 = vunpack.c.l.s8.bf16 %v3171_v20 }
 0x870   : > { %6171 = vmatprep.subr.bf16.mxu1 %v3351_v34  ;;  %v3170_v34 = vld [vmem:[%s8090_s23 + $0x2d0] sm:$0xff]  ;;  %v3384_v21 = vunpack.c.l.s8.bf16 %v3168_v57 }
 0x871   : > { %v3386_v27 = vunpack.c.l.s8.bf16 %v3170_v34  ;;  %v3390_v24 = vunpack.c.h.s8.bf16 %v3170_v34  ;;  %v3404_v34 = vunpack.c.h.s8.bf16 %v3176_v9 }
 0x872   : > { %6008 = vmatpush1.bf16.msra.mxu0 %v3348_v11  ;;  %v3389_v11 = vunpack.c.h.s8.bf16 %v3169_v16  ;;  %v3400_v16 = vunpack.c.l.s8.bf16 %v3176_v9 }
 0x873   : > { %6172 = vmatpush1.bf16.msra.mxu1 %v3350_v18  ;;  %6009 = vmatprep.subr.bf16.mxu0 %v3353_v0  ;;  %v3391_v18 = vunpack.c.h.s8.bf16 %v3171_v20  ;;  %v3173_v0 = vld [vmem:[%s8090_s23 + $0x2e8] sm:$0xff] }
 0x874   : > { %6173 = vmatprep.subr.bf16.mxu1 %v3355_v41  ;;  %v3388_v41 = vunpack.c.h.s8.bf16 %v3168_v57  ;;  %v3183_v57 = vld [vmem:[%s8090_s23 + $0x338] sm:$0xff] }
 0x876   : > { %6010 = vmatpush1.bf16.msra.mxu0 %v3352_v31  ;;  %v3393_v31 = vunpack.c.l.s8.bf16 %v3173_v0 }
 0x877   : > { %6174 = vmatpush1.bf16.msra.mxu1 %v3354_v51  ;;  %6011 = vmatprep.subr.bf16.mxu0 %v3357_v3  ;;  %v3172_v51 = vld [vmem:[%s8090_s23 + $0x2e0] sm:$0xff]  ;;  %v3395_v3 = vunpack.c.l.s8.bf16 %v3175_v38 }
 0x878   : > { %6175 = vmatprep.subr.bf16.mxu1 %v3359_v40  ;;  %v3174_v40 = vld [vmem:[%s8090_s23 + $0x2f0] sm:$0xff]  ;;  %v3392_v33 = vunpack.c.l.s8.bf16 %v3172_v51 }
 0x879   : > { %v3394_v22 = vunpack.c.l.s8.bf16 %v3174_v40  ;;  %v3398_v50 = vunpack.c.h.s8.bf16 %v3174_v40 }
 0x87a   : > { %6012 = vmatpush1.bf16.msra.mxu0 %v3356_v26  ;;  %v3397_v26 = vunpack.c.h.s8.bf16 %v3173_v0  ;;  %v3182_v0 = vld [vmem:[%s8090_s23 + $0x330] sm:$0xff] }
 0x87b   : > { %6176 = vmatpush1.bf16.msra.mxu1 %v3358_v63  ;;  %6013 = vmatprep.subr.bf16.mxu0 %v3361_v37  ;;  %v3399_v63 = vunpack.c.h.s8.bf16 %v3175_v38  ;;  %v9241_v37 = vld [vmem:[%s8090_s23 + $0x308] sm:$0xff] }
 0x87c   : > { %6177 = vmatprep.subr.bf16.mxu1 %v3363_v48  ;;  %v3396_v48 = vunpack.c.h.s8.bf16 %v3172_v51  ;;  %v3185_v51 = vld [vmem:[%s8090_s23 + $0x348] sm:$0xff] }
 0x87e   : > { %6014 = vmatpush1.bf16.msra.mxu0 %v3360_v55  ;;  %v3401_v55 = vunpack.c.l.s8.bf16 %v9241_v37 }
 0x87f   : > { %6178 = vmatpush1.bf16.msra.mxu1 %v3362_v47  ;;  %6015 = vmatprep.subr.bf16.mxu0 %v3365_v52  ;;  %v3403_v47 = vunpack.c.l.s8.bf16 %v9244_v56  ;;  %v9250_v52 = vld [vmem:[%s955_s0] sm:$0xff] }
 0x880   : > { %6179 = vmatprep.subr.bf16.mxu1 %v3367_v53  ;;  %v5825_v53 = vrot.slane %v9250_v52, %v8514_v12  ;;  %v5829_v35 = vrot.slane %v9250_v52, %v8460_v2 }
 0x882   : > { %6016 = vmatpush1.bf16.msra.mxu0 %v3364_v1  ;;  %v5874_v1 = vrot.slane %v9258_v30, %v8514_v12 }
 0x883   : > { %6180 = vmatpush1.bf16.msra.mxu1 %v3366_v36  ;;  %6017 = vmatprep.subr.bf16.mxu0 %v3369_v46  ;;  %v5837_v36 = vrot.slane %v9250_v52, %v8519_v25 }
 0x884   : > { %6181 = vmatprep.subr.bf16.mxu1 %v3371_v58 }
 0x886   : > { %6018 = vmatpush1.bf16.msra.mxu0 %v3368_v59 }
 0x887   : > { %6182 = vmatpush1.bf16.msra.mxu1 %v3370_v61  ;;  %6019 = vmatprep.subr.bf16.mxu0 %v3373_v13  ;;  %v5886_v61 = vrot.slane %v9258_v30, %v8519_v25 }
 0x888   : > { %6183 = vmatprep.subr.bf16.mxu1 %v3375_v10 }
 0x88a   : > { %6020 = vmatpush1.bf16.msra.mxu0 %v3372_v60 }
 0x88b   : > { %6184 = vmatpush1.bf16.msra.mxu1 %v3374_v6  ;;  %6021 = vmatprep.subr.bf16.mxu0 %v3377_v5 }
 0x88c   : > { %6185 = vmatprep.subr.bf16.mxu1 %v3379_v7 }
 0x88e   : > { %6022 = vmatpush1.bf16.msra.mxu0 %v3376_v14  ;;  %v3178_v14 = vld [vmem:[%s8090_s23 + $0x310] sm:$0xff] }
 0x88f   : > { %6186 = vmatpush1.bf16.msra.mxu1 %v3378_v8  ;;  %6023 = vmatprep.subr.bf16.mxu0 %v3381_v17  ;;  %v3402_v25 = vunpack.c.l.s8.bf16 %v3178_v14 }
 0x890   : > { %6187 = vmatprep.subr.bf16.mxu1 %v3383_v49 }
 0x892   : > { %6024 = vmatpush1.bf16.msra.mxu0 %v3380_v15  ;;  %v3405_v15 = vunpack.c.h.s8.bf16 %v9241_v37  ;;  %v3186_v37 = vld [vmem:[%s8090_s23 + $0x350] sm:$0xff] }
 0x893   : > { %6188 = vmatpush1.bf16.msra.mxu1 %v3382_v29  ;;  %6025 = vmatprep.subr.bf16.mxu0 %v3385_v28  ;;  %v3407_v29 = vunpack.c.h.s8.bf16 %v9244_v56  ;;  %v3181_v28 = vld [vmem:[%s8090_s23 + $0x328] sm:$0xff] }
 0x894   : > { %6189 = vmatprep.subr.bf16.mxu1 %v3387_v32 }
 0x896   : > { %6026 = vmatpush1.bf16.msra.mxu0 %v3384_v21  ;;  %v3406_v21 = vunpack.c.h.s8.bf16 %v3178_v14 }
 0x897   : > { %6190 = vmatpush1.bf16.msra.mxu1 %v3386_v27  ;;  %6027 = vmatprep.subr.bf16.mxu0 %v3389_v11  ;;  %v3409_v27 = vunpack.c.l.s8.bf16 %v3181_v28  ;;  %v3411_v11 = vunpack.c.l.s8.bf16 %v3183_v57 }
 0x898   : > { %6191 = vmatprep.subr.bf16.mxu1 %v3391_v18  ;;  %v3180_v18 = vld [vmem:[%s8090_s23 + $0x320] sm:$0xff] }
 0x899   : > { %v3408_v38 = vunpack.c.l.s8.bf16 %v3180_v18  ;;  %v3412_v40 = vunpack.c.h.s8.bf16 %v3180_v18 }
 0x89a   : > { %6028 = vmatpush1.bf16.msra.mxu0 %v3388_v41  ;;  %v3410_v41 = vunpack.c.l.s8.bf16 %v3182_v0 }
 0x89b   : > { %6192 = vmatpush1.bf16.msra.mxu1 %v3390_v24  ;;  %6029 = vmatprep.subr.bf16.mxu0 %v3393_v31  ;;  %v3413_v24 = vunpack.c.h.s8.bf16 %v3181_v28  ;;  %v3415_v31 = vunpack.c.h.s8.bf16 %v3183_v57  ;;  %v3198_v28 = vld [vmem:[%s8090_s23 + $0x3b0] sm:$0xff] }
 0x89c   : > { %6193 = vmatprep.subr.bf16.mxu1 %v3395_v3  ;;  %v3187_v3 = vld [vmem:[%s8090_s23 + $0x358] sm:$0xff] }
 0x89e   : > { %6030 = vmatpush1.bf16.msra.mxu0 %v3392_v33  ;;  %v3414_v33 = vunpack.c.h.s8.bf16 %v3182_v0  ;;  %v3446_v0 = vunpack.c.h.s8.bf16 %v3198_v28 }
 0x89f   : > { %6194 = vmatpush1.bf16.msra.mxu1 %v3394_v22  ;;  %6031 = vmatprep.subr.bf16.mxu0 %v3397_v26  ;;  %v3417_v22 = vunpack.c.l.s8.bf16 %v3185_v51  ;;  %v3419_v26 = vunpack.c.l.s8.bf16 %v3187_v3 }
 0x8a0   : > { %6195 = vmatprep.subr.bf16.mxu1 %v3399_v63  ;;  %v3184_v63 = vld [vmem:[%s8090_s23 + $0x340] sm:$0xff] }
 0x8a1   : > { %v3416_v56 = vunpack.c.l.s8.bf16 %v3184_v63 }
 0x8a2   : > { %6032 = vmatpush1.bf16.msra.mxu0 %v3396_v48  ;;  %v3418_v48 = vunpack.c.l.s8.bf16 %v3186_v37 }
 0x8a3   : > { %6196 = vmatpush1.bf16.msra.mxu1 %v3398_v50  ;;  %6042 = vmatprep.subr.bf16.mxu0 %v3401_v55  ;;  %v3421_v50 = vunpack.c.h.s8.bf16 %v3185_v51  ;;  %v3423_v55 = vunpack.c.h.s8.bf16 %v3187_v3 }
 0x8a4   : > { %6206 = vmatprep.subr.bf16.mxu1 %v3403_v47  ;;  %v3189_v47 = vld [vmem:[%s8090_s23 + $0x368] sm:$0xff] }
 0x8b8   : > { %v5634_v46 = vpop.f32.mrb[20].mxu0 }
 0x8b9   : > { %v5850_v58 = vmul.f32 %v5825_v53, %v5634_v46  ;;  %v9266_v54 = vpop.f32.mrb[20].mxu1  ;;  %v5636_v59 = vpop.f32.mrb[21].mxu0  ;;  %v3191_v53 = vld [vmem:[%s8090_s23 + $0x378] sm:$0xff] }
 0x8ba   : > { %v5851_v13 = vmul.f32 %v5829_v35, %v5636_v59  ;;  %v5800_v10 = vpop.f32.mrb[21].mxu1  ;;  %v5638_v4 = vpop.f32.mrb[22].mxu0  ;;  %v3420_v35 = vunpack.c.h.s8.bf16 %v3184_v63  ;;  %v3427_v46 = vunpack.c.l.s8.bf16 %v3191_v53  ;;  %v3207_v63 = vld [vmem:[%s8090_s23 + $0x3f8] sm:$0xff] }
 0x8bb   : > { %v5899_v12 = vadd.f32 %v5874_v1, %v5850_v58  ;;  %v5853_v39 = vmul.f32 %v5837_v36, %v5800_v10  ;;  %v5802_v60 = vpop.f32.mrb[22].mxu1  ;;  %v5639_v6 = vpop.f32.mrb[23].mxu0  ;;  %v3422_v1 = vunpack.c.h.s8.bf16 %v3186_v37  ;;  %v3425_v36 = vunpack.c.l.s8.bf16 %v3189_v47  ;;  %v3190_v58 = vld [vmem:[%s8090_s23 + $0x370] sm:$0xff]  ;;  %v3193_v4 = vld [vmem:[%s8090_s23 + $0x388] sm:$0xff] }
 0x8bc   : > { %v5900_v5 = vadd.f32 %v5878_v23, %v5851_v13  ;;  %v5803_v62 = vpop.f32.mrb[23].mxu1  ;;  %v3188_v23 = vld [vmem:[%s8090_s23 + $0x360] sm:$0xff]  ;;  %v3429_v13 = vunpack.c.h.s8.bf16 %v3189_v47  ;;  %v3431_v10 = vunpack.c.h.s8.bf16 %v3191_v53  ;;  %v3430_v60 = vunpack.c.h.s8.bf16 %v3190_v58  ;;  %v3206_v53 = vld [vmem:[%s8090_s23 + $0x3f0] sm:$0xff] }
 0x8bd   : > { %v5907_v2 = vmax.f32 %v5899_v12, 0.0  ;;  %v5902_v7 = vadd.f32 %v5886_v61, %v5853_v39  ;;  %v3424_v59 = vunpack.c.l.s8.bf16 %v3188_v23  ;;  %v3426_v61 = vunpack.c.l.s8.bf16 %v3190_v58  ;;  %v3195_v12 = vld [vmem:[%s8090_s23 + $0x398] sm:$0xff]  ;;  %v3192_v62 = vld [vmem:[%s8090_s23 + $0x380] sm:$0xff] }
 0x8be   : > { %v5908_v8 = vmax.f32 %v5900_v5, 0.0  ;;  %v3428_v39 = vunpack.c.h.s8.bf16 %v3188_v23  ;;  %v3433_v6 = vunpack.c.l.s8.bf16 %v3193_v4  ;;  %v3435_v5 = vunpack.c.l.s8.bf16 %v3195_v12  ;;  %v3204_v47 = vld [vmem:[%s8090_s23 + $0x3e0] sm:$0xff] }
 0x8bf   : > { %v5910_v17 = vmax.f32 %v5902_v7, 0.0  ;;  %v5915_v20 = vpack.c.bf16 %v5907_v2, %v5907_v2  ;;  %v3194_v2 = vld [vmem:[%s8090_s23 + $0x390] sm:$0xff]  ;;  %v3432_v7 = vunpack.c.l.s8.bf16 %v3192_v62  ;;  %v3437_v14 = vunpack.c.h.s8.bf16 %v3193_v4 }
 0x8c0   : > { %v5916_v49 = vpack.c.bf16 %v5908_v8, %v5908_v8  ;;  %v3434_v9 = vunpack.c.l.s8.bf16 %v3194_v2  ;;  %v3439_v8 = vunpack.c.h.s8.bf16 %v3195_v12 }
 0x8c1   : > { %v5918_v32 = vpack.c.bf16 %v5910_v17, %v5910_v17  ;;  %v3197_v17 = vld [vmem:[%s8090_s23 + $0x3a8] sm:$0xff] }
 0x8c2   : > { %6033 = vmatprep.mubr.bf16.mxu0 %v5916_v49  ;;  %6197 = vmatprep.mubr.bf16.mxu1 %v5916_v49  ;;  %v3199_v49 = vld [vmem:[%s8090_s23 + $0x3b8] sm:$0xff] }
 0x8c3   : > { %6034 = vmatmul.mubr.bf16.vlgmr.msra.gmra.mrb[24].mxu0 %v5915_v20  ;;  %6198 = vmatmul.mubr.bf16.vlgmr.msra.gmra.mrb[24].mxu1 %v5915_v20  ;;  %v3441_v20 = vunpack.c.l.s8.bf16 %v3197_v17 }
 0x8c4   : > { %6043 = vmatpush1.bf16.msra.mxu0 %v3400_v16  ;;  %6207 = vmatpush1.bf16.msra.mxu1 %v3402_v25  ;;  %v3436_v16 = vunpack.c.h.s8.bf16 %v3192_v62  ;;  %v3438_v25 = vunpack.c.h.s8.bf16 %v3194_v2 }
 0x8c5   : > { %6074 = vmatprep.mubr.bf16.mxu0 %v5918_v32  ;;  %6238 = vmatprep.mubr.bf16.mxu1 %v5918_v32  ;;  %v3442_v32 = vunpack.c.l.s8.bf16 %v3198_v28  ;;  %v6300_v28 = vld [vmem:[#allocation23 + $0x18] sm:$0xff] }
 0x8c6   : > { %6044 = vmatprep.subr.bf16.mxu0 %v3405_v15  ;;  %6208 = vmatprep.subr.bf16.mxu1 %v3407_v29  ;;  %v3443_v15 = vunpack.c.l.s8.bf16 %v3199_v49  ;;  %v3196_v29 = vld [vmem:[%s8090_s23 + $0x3a0] sm:$0xff] }
 0x8c7   : > { %v3440_v57 = vunpack.c.l.s8.bf16 %v3196_v29  ;;  %v3444_v18 = vunpack.c.h.s8.bf16 %v3196_v29 }
 0x8c8   : > { %6045 = vmatpush1.bf16.msra.mxu0 %v3404_v34  ;;  %6209 = vmatpush1.bf16.msra.mxu1 %v3406_v21  ;;  %v3445_v34 = vunpack.c.h.s8.bf16 %v3197_v17  ;;  %v3447_v21 = vunpack.c.h.s8.bf16 %v3199_v49  ;;  %v6297_v17 = vld [vmem:[#allocation23] sm:$0xff]  ;;  %v6299_v49 = vld [vmem:[#allocation23 + $0x10] sm:$0xff] }
 0x8c9   : > { %6046 = vmatprep.subr.bf16.mxu0 %v3409_v27  ;;  %6210 = vmatprep.subr.bf16.mxu1 %v3411_v11  ;;  %v3201_v27 = vld [vmem:[%s8090_s23 + $0x3c8] sm:$0xff]  ;;  %v3203_v11 = vld [vmem:[%s8090_s23 + $0x3d8] sm:$0xff] }
 0x8cc   : > { %6047 = vmatpush1.bf16.msra.mxu0 %v3408_v38  ;;  %6211 = vmatpush1.bf16.msra.mxu1 %v3410_v41  ;;  %v3449_v38 = vunpack.c.l.s8.bf16 %v3201_v27  ;;  %v3451_v41 = vunpack.c.l.s8.bf16 %v3203_v11 }
 0x8cd   : > { %6048 = vmatprep.subr.bf16.mxu0 %v3413_v24  ;;  %6212 = vmatprep.subr.bf16.mxu1 %v3415_v31  ;;  %v3200_v24 = vld [vmem:[%s8090_s23 + $0x3c0] sm:$0xff]  ;;  %v3202_v31 = vld [vmem:[%s8090_s23 + $0x3d0] sm:$0xff] }
 0x8ce   : > { %v3448_v51 = vunpack.c.l.s8.bf16 %v3200_v24  ;;  %v3450_v3 = vunpack.c.l.s8.bf16 %v3202_v31  ;;  %v3452_v37 = vunpack.c.h.s8.bf16 %v3200_v24 }
 0x8d0   : > { %6049 = vmatpush1.bf16.msra.mxu0 %v3412_v40  ;;  %6213 = vmatpush1.bf16.msra.mxu1 %v3414_v33  ;;  %v5833_v40 = vrot.slane %v9250_v52, %v8570_v19  ;;  %v3453_v33 = vunpack.c.h.s8.bf16 %v3201_v27 }
 0x8d1   : > { %6050 = vmatprep.subr.bf16.mxu0 %v3417_v22  ;;  %6214 = vmatprep.subr.bf16.mxu1 %v3419_v26  ;;  %v3455_v22 = vunpack.c.h.s8.bf16 %v3203_v11  ;;  %v3205_v26 = vld [vmem:[%s8090_s23 + $0x3e8] sm:$0xff] }
 0x8d2   : > { %v3457_v52 = vunpack.c.l.s8.bf16 %v3205_v26 }
 0x8d4   : > { %6051 = vmatpush1.bf16.msra.mxu0 %v3416_v56  ;;  %6215 = vmatpush1.bf16.msra.mxu1 %v3418_v48  ;;  %v3454_v56 = vunpack.c.h.s8.bf16 %v3202_v31  ;;  %v5852_v48 = vmul.f32 %v5833_v40, %v9266_v54  ;;  %v3463_v54 = vunpack.c.h.s8.bf16 %v3207_v63 }
 0x8d5   : > { %6052 = vmatprep.subr.bf16.mxu0 %v3421_v50  ;;  %6216 = vmatprep.subr.bf16.mxu1 %v3423_v55  ;;  %v5882_v50 = vrot.slane %v9258_v30, %v8570_v19  ;;  %v3459_v55 = vunpack.c.l.s8.bf16 %v3207_v63  ;;  %v3460_v19 = vunpack.c.h.s8.bf16 %v3204_v47  ;;  %v3462_v30 = vunpack.c.h.s8.bf16 %v3206_v53 }
 0x8d8   : > { %6053 = vmatpush1.bf16.msra.mxu0 %v3420_v35  ;;  %6217 = vmatpush1.bf16.msra.mxu1 %v3422_v1  ;;  %v3456_v35 = vunpack.c.l.s8.bf16 %v3204_v47  ;;  %v3458_v1 = vunpack.c.l.s8.bf16 %v3206_v53 }
 0x8d9   : > { %6054 = vmatprep.subr.bf16.mxu0 %v3425_v36  ;;  %6218 = vmatprep.subr.bf16.mxu1 %v3427_v46  ;;  %v5901_v36 = vadd.f32 %v5882_v50, %v5852_v48  ;;  %v3461_v46 = vunpack.c.h.s8.bf16 %v3205_v26 }
 0x8db   : > { %v5909_v23 = vmax.f32 %v5901_v36, 0.0 }
 0x8dc   : > { %6055 = vmatpush1.bf16.msra.mxu0 %v3424_v59  ;;  %6219 = vmatpush1.bf16.msra.mxu1 %v3426_v61  ;;  %v1158_v59 = vld [vmem:[%s982_s30] sm:$0xf]  ;;  %v1159_v61 = vld [vmem:[%s991_s13] sm:$0xf] }
 0x8dd   : > { %6056 = vmatprep.subr.bf16.mxu0 %v3429_v13  ;;  %6220 = vmatprep.subr.bf16.mxu1 %v3431_v10  ;;  %v5917_v58 = vpack.c.bf16 %v5909_v23, %v5909_v23  ;;  %v6251_v13 = vrot.slane %v1158_v59, %v8146_v42  ;;  %v6259_v10 = vrot.slane %v1158_v59, %v8149_v43 }
 0x8de   : > { %v6255_v4 = vrot.slane %v1158_v59, %v8152_v44  ;;  %v6263_v12 = vrot.slane %v1158_v59, %v8155_v45  ;;  %v6280_v62 = vrot.slane %v1159_v61, %v8152_v44  ;;  %v6288_v2 = vrot.slane %v1159_v61, %v8155_v45 }
 0x8e0   : > { %6057 = vmatpush1.bf16.msra.mxu0 %v3428_v39  ;;  %6221 = vmatpush1.bf16.msra.mxu1 %v3430_v60  ;;  %v6276_v39 = vrot.slane %v1159_v61, %v8146_v42  ;;  %v6284_v60 = vrot.slane %v1159_v61, %v8149_v43  ;;  %v6298_v43 = vld [vmem:[#allocation23 + $0x8] sm:$0xff] }
 0x8e1   : > { %6058 = vmatprep.subr.bf16.mxu0 %v3433_v6  ;;  %6222 = vmatprep.subr.bf16.mxu1 %v3435_v5 }
 0x8e4   : > { %6059 = vmatpush1.bf16.msra.mxu0 %v3432_v7  ;;  %6223 = vmatpush1.bf16.msra.mxu1 %v3434_v9 }
 0x8e5   : > { %6060 = vmatprep.subr.bf16.mxu0 %v3437_v14  ;;  %6224 = vmatprep.subr.bf16.mxu1 %v3439_v8 }
 0x8e8   : > { %6061 = vmatpush1.bf16.msra.mxu0 %v3436_v16  ;;  %6225 = vmatpush1.bf16.msra.mxu1 %v3438_v25 }
 0x8e9   : > { %6062 = vmatprep.subr.bf16.mxu0 %v3441_v20  ;;  %6226 = vmatprep.subr.bf16.mxu1 %v3443_v15 }
 0x8ec   : > { %6063 = vmatpush1.bf16.msra.mxu0 %v3440_v57  ;;  %6227 = vmatpush1.bf16.msra.mxu1 %v3442_v32 }
 0x8ed   : > { %6064 = vmatprep.subr.bf16.mxu0 %v3445_v34  ;;  %6228 = vmatprep.subr.bf16.mxu1 %v3447_v21 }
 0x8f0   : > { %6065 = vmatpush1.bf16.msra.mxu0 %v3444_v18  ;;  %6229 = vmatpush1.bf16.msra.mxu1 %v3446_v0 }
 0x8f1   : > { %6066 = vmatprep.subr.bf16.mxu0 %v3449_v38  ;;  %6230 = vmatprep.subr.bf16.mxu1 %v3451_v41 }
 0x8f4   : > { %6067 = vmatpush1.bf16.msra.mxu0 %v3448_v51  ;;  %6231 = vmatpush1.bf16.msra.mxu1 %v3450_v3 }
 0x8f5   : > { %6068 = vmatprep.subr.bf16.mxu0 %v3453_v33  ;;  %6232 = vmatprep.subr.bf16.mxu1 %v3455_v22 }
 0x8f8   : > { %6069 = vmatpush1.bf16.msra.mxu0 %v3452_v37  ;;  %6233 = vmatpush1.bf16.msra.mxu1 %v3454_v56 }
 0x8f9   : > { %6070 = vmatprep.subr.bf16.mxu0 %v3457_v52  ;;  %6234 = vmatprep.subr.bf16.mxu1 %v3459_v55 }
 0x8fc   : > { %6071 = vmatpush1.bf16.msra.mxu0 %v3456_v35  ;;  %6235 = vmatpush1.bf16.msra.mxu1 %v3458_v1 }
 0x8fd   : > { %6072 = vmatprep.subr.bf16.mxu0 %v3461_v46  ;;  %6236 = vmatprep.subr.bf16.mxu1 %v3463_v54 }
 0x900   : > { %6073 = vmatpush1.bf16.msra.mxu0 %v3460_v19  ;;  %6237 = vmatpush1.bf16.msra.mxu1 %v3462_v30 }
 0x903   : > { %6075 = vmatmul.mubr.bf16.vlgmr.msra.gmra.mrb[24].mxu0 %v5917_v58  ;;  %6239 = vmatmul.mubr.bf16.vlgmr.msra.gmra.mrb[24].mxu1 %v5917_v58 }
 0x9d6   : > { %v6076_v6 = vpop.f32.mrb[24].mxu0  ;;  %v6240_v5 = vpop.f32.mrb[24].mxu1 }
 0x9d7   : > { %v6268_v7 = vmul.f32 %v6251_v13, %v6076_v6  ;;  %v6270_v9 = vmul.f32 %v6259_v10, %v6240_v5  ;;  %v6078_v14 = vpop.f32.mrb[25].mxu0  ;;  %v6242_v8 = vpop.f32.mrb[25].mxu1 }
 0x9d8   : > { %v6269_v16 = vmul.f32 %v6255_v4, %v6078_v14  ;;  %v6271_v25 = vmul.f32 %v6263_v12, %v6242_v8  ;;  %v6080_v20 = vpop.f32.mrb[26].mxu0  ;;  %v6244_v15 = vpop.f32.mrb[26].mxu1 }
 0x9d9   : > { %v6293_v42 = vadd.f32 %v6276_v39, %v6268_v7  ;;  %v6295_v29 = vadd.f32 %v6284_v60, %v6270_v9  ;;  %v6081_v57 = vpop.f32.mrb[27].mxu0  ;;  %v6245_v32 = vpop.f32.mrb[27].mxu1 }
 0x9da   : > { %v6294_v44 = vadd.f32 %v6280_v62, %v6269_v16  ;;  %v6296_v45 = vadd.f32 %v6288_v2, %v6271_v25 }
 0x9db   : > { %v6301_v34 = vadd.f32 %v6297_v17, %v6293_v42  ;;  %v6303_v21 = vadd.f32 %v6299_v49, %v6295_v29 }
 0x9dc   : > { %v6302_v27 = vadd.f32 %v6298_v43, %v6294_v44  ;;  %v6304_v11 = vadd.f32 %v6300_v28, %v6296_v45 }
 0x9dd   : > { %6305 = vst [vmem:[#allocation23] sm:$0xff] %v6301_v34  ;;  %6307 = vst [vmem:[#allocation23 + $0x10] sm:$0xff] %v6303_v21 }
 0x9de   : > { %6306 = vst [vmem:[#allocation23 + $0x8] sm:$0xff] %v6302_v27  ;;  %6308 = vst [vmem:[#allocation23 + $0x18] sm:$0xff] %v6304_v11 }
 0x9df   : > { %7359 = shalt.err (!%p7356_p9)
}
 0x9e0   : > { %s9445_s20 = sld [smem:[#allocation48_spill]] }
 0x9e6   : > { %s7360_s15 = scalar_lea.hbm %s9445_s20, 512 }
 0x9e7   : > { %p7361_p1 = scmp.ne.s32.totalorder %s9445_s20, %s7360_s15  ;;  %p7366_p0 = scmp.lt.u32.totalorder %s7360_s15, %s9445_s20 }
 0x9e9   : > { %p7362_p11 = pnand %p7361_p1, %p6902_p13 }
 0x9eb   : > { %p7363_p12 = pneg %p7362_p11 }
 0x9ed   : > { %p7368_p2 = pnand %p7366_p0, %p7363_p12 }
 0x9ef   : > { %7371 = shalt.err (!%p7368_p2)
}
 0x9f0   : > { %6899 = dma.vmem_to_hbm [thread:$0]  (%p6902_p13), %s6320_s29, 512, %s9445_s20, [#allocation4]  }
 0x9f1   : > { %7425 = dma.done.wait (%p6902_p13), [#allocation4], 512  }
 0x9f2   : > { %7427 = vsyncadd (%p6902_p13), [#allocation4], 4294966784 }
 0x9f3 PF: > { %s9446_s28 = sld [smem:[#allocation36_spill]]  ;;  %s9447_s29 = sld [smem:[#allocation32_spill]] }
 0x9f4   : > { %s9448_s30 = sld [smem:[#allocation33_spill]]  ;;  %s9449_s15 = sld [smem:[#allocation40_spill]] }
 0x9f5   : > { %s9450_s16 = sld [smem:[#allocation35_spill]]  ;;  %s9451_s17 = sld [smem:[#allocation38_spill]] }
 0x9f9   : > { %s46_s18 = sadd.s32 1, %s9446_s28  }
 0x9fa   : > { %p43_p7 = scmp.ge.s32.totalorder %s46_s18, 5  }
 0x9fc   :  { %45 = sbr.rel (!%p43_p7) target bundleno = 26 (0x1a), region = 262 }
 0xa03   :  { %6332 = vsyncpa [#allocation3], 1 }
 0xa04   :  { %6334 = vsyncpa [#allocation3 + $0x1], 1 }
 0xa05   :  { %6335 = vsyncpa [#allocation6], 1 }
 0xa06   :  { %6337 = vsyncpa [#allocation6 + $0x1], 1 }
 0xa07   :  { %6338 = vsyncpa [#allocation9], 1 }
 0xa08   :  { %6340 = vsyncpa [#allocation9 + $0x1], 1 }
 0xa09   :  { %6341 = vsyncpa [#allocation12], 1 }
 0xa0a   :  { %6343 = vsyncpa [#allocation12 + $0x1], 1 }
 0xa0b   :  { %6344 = vsyncpa [#allocation15], 1 }
 0xa0c   :  { %6346 = vsyncpa [#allocation15 + $0x1], 1 }
 0xa0d   :  { %6347 = vsyncpa [#allocation18], 1 }
 0xa0e   :  { %6349 = vsyncpa [#allocation18 + $0x1], 1 }
 0xa0f   :  { %6350 = vsyncpa [#allocation21], 1 }
 0xa10   :  { %6352 = vsyncpa [#allocation21 + $0x1], 1 }
 0xa11   :  { %6353 = vsyncpa [#allocation4], 1 }
 0xa12   :  { %6355 = vsyncpa [#allocation4 + $0x1], 1 }

</bundles_post_ra>
